<compile_context>
chip_gen: v5e
topology: v5e:2x2
jax: 0.10.0
libtpu: 0.0.40
codegen_flags: <defaults>
</compile_context>

<pallas_src>
import functools

import jax
import jax.numpy as jnp
from jax.experimental import pallas as pl

# ----------------------------- small-model config -----------------------------
IMAGE_RES = 16
PATCH = 4
IN_CHANS = 3
HIDDEN = 32
HEADS = 4
HEAD_DIM = HIDDEN // HEADS
DEPTH = 2
MLP_HIDDEN = 4 * HIDDEN
N_INCI = 43
N_PLAC = 49
LN_EPS = 1e-6

NUM_PATCHES = (IMAGE_RES // PATCH) ** 2          # 16
N_TOK = NUM_PATCHES + 1                          # 17 (CLS + patches)
N_PAD = ((N_TOK + 7) // 8) * 8                   # 24: sublane-aligned per-sequence rows
PATCH_DIM = IN_CHANS * PATCH * PATCH             # 48
HEAD_OUT_PAD = 128                               # lane-dense padded logits width
HEAD_SLAB_ROWS = 104                             # packed head/final-LN/mask slab rows


# ----------------------------- in-kernel math helpers -----------------------------
def _gelu_tanh(x):
    # tanh-form GELU: the tanh goes to the EUP slot (idle otherwise) instead of an erf
    # polynomial on the VALU.  ~1e-3 max abs diff vs torch's exact-erf nn.GELU.
    return 0.5 * x * (1.0 + jnp.tanh(0.7978845608028654 * (x + 0.044715 * x * x * x)))


def _layernorm(v, g, b):
    mu = jnp.mean(v, axis=-1, keepdims=True)
    vc = v - mu
    var = jnp.mean(vc * vc, axis=-1, keepdims=True)
    return vc * jax.lax.rsqrt(var + LN_EPS) * g + b


# ----------------------------- fused forward kernel -----------------------------
def _fused_crisisvit_kernel(
    tokens_ref, onehot_ref,                       # per-call inputs
    patch_w_ref, add_ref, qkv_w_ref, qkv_b_ref,   # cached packed parameters
    proj_w_ref, fc1_w_ref, fc2_w_ref, vec_ref, head_ref,
    logits_ref, loss_ref,                         # outputs
    *, batch, n_tok, n_pad,
):
    scale = HEAD_DIM ** -0.5

    # patch-embed matmul; add_ref carries cls_token/pos_embed/patch-bias per sequence row
    # (padded rows are zero), tiled across the batch in registers.
    x = jnp.dot(tokens_ref[...], patch_w_ref[...], preferred_element_type=jnp.float32)
    x = x + jnp.concatenate([add_ref[...]] * batch, axis=0)                 # (M, H)

    # key-side padding mask (tokens >= n_tok within each padded sequence are invalid)
    kcol = jax.lax.broadcasted_iota(jnp.int32, (1, n_pad), 1)
    kmask = jnp.where(kcol < n_tok, 0.0, -1e30)

    for d in range(DEPTH):
        ln1_g = vec_ref[d, 0:1, :HIDDEN]
        ln1_b = vec_ref[d, 1:2, :HIDDEN]
        ln2_g = vec_ref[d, 2:3, :HIDDEN]
        ln2_b = vec_ref[d, 3:4, :HIDDEN]
        proj_b = vec_ref[d, 4:5, :HIDDEN]
        fc1_b = vec_ref[d, 5:6, :]
        fc2_b = vec_ref[d, 6:7, :HIDDEN]

        # ---- attention: per-head prepacked weights -> no lane slicing, no masked stores ----
        h = _layernorm(x, ln1_g, ln1_b)
        accs = [None] * batch
        for hh in range(HEADS):
            base = (d * HEADS + hh) * 3
            q = jnp.dot(h, qkv_w_ref[base + 0],
                        preferred_element_type=jnp.float32) + qkv_b_ref[base + 0]   # (M, 8)
            k = jnp.dot(h, qkv_w_ref[base + 1],
                        preferred_element_type=jnp.float32) + qkv_b_ref[base + 1]
            v = jnp.dot(h, qkv_w_ref[base + 2],
                        preferred_element_type=jnp.float32) + qkv_b_ref[base + 2]
            pw = proj_w_ref[d, hh * HEAD_DIM:(hh + 1) * HEAD_DIM, :]                 # 8-aligned rows
            for b in range(batch):
                r0 = b * n_pad                                     # multiple of 8 (24)
                qb = q[r0:r0 + n_pad]
                kb = k[r0:r0 + n_pad]
                vb = v[r0:r0 + n_pad]
                # q @ k^T via last-dim contraction (no XLU transpose)
                s = jax.lax.dot_general(qb, kb, (((1,), (1,)), ((), ())),
                                        preferred_element_type=jnp.float32) * scale + kmask
                m = jnp.max(s, axis=-1, keepdims=True)
                p = jnp.exp(s - m)
                p = p * pl.reciprocal(jnp.sum(p, axis=-1, keepdims=True), approx=True)
                o = jnp.dot(p, vb, preferred_element_type=jnp.float32)               # (n_pad, 8)
                # accumulate this head's projection contribution directly (no attn_buf)
                c = jnp.dot(o, pw, preferred_element_type=jnp.float32)               # (n_pad, H)
                accs[b] = c if accs[b] is None else accs[b] + c
        x = jnp.concatenate(accs, axis=0) + proj_b + x

        # ---- MLP ----
        h = _layernorm(x, ln2_g, ln2_b)
        h = jnp.dot(h, fc1_w_ref[d], preferred_element_type=jnp.float32) + fc1_b
        h = _gelu_tanh(h)
        x = jnp.dot(h, fc2_w_ref[d], preferred_element_type=jnp.float32) + fc2_b + x

    # ---- final LN + fused classification heads on ALL rows (CLS rows sliced outside) ----
    lnf_g = head_ref[96:97, :HIDDEN]
    lnf_b = head_ref[97:98, :HIDDEN]
    hw1 = head_ref[64:96, :2 * HIDDEN]            # [inci.w1 | plac.w1]
    hb1 = head_ref[98:99, :2 * HIDDEN]
    hw2 = head_ref[0:64, :]                       # block-diagonal (64, 128) output layer
    hb2 = head_ref[99:100, :]

    xf = _layernorm(x, lnf_g, lnf_b)
    hid = jnp.maximum(jnp.dot(xf, hw1, preferred_element_type=jnp.float32) + hb1, 0.0)
    logits = jnp.dot(hid, hw2, preferred_element_type=jnp.float32) + hb2            # (M, 128)
    logits_ref[...] = logits                                                         # lane-dense store

    # ---- fused cross-entropy (mean over batch); one-hot rows are nonzero only at CLS rows ----
    addm_i = head_ref[100:101, :]                 # 0 on inci lanes, -1e30 elsewhere
    addm_p = head_ref[101:102, :]
    mulm_i = head_ref[102:103, :]                 # 1 on inci lanes, 0 elsewhere
    mulm_p = head_ref[103:104, :]
    oh = onehot_ref[...]

    def _mean_nll(addm, mulm):
        lm = logits + addm
        mx = jnp.max(lm, axis=-1, keepdims=True)
        lse = mx + jnp.log(jnp.sum(jnp.exp(lm - mx), axis=-1, keepdims=True))        # (M, 1)
        ohm = oh * mulm
        picked = jnp.sum(ohm * logits, axis=-1, keepdims=True)                       # (M, 1)
        ind = jnp.sum(ohm, axis=-1, keepdims=True)       # 1 at labelled CLS rows, 0 elsewhere
        return jnp.sum(lse * ind - picked, axis=0, keepdims=True) * (1.0 / batch)    # (1, 1)

    loss_i = _mean_nll(addm_i, mulm_i)
    loss_p = _mean_nll(addm_p, mulm_p)
    loss_ref[...] = jnp.broadcast_to(
        jnp.concatenate([loss_i, loss_p], axis=0), (2, HEAD_OUT_PAD))


# ----------------------------- parameter init (deterministic) -----------------------------
def init_params(key):
    def nrm(k, shape, scale=0.02):
        return scale * jax.random.normal(k, shape, dtype=jnp.float32)

    keys = iter(jax.random.split(key, 8 + DEPTH * 4 + 8))
    params = {
        "patch_w": nrm(next(keys), (PATCH_DIM, HIDDEN)),
        "patch_b": jnp.zeros((HIDDEN,), jnp.float32),
        "cls_token": nrm(next(keys), (1, 1, HIDDEN)),
        "pos_embed": nrm(next(keys), (1, N_TOK, HIDDEN)),
        "ln_f_g": jnp.ones((HIDDEN,), jnp.float32),
        "ln_f_b": jnp.zeros((HIDDEN,), jnp.float32),
        "blocks": [],
    }
    for _ in range(DEPTH):
        params["blocks"].append({
            "ln1_g": jnp.ones((HIDDEN,), jnp.float32),
            "ln1_b": jnp.zeros((HIDDEN,), jnp.float32),
            "qkv_w": nrm(next(keys), (HIDDEN, 3 * HIDDEN)),
            "qkv_b": jnp.zeros((3 * HIDDEN,), jnp.float32),
            "proj_w": nrm(next(keys), (HIDDEN, HIDDEN)),
            "proj_b": jnp.zeros((HIDDEN,), jnp.float32),
            "ln2_g": jnp.ones((HIDDEN,), jnp.float32),
            "ln2_b": jnp.zeros((HIDDEN,), jnp.float32),
            "fc1_w": nrm(next(keys), (HIDDEN, MLP_HIDDEN)),
            "fc1_b": jnp.zeros((MLP_HIDDEN,), jnp.float32),
            "fc2_w": nrm(next(keys), (MLP_HIDDEN, HIDDEN)),
            "fc2_b": jnp.zeros((HIDDEN,), jnp.float32),
        })
    params["head_inci"] = {
        "w1": nrm(next(keys), (HIDDEN, HIDDEN)), "b1": jnp.zeros((HIDDEN,), jnp.float32),
        "w2": nrm(next(keys), (HIDDEN, N_INCI)), "b2": jnp.zeros((N_INCI,), jnp.float32),
    }
    params["head_plac"] = {
        "w1": nrm(next(keys), (HIDDEN, HIDDEN)), "b1": jnp.zeros((HIDDEN,), jnp.float32),
        "w2": nrm(next(keys), (HIDDEN, N_PLAC)), "b2": jnp.zeros((N_PLAC,), jnp.float32),
    }
    return params


# ----------------------------- one-time parameter packing (off the hot path) -----------------------------
def pack_params(params):
    """Convert the nn.Module-style state dict into a few kernel-layout slabs (call once)."""
    # additive per-row embedding: CLS row = cls_token + pos[0] (zero pixels => no patch bias),
    # patch rows = pos[1+p] + patch_b, padded rows = 0.
    pos = params["pos_embed"][0]
    cls_row = (params["cls_token"][0, 0] + pos[0])[None, :]
    patch_rows = pos[1:] + params["patch_b"][None, :]
    add = jnp.concatenate([cls_row, patch_rows], axis=0)
    add = jnp.pad(add, ((0, N_PAD - N_TOK), (0, 0)))                       # (N_PAD, H)

    qkv_w, qkv_b, proj_w, fc1_w, fc2_w, vecs = [], [], [], [], [], []
    for blk in params["blocks"]:
        w = blk["qkv_w"].reshape(HIDDEN, 3, HEADS, HEAD_DIM)               # cols: [q|k|v][head][hd]
        b = blk["qkv_b"].reshape(3, HEADS, HEAD_DIM)
        for h in range(HEADS):
            for t in range(3):                                             # index = (d*HEADS+h)*3 + t
                qkv_w.append(w[:, t, h, :])                                # (H, HD)
                qkv_b.append(b[t, h][None, :])                             # (1, HD)
        proj_w.append(blk["proj_w"])
        fc1_w.append(blk["fc1_w"])
        fc2_w.append(blk["fc2_w"])
        v = jnp.zeros((8, HEAD_OUT_PAD), jnp.float32)
        v = v.at[0, :HIDDEN].set(blk["ln1_g"]).at[1, :HIDDEN].set(blk["ln1_b"])
        v = v.at[2, :HIDDEN].set(blk["ln2_g"]).at[3, :HIDDEN].set(blk["ln2_b"])
        v = v.at[4, :HIDDEN].set(blk["proj_b"]).at[5, :MLP_HIDDEN].set(blk["fc1_b"])
        v = v.at[6, :HIDDEN].set(blk["fc2_b"])
        vecs.append(v)

    hi, hp = params["head_inci"], params["head_plac"]
    slab = jnp.zeros((HEAD_SLAB_ROWS, HEAD_OUT_PAD), jnp.float32)
    slab = slab.at[0:HIDDEN, :N_INCI].set(hi["w2"])                        # block-diag output layer
    slab = slab.at[HIDDEN:2 * HIDDEN, N_INCI:N_INCI + N_PLAC].set(hp["w2"])
    slab = slab.at[64:96, :HIDDEN].set(hi["w1"])
    slab = slab.at[64:96, HIDDEN:2 * HIDDEN].set(hp["w1"])
    slab = slab.at[96, :HIDDEN].set(params["ln_f_g"])
    slab = slab.at[97, :HIDDEN].set(params["ln_f_b"])
    slab = slab.at[98, :HIDDEN].set(hi["b1"])
    slab = slab.at[98, HIDDEN:2 * HIDDEN].set(hp["b1"])
    slab = slab.at[99, :N_INCI].set(hi["b2"])
    slab = slab.at[99, N_INCI:N_INCI + N_PLAC].set(hp["b2"])
    lane = jnp.arange(HEAD_OUT_PAD)
    inci_valid = lane < N_INCI
    plac_valid = (lane >= N_INCI) & (lane < N_INCI + N_PLAC)
    slab = slab.at[100].set(jnp.where(inci_valid, 0.0, -1e30))
    slab = slab.at[101].set(jnp.where(plac_valid, 0.0, -1e30))
    slab = slab.at[102].set(inci_valid.astype(jnp.float32))
    slab = slab.at[103].set(plac_valid.astype(jnp.float32))

    return dict(
        patch_w=params["patch_w"],                   # (48, 32)
        add=add,                                     # (24, 32)
        qkv_w=jnp.stack(qkv_w),                      # (DEPTH*HEADS*3, 32, 8)
        qkv_b=jnp.stack(qkv_b),                      # (DEPTH*HEADS*3, 1, 8)
        proj_w=jnp.stack(proj_w),                    # (DEPTH, 32, 32)
        fc1_w=jnp.stack(fc1_w),                      # (DEPTH, 32, 128)
        fc2_w=jnp.stack(fc2_w),                      # (DEPTH, 128, 32)
        vecs=jnp.stack(vecs),                        # (DEPTH, 8, 128)
        head=slab,                                   # (104, 128)
    )


# ----------------------------- jitted per-step forward -----------------------------
@jax.jit
def _fused_forward(packed, image, labels_inci, labels_plac):
    B, C, H, W = image.shape
    gh, gw = H // PATCH, W // PATCH
    num_patches = gh * gw
    n_tok = num_patches + 1
    n_pad = ((n_tok + 7) // 8) * 8
    patch_dim = C * PATCH * PATCH

    # patch extraction (conv-as-matmul layout, channel-major like Conv2d weights),
    # CLS slot = zero pixels, rows padded to the 8-sublane grid.
    px = image.reshape(B, C, gh, PATCH, gw, PATCH).transpose(0, 2, 4, 1, 3, 5)
    px = px.reshape(B, num_patches, patch_dim)
    tokens = jnp.zeros((B, n_pad, patch_dim), jnp.float32)
    tokens = tokens.at[:, 1:n_tok, :].set(px).reshape(B * n_pad, patch_dim)

    # one-hot labels placed at CLS rows (rows b*n_pad) in the same lane layout as the logits
    ohi = jax.nn.one_hot(labels_inci, N_INCI, dtype=jnp.float32)
    ohp = jax.nn.one_hot(labels_plac, N_PLAC, dtype=jnp.float32)
    oh = jnp.zeros((B, n_pad, HEAD_OUT_PAD), jnp.float32)
    oh = oh.at[:, 0, :N_INCI].set(ohi)
    oh = oh.at[:, 0, N_INCI:N_INCI + N_PLAC].set(ohp)
    onehot = oh.reshape(B * n_pad, HEAD_OUT_PAD)

    kernel = functools.partial(_fused_crisisvit_kernel, batch=B, n_tok=n_tok, n_pad=n_pad)
    logits_slab, losses = pl.pallas_call(
        kernel,
        out_shape=(jax.ShapeDtypeStruct((B * n_pad, HEAD_OUT_PAD), jnp.float32),
                   jax.ShapeDtypeStruct((2, HEAD_OUT_PAD), jnp.float32)),
    )(tokens, onehot,
      packed["patch_w"], packed["add"], packed["qkv_w"], packed["qkv_b"],
      packed["proj_w"], packed["fc1_w"], packed["fc2_w"], packed["vecs"], packed["head"])

    cls = logits_slab.reshape(B, n_pad, HEAD_OUT_PAD)[:, 0, :]
    return (cls[:, :N_INCI], cls[:, N_INCI:N_INCI + N_PLAC], losses[0, 0], losses[1, 0])


def crisis_vit_forward(packed, image, labels_inci=None, labels_plac=None,
                       task="incidence", train=True):
    B = image.shape[0]
    li = labels_inci if labels_inci is not None else jnp.zeros((B,), jnp.int32)
    lp = labels_plac if labels_plac is not None else jnp.zeros((B,), jnp.int32)
    preds_inci, preds_plac, loss_i, loss_p = _fused_forward(packed, image, li, lp)
    if task == "multi":
        return (loss_i, loss_p) if train else (preds_inci, preds_plac)
    elif task == "incidence":
        return loss_i if train else preds_inci
    elif task == "place":
        return loss_p if train else preds_plac
    else:
        raise NotImplementedError


# ----------------------------- main -----------------------------
if __name__ == "__main__":
    root = jax.random.PRNGKey(0)
    k_param, k_img, k_li, k_lp = jax.random.split(root, 4)

    params = init_params(k_param)
    packed = pack_params(params)                 # one-time packing (hoisted off the hot path)
    image = jax.random.normal(k_img, (2, IN_CHANS, IMAGE_RES, IMAGE_RES), dtype=jnp.float32)
    labels_inci = jax.random.randint(k_li, (2,), 0, N_INCI, dtype=jnp.int32)
    labels_plac = jax.random.randint(k_lp, (2,), 0, N_PLAC, dtype=jnp.int32)

    # training path (task='incidence', train=True): scalar cross-entropy loss
    loss_inci = crisis_vit_forward(packed, image, labels_inci, labels_plac,
                                   task="incidence", train=True)
    # training path (task='multi'): both losses
    loss_mi, loss_mp = crisis_vit_forward(packed, image, labels_inci, labels_plac,
                                          task="multi", train=True)
    # eval path (task='multi', train=False): (preds_inci (2,43), preds_plac (2,49))
    preds_inci, preds_plac = crisis_vit_forward(packed, image, task="multi", train=False)

    jax.block_until_ready(loss_inci)
    jax.block_until_ready(loss_mp)
    jax.block_until_ready(preds_inci)
    jax.block_until_ready(preds_plac)

    assert loss_inci.shape == () and bool(jnp.isfinite(loss_inci))
    assert loss_mi.shape == () and loss_mp.shape == ()
    assert bool(jnp.isfinite(loss_mi)) and bool(jnp.isfinite(loss_mp))
    assert preds_inci.shape == (2, N_INCI) and preds_plac.shape == (2, N_PLAC)
    assert bool(jnp.all(jnp.isfinite(preds_inci))) and bool(jnp.all(jnp.isfinite(preds_plac)))
    print("KERNEL_OK")
</pallas_src>

<mosaic_0001>
module attributes {stable_mosaic.version = 11 : i64} {
  func.func @_fused_crisisvit_kernel(%arg0: memref<48x48xf32, #tpu.memory_space<vmem>>, %arg1: memref<48x128xf32, #tpu.memory_space<vmem>>, %arg2: memref<48x32xf32, #tpu.memory_space<vmem>>, %arg3: memref<24x32xf32, #tpu.memory_space<vmem>>, %arg4: memref<24x32x8xf32, #tpu.memory_space<vmem>>, %arg5: memref<24x1x8xf32, #tpu.memory_space<vmem>>, %arg6: memref<2x32x32xf32, #tpu.memory_space<vmem>>, %arg7: memref<2x32x128xf32, #tpu.memory_space<vmem>>, %arg8: memref<2x128x32xf32, #tpu.memory_space<vmem>>, %arg9: memref<2x8x128xf32, #tpu.memory_space<vmem>>, %arg10: memref<104x128xf32, #tpu.memory_space<vmem>>, %arg11: memref<48x128xf32, #tpu.memory_space<vmem>>, %arg12: memref<2x128xf32, #tpu.memory_space<vmem>>) attributes {dimension_semantics = [], scalar_prefetch = 0 : i64, scratch_operands = 0 : i64, tpu.core_type = #tpu.core_type<tc>} {
    %c0 = arith.constant 0 : index
    %c0_0 = arith.constant 0 : index
    %0 = vector.load %arg0[%c0, %c0_0] : memref<48x48xf32, #tpu.memory_space<vmem>>, vector<48x48xf32>
    %c0_1 = arith.constant 0 : index
    %c0_2 = arith.constant 0 : index
    %1 = vector.load %arg2[%c0_1, %c0_2] : memref<48x32xf32, #tpu.memory_space<vmem>>, vector<48x32xf32>
    %cst = arith.constant dense<0.000000e+00> : vector<48x32xf32>
    %2 = tpu.matmul %0, %1, %cst {dimension_numbers = #tpu.dot_dimension_numbers<[1], [0], [0], [1], [0, 0, 1, 1], [], []>} : vector<48x48xf32>, vector<48x32xf32>, vector<48x32xf32> -> vector<48x32xf32>
    %c0_3 = arith.constant 0 : index
    %c0_4 = arith.constant 0 : index
    %3 = vector.load %arg3[%c0_3, %c0_4] : memref<24x32xf32, #tpu.memory_space<vmem>>, vector<24x32xf32>
    %4 = tpu.concatenate %3, %3 in 0 : vector<24x32xf32>, vector<24x32xf32> -> vector<48x32xf32>
    %5 = arith.addf %2, %4 : vector<48x32xf32>
    %6 = tpu.iota {dimensions = array<i32: 1>} : vector<1x24xi32>
    %c17_i32 = arith.constant 17 : i32
    %7 = vector.broadcast %c17_i32 : i32 to vector<1x24xi32>
    %8 = arith.cmpi slt, %6, %7 : vector<1x24xi32>
    %cst_5 = arith.constant 0.000000e+00 : f32
    %cst_6 = arith.constant -1.000000e+30 : f32
    %9 = vector.broadcast %cst_5 : f32 to vector<1x24xf32>
    %10 = vector.broadcast %cst_6 : f32 to vector<1x24xf32>
    %11 = arith.select %8, %9, %10 : vector<1x24xi1>, vector<1x24xf32>
    %c0_7 = arith.constant 0 : index
    %c0_8 = arith.constant 0 : index
    %c0_9 = arith.constant 0 : index
    %12 = vector.load %arg9[%c0_7, %c0_8, %c0_9] : memref<2x8x128xf32, #tpu.memory_space<vmem>>, vector<1x1x32xf32>
    %13 = vector.shape_cast %12 : vector<1x1x32xf32> to vector<1x32xf32>
    %c0_10 = arith.constant 0 : index
    %c1 = arith.constant 1 : index
    %c0_11 = arith.constant 0 : index
    %14 = vector.load %arg9[%c0_10, %c1, %c0_11] : memref<2x8x128xf32, #tpu.memory_space<vmem>>, vector<1x1x32xf32>
    %15 = vector.shape_cast %14 : vector<1x1x32xf32> to vector<1x32xf32>
    %c0_12 = arith.constant 0 : index
    %c2 = arith.constant 2 : index
    %c0_13 = arith.constant 0 : index
    %16 = vector.load %arg9[%c0_12, %c2, %c0_13] : memref<2x8x128xf32, #tpu.memory_space<vmem>>, vector<1x1x32xf32>
    %17 = vector.shape_cast %16 : vector<1x1x32xf32> to vector<1x32xf32>
    %c0_14 = arith.constant 0 : index
    %c3 = arith.constant 3 : index
    %c0_15 = arith.constant 0 : index
    %18 = vector.load %arg9[%c0_14, %c3, %c0_15] : memref<2x8x128xf32, #tpu.memory_space<vmem>>, vector<1x1x32xf32>
    %19 = vector.shape_cast %18 : vector<1x1x32xf32> to vector<1x32xf32>
    %c0_16 = arith.constant 0 : index
    %c4 = arith.constant 4 : index
    %c0_17 = arith.constant 0 : index
    %20 = vector.load %arg9[%c0_16, %c4, %c0_17] : memref<2x8x128xf32, #tpu.memory_space<vmem>>, vector<1x1x32xf32>
    %21 = vector.shape_cast %20 : vector<1x1x32xf32> to vector<1x32xf32>
    %c0_18 = arith.constant 0 : index
    %c5 = arith.constant 5 : index
    %c0_19 = arith.constant 0 : index
    %22 = vector.load %arg9[%c0_18, %c5, %c0_19] : memref<2x8x128xf32, #tpu.memory_space<vmem>>, vector<1x1x128xf32>
    %23 = vector.shape_cast %22 : vector<1x1x128xf32> to vector<1x128xf32>
    %c0_20 = arith.constant 0 : index
    %c6 = arith.constant 6 : index
    %c0_21 = arith.constant 0 : index
    %24 = vector.load %arg9[%c0_20, %c6, %c0_21] : memref<2x8x128xf32, #tpu.memory_space<vmem>>, vector<1x1x32xf32>
    %25 = vector.shape_cast %24 : vector<1x1x32xf32> to vector<1x32xf32>
    %cst_22 = arith.constant dense<0.000000e+00> : vector<48xf32>
    %26 = vector.multi_reduction <add>, %5, %cst_22 [1] : vector<48x32xf32> to vector<48xf32>
    %27 = vector.shape_cast %26 : vector<48xf32> to vector<48x1xf32>
    %cst_23 = arith.constant 3.200000e+01 : f32
    %28 = vector.broadcast %cst_23 : f32 to vector<48x1xf32>
    %29 = arith.divf %27, %28 : vector<48x1xf32>
    %30 = vector.broadcast %29 : vector<48x1xf32> to vector<48x32xf32>
    %31 = arith.subf %5, %30 : vector<48x32xf32>
    %32 = arith.mulf %31, %31 : vector<48x32xf32>
    %cst_24 = arith.constant dense<0.000000e+00> : vector<48xf32>
    %33 = vector.multi_reduction <add>, %32, %cst_24 [1] : vector<48x32xf32> to vector<48xf32>
    %34 = vector.shape_cast %33 : vector<48xf32> to vector<48x1xf32>
    %cst_25 = arith.constant 3.200000e+01 : f32
    %35 = vector.broadcast %cst_25 : f32 to vector<48x1xf32>
    %36 = arith.divf %34, %35 : vector<48x1xf32>
    %cst_26 = arith.constant 9.99999997E-7 : f32
    %37 = vector.broadcast %cst_26 : f32 to vector<48x1xf32>
    %38 = arith.addf %36, %37 : vector<48x1xf32>
    %39 = math.rsqrt %38 : vector<48x1xf32>
    %40 = vector.broadcast %39 : vector<48x1xf32> to vector<48x32xf32>
    %41 = arith.mulf %31, %40 : vector<48x32xf32>
    %42 = vector.broadcast %13 : vector<1x32xf32> to vector<48x32xf32>
    %43 = arith.mulf %41, %42 : vector<48x32xf32>
    %44 = vector.broadcast %15 : vector<1x32xf32> to vector<48x32xf32>
    %45 = arith.addf %43, %44 : vector<48x32xf32>
    %c0_27 = arith.constant 0 : index
    %c0_28 = arith.constant 0 : index
    %c0_29 = arith.constant 0 : index
    %46 = vector.load %arg4[%c0_27, %c0_28, %c0_29] : memref<24x32x8xf32, #tpu.memory_space<vmem>>, vector<1x32x8xf32>
    %47 = vector.shape_cast %46 : vector<1x32x8xf32> to vector<32x8xf32>
    %cst_30 = arith.constant dense<0.000000e+00> : vector<48x8xf32>
    %48 = tpu.matmul %45, %47, %cst_30 {dimension_numbers = #tpu.dot_dimension_numbers<[1], [0], [0], [1], [0, 0, 1, 1], [], []>} : vector<48x32xf32>, vector<32x8xf32>, vector<48x8xf32> -> vector<48x8xf32>
    %c0_31 = arith.constant 0 : index
    %c0_32 = arith.constant 0 : index
    %c0_33 = arith.constant 0 : index
    %49 = vector.load %arg5[%c0_31, %c0_32, %c0_33] : memref<24x1x8xf32, #tpu.memory_space<vmem>>, vector<1x1x8xf32>
    %50 = vector.shape_cast %49 : vector<1x1x8xf32> to vector<1x8xf32>
    %51 = vector.broadcast %50 : vector<1x8xf32> to vector<48x8xf32>
    %52 = arith.addf %48, %51 : vector<48x8xf32>
    %c1_34 = arith.constant 1 : index
    %c0_35 = arith.constant 0 : index
    %c0_36 = arith.constant 0 : index
    %53 = vector.load %arg4[%c1_34, %c0_35, %c0_36] : memref<24x32x8xf32, #tpu.memory_space<vmem>>, vector<1x32x8xf32>
    %54 = vector.shape_cast %53 : vector<1x32x8xf32> to vector<32x8xf32>
    %cst_37 = arith.constant dense<0.000000e+00> : vector<48x8xf32>
    %55 = tpu.matmul %45, %54, %cst_37 {dimension_numbers = #tpu.dot_dimension_numbers<[1], [0], [0], [1], [0, 0, 1, 1], [], []>} : vector<48x32xf32>, vector<32x8xf32>, vector<48x8xf32> -> vector<48x8xf32>
    %c1_38 = arith.constant 1 : index
    %c0_39 = arith.constant 0 : index
    %c0_40 = arith.constant 0 : index
    %56 = vector.load %arg5[%c1_38, %c0_39, %c0_40] : memref<24x1x8xf32, #tpu.memory_space<vmem>>, vector<1x1x8xf32>
    %57 = vector.shape_cast %56 : vector<1x1x8xf32> to vector<1x8xf32>
    %58 = vector.broadcast %57 : vector<1x8xf32> to vector<48x8xf32>
    %59 = arith.addf %55, %58 : vector<48x8xf32>
    %c2_41 = arith.constant 2 : index
    %c0_42 = arith.constant 0 : index
    %c0_43 = arith.constant 0 : index
    %60 = vector.load %arg4[%c2_41, %c0_42, %c0_43] : memref<24x32x8xf32, #tpu.memory_space<vmem>>, vector<1x32x8xf32>
    %61 = vector.shape_cast %60 : vector<1x32x8xf32> to vector<32x8xf32>
    %cst_44 = arith.constant dense<0.000000e+00> : vector<48x8xf32>
    %62 = tpu.matmul %45, %61, %cst_44 {dimension_numbers = #tpu.dot_dimension_numbers<[1], [0], [0], [1], [0, 0, 1, 1], [], []>} : vector<48x32xf32>, vector<32x8xf32>, vector<48x8xf32> -> vector<48x8xf32>
    %c2_45 = arith.constant 2 : index
    %c0_46 = arith.constant 0 : index
    %c0_47 = arith.constant 0 : index
    %63 = vector.load %arg5[%c2_45, %c0_46, %c0_47] : memref<24x1x8xf32, #tpu.memory_space<vmem>>, vector<1x1x8xf32>
    %64 = vector.shape_cast %63 : vector<1x1x8xf32> to vector<1x8xf32>
    %65 = vector.broadcast %64 : vector<1x8xf32> to vector<48x8xf32>
    %66 = arith.addf %62, %65 : vector<48x8xf32>
    %c0_48 = arith.constant 0 : index
    %c0_49 = arith.constant 0 : index
    %c0_50 = arith.constant 0 : index
    %67 = vector.load %arg6[%c0_48, %c0_49, %c0_50] : memref<2x32x32xf32, #tpu.memory_space<vmem>>, vector<1x8x32xf32>
    %68 = vector.shape_cast %67 : vector<1x8x32xf32> to vector<8x32xf32>
    %69 = vector.extract_strided_slice %52 {offsets = [0, 0], sizes = [24, 8], strides = [1, 1]} : vector<48x8xf32> to vector<24x8xf32>
    %70 = vector.extract_strided_slice %59 {offsets = [0, 0], sizes = [24, 8], strides = [1, 1]} : vector<48x8xf32> to vector<24x8xf32>
    %71 = vector.extract_strided_slice %66 {offsets = [0, 0], sizes = [24, 8], strides = [1, 1]} : vector<48x8xf32> to vector<24x8xf32>
    %cst_51 = arith.constant dense<0.000000e+00> : vector<24x24xf32>
    %72 = tpu.matmul %69, %70, %cst_51 {dimension_numbers = #tpu.dot_dimension_numbers<[1], [1], [0], [0], [0, 0, 1, 0], [], []>} : vector<24x8xf32>, vector<24x8xf32>, vector<24x24xf32> -> vector<24x24xf32>
    %cst_52 = arith.constant 0.353553385 : f32
    %73 = vector.broadcast %cst_52 : f32 to vector<24x24xf32>
    %74 = arith.mulf %72, %73 : vector<24x24xf32>
    %75 = vector.broadcast %11 : vector<1x24xf32> to vector<24x24xf32>
    %76 = arith.addf %74, %75 : vector<24x24xf32>
    %cst_53 = arith.constant dense<0xFF800000> : vector<24xf32>
    %77 = vector.multi_reduction <maximumf>, %76, %cst_53 [1] : vector<24x24xf32> to vector<24xf32>
    %78 = vector.shape_cast %77 : vector<24xf32> to vector<24x1xf32>
    %79 = vector.broadcast %78 : vector<24x1xf32> to vector<24x24xf32>
    %80 = arith.subf %76, %79 : vector<24x24xf32>
    %81 = math.exp %80 : vector<24x24xf32>
    %cst_54 = arith.constant dense<0.000000e+00> : vector<24xf32>
    %82 = vector.multi_reduction <add>, %81, %cst_54 [1] : vector<24x24xf32> to vector<24xf32>
    %83 = vector.shape_cast %82 : vector<24xf32> to vector<24x1xf32>
    %84 = tpu.reciprocal %83 {approx = true} : vector<24x1xf32> -> vector<24x1xf32>
    %85 = vector.broadcast %84 : vector<24x1xf32> to vector<24x24xf32>
    %86 = arith.mulf %81, %85 : vector<24x24xf32>
    %cst_55 = arith.constant dense<0.000000e+00> : vector<24x8xf32>
    %87 = tpu.matmul %86, %71, %cst_55 {dimension_numbers = #tpu.dot_dimension_numbers<[1], [0], [0], [1], [0, 0, 1, 1], [], []>} : vector<24x24xf32>, vector<24x8xf32>, vector<24x8xf32> -> vector<24x8xf32>
    %cst_56 = arith.constant dense<0.000000e+00> : vector<24x32xf32>
    %88 = tpu.matmul %87, %68, %cst_56 {dimension_numbers = #tpu.dot_dimension_numbers<[1], [0], [0], [1], [0, 0, 1, 1], [], []>} : vector<24x8xf32>, vector<8x32xf32>, vector<24x32xf32> -> vector<24x32xf32>
    %89 = vector.extract_strided_slice %52 {offsets = [24, 0], sizes = [24, 8], strides = [1, 1]} : vector<48x8xf32> to vector<24x8xf32>
    %90 = vector.extract_strided_slice %59 {offsets = [24, 0], sizes = [24, 8], strides = [1, 1]} : vector<48x8xf32> to vector<24x8xf32>
    %91 = vector.extract_strided_slice %66 {offsets = [24, 0], sizes = [24, 8], strides = [1, 1]} : vector<48x8xf32> to vector<24x8xf32>
    %cst_57 = arith.constant dense<0.000000e+00> : vector<24x24xf32>
    %92 = tpu.matmul %89, %90, %cst_57 {dimension_numbers = #tpu.dot_dimension_numbers<[1], [1], [0], [0], [0, 0, 1, 0], [], []>} : vector<24x8xf32>, vector<24x8xf32>, vector<24x24xf32> -> vector<24x24xf32>
    %cst_58 = arith.constant 0.353553385 : f32
    %93 = vector.broadcast %cst_58 : f32 to vector<24x24xf32>
    %94 = arith.mulf %92, %93 : vector<24x24xf32>
    %95 = vector.broadcast %11 : vector<1x24xf32> to vector<24x24xf32>
    %96 = arith.addf %94, %95 : vector<24x24xf32>
    %cst_59 = arith.constant dense<0xFF800000> : vector<24xf32>
    %97 = vector.multi_reduction <maximumf>, %96, %cst_59 [1] : vector<24x24xf32> to vector<24xf32>
    %98 = vector.shape_cast %97 : vector<24xf32> to vector<24x1xf32>
    %99 = vector.broadcast %98 : vector<24x1xf32> to vector<24x24xf32>
    %100 = arith.subf %96, %99 : vector<24x24xf32>
    %101 = math.exp %100 : vector<24x24xf32>
    %cst_60 = arith.constant dense<0.000000e+00> : vector<24xf32>
    %102 = vector.multi_reduction <add>, %101, %cst_60 [1] : vector<24x24xf32> to vector<24xf32>
    %103 = vector.shape_cast %102 : vector<24xf32> to vector<24x1xf32>
    %104 = tpu.reciprocal %103 {approx = true} : vector<24x1xf32> -> vector<24x1xf32>
    %105 = vector.broadcast %104 : vector<24x1xf32> to vector<24x24xf32>
    %106 = arith.mulf %101, %105 : vector<24x24xf32>
    %cst_61 = arith.constant dense<0.000000e+00> : vector<24x8xf32>
    %107 = tpu.matmul %106, %91, %cst_61 {dimension_numbers = #tpu.dot_dimension_numbers<[1], [0], [0], [1], [0, 0, 1, 1], [], []>} : vector<24x24xf32>, vector<24x8xf32>, vector<24x8xf32> -> vector<24x8xf32>
    %cst_62 = arith.constant dense<0.000000e+00> : vector<24x32xf32>
    %108 = tpu.matmul %107, %68, %cst_62 {dimension_numbers = #tpu.dot_dimension_numbers<[1], [0], [0], [1], [0, 0, 1, 1], [], []>} : vector<24x8xf32>, vector<8x32xf32>, vector<24x32xf32> -> vector<24x32xf32>
    %c3_63 = arith.constant 3 : index
    %c0_64 = arith.constant 0 : index
    %c0_65 = arith.constant 0 : index
    %109 = vector.load %arg4[%c3_63, %c0_64, %c0_65] : memref<24x32x8xf32, #tpu.memory_space<vmem>>, vector<1x32x8xf32>
    %110 = vector.shape_cast %109 : vector<1x32x8xf32> to vector<32x8xf32>
    %cst_66 = arith.constant dense<0.000000e+00> : vector<48x8xf32>
    %111 = tpu.matmul %45, %110, %cst_66 {dimension_numbers = #tpu.dot_dimension_numbers<[1], [0], [0], [1], [0, 0, 1, 1], [], []>} : vector<48x32xf32>, vector<32x8xf32>, vector<48x8xf32> -> vector<48x8xf32>
    %c3_67 = arith.constant 3 : index
    %c0_68 = arith.constant 0 : index
    %c0_69 = arith.constant 0 : index
    %112 = vector.load %arg5[%c3_67, %c0_68, %c0_69] : memref<24x1x8xf32, #tpu.memory_space<vmem>>, vector<1x1x8xf32>
    %113 = vector.shape_cast %112 : vector<1x1x8xf32> to vector<1x8xf32>
    %114 = vector.broadcast %113 : vector<1x8xf32> to vector<48x8xf32>
    %115 = arith.addf %111, %114 : vector<48x8xf32>
    %c4_70 = arith.constant 4 : index
    %c0_71 = arith.constant 0 : index
    %c0_72 = arith.constant 0 : index
    %116 = vector.load %arg4[%c4_70, %c0_71, %c0_72] : memref<24x32x8xf32, #tpu.memory_space<vmem>>, vector<1x32x8xf32>
    %117 = vector.shape_cast %116 : vector<1x32x8xf32> to vector<32x8xf32>
    %cst_73 = arith.constant dense<0.000000e+00> : vector<48x8xf32>
    %118 = tpu.matmul %45, %117, %cst_73 {dimension_numbers = #tpu.dot_dimension_numbers<[1], [0], [0], [1], [0, 0, 1, 1], [], []>} : vector<48x32xf32>, vector<32x8xf32>, vector<48x8xf32> -> vector<48x8xf32>
    %c4_74 = arith.constant 4 : index
    %c0_75 = arith.constant 0 : index
    %c0_76 = arith.constant 0 : index
    %119 = vector.load %arg5[%c4_74, %c0_75, %c0_76] : memref<24x1x8xf32, #tpu.memory_space<vmem>>, vector<1x1x8xf32>
    %120 = vector.shape_cast %119 : vector<1x1x8xf32> to vector<1x8xf32>
    %121 = vector.broadcast %120 : vector<1x8xf32> to vector<48x8xf32>
    %122 = arith.addf %118, %121 : vector<48x8xf32>
    %c5_77 = arith.constant 5 : index
    %c0_78 = arith.constant 0 : index
    %c0_79 = arith.constant 0 : index
    %123 = vector.load %arg4[%c5_77, %c0_78, %c0_79] : memref<24x32x8xf32, #tpu.memory_space<vmem>>, vector<1x32x8xf32>
    %124 = vector.shape_cast %123 : vector<1x32x8xf32> to vector<32x8xf32>
    %cst_80 = arith.constant dense<0.000000e+00> : vector<48x8xf32>
    %125 = tpu.matmul %45, %124, %cst_80 {dimension_numbers = #tpu.dot_dimension_numbers<[1], [0], [0], [1], [0, 0, 1, 1], [], []>} : vector<48x32xf32>, vector<32x8xf32>, vector<48x8xf32> -> vector<48x8xf32>
    %c5_81 = arith.constant 5 : index
    %c0_82 = arith.constant 0 : index
    %c0_83 = arith.constant 0 : index
    %126 = vector.load %arg5[%c5_81, %c0_82, %c0_83] : memref<24x1x8xf32, #tpu.memory_space<vmem>>, vector<1x1x8xf32>
    %127 = vector.shape_cast %126 : vector<1x1x8xf32> to vector<1x8xf32>
    %128 = vector.broadcast %127 : vector<1x8xf32> to vector<48x8xf32>
    %129 = arith.addf %125, %128 : vector<48x8xf32>
    %c0_84 = arith.constant 0 : index
    %c8 = arith.constant 8 : index
    %c0_85 = arith.constant 0 : index
    %130 = vector.load %arg6[%c0_84, %c8, %c0_85] : memref<2x32x32xf32, #tpu.memory_space<vmem>>, vector<1x8x32xf32>
    %131 = vector.shape_cast %130 : vector<1x8x32xf32> to vector<8x32xf32>
    %132 = vector.extract_strided_slice %115 {offsets = [0, 0], sizes = [24, 8], strides = [1, 1]} : vector<48x8xf32> to vector<24x8xf32>
    %133 = vector.extract_strided_slice %122 {offsets = [0, 0], sizes = [24, 8], strides = [1, 1]} : vector<48x8xf32> to vector<24x8xf32>
    %134 = vector.extract_strided_slice %129 {offsets = [0, 0], sizes = [24, 8], strides = [1, 1]} : vector<48x8xf32> to vector<24x8xf32>
    %cst_86 = arith.constant dense<0.000000e+00> : vector<24x24xf32>
    %135 = tpu.matmul %132, %133, %cst_86 {dimension_numbers = #tpu.dot_dimension_numbers<[1], [1], [0], [0], [0, 0, 1, 0], [], []>} : vector<24x8xf32>, vector<24x8xf32>, vector<24x24xf32> -> vector<24x24xf32>
    %cst_87 = arith.constant 0.353553385 : f32
    %136 = vector.broadcast %cst_87 : f32 to vector<24x24xf32>
    %137 = arith.mulf %135, %136 : vector<24x24xf32>
    %138 = vector.broadcast %11 : vector<1x24xf32> to vector<24x24xf32>
    %139 = arith.addf %137, %138 : vector<24x24xf32>
    %cst_88 = arith.constant dense<0xFF800000> : vector<24xf32>
    %140 = vector.multi_reduction <maximumf>, %139, %cst_88 [1] : vector<24x24xf32> to vector<24xf32>
    %141 = vector.shape_cast %140 : vector<24xf32> to vector<24x1xf32>
    %142 = vector.broadcast %141 : vector<24x1xf32> to vector<24x24xf32>
    %143 = arith.subf %139, %142 : vector<24x24xf32>
    %144 = math.exp %143 : vector<24x24xf32>
    %cst_89 = arith.constant dense<0.000000e+00> : vector<24xf32>
    %145 = vector.multi_reduction <add>, %144, %cst_89 [1] : vector<24x24xf32> to vector<24xf32>
    %146 = vector.shape_cast %145 : vector<24xf32> to vector<24x1xf32>
    %147 = tpu.reciprocal %146 {approx = true} : vector<24x1xf32> -> vector<24x1xf32>
    %148 = vector.broadcast %147 : vector<24x1xf32> to vector<24x24xf32>
    %149 = arith.mulf %144, %148 : vector<24x24xf32>
    %cst_90 = arith.constant dense<0.000000e+00> : vector<24x8xf32>
    %150 = tpu.matmul %149, %134, %cst_90 {dimension_numbers = #tpu.dot_dimension_numbers<[1], [0], [0], [1], [0, 0, 1, 1], [], []>} : vector<24x24xf32>, vector<24x8xf32>, vector<24x8xf32> -> vector<24x8xf32>
    %cst_91 = arith.constant dense<0.000000e+00> : vector<24x32xf32>
    %151 = tpu.matmul %150, %131, %cst_91 {dimension_numbers = #tpu.dot_dimension_numbers<[1], [0], [0], [1], [0, 0, 1, 1], [], []>} : vector<24x8xf32>, vector<8x32xf32>, vector<24x32xf32> -> vector<24x32xf32>
    %152 = arith.addf %88, %151 : vector<24x32xf32>
    %153 = vector.extract_strided_slice %115 {offsets = [24, 0], sizes = [24, 8], strides = [1, 1]} : vector<48x8xf32> to vector<24x8xf32>
    %154 = vector.extract_strided_slice %122 {offsets = [24, 0], sizes = [24, 8], strides = [1, 1]} : vector<48x8xf32> to vector<24x8xf32>
    %155 = vector.extract_strided_slice %129 {offsets = [24, 0], sizes = [24, 8], strides = [1, 1]} : vector<48x8xf32> to vector<24x8xf32>
    %cst_92 = arith.constant dense<0.000000e+00> : vector<24x24xf32>
    %156 = tpu.matmul %153, %154, %cst_92 {dimension_numbers = #tpu.dot_dimension_numbers<[1], [1], [0], [0], [0, 0, 1, 0], [], []>} : vector<24x8xf32>, vector<24x8xf32>, vector<24x24xf32> -> vector<24x24xf32>
    %cst_93 = arith.constant 0.353553385 : f32
    %157 = vector.broadcast %cst_93 : f32 to vector<24x24xf32>
    %158 = arith.mulf %156, %157 : vector<24x24xf32>
    %159 = vector.broadcast %11 : vector<1x24xf32> to vector<24x24xf32>
    %160 = arith.addf %158, %159 : vector<24x24xf32>
    %cst_94 = arith.constant dense<0xFF800000> : vector<24xf32>
    %161 = vector.multi_reduction <maximumf>, %160, %cst_94 [1] : vector<24x24xf32> to vector<24xf32>
    %162 = vector.shape_cast %161 : vector<24xf32> to vector<24x1xf32>
    %163 = vector.broadcast %162 : vector<24x1xf32> to vector<24x24xf32>
    %164 = arith.subf %160, %163 : vector<24x24xf32>
    %165 = math.exp %164 : vector<24x24xf32>
    %cst_95 = arith.constant dense<0.000000e+00> : vector<24xf32>
    %166 = vector.multi_reduction <add>, %165, %cst_95 [1] : vector<24x24xf32> to vector<24xf32>
    %167 = vector.shape_cast %166 : vector<24xf32> to vector<24x1xf32>
    %168 = tpu.reciprocal %167 {approx = true} : vector<24x1xf32> -> vector<24x1xf32>
    %169 = vector.broadcast %168 : vector<24x1xf32> to vector<24x24xf32>
    %170 = arith.mulf %165, %169 : vector<24x24xf32>
    %cst_96 = arith.constant dense<0.000000e+00> : vector<24x8xf32>
    %171 = tpu.matmul %170, %155, %cst_96 {dimension_numbers = #tpu.dot_dimension_numbers<[1], [0], [0], [1], [0, 0, 1, 1], [], []>} : vector<24x24xf32>, vector<24x8xf32>, vector<24x8xf32> -> vector<24x8xf32>
    %cst_97 = arith.constant dense<0.000000e+00> : vector<24x32xf32>
    %172 = tpu.matmul %171, %131, %cst_97 {dimension_numbers = #tpu.dot_dimension_numbers<[1], [0], [0], [1], [0, 0, 1, 1], [], []>} : vector<24x8xf32>, vector<8x32xf32>, vector<24x32xf32> -> vector<24x32xf32>
    %173 = arith.addf %108, %172 : vector<24x32xf32>
    %c6_98 = arith.constant 6 : index
    %c0_99 = arith.constant 0 : index
    %c0_100 = arith.constant 0 : index
    %174 = vector.load %arg4[%c6_98, %c0_99, %c0_100] : memref<24x32x8xf32, #tpu.memory_space<vmem>>, vector<1x32x8xf32>
    %175 = vector.shape_cast %174 : vector<1x32x8xf32> to vector<32x8xf32>
    %cst_101 = arith.constant dense<0.000000e+00> : vector<48x8xf32>
    %176 = tpu.matmul %45, %175, %cst_101 {dimension_numbers = #tpu.dot_dimension_numbers<[1], [0], [0], [1], [0, 0, 1, 1], [], []>} : vector<48x32xf32>, vector<32x8xf32>, vector<48x8xf32> -> vector<48x8xf32>
    %c6_102 = arith.constant 6 : index
    %c0_103 = arith.constant 0 : index
    %c0_104 = arith.constant 0 : index
    %177 = vector.load %arg5[%c6_102, %c0_103, %c0_104] : memref<24x1x8xf32, #tpu.memory_space<vmem>>, vector<1x1x8xf32>
    %178 = vector.shape_cast %177 : vector<1x1x8xf32> to vector<1x8xf32>
    %179 = vector.broadcast %178 : vector<1x8xf32> to vector<48x8xf32>
    %180 = arith.addf %176, %179 : vector<48x8xf32>
    %c7 = arith.constant 7 : index
    %c0_105 = arith.constant 0 : index
    %c0_106 = arith.constant 0 : index
    %181 = vector.load %arg4[%c7, %c0_105, %c0_106] : memref<24x32x8xf32, #tpu.memory_space<vmem>>, vector<1x32x8xf32>
    %182 = vector.shape_cast %181 : vector<1x32x8xf32> to vector<32x8xf32>
    %cst_107 = arith.constant dense<0.000000e+00> : vector<48x8xf32>
    %183 = tpu.matmul %45, %182, %cst_107 {dimension_numbers = #tpu.dot_dimension_numbers<[1], [0], [0], [1], [0, 0, 1, 1], [], []>} : vector<48x32xf32>, vector<32x8xf32>, vector<48x8xf32> -> vector<48x8xf32>
    %c7_108 = arith.constant 7 : index
    %c0_109 = arith.constant 0 : index
    %c0_110 = arith.constant 0 : index
    %184 = vector.load %arg5[%c7_108, %c0_109, %c0_110] : memref<24x1x8xf32, #tpu.memory_space<vmem>>, vector<1x1x8xf32>
    %185 = vector.shape_cast %184 : vector<1x1x8xf32> to vector<1x8xf32>
    %186 = vector.broadcast %185 : vector<1x8xf32> to vector<48x8xf32>
    %187 = arith.addf %183, %186 : vector<48x8xf32>
    %c8_111 = arith.constant 8 : index
    %c0_112 = arith.constant 0 : index
    %c0_113 = arith.constant 0 : index
    %188 = vector.load %arg4[%c8_111, %c0_112, %c0_113] : memref<24x32x8xf32, #tpu.memory_space<vmem>>, vector<1x32x8xf32>
    %189 = vector.shape_cast %188 : vector<1x32x8xf32> to vector<32x8xf32>
    %cst_114 = arith.constant dense<0.000000e+00> : vector<48x8xf32>
    %190 = tpu.matmul %45, %189, %cst_114 {dimension_numbers = #tpu.dot_dimension_numbers<[1], [0], [0], [1], [0, 0, 1, 1], [], []>} : vector<48x32xf32>, vector<32x8xf32>, vector<48x8xf32> -> vector<48x8xf32>
    %c8_115 = arith.constant 8 : index
    %c0_116 = arith.constant 0 : index
    %c0_117 = arith.constant 0 : index
    %191 = vector.load %arg5[%c8_115, %c0_116, %c0_117] : memref<24x1x8xf32, #tpu.memory_space<vmem>>, vector<1x1x8xf32>
    %192 = vector.shape_cast %191 : vector<1x1x8xf32> to vector<1x8xf32>
    %193 = vector.broadcast %192 : vector<1x8xf32> to vector<48x8xf32>
    %194 = arith.addf %190, %193 : vector<48x8xf32>
    %c0_118 = arith.constant 0 : index
    %c16 = arith.constant 16 : index
    %c0_119 = arith.constant 0 : index
    %195 = vector.load %arg6[%c0_118, %c16, %c0_119] : memref<2x32x32xf32, #tpu.memory_space<vmem>>, vector<1x8x32xf32>
    %196 = vector.shape_cast %195 : vector<1x8x32xf32> to vector<8x32xf32>
    %197 = vector.extract_strided_slice %180 {offsets = [0, 0], sizes = [24, 8], strides = [1, 1]} : vector<48x8xf32> to vector<24x8xf32>
    %198 = vector.extract_strided_slice %187 {offsets = [0, 0], sizes = [24, 8], strides = [1, 1]} : vector<48x8xf32> to vector<24x8xf32>
    %199 = vector.extract_strided_slice %194 {offsets = [0, 0], sizes = [24, 8], strides = [1, 1]} : vector<48x8xf32> to vector<24x8xf32>
    %cst_120 = arith.constant dense<0.000000e+00> : vector<24x24xf32>
    %200 = tpu.matmul %197, %198, %cst_120 {dimension_numbers = #tpu.dot_dimension_numbers<[1], [1], [0], [0], [0, 0, 1, 0], [], []>} : vector<24x8xf32>, vector<24x8xf32>, vector<24x24xf32> -> vector<24x24xf32>
    %cst_121 = arith.constant 0.353553385 : f32
    %201 = vector.broadcast %cst_121 : f32 to vector<24x24xf32>
    %202 = arith.mulf %200, %201 : vector<24x24xf32>
    %203 = vector.broadcast %11 : vector<1x24xf32> to vector<24x24xf32>
    %204 = arith.addf %202, %203 : vector<24x24xf32>
    %cst_122 = arith.constant dense<0xFF800000> : vector<24xf32>
    %205 = vector.multi_reduction <maximumf>, %204, %cst_122 [1] : vector<24x24xf32> to vector<24xf32>
    %206 = vector.shape_cast %205 : vector<24xf32> to vector<24x1xf32>
    %207 = vector.broadcast %206 : vector<24x1xf32> to vector<24x24xf32>
    %208 = arith.subf %204, %207 : vector<24x24xf32>
    %209 = math.exp %208 : vector<24x24xf32>
    %cst_123 = arith.constant dense<0.000000e+00> : vector<24xf32>
    %210 = vector.multi_reduction <add>, %209, %cst_123 [1] : vector<24x24xf32> to vector<24xf32>
    %211 = vector.shape_cast %210 : vector<24xf32> to vector<24x1xf32>
    %212 = tpu.reciprocal %211 {approx = true} : vector<24x1xf32> -> vector<24x1xf32>
    %213 = vector.broadcast %212 : vector<24x1xf32> to vector<24x24xf32>
    %214 = arith.mulf %209, %213 : vector<24x24xf32>
    %cst_124 = arith.constant dense<0.000000e+00> : vector<24x8xf32>
    %215 = tpu.matmul %214, %199, %cst_124 {dimension_numbers = #tpu.dot_dimension_numbers<[1], [0], [0], [1], [0, 0, 1, 1], [], []>} : vector<24x24xf32>, vector<24x8xf32>, vector<24x8xf32> -> vector<24x8xf32>
    %cst_125 = arith.constant dense<0.000000e+00> : vector<24x32xf32>
    %216 = tpu.matmul %215, %196, %cst_125 {dimension_numbers = #tpu.dot_dimension_numbers<[1], [0], [0], [1], [0, 0, 1, 1], [], []>} : vector<24x8xf32>, vector<8x32xf32>, vector<24x32xf32> -> vector<24x32xf32>
    %217 = arith.addf %152, %216 : vector<24x32xf32>
    %218 = vector.extract_strided_slice %180 {offsets = [24, 0], sizes = [24, 8], strides = [1, 1]} : vector<48x8xf32> to vector<24x8xf32>
    %219 = vector.extract_strided_slice %187 {offsets = [24, 0], sizes = [24, 8], strides = [1, 1]} : vector<48x8xf32> to vector<24x8xf32>
    %220 = vector.extract_strided_slice %194 {offsets = [24, 0], sizes = [24, 8], strides = [1, 1]} : vector<48x8xf32> to vector<24x8xf32>
    %cst_126 = arith.constant dense<0.000000e+00> : vector<24x24xf32>
    %221 = tpu.matmul %218, %219, %cst_126 {dimension_numbers = #tpu.dot_dimension_numbers<[1], [1], [0], [0], [0, 0, 1, 0], [], []>} : vector<24x8xf32>, vector<24x8xf32>, vector<24x24xf32> -> vector<24x24xf32>
    %cst_127 = arith.constant 0.353553385 : f32
    %222 = vector.broadcast %cst_127 : f32 to vector<24x24xf32>
    %223 = arith.mulf %221, %222 : vector<24x24xf32>
    %224 = vector.broadcast %11 : vector<1x24xf32> to vector<24x24xf32>
    %225 = arith.addf %223, %224 : vector<24x24xf32>
    %cst_128 = arith.constant dense<0xFF800000> : vector<24xf32>
    %226 = vector.multi_reduction <maximumf>, %225, %cst_128 [1] : vector<24x24xf32> to vector<24xf32>
    %227 = vector.shape_cast %226 : vector<24xf32> to vector<24x1xf32>
    %228 = vector.broadcast %227 : vector<24x1xf32> to vector<24x24xf32>
    %229 = arith.subf %225, %228 : vector<24x24xf32>
    %230 = math.exp %229 : vector<24x24xf32>
    %cst_129 = arith.constant dense<0.000000e+00> : vector<24xf32>
    %231 = vector.multi_reduction <add>, %230, %cst_129 [1] : vector<24x24xf32> to vector<24xf32>
    %232 = vector.shape_cast %231 : vector<24xf32> to vector<24x1xf32>
    %233 = tpu.reciprocal %232 {approx = true} : vector<24x1xf32> -> vector<24x1xf32>
    %234 = vector.broadcast %233 : vector<24x1xf32> to vector<24x24xf32>
    %235 = arith.mulf %230, %234 : vector<24x24xf32>
    %cst_130 = arith.constant dense<0.000000e+00> : vector<24x8xf32>
    %236 = tpu.matmul %235, %220, %cst_130 {dimension_numbers = #tpu.dot_dimension_numbers<[1], [0], [0], [1], [0, 0, 1, 1], [], []>} : vector<24x24xf32>, vector<24x8xf32>, vector<24x8xf32> -> vector<24x8xf32>
    %cst_131 = arith.constant dense<0.000000e+00> : vector<24x32xf32>
    %237 = tpu.matmul %236, %196, %cst_131 {dimension_numbers = #tpu.dot_dimension_numbers<[1], [0], [0], [1], [0, 0, 1, 1], [], []>} : vector<24x8xf32>, vector<8x32xf32>, vector<24x32xf32> -> vector<24x32xf32>
    %238 = arith.addf %173, %237 : vector<24x32xf32>
    %c9 = arith.constant 9 : index
    %c0_132 = arith.constant 0 : index
    %c0_133 = arith.constant 0 : index
    %239 = vector.load %arg4[%c9, %c0_132, %c0_133] : memref<24x32x8xf32, #tpu.memory_space<vmem>>, vector<1x32x8xf32>
    %240 = vector.shape_cast %239 : vector<1x32x8xf32> to vector<32x8xf32>
    %cst_134 = arith.constant dense<0.000000e+00> : vector<48x8xf32>
    %241 = tpu.matmul %45, %240, %cst_134 {dimension_numbers = #tpu.dot_dimension_numbers<[1], [0], [0], [1], [0, 0, 1, 1], [], []>} : vector<48x32xf32>, vector<32x8xf32>, vector<48x8xf32> -> vector<48x8xf32>
    %c9_135 = arith.constant 9 : index
    %c0_136 = arith.constant 0 : index
    %c0_137 = arith.constant 0 : index
    %242 = vector.load %arg5[%c9_135, %c0_136, %c0_137] : memref<24x1x8xf32, #tpu.memory_space<vmem>>, vector<1x1x8xf32>
    %243 = vector.shape_cast %242 : vector<1x1x8xf32> to vector<1x8xf32>
    %244 = vector.broadcast %243 : vector<1x8xf32> to vector<48x8xf32>
    %245 = arith.addf %241, %244 : vector<48x8xf32>
    %c10 = arith.constant 10 : index
    %c0_138 = arith.constant 0 : index
    %c0_139 = arith.constant 0 : index
    %246 = vector.load %arg4[%c10, %c0_138, %c0_139] : memref<24x32x8xf32, #tpu.memory_space<vmem>>, vector<1x32x8xf32>
    %247 = vector.shape_cast %246 : vector<1x32x8xf32> to vector<32x8xf32>
    %cst_140 = arith.constant dense<0.000000e+00> : vector<48x8xf32>
    %248 = tpu.matmul %45, %247, %cst_140 {dimension_numbers = #tpu.dot_dimension_numbers<[1], [0], [0], [1], [0, 0, 1, 1], [], []>} : vector<48x32xf32>, vector<32x8xf32>, vector<48x8xf32> -> vector<48x8xf32>
    %c10_141 = arith.constant 10 : index
    %c0_142 = arith.constant 0 : index
    %c0_143 = arith.constant 0 : index
    %249 = vector.load %arg5[%c10_141, %c0_142, %c0_143] : memref<24x1x8xf32, #tpu.memory_space<vmem>>, vector<1x1x8xf32>
    %250 = vector.shape_cast %249 : vector<1x1x8xf32> to vector<1x8xf32>
    %251 = vector.broadcast %250 : vector<1x8xf32> to vector<48x8xf32>
    %252 = arith.addf %248, %251 : vector<48x8xf32>
    %c11 = arith.constant 11 : index
    %c0_144 = arith.constant 0 : index
    %c0_145 = arith.constant 0 : index
    %253 = vector.load %arg4[%c11, %c0_144, %c0_145] : memref<24x32x8xf32, #tpu.memory_space<vmem>>, vector<1x32x8xf32>
    %254 = vector.shape_cast %253 : vector<1x32x8xf32> to vector<32x8xf32>
    %cst_146 = arith.constant dense<0.000000e+00> : vector<48x8xf32>
    %255 = tpu.matmul %45, %254, %cst_146 {dimension_numbers = #tpu.dot_dimension_numbers<[1], [0], [0], [1], [0, 0, 1, 1], [], []>} : vector<48x32xf32>, vector<32x8xf32>, vector<48x8xf32> -> vector<48x8xf32>
    %c11_147 = arith.constant 11 : index
    %c0_148 = arith.constant 0 : index
    %c0_149 = arith.constant 0 : index
    %256 = vector.load %arg5[%c11_147, %c0_148, %c0_149] : memref<24x1x8xf32, #tpu.memory_space<vmem>>, vector<1x1x8xf32>
    %257 = vector.shape_cast %256 : vector<1x1x8xf32> to vector<1x8xf32>
    %258 = vector.broadcast %257 : vector<1x8xf32> to vector<48x8xf32>
    %259 = arith.addf %255, %258 : vector<48x8xf32>
    %c0_150 = arith.constant 0 : index
    %c24 = arith.constant 24 : index
    %c0_151 = arith.constant 0 : index
    %260 = vector.load %arg6[%c0_150, %c24, %c0_151] : memref<2x32x32xf32, #tpu.memory_space<vmem>>, vector<1x8x32xf32>
    %261 = vector.shape_cast %260 : vector<1x8x32xf32> to vector<8x32xf32>
    %262 = vector.extract_strided_slice %245 {offsets = [0, 0], sizes = [24, 8], strides = [1, 1]} : vector<48x8xf32> to vector<24x8xf32>
    %263 = vector.extract_strided_slice %252 {offsets = [0, 0], sizes = [24, 8], strides = [1, 1]} : vector<48x8xf32> to vector<24x8xf32>
    %264 = vector.extract_strided_slice %259 {offsets = [0, 0], sizes = [24, 8], strides = [1, 1]} : vector<48x8xf32> to vector<24x8xf32>
    %cst_152 = arith.constant dense<0.000000e+00> : vector<24x24xf32>
    %265 = tpu.matmul %262, %263, %cst_152 {dimension_numbers = #tpu.dot_dimension_numbers<[1], [1], [0], [0], [0, 0, 1, 0], [], []>} : vector<24x8xf32>, vector<24x8xf32>, vector<24x24xf32> -> vector<24x24xf32>
    %cst_153 = arith.constant 0.353553385 : f32
    %266 = vector.broadcast %cst_153 : f32 to vector<24x24xf32>
    %267 = arith.mulf %265, %266 : vector<24x24xf32>
    %268 = vector.broadcast %11 : vector<1x24xf32> to vector<24x24xf32>
    %269 = arith.addf %267, %268 : vector<24x24xf32>
    %cst_154 = arith.constant dense<0xFF800000> : vector<24xf32>
    %270 = vector.multi_reduction <maximumf>, %269, %cst_154 [1] : vector<24x24xf32> to vector<24xf32>
    %271 = vector.shape_cast %270 : vector<24xf32> to vector<24x1xf32>
    %272 = vector.broadcast %271 : vector<24x1xf32> to vector<24x24xf32>
    %273 = arith.subf %269, %272 : vector<24x24xf32>
    %274 = math.exp %273 : vector<24x24xf32>
    %cst_155 = arith.constant dense<0.000000e+00> : vector<24xf32>
    %275 = vector.multi_reduction <add>, %274, %cst_155 [1] : vector<24x24xf32> to vector<24xf32>
    %276 = vector.shape_cast %275 : vector<24xf32> to vector<24x1xf32>
    %277 = tpu.reciprocal %276 {approx = true} : vector<24x1xf32> -> vector<24x1xf32>
    %278 = vector.broadcast %277 : vector<24x1xf32> to vector<24x24xf32>
    %279 = arith.mulf %274, %278 : vector<24x24xf32>
    %cst_156 = arith.constant dense<0.000000e+00> : vector<24x8xf32>
    %280 = tpu.matmul %279, %264, %cst_156 {dimension_numbers = #tpu.dot_dimension_numbers<[1], [0], [0], [1], [0, 0, 1, 1], [], []>} : vector<24x24xf32>, vector<24x8xf32>, vector<24x8xf32> -> vector<24x8xf32>
    %cst_157 = arith.constant dense<0.000000e+00> : vector<24x32xf32>
    %281 = tpu.matmul %280, %261, %cst_157 {dimension_numbers = #tpu.dot_dimension_numbers<[1], [0], [0], [1], [0, 0, 1, 1], [], []>} : vector<24x8xf32>, vector<8x32xf32>, vector<24x32xf32> -> vector<24x32xf32>
    %282 = arith.addf %217, %281 : vector<24x32xf32>
    %283 = vector.extract_strided_slice %245 {offsets = [24, 0], sizes = [24, 8], strides = [1, 1]} : vector<48x8xf32> to vector<24x8xf32>
    %284 = vector.extract_strided_slice %252 {offsets = [24, 0], sizes = [24, 8], strides = [1, 1]} : vector<48x8xf32> to vector<24x8xf32>
    %285 = vector.extract_strided_slice %259 {offsets = [24, 0], sizes = [24, 8], strides = [1, 1]} : vector<48x8xf32> to vector<24x8xf32>
    %cst_158 = arith.constant dense<0.000000e+00> : vector<24x24xf32>
    %286 = tpu.matmul %283, %284, %cst_158 {dimension_numbers = #tpu.dot_dimension_numbers<[1], [1], [0], [0], [0, 0, 1, 0], [], []>} : vector<24x8xf32>, vector<24x8xf32>, vector<24x24xf32> -> vector<24x24xf32>
    %cst_159 = arith.constant 0.353553385 : f32
    %287 = vector.broadcast %cst_159 : f32 to vector<24x24xf32>
    %288 = arith.mulf %286, %287 : vector<24x24xf32>
    %289 = vector.broadcast %11 : vector<1x24xf32> to vector<24x24xf32>
    %290 = arith.addf %288, %289 : vector<24x24xf32>
    %cst_160 = arith.constant dense<0xFF800000> : vector<24xf32>
    %291 = vector.multi_reduction <maximumf>, %290, %cst_160 [1] : vector<24x24xf32> to vector<24xf32>
    %292 = vector.shape_cast %291 : vector<24xf32> to vector<24x1xf32>
    %293 = vector.broadcast %292 : vector<24x1xf32> to vector<24x24xf32>
    %294 = arith.subf %290, %293 : vector<24x24xf32>
    %295 = math.exp %294 : vector<24x24xf32>
    %cst_161 = arith.constant dense<0.000000e+00> : vector<24xf32>
    %296 = vector.multi_reduction <add>, %295, %cst_161 [1] : vector<24x24xf32> to vector<24xf32>
    %297 = vector.shape_cast %296 : vector<24xf32> to vector<24x1xf32>
    %298 = tpu.reciprocal %297 {approx = true} : vector<24x1xf32> -> vector<24x1xf32>
    %299 = vector.broadcast %298 : vector<24x1xf32> to vector<24x24xf32>
    %300 = arith.mulf %295, %299 : vector<24x24xf32>
    %cst_162 = arith.constant dense<0.000000e+00> : vector<24x8xf32>
    %301 = tpu.matmul %300, %285, %cst_162 {dimension_numbers = #tpu.dot_dimension_numbers<[1], [0], [0], [1], [0, 0, 1, 1], [], []>} : vector<24x24xf32>, vector<24x8xf32>, vector<24x8xf32> -> vector<24x8xf32>
    %cst_163 = arith.constant dense<0.000000e+00> : vector<24x32xf32>
    %302 = tpu.matmul %301, %261, %cst_163 {dimension_numbers = #tpu.dot_dimension_numbers<[1], [0], [0], [1], [0, 0, 1, 1], [], []>} : vector<24x8xf32>, vector<8x32xf32>, vector<24x32xf32> -> vector<24x32xf32>
    %303 = arith.addf %238, %302 : vector<24x32xf32>
    %304 = tpu.concatenate %282, %303 in 0 : vector<24x32xf32>, vector<24x32xf32> -> vector<48x32xf32>
    %305 = vector.broadcast %21 : vector<1x32xf32> to vector<48x32xf32>
    %306 = arith.addf %304, %305 : vector<48x32xf32>
    %307 = arith.addf %306, %5 : vector<48x32xf32>
    %cst_164 = arith.constant dense<0.000000e+00> : vector<48xf32>
    %308 = vector.multi_reduction <add>, %307, %cst_164 [1] : vector<48x32xf32> to vector<48xf32>
    %309 = vector.shape_cast %308 : vector<48xf32> to vector<48x1xf32>
    %cst_165 = arith.constant 3.200000e+01 : f32
    %310 = vector.broadcast %cst_165 : f32 to vector<48x1xf32>
    %311 = arith.divf %309, %310 : vector<48x1xf32>
    %312 = vector.broadcast %311 : vector<48x1xf32> to vector<48x32xf32>
    %313 = arith.subf %307, %312 : vector<48x32xf32>
    %314 = arith.mulf %313, %313 : vector<48x32xf32>
    %cst_166 = arith.constant dense<0.000000e+00> : vector<48xf32>
    %315 = vector.multi_reduction <add>, %314, %cst_166 [1] : vector<48x32xf32> to vector<48xf32>
    %316 = vector.shape_cast %315 : vector<48xf32> to vector<48x1xf32>
    %cst_167 = arith.constant 3.200000e+01 : f32
    %317 = vector.broadcast %cst_167 : f32 to vector<48x1xf32>
    %318 = arith.divf %316, %317 : vector<48x1xf32>
    %cst_168 = arith.constant 9.99999997E-7 : f32
    %319 = vector.broadcast %cst_168 : f32 to vector<48x1xf32>
    %320 = arith.addf %318, %319 : vector<48x1xf32>
    %321 = math.rsqrt %320 : vector<48x1xf32>
    %322 = vector.broadcast %321 : vector<48x1xf32> to vector<48x32xf32>
    %323 = arith.mulf %313, %322 : vector<48x32xf32>
    %324 = vector.broadcast %17 : vector<1x32xf32> to vector<48x32xf32>
    %325 = arith.mulf %323, %324 : vector<48x32xf32>
    %326 = vector.broadcast %19 : vector<1x32xf32> to vector<48x32xf32>
    %327 = arith.addf %325, %326 : vector<48x32xf32>
    %c0_169 = arith.constant 0 : index
    %c0_170 = arith.constant 0 : index
    %c0_171 = arith.constant 0 : index
    %328 = vector.load %arg7[%c0_169, %c0_170, %c0_171] : memref<2x32x128xf32, #tpu.memory_space<vmem>>, vector<1x32x128xf32>
    %329 = vector.shape_cast %328 : vector<1x32x128xf32> to vector<32x128xf32>
    %cst_172 = arith.constant dense<0.000000e+00> : vector<48x128xf32>
    %330 = tpu.matmul %327, %329, %cst_172 {dimension_numbers = #tpu.dot_dimension_numbers<[1], [0], [0], [1], [0, 0, 1, 1], [], []>} : vector<48x32xf32>, vector<32x128xf32>, vector<48x128xf32> -> vector<48x128xf32>
    %331 = vector.broadcast %23 : vector<1x128xf32> to vector<48x128xf32>
    %332 = arith.addf %330, %331 : vector<48x128xf32>
    %cst_173 = arith.constant 5.000000e-01 : f32
    %333 = vector.broadcast %cst_173 : f32 to vector<48x128xf32>
    %334 = arith.mulf %333, %332 : vector<48x128xf32>
    %cst_174 = arith.constant 4.471500e-02 : f32
    %335 = vector.broadcast %cst_174 : f32 to vector<48x128xf32>
    %336 = arith.mulf %335, %332 : vector<48x128xf32>
    %337 = arith.mulf %336, %332 : vector<48x128xf32>
    %338 = arith.mulf %337, %332 : vector<48x128xf32>
    %339 = arith.addf %332, %338 : vector<48x128xf32>
    %cst_175 = arith.constant 0.797884583 : f32
    %340 = vector.broadcast %cst_175 : f32 to vector<48x128xf32>
    %341 = arith.mulf %340, %339 : vector<48x128xf32>
    %342 = math.tanh %341 : vector<48x128xf32>
    %cst_176 = arith.constant 1.000000e+00 : f32
    %343 = vector.broadcast %cst_176 : f32 to vector<48x128xf32>
    %344 = arith.addf %343, %342 : vector<48x128xf32>
    %345 = arith.mulf %334, %344 : vector<48x128xf32>
    %c0_177 = arith.constant 0 : index
    %c0_178 = arith.constant 0 : index
    %c0_179 = arith.constant 0 : index
    %346 = vector.load %arg8[%c0_177, %c0_178, %c0_179] : memref<2x128x32xf32, #tpu.memory_space<vmem>>, vector<1x128x32xf32>
    %347 = vector.shape_cast %346 : vector<1x128x32xf32> to vector<128x32xf32>
    %cst_180 = arith.constant dense<0.000000e+00> : vector<48x32xf32>
    %348 = tpu.matmul %345, %347, %cst_180 {dimension_numbers = #tpu.dot_dimension_numbers<[1], [0], [0], [1], [0, 0, 1, 1], [], []>} : vector<48x128xf32>, vector<128x32xf32>, vector<48x32xf32> -> vector<48x32xf32>
    %349 = vector.broadcast %25 : vector<1x32xf32> to vector<48x32xf32>
    %350 = arith.addf %348, %349 : vector<48x32xf32>
    %351 = arith.addf %350, %307 : vector<48x32xf32>
    %c1_181 = arith.constant 1 : index
    %c0_182 = arith.constant 0 : index
    %c0_183 = arith.constant 0 : index
    %352 = vector.load %arg9[%c1_181, %c0_182, %c0_183] : memref<2x8x128xf32, #tpu.memory_space<vmem>>, vector<1x1x32xf32>
    %353 = vector.shape_cast %352 : vector<1x1x32xf32> to vector<1x32xf32>
    %c1_184 = arith.constant 1 : index
    %c1_185 = arith.constant 1 : index
    %c0_186 = arith.constant 0 : index
    %354 = vector.load %arg9[%c1_184, %c1_185, %c0_186] : memref<2x8x128xf32, #tpu.memory_space<vmem>>, vector<1x1x32xf32>
    %355 = vector.shape_cast %354 : vector<1x1x32xf32> to vector<1x32xf32>
    %c1_187 = arith.constant 1 : index
    %c2_188 = arith.constant 2 : index
    %c0_189 = arith.constant 0 : index
    %356 = vector.load %arg9[%c1_187, %c2_188, %c0_189] : memref<2x8x128xf32, #tpu.memory_space<vmem>>, vector<1x1x32xf32>
    %357 = vector.shape_cast %356 : vector<1x1x32xf32> to vector<1x32xf32>
    %c1_190 = arith.constant 1 : index
    %c3_191 = arith.constant 3 : index
    %c0_192 = arith.constant 0 : index
    %358 = vector.load %arg9[%c1_190, %c3_191, %c0_192] : memref<2x8x128xf32, #tpu.memory_space<vmem>>, vector<1x1x32xf32>
    %359 = vector.shape_cast %358 : vector<1x1x32xf32> to vector<1x32xf32>
    %c1_193 = arith.constant 1 : index
    %c4_194 = arith.constant 4 : index
    %c0_195 = arith.constant 0 : index
    %360 = vector.load %arg9[%c1_193, %c4_194, %c0_195] : memref<2x8x128xf32, #tpu.memory_space<vmem>>, vector<1x1x32xf32>
    %361 = vector.shape_cast %360 : vector<1x1x32xf32> to vector<1x32xf32>
    %c1_196 = arith.constant 1 : index
    %c5_197 = arith.constant 5 : index
    %c0_198 = arith.constant 0 : index
    %362 = vector.load %arg9[%c1_196, %c5_197, %c0_198] : memref<2x8x128xf32, #tpu.memory_space<vmem>>, vector<1x1x128xf32>
    %363 = vector.shape_cast %362 : vector<1x1x128xf32> to vector<1x128xf32>
    %c1_199 = arith.constant 1 : index
    %c6_200 = arith.constant 6 : index
    %c0_201 = arith.constant 0 : index
    %364 = vector.load %arg9[%c1_199, %c6_200, %c0_201] : memref<2x8x128xf32, #tpu.memory_space<vmem>>, vector<1x1x32xf32>
    %365 = vector.shape_cast %364 : vector<1x1x32xf32> to vector<1x32xf32>
    %cst_202 = arith.constant dense<0.000000e+00> : vector<48xf32>
    %366 = vector.multi_reduction <add>, %351, %cst_202 [1] : vector<48x32xf32> to vector<48xf32>
    %367 = vector.shape_cast %366 : vector<48xf32> to vector<48x1xf32>
    %cst_203 = arith.constant 3.200000e+01 : f32
    %368 = vector.broadcast %cst_203 : f32 to vector<48x1xf32>
    %369 = arith.divf %367, %368 : vector<48x1xf32>
    %370 = vector.broadcast %369 : vector<48x1xf32> to vector<48x32xf32>
    %371 = arith.subf %351, %370 : vector<48x32xf32>
    %372 = arith.mulf %371, %371 : vector<48x32xf32>
    %cst_204 = arith.constant dense<0.000000e+00> : vector<48xf32>
    %373 = vector.multi_reduction <add>, %372, %cst_204 [1] : vector<48x32xf32> to vector<48xf32>
    %374 = vector.shape_cast %373 : vector<48xf32> to vector<48x1xf32>
    %cst_205 = arith.constant 3.200000e+01 : f32
    %375 = vector.broadcast %cst_205 : f32 to vector<48x1xf32>
    %376 = arith.divf %374, %375 : vector<48x1xf32>
    %cst_206 = arith.constant 9.99999997E-7 : f32
    %377 = vector.broadcast %cst_206 : f32 to vector<48x1xf32>
    %378 = arith.addf %376, %377 : vector<48x1xf32>
    %379 = math.rsqrt %378 : vector<48x1xf32>
    %380 = vector.broadcast %379 : vector<48x1xf32> to vector<48x32xf32>
    %381 = arith.mulf %371, %380 : vector<48x32xf32>
    %382 = vector.broadcast %353 : vector<1x32xf32> to vector<48x32xf32>
    %383 = arith.mulf %381, %382 : vector<48x32xf32>
    %384 = vector.broadcast %355 : vector<1x32xf32> to vector<48x32xf32>
    %385 = arith.addf %383, %384 : vector<48x32xf32>
    %c12 = arith.constant 12 : index
    %c0_207 = arith.constant 0 : index
    %c0_208 = arith.constant 0 : index
    %386 = vector.load %arg4[%c12, %c0_207, %c0_208] : memref<24x32x8xf32, #tpu.memory_space<vmem>>, vector<1x32x8xf32>
    %387 = vector.shape_cast %386 : vector<1x32x8xf32> to vector<32x8xf32>
    %cst_209 = arith.constant dense<0.000000e+00> : vector<48x8xf32>
    %388 = tpu.matmul %385, %387, %cst_209 {dimension_numbers = #tpu.dot_dimension_numbers<[1], [0], [0], [1], [0, 0, 1, 1], [], []>} : vector<48x32xf32>, vector<32x8xf32>, vector<48x8xf32> -> vector<48x8xf32>
    %c12_210 = arith.constant 12 : index
    %c0_211 = arith.constant 0 : index
    %c0_212 = arith.constant 0 : index
    %389 = vector.load %arg5[%c12_210, %c0_211, %c0_212] : memref<24x1x8xf32, #tpu.memory_space<vmem>>, vector<1x1x8xf32>
    %390 = vector.shape_cast %389 : vector<1x1x8xf32> to vector<1x8xf32>
    %391 = vector.broadcast %390 : vector<1x8xf32> to vector<48x8xf32>
    %392 = arith.addf %388, %391 : vector<48x8xf32>
    %c13 = arith.constant 13 : index
    %c0_213 = arith.constant 0 : index
    %c0_214 = arith.constant 0 : index
    %393 = vector.load %arg4[%c13, %c0_213, %c0_214] : memref<24x32x8xf32, #tpu.memory_space<vmem>>, vector<1x32x8xf32>
    %394 = vector.shape_cast %393 : vector<1x32x8xf32> to vector<32x8xf32>
    %cst_215 = arith.constant dense<0.000000e+00> : vector<48x8xf32>
    %395 = tpu.matmul %385, %394, %cst_215 {dimension_numbers = #tpu.dot_dimension_numbers<[1], [0], [0], [1], [0, 0, 1, 1], [], []>} : vector<48x32xf32>, vector<32x8xf32>, vector<48x8xf32> -> vector<48x8xf32>
    %c13_216 = arith.constant 13 : index
    %c0_217 = arith.constant 0 : index
    %c0_218 = arith.constant 0 : index
    %396 = vector.load %arg5[%c13_216, %c0_217, %c0_218] : memref<24x1x8xf32, #tpu.memory_space<vmem>>, vector<1x1x8xf32>
    %397 = vector.shape_cast %396 : vector<1x1x8xf32> to vector<1x8xf32>
    %398 = vector.broadcast %397 : vector<1x8xf32> to vector<48x8xf32>
    %399 = arith.addf %395, %398 : vector<48x8xf32>
    %c14 = arith.constant 14 : index
    %c0_219 = arith.constant 0 : index
    %c0_220 = arith.constant 0 : index
    %400 = vector.load %arg4[%c14, %c0_219, %c0_220] : memref<24x32x8xf32, #tpu.memory_space<vmem>>, vector<1x32x8xf32>
    %401 = vector.shape_cast %400 : vector<1x32x8xf32> to vector<32x8xf32>
    %cst_221 = arith.constant dense<0.000000e+00> : vector<48x8xf32>
    %402 = tpu.matmul %385, %401, %cst_221 {dimension_numbers = #tpu.dot_dimension_numbers<[1], [0], [0], [1], [0, 0, 1, 1], [], []>} : vector<48x32xf32>, vector<32x8xf32>, vector<48x8xf32> -> vector<48x8xf32>
    %c14_222 = arith.constant 14 : index
    %c0_223 = arith.constant 0 : index
    %c0_224 = arith.constant 0 : index
    %403 = vector.load %arg5[%c14_222, %c0_223, %c0_224] : memref<24x1x8xf32, #tpu.memory_space<vmem>>, vector<1x1x8xf32>
    %404 = vector.shape_cast %403 : vector<1x1x8xf32> to vector<1x8xf32>
    %405 = vector.broadcast %404 : vector<1x8xf32> to vector<48x8xf32>
    %406 = arith.addf %402, %405 : vector<48x8xf32>
    %c1_225 = arith.constant 1 : index
    %c0_226 = arith.constant 0 : index
    %c0_227 = arith.constant 0 : index
    %407 = vector.load %arg6[%c1_225, %c0_226, %c0_227] : memref<2x32x32xf32, #tpu.memory_space<vmem>>, vector<1x8x32xf32>
    %408 = vector.shape_cast %407 : vector<1x8x32xf32> to vector<8x32xf32>
    %409 = vector.extract_strided_slice %392 {offsets = [0, 0], sizes = [24, 8], strides = [1, 1]} : vector<48x8xf32> to vector<24x8xf32>
    %410 = vector.extract_strided_slice %399 {offsets = [0, 0], sizes = [24, 8], strides = [1, 1]} : vector<48x8xf32> to vector<24x8xf32>
    %411 = vector.extract_strided_slice %406 {offsets = [0, 0], sizes = [24, 8], strides = [1, 1]} : vector<48x8xf32> to vector<24x8xf32>
    %cst_228 = arith.constant dense<0.000000e+00> : vector<24x24xf32>
    %412 = tpu.matmul %409, %410, %cst_228 {dimension_numbers = #tpu.dot_dimension_numbers<[1], [1], [0], [0], [0, 0, 1, 0], [], []>} : vector<24x8xf32>, vector<24x8xf32>, vector<24x24xf32> -> vector<24x24xf32>
    %cst_229 = arith.constant 0.353553385 : f32
    %413 = vector.broadcast %cst_229 : f32 to vector<24x24xf32>
    %414 = arith.mulf %412, %413 : vector<24x24xf32>
    %415 = vector.broadcast %11 : vector<1x24xf32> to vector<24x24xf32>
    %416 = arith.addf %414, %415 : vector<24x24xf32>
    %cst_230 = arith.constant dense<0xFF800000> : vector<24xf32>
    %417 = vector.multi_reduction <maximumf>, %416, %cst_230 [1] : vector<24x24xf32> to vector<24xf32>
    %418 = vector.shape_cast %417 : vector<24xf32> to vector<24x1xf32>
    %419 = vector.broadcast %418 : vector<24x1xf32> to vector<24x24xf32>
    %420 = arith.subf %416, %419 : vector<24x24xf32>
    %421 = math.exp %420 : vector<24x24xf32>
    %cst_231 = arith.constant dense<0.000000e+00> : vector<24xf32>
    %422 = vector.multi_reduction <add>, %421, %cst_231 [1] : vector<24x24xf32> to vector<24xf32>
    %423 = vector.shape_cast %422 : vector<24xf32> to vector<24x1xf32>
    %424 = tpu.reciprocal %423 {approx = true} : vector<24x1xf32> -> vector<24x1xf32>
    %425 = vector.broadcast %424 : vector<24x1xf32> to vector<24x24xf32>
    %426 = arith.mulf %421, %425 : vector<24x24xf32>
    %cst_232 = arith.constant dense<0.000000e+00> : vector<24x8xf32>
    %427 = tpu.matmul %426, %411, %cst_232 {dimension_numbers = #tpu.dot_dimension_numbers<[1], [0], [0], [1], [0, 0, 1, 1], [], []>} : vector<24x24xf32>, vector<24x8xf32>, vector<24x8xf32> -> vector<24x8xf32>
    %cst_233 = arith.constant dense<0.000000e+00> : vector<24x32xf32>
    %428 = tpu.matmul %427, %408, %cst_233 {dimension_numbers = #tpu.dot_dimension_numbers<[1], [0], [0], [1], [0, 0, 1, 1], [], []>} : vector<24x8xf32>, vector<8x32xf32>, vector<24x32xf32> -> vector<24x32xf32>
    %429 = vector.extract_strided_slice %392 {offsets = [24, 0], sizes = [24, 8], strides = [1, 1]} : vector<48x8xf32> to vector<24x8xf32>
    %430 = vector.extract_strided_slice %399 {offsets = [24, 0], sizes = [24, 8], strides = [1, 1]} : vector<48x8xf32> to vector<24x8xf32>
    %431 = vector.extract_strided_slice %406 {offsets = [24, 0], sizes = [24, 8], strides = [1, 1]} : vector<48x8xf32> to vector<24x8xf32>
    %cst_234 = arith.constant dense<0.000000e+00> : vector<24x24xf32>
    %432 = tpu.matmul %429, %430, %cst_234 {dimension_numbers = #tpu.dot_dimension_numbers<[1], [1], [0], [0], [0, 0, 1, 0], [], []>} : vector<24x8xf32>, vector<24x8xf32>, vector<24x24xf32> -> vector<24x24xf32>
    %cst_235 = arith.constant 0.353553385 : f32
    %433 = vector.broadcast %cst_235 : f32 to vector<24x24xf32>
    %434 = arith.mulf %432, %433 : vector<24x24xf32>
    %435 = vector.broadcast %11 : vector<1x24xf32> to vector<24x24xf32>
    %436 = arith.addf %434, %435 : vector<24x24xf32>
    %cst_236 = arith.constant dense<0xFF800000> : vector<24xf32>
    %437 = vector.multi_reduction <maximumf>, %436, %cst_236 [1] : vector<24x24xf32> to vector<24xf32>
    %438 = vector.shape_cast %437 : vector<24xf32> to vector<24x1xf32>
    %439 = vector.broadcast %438 : vector<24x1xf32> to vector<24x24xf32>
    %440 = arith.subf %436, %439 : vector<24x24xf32>
    %441 = math.exp %440 : vector<24x24xf32>
    %cst_237 = arith.constant dense<0.000000e+00> : vector<24xf32>
    %442 = vector.multi_reduction <add>, %441, %cst_237 [1] : vector<24x24xf32> to vector<24xf32>
    %443 = vector.shape_cast %442 : vector<24xf32> to vector<24x1xf32>
    %444 = tpu.reciprocal %443 {approx = true} : vector<24x1xf32> -> vector<24x1xf32>
    %445 = vector.broadcast %444 : vector<24x1xf32> to vector<24x24xf32>
    %446 = arith.mulf %441, %445 : vector<24x24xf32>
    %cst_238 = arith.constant dense<0.000000e+00> : vector<24x8xf32>
    %447 = tpu.matmul %446, %431, %cst_238 {dimension_numbers = #tpu.dot_dimension_numbers<[1], [0], [0], [1], [0, 0, 1, 1], [], []>} : vector<24x24xf32>, vector<24x8xf32>, vector<24x8xf32> -> vector<24x8xf32>
    %cst_239 = arith.constant dense<0.000000e+00> : vector<24x32xf32>
    %448 = tpu.matmul %447, %408, %cst_239 {dimension_numbers = #tpu.dot_dimension_numbers<[1], [0], [0], [1], [0, 0, 1, 1], [], []>} : vector<24x8xf32>, vector<8x32xf32>, vector<24x32xf32> -> vector<24x32xf32>
    %c15 = arith.constant 15 : index
    %c0_240 = arith.constant 0 : index
    %c0_241 = arith.constant 0 : index
    %449 = vector.load %arg4[%c15, %c0_240, %c0_241] : memref<24x32x8xf32, #tpu.memory_space<vmem>>, vector<1x32x8xf32>
    %450 = vector.shape_cast %449 : vector<1x32x8xf32> to vector<32x8xf32>
    %cst_242 = arith.constant dense<0.000000e+00> : vector<48x8xf32>
    %451 = tpu.matmul %385, %450, %cst_242 {dimension_numbers = #tpu.dot_dimension_numbers<[1], [0], [0], [1], [0, 0, 1, 1], [], []>} : vector<48x32xf32>, vector<32x8xf32>, vector<48x8xf32> -> vector<48x8xf32>
    %c15_243 = arith.constant 15 : index
    %c0_244 = arith.constant 0 : index
    %c0_245 = arith.constant 0 : index
    %452 = vector.load %arg5[%c15_243, %c0_244, %c0_245] : memref<24x1x8xf32, #tpu.memory_space<vmem>>, vector<1x1x8xf32>
    %453 = vector.shape_cast %452 : vector<1x1x8xf32> to vector<1x8xf32>
    %454 = vector.broadcast %453 : vector<1x8xf32> to vector<48x8xf32>
    %455 = arith.addf %451, %454 : vector<48x8xf32>
    %c16_246 = arith.constant 16 : index
    %c0_247 = arith.constant 0 : index
    %c0_248 = arith.constant 0 : index
    %456 = vector.load %arg4[%c16_246, %c0_247, %c0_248] : memref<24x32x8xf32, #tpu.memory_space<vmem>>, vector<1x32x8xf32>
    %457 = vector.shape_cast %456 : vector<1x32x8xf32> to vector<32x8xf32>
    %cst_249 = arith.constant dense<0.000000e+00> : vector<48x8xf32>
    %458 = tpu.matmul %385, %457, %cst_249 {dimension_numbers = #tpu.dot_dimension_numbers<[1], [0], [0], [1], [0, 0, 1, 1], [], []>} : vector<48x32xf32>, vector<32x8xf32>, vector<48x8xf32> -> vector<48x8xf32>
    %c16_250 = arith.constant 16 : index
    %c0_251 = arith.constant 0 : index
    %c0_252 = arith.constant 0 : index
    %459 = vector.load %arg5[%c16_250, %c0_251, %c0_252] : memref<24x1x8xf32, #tpu.memory_space<vmem>>, vector<1x1x8xf32>
    %460 = vector.shape_cast %459 : vector<1x1x8xf32> to vector<1x8xf32>
    %461 = vector.broadcast %460 : vector<1x8xf32> to vector<48x8xf32>
    %462 = arith.addf %458, %461 : vector<48x8xf32>
    %c17 = arith.constant 17 : index
    %c0_253 = arith.constant 0 : index
    %c0_254 = arith.constant 0 : index
    %463 = vector.load %arg4[%c17, %c0_253, %c0_254] : memref<24x32x8xf32, #tpu.memory_space<vmem>>, vector<1x32x8xf32>
    %464 = vector.shape_cast %463 : vector<1x32x8xf32> to vector<32x8xf32>
    %cst_255 = arith.constant dense<0.000000e+00> : vector<48x8xf32>
    %465 = tpu.matmul %385, %464, %cst_255 {dimension_numbers = #tpu.dot_dimension_numbers<[1], [0], [0], [1], [0, 0, 1, 1], [], []>} : vector<48x32xf32>, vector<32x8xf32>, vector<48x8xf32> -> vector<48x8xf32>
    %c17_256 = arith.constant 17 : index
    %c0_257 = arith.constant 0 : index
    %c0_258 = arith.constant 0 : index
    %466 = vector.load %arg5[%c17_256, %c0_257, %c0_258] : memref<24x1x8xf32, #tpu.memory_space<vmem>>, vector<1x1x8xf32>
    %467 = vector.shape_cast %466 : vector<1x1x8xf32> to vector<1x8xf32>
    %468 = vector.broadcast %467 : vector<1x8xf32> to vector<48x8xf32>
    %469 = arith.addf %465, %468 : vector<48x8xf32>
    %c1_259 = arith.constant 1 : index
    %c8_260 = arith.constant 8 : index
    %c0_261 = arith.constant 0 : index
    %470 = vector.load %arg6[%c1_259, %c8_260, %c0_261] : memref<2x32x32xf32, #tpu.memory_space<vmem>>, vector<1x8x32xf32>
    %471 = vector.shape_cast %470 : vector<1x8x32xf32> to vector<8x32xf32>
    %472 = vector.extract_strided_slice %455 {offsets = [0, 0], sizes = [24, 8], strides = [1, 1]} : vector<48x8xf32> to vector<24x8xf32>
    %473 = vector.extract_strided_slice %462 {offsets = [0, 0], sizes = [24, 8], strides = [1, 1]} : vector<48x8xf32> to vector<24x8xf32>
    %474 = vector.extract_strided_slice %469 {offsets = [0, 0], sizes = [24, 8], strides = [1, 1]} : vector<48x8xf32> to vector<24x8xf32>
    %cst_262 = arith.constant dense<0.000000e+00> : vector<24x24xf32>
    %475 = tpu.matmul %472, %473, %cst_262 {dimension_numbers = #tpu.dot_dimension_numbers<[1], [1], [0], [0], [0, 0, 1, 0], [], []>} : vector<24x8xf32>, vector<24x8xf32>, vector<24x24xf32> -> vector<24x24xf32>
    %cst_263 = arith.constant 0.353553385 : f32
    %476 = vector.broadcast %cst_263 : f32 to vector<24x24xf32>
    %477 = arith.mulf %475, %476 : vector<24x24xf32>
    %478 = vector.broadcast %11 : vector<1x24xf32> to vector<24x24xf32>
    %479 = arith.addf %477, %478 : vector<24x24xf32>
    %cst_264 = arith.constant dense<0xFF800000> : vector<24xf32>
    %480 = vector.multi_reduction <maximumf>, %479, %cst_264 [1] : vector<24x24xf32> to vector<24xf32>
    %481 = vector.shape_cast %480 : vector<24xf32> to vector<24x1xf32>
    %482 = vector.broadcast %481 : vector<24x1xf32> to vector<24x24xf32>
    %483 = arith.subf %479, %482 : vector<24x24xf32>
    %484 = math.exp %483 : vector<24x24xf32>
    %cst_265 = arith.constant dense<0.000000e+00> : vector<24xf32>
    %485 = vector.multi_reduction <add>, %484, %cst_265 [1] : vector<24x24xf32> to vector<24xf32>
    %486 = vector.shape_cast %485 : vector<24xf32> to vector<24x1xf32>
    %487 = tpu.reciprocal %486 {approx = true} : vector<24x1xf32> -> vector<24x1xf32>
    %488 = vector.broadcast %487 : vector<24x1xf32> to vector<24x24xf32>
    %489 = arith.mulf %484, %488 : vector<24x24xf32>
    %cst_266 = arith.constant dense<0.000000e+00> : vector<24x8xf32>
    %490 = tpu.matmul %489, %474, %cst_266 {dimension_numbers = #tpu.dot_dimension_numbers<[1], [0], [0], [1], [0, 0, 1, 1], [], []>} : vector<24x24xf32>, vector<24x8xf32>, vector<24x8xf32> -> vector<24x8xf32>
    %cst_267 = arith.constant dense<0.000000e+00> : vector<24x32xf32>
    %491 = tpu.matmul %490, %471, %cst_267 {dimension_numbers = #tpu.dot_dimension_numbers<[1], [0], [0], [1], [0, 0, 1, 1], [], []>} : vector<24x8xf32>, vector<8x32xf32>, vector<24x32xf32> -> vector<24x32xf32>
    %492 = arith.addf %428, %491 : vector<24x32xf32>
    %493 = vector.extract_strided_slice %455 {offsets = [24, 0], sizes = [24, 8], strides = [1, 1]} : vector<48x8xf32> to vector<24x8xf32>
    %494 = vector.extract_strided_slice %462 {offsets = [24, 0], sizes = [24, 8], strides = [1, 1]} : vector<48x8xf32> to vector<24x8xf32>
    %495 = vector.extract_strided_slice %469 {offsets = [24, 0], sizes = [24, 8], strides = [1, 1]} : vector<48x8xf32> to vector<24x8xf32>
    %cst_268 = arith.constant dense<0.000000e+00> : vector<24x24xf32>
    %496 = tpu.matmul %493, %494, %cst_268 {dimension_numbers = #tpu.dot_dimension_numbers<[1], [1], [0], [0], [0, 0, 1, 0], [], []>} : vector<24x8xf32>, vector<24x8xf32>, vector<24x24xf32> -> vector<24x24xf32>
    %cst_269 = arith.constant 0.353553385 : f32
    %497 = vector.broadcast %cst_269 : f32 to vector<24x24xf32>
    %498 = arith.mulf %496, %497 : vector<24x24xf32>
    %499 = vector.broadcast %11 : vector<1x24xf32> to vector<24x24xf32>
    %500 = arith.addf %498, %499 : vector<24x24xf32>
    %cst_270 = arith.constant dense<0xFF800000> : vector<24xf32>
    %501 = vector.multi_reduction <maximumf>, %500, %cst_270 [1] : vector<24x24xf32> to vector<24xf32>
    %502 = vector.shape_cast %501 : vector<24xf32> to vector<24x1xf32>
    %503 = vector.broadcast %502 : vector<24x1xf32> to vector<24x24xf32>
    %504 = arith.subf %500, %503 : vector<24x24xf32>
    %505 = math.exp %504 : vector<24x24xf32>
    %cst_271 = arith.constant dense<0.000000e+00> : vector<24xf32>
    %506 = vector.multi_reduction <add>, %505, %cst_271 [1] : vector<24x24xf32> to vector<24xf32>
    %507 = vector.shape_cast %506 : vector<24xf32> to vector<24x1xf32>
    %508 = tpu.reciprocal %507 {approx = true} : vector<24x1xf32> -> vector<24x1xf32>
    %509 = vector.broadcast %508 : vector<24x1xf32> to vector<24x24xf32>
    %510 = arith.mulf %505, %509 : vector<24x24xf32>
    %cst_272 = arith.constant dense<0.000000e+00> : vector<24x8xf32>
    %511 = tpu.matmul %510, %495, %cst_272 {dimension_numbers = #tpu.dot_dimension_numbers<[1], [0], [0], [1], [0, 0, 1, 1], [], []>} : vector<24x24xf32>, vector<24x8xf32>, vector<24x8xf32> -> vector<24x8xf32>
    %cst_273 = arith.constant dense<0.000000e+00> : vector<24x32xf32>
    %512 = tpu.matmul %511, %471, %cst_273 {dimension_numbers = #tpu.dot_dimension_numbers<[1], [0], [0], [1], [0, 0, 1, 1], [], []>} : vector<24x8xf32>, vector<8x32xf32>, vector<24x32xf32> -> vector<24x32xf32>
    %513 = arith.addf %448, %512 : vector<24x32xf32>
    %c18 = arith.constant 18 : index
    %c0_274 = arith.constant 0 : index
    %c0_275 = arith.constant 0 : index
    %514 = vector.load %arg4[%c18, %c0_274, %c0_275] : memref<24x32x8xf32, #tpu.memory_space<vmem>>, vector<1x32x8xf32>
    %515 = vector.shape_cast %514 : vector<1x32x8xf32> to vector<32x8xf32>
    %cst_276 = arith.constant dense<0.000000e+00> : vector<48x8xf32>
    %516 = tpu.matmul %385, %515, %cst_276 {dimension_numbers = #tpu.dot_dimension_numbers<[1], [0], [0], [1], [0, 0, 1, 1], [], []>} : vector<48x32xf32>, vector<32x8xf32>, vector<48x8xf32> -> vector<48x8xf32>
    %c18_277 = arith.constant 18 : index
    %c0_278 = arith.constant 0 : index
    %c0_279 = arith.constant 0 : index
    %517 = vector.load %arg5[%c18_277, %c0_278, %c0_279] : memref<24x1x8xf32, #tpu.memory_space<vmem>>, vector<1x1x8xf32>
    %518 = vector.shape_cast %517 : vector<1x1x8xf32> to vector<1x8xf32>
    %519 = vector.broadcast %518 : vector<1x8xf32> to vector<48x8xf32>
    %520 = arith.addf %516, %519 : vector<48x8xf32>
    %c19 = arith.constant 19 : index
    %c0_280 = arith.constant 0 : index
    %c0_281 = arith.constant 0 : index
    %521 = vector.load %arg4[%c19, %c0_280, %c0_281] : memref<24x32x8xf32, #tpu.memory_space<vmem>>, vector<1x32x8xf32>
    %522 = vector.shape_cast %521 : vector<1x32x8xf32> to vector<32x8xf32>
    %cst_282 = arith.constant dense<0.000000e+00> : vector<48x8xf32>
    %523 = tpu.matmul %385, %522, %cst_282 {dimension_numbers = #tpu.dot_dimension_numbers<[1], [0], [0], [1], [0, 0, 1, 1], [], []>} : vector<48x32xf32>, vector<32x8xf32>, vector<48x8xf32> -> vector<48x8xf32>
    %c19_283 = arith.constant 19 : index
    %c0_284 = arith.constant 0 : index
    %c0_285 = arith.constant 0 : index
    %524 = vector.load %arg5[%c19_283, %c0_284, %c0_285] : memref<24x1x8xf32, #tpu.memory_space<vmem>>, vector<1x1x8xf32>
    %525 = vector.shape_cast %524 : vector<1x1x8xf32> to vector<1x8xf32>
    %526 = vector.broadcast %525 : vector<1x8xf32> to vector<48x8xf32>
    %527 = arith.addf %523, %526 : vector<48x8xf32>
    %c20 = arith.constant 20 : index
    %c0_286 = arith.constant 0 : index
    %c0_287 = arith.constant 0 : index
    %528 = vector.load %arg4[%c20, %c0_286, %c0_287] : memref<24x32x8xf32, #tpu.memory_space<vmem>>, vector<1x32x8xf32>
    %529 = vector.shape_cast %528 : vector<1x32x8xf32> to vector<32x8xf32>
    %cst_288 = arith.constant dense<0.000000e+00> : vector<48x8xf32>
    %530 = tpu.matmul %385, %529, %cst_288 {dimension_numbers = #tpu.dot_dimension_numbers<[1], [0], [0], [1], [0, 0, 1, 1], [], []>} : vector<48x32xf32>, vector<32x8xf32>, vector<48x8xf32> -> vector<48x8xf32>
    %c20_289 = arith.constant 20 : index
    %c0_290 = arith.constant 0 : index
    %c0_291 = arith.constant 0 : index
    %531 = vector.load %arg5[%c20_289, %c0_290, %c0_291] : memref<24x1x8xf32, #tpu.memory_space<vmem>>, vector<1x1x8xf32>
    %532 = vector.shape_cast %531 : vector<1x1x8xf32> to vector<1x8xf32>
    %533 = vector.broadcast %532 : vector<1x8xf32> to vector<48x8xf32>
    %534 = arith.addf %530, %533 : vector<48x8xf32>
    %c1_292 = arith.constant 1 : index
    %c16_293 = arith.constant 16 : index
    %c0_294 = arith.constant 0 : index
    %535 = vector.load %arg6[%c1_292, %c16_293, %c0_294] : memref<2x32x32xf32, #tpu.memory_space<vmem>>, vector<1x8x32xf32>
    %536 = vector.shape_cast %535 : vector<1x8x32xf32> to vector<8x32xf32>
    %537 = vector.extract_strided_slice %520 {offsets = [0, 0], sizes = [24, 8], strides = [1, 1]} : vector<48x8xf32> to vector<24x8xf32>
    %538 = vector.extract_strided_slice %527 {offsets = [0, 0], sizes = [24, 8], strides = [1, 1]} : vector<48x8xf32> to vector<24x8xf32>
    %539 = vector.extract_strided_slice %534 {offsets = [0, 0], sizes = [24, 8], strides = [1, 1]} : vector<48x8xf32> to vector<24x8xf32>
    %cst_295 = arith.constant dense<0.000000e+00> : vector<24x24xf32>
    %540 = tpu.matmul %537, %538, %cst_295 {dimension_numbers = #tpu.dot_dimension_numbers<[1], [1], [0], [0], [0, 0, 1, 0], [], []>} : vector<24x8xf32>, vector<24x8xf32>, vector<24x24xf32> -> vector<24x24xf32>
    %cst_296 = arith.constant 0.353553385 : f32
    %541 = vector.broadcast %cst_296 : f32 to vector<24x24xf32>
    %542 = arith.mulf %540, %541 : vector<24x24xf32>
    %543 = vector.broadcast %11 : vector<1x24xf32> to vector<24x24xf32>
    %544 = arith.addf %542, %543 : vector<24x24xf32>
    %cst_297 = arith.constant dense<0xFF800000> : vector<24xf32>
    %545 = vector.multi_reduction <maximumf>, %544, %cst_297 [1] : vector<24x24xf32> to vector<24xf32>
    %546 = vector.shape_cast %545 : vector<24xf32> to vector<24x1xf32>
    %547 = vector.broadcast %546 : vector<24x1xf32> to vector<24x24xf32>
    %548 = arith.subf %544, %547 : vector<24x24xf32>
    %549 = math.exp %548 : vector<24x24xf32>
    %cst_298 = arith.constant dense<0.000000e+00> : vector<24xf32>
    %550 = vector.multi_reduction <add>, %549, %cst_298 [1] : vector<24x24xf32> to vector<24xf32>
    %551 = vector.shape_cast %550 : vector<24xf32> to vector<24x1xf32>
    %552 = tpu.reciprocal %551 {approx = true} : vector<24x1xf32> -> vector<24x1xf32>
    %553 = vector.broadcast %552 : vector<24x1xf32> to vector<24x24xf32>
    %554 = arith.mulf %549, %553 : vector<24x24xf32>
    %cst_299 = arith.constant dense<0.000000e+00> : vector<24x8xf32>
    %555 = tpu.matmul %554, %539, %cst_299 {dimension_numbers = #tpu.dot_dimension_numbers<[1], [0], [0], [1], [0, 0, 1, 1], [], []>} : vector<24x24xf32>, vector<24x8xf32>, vector<24x8xf32> -> vector<24x8xf32>
    %cst_300 = arith.constant dense<0.000000e+00> : vector<24x32xf32>
    %556 = tpu.matmul %555, %536, %cst_300 {dimension_numbers = #tpu.dot_dimension_numbers<[1], [0], [0], [1], [0, 0, 1, 1], [], []>} : vector<24x8xf32>, vector<8x32xf32>, vector<24x32xf32> -> vector<24x32xf32>
    %557 = arith.addf %492, %556 : vector<24x32xf32>
    %558 = vector.extract_strided_slice %520 {offsets = [24, 0], sizes = [24, 8], strides = [1, 1]} : vector<48x8xf32> to vector<24x8xf32>
    %559 = vector.extract_strided_slice %527 {offsets = [24, 0], sizes = [24, 8], strides = [1, 1]} : vector<48x8xf32> to vector<24x8xf32>
    %560 = vector.extract_strided_slice %534 {offsets = [24, 0], sizes = [24, 8], strides = [1, 1]} : vector<48x8xf32> to vector<24x8xf32>
    %cst_301 = arith.constant dense<0.000000e+00> : vector<24x24xf32>
    %561 = tpu.matmul %558, %559, %cst_301 {dimension_numbers = #tpu.dot_dimension_numbers<[1], [1], [0], [0], [0, 0, 1, 0], [], []>} : vector<24x8xf32>, vector<24x8xf32>, vector<24x24xf32> -> vector<24x24xf32>
    %cst_302 = arith.constant 0.353553385 : f32
    %562 = vector.broadcast %cst_302 : f32 to vector<24x24xf32>
    %563 = arith.mulf %561, %562 : vector<24x24xf32>
    %564 = vector.broadcast %11 : vector<1x24xf32> to vector<24x24xf32>
    %565 = arith.addf %563, %564 : vector<24x24xf32>
    %cst_303 = arith.constant dense<0xFF800000> : vector<24xf32>
    %566 = vector.multi_reduction <maximumf>, %565, %cst_303 [1] : vector<24x24xf32> to vector<24xf32>
    %567 = vector.shape_cast %566 : vector<24xf32> to vector<24x1xf32>
    %568 = vector.broadcast %567 : vector<24x1xf32> to vector<24x24xf32>
    %569 = arith.subf %565, %568 : vector<24x24xf32>
    %570 = math.exp %569 : vector<24x24xf32>
    %cst_304 = arith.constant dense<0.000000e+00> : vector<24xf32>
    %571 = vector.multi_reduction <add>, %570, %cst_304 [1] : vector<24x24xf32> to vector<24xf32>
    %572 = vector.shape_cast %571 : vector<24xf32> to vector<24x1xf32>
    %573 = tpu.reciprocal %572 {approx = true} : vector<24x1xf32> -> vector<24x1xf32>
    %574 = vector.broadcast %573 : vector<24x1xf32> to vector<24x24xf32>
    %575 = arith.mulf %570, %574 : vector<24x24xf32>
    %cst_305 = arith.constant dense<0.000000e+00> : vector<24x8xf32>
    %576 = tpu.matmul %575, %560, %cst_305 {dimension_numbers = #tpu.dot_dimension_numbers<[1], [0], [0], [1], [0, 0, 1, 1], [], []>} : vector<24x24xf32>, vector<24x8xf32>, vector<24x8xf32> -> vector<24x8xf32>
    %cst_306 = arith.constant dense<0.000000e+00> : vector<24x32xf32>
    %577 = tpu.matmul %576, %536, %cst_306 {dimension_numbers = #tpu.dot_dimension_numbers<[1], [0], [0], [1], [0, 0, 1, 1], [], []>} : vector<24x8xf32>, vector<8x32xf32>, vector<24x32xf32> -> vector<24x32xf32>
    %578 = arith.addf %513, %577 : vector<24x32xf32>
    %c21 = arith.constant 21 : index
    %c0_307 = arith.constant 0 : index
    %c0_308 = arith.constant 0 : index
    %579 = vector.load %arg4[%c21, %c0_307, %c0_308] : memref<24x32x8xf32, #tpu.memory_space<vmem>>, vector<1x32x8xf32>
    %580 = vector.shape_cast %579 : vector<1x32x8xf32> to vector<32x8xf32>
    %cst_309 = arith.constant dense<0.000000e+00> : vector<48x8xf32>
    %581 = tpu.matmul %385, %580, %cst_309 {dimension_numbers = #tpu.dot_dimension_numbers<[1], [0], [0], [1], [0, 0, 1, 1], [], []>} : vector<48x32xf32>, vector<32x8xf32>, vector<48x8xf32> -> vector<48x8xf32>
    %c21_310 = arith.constant 21 : index
    %c0_311 = arith.constant 0 : index
    %c0_312 = arith.constant 0 : index
    %582 = vector.load %arg5[%c21_310, %c0_311, %c0_312] : memref<24x1x8xf32, #tpu.memory_space<vmem>>, vector<1x1x8xf32>
    %583 = vector.shape_cast %582 : vector<1x1x8xf32> to vector<1x8xf32>
    %584 = vector.broadcast %583 : vector<1x8xf32> to vector<48x8xf32>
    %585 = arith.addf %581, %584 : vector<48x8xf32>
    %c22 = arith.constant 22 : index
    %c0_313 = arith.constant 0 : index
    %c0_314 = arith.constant 0 : index
    %586 = vector.load %arg4[%c22, %c0_313, %c0_314] : memref<24x32x8xf32, #tpu.memory_space<vmem>>, vector<1x32x8xf32>
    %587 = vector.shape_cast %586 : vector<1x32x8xf32> to vector<32x8xf32>
    %cst_315 = arith.constant dense<0.000000e+00> : vector<48x8xf32>
    %588 = tpu.matmul %385, %587, %cst_315 {dimension_numbers = #tpu.dot_dimension_numbers<[1], [0], [0], [1], [0, 0, 1, 1], [], []>} : vector<48x32xf32>, vector<32x8xf32>, vector<48x8xf32> -> vector<48x8xf32>
    %c22_316 = arith.constant 22 : index
    %c0_317 = arith.constant 0 : index
    %c0_318 = arith.constant 0 : index
    %589 = vector.load %arg5[%c22_316, %c0_317, %c0_318] : memref<24x1x8xf32, #tpu.memory_space<vmem>>, vector<1x1x8xf32>
    %590 = vector.shape_cast %589 : vector<1x1x8xf32> to vector<1x8xf32>
    %591 = vector.broadcast %590 : vector<1x8xf32> to vector<48x8xf32>
    %592 = arith.addf %588, %591 : vector<48x8xf32>
    %c23 = arith.constant 23 : index
    %c0_319 = arith.constant 0 : index
    %c0_320 = arith.constant 0 : index
    %593 = vector.load %arg4[%c23, %c0_319, %c0_320] : memref<24x32x8xf32, #tpu.memory_space<vmem>>, vector<1x32x8xf32>
    %594 = vector.shape_cast %593 : vector<1x32x8xf32> to vector<32x8xf32>
    %cst_321 = arith.constant dense<0.000000e+00> : vector<48x8xf32>
    %595 = tpu.matmul %385, %594, %cst_321 {dimension_numbers = #tpu.dot_dimension_numbers<[1], [0], [0], [1], [0, 0, 1, 1], [], []>} : vector<48x32xf32>, vector<32x8xf32>, vector<48x8xf32> -> vector<48x8xf32>
    %c23_322 = arith.constant 23 : index
    %c0_323 = arith.constant 0 : index
    %c0_324 = arith.constant 0 : index
    %596 = vector.load %arg5[%c23_322, %c0_323, %c0_324] : memref<24x1x8xf32, #tpu.memory_space<vmem>>, vector<1x1x8xf32>
    %597 = vector.shape_cast %596 : vector<1x1x8xf32> to vector<1x8xf32>
    %598 = vector.broadcast %597 : vector<1x8xf32> to vector<48x8xf32>
    %599 = arith.addf %595, %598 : vector<48x8xf32>
    %c1_325 = arith.constant 1 : index
    %c24_326 = arith.constant 24 : index
    %c0_327 = arith.constant 0 : index
    %600 = vector.load %arg6[%c1_325, %c24_326, %c0_327] : memref<2x32x32xf32, #tpu.memory_space<vmem>>, vector<1x8x32xf32>
    %601 = vector.shape_cast %600 : vector<1x8x32xf32> to vector<8x32xf32>
    %602 = vector.extract_strided_slice %585 {offsets = [0, 0], sizes = [24, 8], strides = [1, 1]} : vector<48x8xf32> to vector<24x8xf32>
    %603 = vector.extract_strided_slice %592 {offsets = [0, 0], sizes = [24, 8], strides = [1, 1]} : vector<48x8xf32> to vector<24x8xf32>
    %604 = vector.extract_strided_slice %599 {offsets = [0, 0], sizes = [24, 8], strides = [1, 1]} : vector<48x8xf32> to vector<24x8xf32>
    %cst_328 = arith.constant dense<0.000000e+00> : vector<24x24xf32>
    %605 = tpu.matmul %602, %603, %cst_328 {dimension_numbers = #tpu.dot_dimension_numbers<[1], [1], [0], [0], [0, 0, 1, 0], [], []>} : vector<24x8xf32>, vector<24x8xf32>, vector<24x24xf32> -> vector<24x24xf32>
    %cst_329 = arith.constant 0.353553385 : f32
    %606 = vector.broadcast %cst_329 : f32 to vector<24x24xf32>
    %607 = arith.mulf %605, %606 : vector<24x24xf32>
    %608 = vector.broadcast %11 : vector<1x24xf32> to vector<24x24xf32>
    %609 = arith.addf %607, %608 : vector<24x24xf32>
    %cst_330 = arith.constant dense<0xFF800000> : vector<24xf32>
    %610 = vector.multi_reduction <maximumf>, %609, %cst_330 [1] : vector<24x24xf32> to vector<24xf32>
    %611 = vector.shape_cast %610 : vector<24xf32> to vector<24x1xf32>
    %612 = vector.broadcast %611 : vector<24x1xf32> to vector<24x24xf32>
    %613 = arith.subf %609, %612 : vector<24x24xf32>
    %614 = math.exp %613 : vector<24x24xf32>
    %cst_331 = arith.constant dense<0.000000e+00> : vector<24xf32>
    %615 = vector.multi_reduction <add>, %614, %cst_331 [1] : vector<24x24xf32> to vector<24xf32>
    %616 = vector.shape_cast %615 : vector<24xf32> to vector<24x1xf32>
    %617 = tpu.reciprocal %616 {approx = true} : vector<24x1xf32> -> vector<24x1xf32>
    %618 = vector.broadcast %617 : vector<24x1xf32> to vector<24x24xf32>
    %619 = arith.mulf %614, %618 : vector<24x24xf32>
    %cst_332 = arith.constant dense<0.000000e+00> : vector<24x8xf32>
    %620 = tpu.matmul %619, %604, %cst_332 {dimension_numbers = #tpu.dot_dimension_numbers<[1], [0], [0], [1], [0, 0, 1, 1], [], []>} : vector<24x24xf32>, vector<24x8xf32>, vector<24x8xf32> -> vector<24x8xf32>
    %cst_333 = arith.constant dense<0.000000e+00> : vector<24x32xf32>
    %621 = tpu.matmul %620, %601, %cst_333 {dimension_numbers = #tpu.dot_dimension_numbers<[1], [0], [0], [1], [0, 0, 1, 1], [], []>} : vector<24x8xf32>, vector<8x32xf32>, vector<24x32xf32> -> vector<24x32xf32>
    %622 = arith.addf %557, %621 : vector<24x32xf32>
    %623 = vector.extract_strided_slice %585 {offsets = [24, 0], sizes = [24, 8], strides = [1, 1]} : vector<48x8xf32> to vector<24x8xf32>
    %624 = vector.extract_strided_slice %592 {offsets = [24, 0], sizes = [24, 8], strides = [1, 1]} : vector<48x8xf32> to vector<24x8xf32>
    %625 = vector.extract_strided_slice %599 {offsets = [24, 0], sizes = [24, 8], strides = [1, 1]} : vector<48x8xf32> to vector<24x8xf32>
    %cst_334 = arith.constant dense<0.000000e+00> : vector<24x24xf32>
    %626 = tpu.matmul %623, %624, %cst_334 {dimension_numbers = #tpu.dot_dimension_numbers<[1], [1], [0], [0], [0, 0, 1, 0], [], []>} : vector<24x8xf32>, vector<24x8xf32>, vector<24x24xf32> -> vector<24x24xf32>
    %cst_335 = arith.constant 0.353553385 : f32
    %627 = vector.broadcast %cst_335 : f32 to vector<24x24xf32>
    %628 = arith.mulf %626, %627 : vector<24x24xf32>
    %629 = vector.broadcast %11 : vector<1x24xf32> to vector<24x24xf32>
    %630 = arith.addf %628, %629 : vector<24x24xf32>
    %cst_336 = arith.constant dense<0xFF800000> : vector<24xf32>
    %631 = vector.multi_reduction <maximumf>, %630, %cst_336 [1] : vector<24x24xf32> to vector<24xf32>
    %632 = vector.shape_cast %631 : vector<24xf32> to vector<24x1xf32>
    %633 = vector.broadcast %632 : vector<24x1xf32> to vector<24x24xf32>
    %634 = arith.subf %630, %633 : vector<24x24xf32>
    %635 = math.exp %634 : vector<24x24xf32>
    %cst_337 = arith.constant dense<0.000000e+00> : vector<24xf32>
    %636 = vector.multi_reduction <add>, %635, %cst_337 [1] : vector<24x24xf32> to vector<24xf32>
    %637 = vector.shape_cast %636 : vector<24xf32> to vector<24x1xf32>
    %638 = tpu.reciprocal %637 {approx = true} : vector<24x1xf32> -> vector<24x1xf32>
    %639 = vector.broadcast %638 : vector<24x1xf32> to vector<24x24xf32>
    %640 = arith.mulf %635, %639 : vector<24x24xf32>
    %cst_338 = arith.constant dense<0.000000e+00> : vector<24x8xf32>
    %641 = tpu.matmul %640, %625, %cst_338 {dimension_numbers = #tpu.dot_dimension_numbers<[1], [0], [0], [1], [0, 0, 1, 1], [], []>} : vector<24x24xf32>, vector<24x8xf32>, vector<24x8xf32> -> vector<24x8xf32>
    %cst_339 = arith.constant dense<0.000000e+00> : vector<24x32xf32>
    %642 = tpu.matmul %641, %601, %cst_339 {dimension_numbers = #tpu.dot_dimension_numbers<[1], [0], [0], [1], [0, 0, 1, 1], [], []>} : vector<24x8xf32>, vector<8x32xf32>, vector<24x32xf32> -> vector<24x32xf32>
    %643 = arith.addf %578, %642 : vector<24x32xf32>
    %644 = tpu.concatenate %622, %643 in 0 : vector<24x32xf32>, vector<24x32xf32> -> vector<48x32xf32>
    %645 = vector.broadcast %361 : vector<1x32xf32> to vector<48x32xf32>
    %646 = arith.addf %644, %645 : vector<48x32xf32>
    %647 = arith.addf %646, %351 : vector<48x32xf32>
    %cst_340 = arith.constant dense<0.000000e+00> : vector<48xf32>
    %648 = vector.multi_reduction <add>, %647, %cst_340 [1] : vector<48x32xf32> to vector<48xf32>
    %649 = vector.shape_cast %648 : vector<48xf32> to vector<48x1xf32>
    %cst_341 = arith.constant 3.200000e+01 : f32
    %650 = vector.broadcast %cst_341 : f32 to vector<48x1xf32>
    %651 = arith.divf %649, %650 : vector<48x1xf32>
    %652 = vector.broadcast %651 : vector<48x1xf32> to vector<48x32xf32>
    %653 = arith.subf %647, %652 : vector<48x32xf32>
    %654 = arith.mulf %653, %653 : vector<48x32xf32>
    %cst_342 = arith.constant dense<0.000000e+00> : vector<48xf32>
    %655 = vector.multi_reduction <add>, %654, %cst_342 [1] : vector<48x32xf32> to vector<48xf32>
    %656 = vector.shape_cast %655 : vector<48xf32> to vector<48x1xf32>
    %cst_343 = arith.constant 3.200000e+01 : f32
    %657 = vector.broadcast %cst_343 : f32 to vector<48x1xf32>
    %658 = arith.divf %656, %657 : vector<48x1xf32>
    %cst_344 = arith.constant 9.99999997E-7 : f32
    %659 = vector.broadcast %cst_344 : f32 to vector<48x1xf32>
    %660 = arith.addf %658, %659 : vector<48x1xf32>
    %661 = math.rsqrt %660 : vector<48x1xf32>
    %662 = vector.broadcast %661 : vector<48x1xf32> to vector<48x32xf32>
    %663 = arith.mulf %653, %662 : vector<48x32xf32>
    %664 = vector.broadcast %357 : vector<1x32xf32> to vector<48x32xf32>
    %665 = arith.mulf %663, %664 : vector<48x32xf32>
    %666 = vector.broadcast %359 : vector<1x32xf32> to vector<48x32xf32>
    %667 = arith.addf %665, %666 : vector<48x32xf32>
    %c1_345 = arith.constant 1 : index
    %c0_346 = arith.constant 0 : index
    %c0_347 = arith.constant 0 : index
    %668 = vector.load %arg7[%c1_345, %c0_346, %c0_347] : memref<2x32x128xf32, #tpu.memory_space<vmem>>, vector<1x32x128xf32>
    %669 = vector.shape_cast %668 : vector<1x32x128xf32> to vector<32x128xf32>
    %cst_348 = arith.constant dense<0.000000e+00> : vector<48x128xf32>
    %670 = tpu.matmul %667, %669, %cst_348 {dimension_numbers = #tpu.dot_dimension_numbers<[1], [0], [0], [1], [0, 0, 1, 1], [], []>} : vector<48x32xf32>, vector<32x128xf32>, vector<48x128xf32> -> vector<48x128xf32>
    %671 = vector.broadcast %363 : vector<1x128xf32> to vector<48x128xf32>
    %672 = arith.addf %670, %671 : vector<48x128xf32>
    %cst_349 = arith.constant 5.000000e-01 : f32
    %673 = vector.broadcast %cst_349 : f32 to vector<48x128xf32>
    %674 = arith.mulf %673, %672 : vector<48x128xf32>
    %cst_350 = arith.constant 4.471500e-02 : f32
    %675 = vector.broadcast %cst_350 : f32 to vector<48x128xf32>
    %676 = arith.mulf %675, %672 : vector<48x128xf32>
    %677 = arith.mulf %676, %672 : vector<48x128xf32>
    %678 = arith.mulf %677, %672 : vector<48x128xf32>
    %679 = arith.addf %672, %678 : vector<48x128xf32>
    %cst_351 = arith.constant 0.797884583 : f32
    %680 = vector.broadcast %cst_351 : f32 to vector<48x128xf32>
    %681 = arith.mulf %680, %679 : vector<48x128xf32>
    %682 = math.tanh %681 : vector<48x128xf32>
    %cst_352 = arith.constant 1.000000e+00 : f32
    %683 = vector.broadcast %cst_352 : f32 to vector<48x128xf32>
    %684 = arith.addf %683, %682 : vector<48x128xf32>
    %685 = arith.mulf %674, %684 : vector<48x128xf32>
    %c1_353 = arith.constant 1 : index
    %c0_354 = arith.constant 0 : index
    %c0_355 = arith.constant 0 : index
    %686 = vector.load %arg8[%c1_353, %c0_354, %c0_355] : memref<2x128x32xf32, #tpu.memory_space<vmem>>, vector<1x128x32xf32>
    %687 = vector.shape_cast %686 : vector<1x128x32xf32> to vector<128x32xf32>
    %cst_356 = arith.constant dense<0.000000e+00> : vector<48x32xf32>
    %688 = tpu.matmul %685, %687, %cst_356 {dimension_numbers = #tpu.dot_dimension_numbers<[1], [0], [0], [1], [0, 0, 1, 1], [], []>} : vector<48x128xf32>, vector<128x32xf32>, vector<48x32xf32> -> vector<48x32xf32>
    %689 = vector.broadcast %365 : vector<1x32xf32> to vector<48x32xf32>
    %690 = arith.addf %688, %689 : vector<48x32xf32>
    %691 = arith.addf %690, %647 : vector<48x32xf32>
    %c96 = arith.constant 96 : index
    %c0_357 = arith.constant 0 : index
    %692 = vector.load %arg10[%c96, %c0_357] : memref<104x128xf32, #tpu.memory_space<vmem>>, vector<1x32xf32>
    %c97 = arith.constant 97 : index
    %c0_358 = arith.constant 0 : index
    %693 = vector.load %arg10[%c97, %c0_358] : memref<104x128xf32, #tpu.memory_space<vmem>>, vector<1x32xf32>
    %c64 = arith.constant 64 : index
    %c0_359 = arith.constant 0 : index
    %694 = vector.load %arg10[%c64, %c0_359] : memref<104x128xf32, #tpu.memory_space<vmem>>, vector<32x64xf32>
    %c98 = arith.constant 98 : index
    %c0_360 = arith.constant 0 : index
    %695 = vector.load %arg10[%c98, %c0_360] : memref<104x128xf32, #tpu.memory_space<vmem>>, vector<1x64xf32>
    %c0_361 = arith.constant 0 : index
    %c0_362 = arith.constant 0 : index
    %696 = vector.load %arg10[%c0_361, %c0_362] : memref<104x128xf32, #tpu.memory_space<vmem>>, vector<64x128xf32>
    %c99 = arith.constant 99 : index
    %c0_363 = arith.constant 0 : index
    %697 = vector.load %arg10[%c99, %c0_363] : memref<104x128xf32, #tpu.memory_space<vmem>>, vector<1x128xf32>
    %cst_364 = arith.constant dense<0.000000e+00> : vector<48xf32>
    %698 = vector.multi_reduction <add>, %691, %cst_364 [1] : vector<48x32xf32> to vector<48xf32>
    %699 = vector.shape_cast %698 : vector<48xf32> to vector<48x1xf32>
    %cst_365 = arith.constant 3.200000e+01 : f32
    %700 = vector.broadcast %cst_365 : f32 to vector<48x1xf32>
    %701 = arith.divf %699, %700 : vector<48x1xf32>
    %702 = vector.broadcast %701 : vector<48x1xf32> to vector<48x32xf32>
    %703 = arith.subf %691, %702 : vector<48x32xf32>
    %704 = arith.mulf %703, %703 : vector<48x32xf32>
    %cst_366 = arith.constant dense<0.000000e+00> : vector<48xf32>
    %705 = vector.multi_reduction <add>, %704, %cst_366 [1] : vector<48x32xf32> to vector<48xf32>
    %706 = vector.shape_cast %705 : vector<48xf32> to vector<48x1xf32>
    %cst_367 = arith.constant 3.200000e+01 : f32
    %707 = vector.broadcast %cst_367 : f32 to vector<48x1xf32>
    %708 = arith.divf %706, %707 : vector<48x1xf32>
    %cst_368 = arith.constant 9.99999997E-7 : f32
    %709 = vector.broadcast %cst_368 : f32 to vector<48x1xf32>
    %710 = arith.addf %708, %709 : vector<48x1xf32>
    %711 = math.rsqrt %710 : vector<48x1xf32>
    %712 = vector.broadcast %711 : vector<48x1xf32> to vector<48x32xf32>
    %713 = arith.mulf %703, %712 : vector<48x32xf32>
    %714 = vector.broadcast %692 : vector<1x32xf32> to vector<48x32xf32>
    %715 = arith.mulf %713, %714 : vector<48x32xf32>
    %716 = vector.broadcast %693 : vector<1x32xf32> to vector<48x32xf32>
    %717 = arith.addf %715, %716 : vector<48x32xf32>
    %cst_369 = arith.constant dense<0.000000e+00> : vector<48x64xf32>
    %718 = tpu.matmul %717, %694, %cst_369 {dimension_numbers = #tpu.dot_dimension_numbers<[1], [0], [0], [1], [0, 0, 1, 1], [], []>} : vector<48x32xf32>, vector<32x64xf32>, vector<48x64xf32> -> vector<48x64xf32>
    %719 = vector.broadcast %695 : vector<1x64xf32> to vector<48x64xf32>
    %720 = arith.addf %718, %719 : vector<48x64xf32>
    %cst_370 = arith.constant 0.000000e+00 : f32
    %721 = vector.broadcast %cst_370 : f32 to vector<48x64xf32>
    %722 = arith.maximumf %720, %721 : vector<48x64xf32>
    %cst_371 = arith.constant dense<0.000000e+00> : vector<48x128xf32>
    %723 = tpu.matmul %722, %696, %cst_371 {dimension_numbers = #tpu.dot_dimension_numbers<[1], [0], [0], [1], [0, 0, 1, 1], [], []>} : vector<48x64xf32>, vector<64x128xf32>, vector<48x128xf32> -> vector<48x128xf32>
    %724 = vector.broadcast %697 : vector<1x128xf32> to vector<48x128xf32>
    %725 = arith.addf %723, %724 : vector<48x128xf32>
    %c0_372 = arith.constant 0 : index
    %c0_373 = arith.constant 0 : index
    %726 = vector.load %arg11[%c0_372, %c0_373] : memref<48x128xf32, #tpu.memory_space<vmem>>, vector<48x128xf32>
    tpu.vector_store %arg11[%c0_372, %c0_373], %725 {strides = array<i32>} : memref<48x128xf32, #tpu.memory_space<vmem>>, vector<48x128xf32>,
    %c100 = arith.constant 100 : index
    %c0_374 = arith.constant 0 : index
    %727 = vector.load %arg10[%c100, %c0_374] : memref<104x128xf32, #tpu.memory_space<vmem>>, vector<1x128xf32>
    %c101 = arith.constant 101 : index
    %c0_375 = arith.constant 0 : index
    %728 = vector.load %arg10[%c101, %c0_375] : memref<104x128xf32, #tpu.memory_space<vmem>>, vector<1x128xf32>
    %c102 = arith.constant 102 : index
    %c0_376 = arith.constant 0 : index
    %729 = vector.load %arg10[%c102, %c0_376] : memref<104x128xf32, #tpu.memory_space<vmem>>, vector<1x128xf32>
    %c103 = arith.constant 103 : index
    %c0_377 = arith.constant 0 : index
    %730 = vector.load %arg10[%c103, %c0_377] : memref<104x128xf32, #tpu.memory_space<vmem>>, vector<1x128xf32>
    %c0_378 = arith.constant 0 : index
    %c0_379 = arith.constant 0 : index
    %731 = vector.load %arg1[%c0_378, %c0_379] : memref<48x128xf32, #tpu.memory_space<vmem>>, vector<48x128xf32>
    %732 = vector.broadcast %727 : vector<1x128xf32> to vector<48x128xf32>
    %733 = arith.addf %725, %732 : vector<48x128xf32>
    %cst_380 = arith.constant dense<0xFF800000> : vector<48xf32>
    %734 = vector.multi_reduction <maximumf>, %733, %cst_380 [1] : vector<48x128xf32> to vector<48xf32>
    %735 = vector.shape_cast %734 : vector<48xf32> to vector<48x1xf32>
    %736 = vector.broadcast %735 : vector<48x1xf32> to vector<48x128xf32>
    %737 = arith.subf %733, %736 : vector<48x128xf32>
    %738 = math.exp %737 : vector<48x128xf32>
    %cst_381 = arith.constant dense<0.000000e+00> : vector<48xf32>
    %739 = vector.multi_reduction <add>, %738, %cst_381 [1] : vector<48x128xf32> to vector<48xf32>
    %740 = vector.shape_cast %739 : vector<48xf32> to vector<48x1xf32>
    %741 = math.log %740 : vector<48x1xf32>
    %742 = arith.addf %735, %741 : vector<48x1xf32>
    %743 = vector.broadcast %729 : vector<1x128xf32> to vector<48x128xf32>
    %744 = arith.mulf %731, %743 : vector<48x128xf32>
    %745 = arith.mulf %744, %725 : vector<48x128xf32>
    %cst_382 = arith.constant dense<0.000000e+00> : vector<48xf32>
    %746 = vector.multi_reduction <add>, %745, %cst_382 [1] : vector<48x128xf32> to vector<48xf32>
    %747 = vector.shape_cast %746 : vector<48xf32> to vector<48x1xf32>
    %cst_383 = arith.constant dense<0.000000e+00> : vector<48xf32>
    %748 = vector.multi_reduction <add>, %744, %cst_383 [1] : vector<48x128xf32> to vector<48xf32>
    %749 = vector.shape_cast %748 : vector<48xf32> to vector<48x1xf32>
    %750 = arith.mulf %742, %749 : vector<48x1xf32>
    %751 = arith.subf %750, %747 : vector<48x1xf32>
    %cst_384 = arith.constant dense<0.000000e+00> : vector<1xf32>
    %752 = vector.multi_reduction <add>, %751, %cst_384 [0] : vector<48x1xf32> to vector<1xf32>
    %753 = vector.shape_cast %752 : vector<1xf32> to vector<1x1xf32>
    %cst_385 = arith.constant 5.000000e-01 : f32
    %754 = vector.broadcast %cst_385 : f32 to vector<1x1xf32>
    %755 = arith.mulf %753, %754 : vector<1x1xf32>
    %756 = vector.broadcast %728 : vector<1x128xf32> to vector<48x128xf32>
    %757 = arith.addf %725, %756 : vector<48x128xf32>
    %cst_386 = arith.constant dense<0xFF800000> : vector<48xf32>
    %758 = vector.multi_reduction <maximumf>, %757, %cst_386 [1] : vector<48x128xf32> to vector<48xf32>
    %759 = vector.shape_cast %758 : vector<48xf32> to vector<48x1xf32>
    %760 = vector.broadcast %759 : vector<48x1xf32> to vector<48x128xf32>
    %761 = arith.subf %757, %760 : vector<48x128xf32>
    %762 = math.exp %761 : vector<48x128xf32>
    %cst_387 = arith.constant dense<0.000000e+00> : vector<48xf32>
    %763 = vector.multi_reduction <add>, %762, %cst_387 [1] : vector<48x128xf32> to vector<48xf32>
    %764 = vector.shape_cast %763 : vector<48xf32> to vector<48x1xf32>
    %765 = math.log %764 : vector<48x1xf32>
    %766 = arith.addf %759, %765 : vector<48x1xf32>
    %767 = vector.broadcast %730 : vector<1x128xf32> to vector<48x128xf32>
    %768 = arith.mulf %731, %767 : vector<48x128xf32>
    %769 = arith.mulf %768, %725 : vector<48x128xf32>
    %cst_388 = arith.constant dense<0.000000e+00> : vector<48xf32>
    %770 = vector.multi_reduction <add>, %769, %cst_388 [1] : vector<48x128xf32> to vector<48xf32>
    %771 = vector.shape_cast %770 : vector<48xf32> to vector<48x1xf32>
    %cst_389 = arith.constant dense<0.000000e+00> : vector<48xf32>
    %772 = vector.multi_reduction <add>, %768, %cst_389 [1] : vector<48x128xf32> to vector<48xf32>
    %773 = vector.shape_cast %772 : vector<48xf32> to vector<48x1xf32>
    %774 = arith.mulf %766, %773 : vector<48x1xf32>
    %775 = arith.subf %774, %771 : vector<48x1xf32>
    %cst_390 = arith.constant dense<0.000000e+00> : vector<1xf32>
    %776 = vector.multi_reduction <add>, %775, %cst_390 [0] : vector<48x1xf32> to vector<1xf32>
    %777 = vector.shape_cast %776 : vector<1xf32> to vector<1x1xf32>
    %cst_391 = arith.constant 5.000000e-01 : f32
    %778 = vector.broadcast %cst_391 : f32 to vector<1x1xf32>
    %779 = arith.mulf %777, %778 : vector<1x1xf32>
    %780 = tpu.concatenate %755, %779 in 0 : vector<1x1xf32>, vector<1x1xf32> -> vector<2x1xf32>
    %781 = vector.shape_cast %780 : vector<2x1xf32> to vector<2x1xf32>
    %782 = vector.broadcast %781 : vector<2x1xf32> to vector<2x128xf32>
    %c0_392 = arith.constant 0 : index
    %c0_393 = arith.constant 0 : index
    %783 = vector.load %arg12[%c0_392, %c0_393] : memref<2x128xf32, #tpu.memory_space<vmem>>, vector<2x128xf32>
    tpu.vector_store %arg12[%c0_392, %c0_393], %782 {strides = array<i32>} : memref<2x128xf32, #tpu.memory_space<vmem>>, vector<2x128xf32>,
    return
  }
}

</mosaic_0001>

<bundles_post_ra>
// kernel: _fused_forward.1
= control target key start
LH: loop header
LB: loop body
LE: loop exit
PB: predicated region body
PF: predicated region fallthrough
CT: control target
= control target key end

     0   :  { %vm55_vm0 = vcmask 392192   ;;  %vm120_vm1 = vcmask 261120   ;;  %v6142_v27 = vmov 32.0   ;;  %s8424_s2 = inlined_call_operand.vmem [shape: f32[48,32], index: 2, kind: input, shape index: {}]   ;;  %s8425_s0 = inlined_call_operand.vmem [shape: f32[48,48], index: 0, kind: input, shape index: {}]   ;;  %s8426_s3 = inlined_call_operand.vmem [shape: f32[24,32], index: 3, kind: input, shape index: {}]   ;;  %s8427_s9 = inlined_call_operand.vmem [shape: f32[2,8,128], index: 9, kind: input, shape index: {}]   ;;  %s8428_s4 = inlined_call_operand.vmem [shape: f32[24,32,8], index: 4, kind: input, shape index: {}]   ;;  %s8429_s5 = inlined_call_operand.vmem [shape: f32[24,1,8], index: 5, kind: input, shape index: {}]   ;;  %s8430_s6 = inlined_call_operand.vmem [shape: f32[2,32,32], index: 6, kind: input, shape index: {}]   ;;  %s8431_s7 = inlined_call_operand.vmem [shape: f32[2,32,128], index: 7, kind: input, shape index: {}]   ;;  %s8432_s8 = inlined_call_operand.vmem [shape: f32[2,128,32], index: 8, kind: input, shape index: {}]   ;;  %s8433_s10 = inlined_call_operand.vmem [shape: f32[104,128], index: 10, kind: input, shape index: {}]   ;;  %s8434_s1 = inlined_call_operand.vmem [shape: f32[48,128], index: 1, kind: input, shape index: {}]   ;;  %s8435_s11 = inlined_call_operand.vmem [shape: f32[48,128], index: 11, kind: output, shape index: {0}]   ;;  %s8436_s12 = inlined_call_operand.vmem [shape: f32[2,128], index: 12, kind: output, shape index: {1}]  }
   0x1   :  { %v51_v0 = vld [vmem:[%s8424_s2 + $0x28] sm:$0xff]  ;;  %v50_v1 = vld [vmem:[%s8424_s2 + $0x20] sm:$0xff]  ;;  %v49_v2 = vld [vmem:[%s8424_s2 + $0x18] sm:$0xff]  ;;  %5816 = vrcp.f32 %v6142_v27 }
   0x2   :  { %84 = vmatpush.msra.mxu0 %v51_v0  ;;  %v48_v3 = vld [vmem:[%s8424_s2 + $0x10] sm:$0xff]  ;;  %v47_v4 = vld [vmem:[%s8424_s2 + $0x8] sm:$0xff]  ;;  %v46_v5 = vld [vmem:[%s8424_s2] sm:$0xff] }
   0x3   :  { %v40_v6 = vld [vmem:[%s8425_s0] sm:$0xff]  ;;  %v41_v7 = vld [vmem:[%s8425_s0 + $0x8] sm:$0xff]  ;;  %v42_v8 = vld [vmem:[%s8425_s0 + $0x10] sm:$0xff] }
   0x4   :  { %85 = vmatpush.msra.mxu0 %v50_v1  ;;  %v43_v9 = vld [vmem:[%s8425_s0 + $0x18] sm:$0xff]  ;;  %v44_v10 = vld [vmem:[%s8425_s0 + $0x20] sm:$0xff]  ;;  %v45_v11 = vld [vmem:[%s8425_s0 + $0x28] sm:$0xff] }
   0x5   :  { %v52_v12 = vld [vmem:[%s8426_s3] sm:$0xff]  ;;  %v53_v16 = vld [vmem:[%s8426_s3 + $0x8] sm:$0xff]  ;;  %v54_v20 = vld [vmem:[%s8426_s3 + $0x10] sm:$0xff] }
   0x6   :  { %86 = vmatpush.msra.mxu0 %v49_v2  ;;  %v277_v60 = vld [vmem:[%s8428_s4 + $0x18] sm:$0xff]  ;;  %v276_v63 = vld [vmem:[%s8428_s4 + $0x10] sm:$0xff]  ;;  %v275_v2 = vld [vmem:[%s8428_s4 + $0x8] sm:$0xff] }
   0x7   :  { %v5817_v28 = vpop.eup %5816  ;;  %v5265_v61 = vld [vmem:[%s8428_s4 + $0x38] sm:$0xff]  ;;  %312 = vmatpush.msra.mxu1 %v277_v60  ;;  %v5264_v0 = vld [vmem:[%s8428_s4 + $0x30] sm:$0xff] }
   0x8   :  { %87 = vmatpush.msra.mxu0 %v48_v3  ;;  %v140_v29 = vmul.f32 32.0, %v5817_v28  ;;  %vm144_vm2 = vweird.f32 %v5817_v28  ;;  %v5276_v62 = vld [vmem:[%s8428_s4 + $0x58] sm:$0xff]  ;;  %357 = vmatpush.msra.mxu2 %v5265_v61  ;;  %v5275_v1 = vld [vmem:[%s8428_s4 + $0x50] sm:$0xff]  ;;  %v5263_v3 = vld [vmem:[%s8428_s4 + $0x28] sm:$0xff] }
   0x9   :  { %402 = vmatpush.msra.mxu3 %v5276_v62  ;;  %313 = vmatpush.msra.mxu1 %v276_v63 }
   0xa   :  { %88 = vmatpush.msra.mxu0 %v47_v4  ;;  %v141_v30 = vsub.f32 1.0, %v140_v29  ;;  %358 = vmatpush.msra.mxu2 %v5264_v0  ;;  %v5274_v4 = vld [vmem:[%s8428_s4 + $0x48] sm:$0xff] }
   0xb   :  { %403 = vmatpush.msra.mxu3 %v5275_v1  ;;  %314 = vmatpush.msra.mxu1 %v275_v2 }
   0xc   :  { %89 = vmatpush.msra.mxu0 %v46_v5  ;;  %v142_v31 = vmul.f32 %v5817_v28, %v141_v30  ;;  %359 = vmatpush.msra.mxu2 %v5263_v3  ;;  %v274_v5 = vld [vmem:[%s8428_s4] sm:$0xff] }
   0xd   :  { %5250 = vmatmul.msk.f32.vlgmr.msra.gmra.mxu0 %vm55_vm0, %v40_v6  ;;  %404 = vmatpush.msra.mxu3 %v5274_v4  ;;  %v5262_v6 = vld [vmem:[%s8428_s4 + $0x20] sm:$0xff] }
   0xe   :  { %v143_v32 = vadd.f32 %v5817_v28, %v142_v31  ;;  %315 = vmatpush.msra.mxu1 %v274_v5  ;;  %360 = vmatpush.msra.mxu2 %v5262_v6 }
  0x10   :  { %v6271_v33 = vsel %vm144_vm2, %v5817_v28, %v143_v32 }
  0x15   :  { %5251 = vmatmul.msk.f32.gmra.mxu0 %vm55_vm0, %v41_v7  ;;  %v5273_v7 = vld [vmem:[%s8428_s4 + $0x40] sm:$0xff] }
  0x16   :  { %405 = vmatpush.msra.mxu3 %v5273_v7 }
  0x1d   :  { %5252 = vmatmul.msk.f32.gmra.mxu0 %vm55_vm0, %v42_v8 }
  0x25   :  { %5253 = vmatmul.msk.f32.gmra.mxu0 %vm55_vm0, %v43_v9 }
  0x2d   :  { %5254 = vmatmul.msk.f32.gmra.mxu0 %vm55_vm0, %v44_v10 }
  0x35   :  { %5255 = vmatmul.msk.f32.gmra.mxu0 %vm55_vm0, %v45_v11 }
  0x8a   :  { %v91_v13 = vpop.f32.mrf.mxu0 }
  0x8b   :  { %v6249_v14 = vadd.f32 %v91_v13, %v52_v12 }
  0x8d   :  { %v121_v15 = vsel %vm120_vm1, %v6249_v14, 0.0 }
  0x8e   :  { %122 = vadd.xlane.f32.xlu0 %v121_v15 }
  0x92   :  { %v94_v17 = vpop.f32.mrf.mxu0 }
  0x93   :  { %v6256_v18 = vadd.f32 %v94_v17, %v53_v16 }
  0x95   :  { %v124_v19 = vsel %vm120_vm1, %v6256_v18, 0.0 }
  0x96   :  { %125 = vadd.xlane.f32.xlu0 %v124_v19 }
  0x9a   :  { %v97_v21 = vpop.f32.mrf.mxu0 }
  0x9b   :  { %v6263_v22 = vadd.f32 %v97_v21, %v54_v20 }
  0x9d   :  { %v127_v23 = vsel %vm120_vm1, %v6263_v22, 0.0 }
  0x9e   :  { %128 = vadd.xlane.f32.xlu1 %v127_v23 }
  0xa2   :  { %v100_v24 = vpop.f32.mrf.mxu0 }
  0xa3   :  { %v6267_v25 = vadd.f32 %v100_v24, %v52_v12 }
  0xa5   :  { %v130_v26 = vsel %vm120_vm1, %v6267_v25, 0.0 }
  0xa6   :  { %131 = vadd.xlane.f32.xlu0 %v130_v26 }
  0xaa   :  { %v103_v38 = vpop.f32.mrf.mxu0 }
  0xab   :  { %v6281_v42 = vadd.f32 %v103_v38, %v53_v16 }
  0xad   :  { %v133_v44 = vsel %vm120_vm1, %v6281_v42, 0.0 }
  0xb2   :  { %v106_v51 = vpop.f32.mrf.mxu0 }
  0xb3   :  { %v6299_v55 = vadd.f32 %v106_v51, %v54_v20 }
  0xb5   :  { %v136_v57 = vsel %vm120_vm1, %v6299_v55, 0.0 }
 0x101   :  { %v123_v34 = vpop.xlane.xlu0 %122 }
 0x102   :  { %v146_v35 = vmul.f32 %v6271_v33, %v123_v34 }
 0x104   :  { %v6275_v36 = vsub.f32 %v6249_v14, %v146_v35  ;;  %v6358_v35 = vld [vmem:[%s8427_s9] ss:$0 sm:$0xff] }
 0x106   :  { %v158_v37 = vmul.f32 %v6275_v36, %v6275_v36 }
 0x108   :  { %v164_v39 = vsel %vm120_vm1, %v158_v37, 0.0 }
 0x109   :  { %165 = vadd.xlane.f32.xlu1 %v164_v39  ;;  %v126_v40 = vpop.xlane.xlu0 %125  ;;  %v6363_v39 = vld [vmem:[%s8427_s9 + $0x1] ss:$0 sm:$0xff] }
 0x10a   :  { %v147_v41 = vmul.f32 %v6271_v33, %v126_v40 }
 0x10c   :  { %v6284_v43 = vsub.f32 %v6256_v18, %v147_v41 }
 0x10e   :  { %v159_v45 = vmul.f32 %v6284_v43, %v6284_v43 }
 0x110   :  { %v167_v46 = vsel %vm120_vm1, %v159_v45, 0.0 }
 0x111   :  { %v129_v47 = vpop.xlane.xlu1 %128  ;;  %134 = vadd.xlane.f32.xlu1 %v133_v44  ;;  %168 = vadd.xlane.f32.xlu2 %v167_v46 }
 0x112   :  { %v148_v48 = vmul.f32 %v6271_v33, %v129_v47 }
 0x114   :  { %v6293_v49 = vsub.f32 %v6263_v22, %v148_v48 }
 0x116   :  { %v160_v50 = vmul.f32 %v6293_v49, %v6293_v49 }
 0x118   :  { %v170_v52 = vsel %vm120_vm1, %v160_v50, 0.0 }
 0x119   :  { %171 = vadd.xlane.f32.xlu2 %v170_v52  ;;  %v132_v53 = vpop.xlane.xlu0 %131 }
 0x11a   :  { %v149_v54 = vmul.f32 %v6271_v33, %v132_v53 }
 0x11c   :  { %v6302_v56 = vsub.f32 %v6267_v25, %v149_v54 }
 0x11e   :  { %v161_v58 = vmul.f32 %v6302_v56, %v6302_v56 }
 0x120   :  { %v173_v59 = vsel %vm120_vm1, %v161_v58, 0.0 }
 0x121   :  { %137 = vadd.xlane.f32.xlu2 %v136_v57  ;;  %174 = vadd.xlane.f32.xlu0 %v173_v59 }
 0x17c   :  { %v166_v8 = vpop.xlane.xlu1 %165 }
 0x17d   :  { %v182_v9 = vmul.f32 %v166_v8, %v6271_v33 }
 0x17f   :  { %v188_v10 = vadd.f32 1e-06, %v182_v9 }
 0x181   :  { %5818 = vrsqrt.f32 %v188_v10  ;;  %vm200_vm4 = vweird.f32 %v188_v10 }
 0x184   :  { %v135_v11 = vpop.xlane.xlu1 %134  ;;  %v169_v12 = vpop.xlane.xlu2 %168 }
 0x185   :  { %v150_v13 = vmul.f32 %v6271_v33, %v135_v11  ;;  %v183_v15 = vmul.f32 %v169_v12, %v6271_v33 }
 0x187   :  { %v5819_v16 = vpop.eup %5818  ;;  %v6349_v17 = vsub.f32 %v6281_v42, %v150_v13  ;;  %v189_v19 = vadd.f32 1e-06, %v183_v15 }
 0x188   :  { %v195_v20 = vmul.f32 %v5819_v16, %v188_v10  ;;  %vm201_vm3 = vweird.f32 %v5819_v16 }
 0x189   :  { %5820 = vrsqrt.f32 %v189_v19  ;;  %v162_v21 = vmul.f32 %v6349_v17, %v6349_v17  ;;  %vm202_vm5 = vmor %vm200_vm4, %vm201_vm3  ;;  %vm210_vm7 = vweird.f32 %v189_v19 }
 0x18a   :  { %v196_v23 = vmul.f32 %v5819_v16, %v195_v20 }
 0x18b   :  { %v176_v24 = vsel %vm120_vm1, %v162_v21, 0.0 }
 0x18c   :  { %v197_v26 = vmul.f32 0.5, %v196_v23  ;;  %177 = vadd.xlane.f32.xlu1 %v176_v24  ;;  %v172_v27 = vpop.xlane.xlu2 %171 }
 0x18d   :  { %v184_v28 = vmul.f32 %v172_v27, %v6271_v33 }
 0x18e   :  { %v198_v29 = vsub.f32 1.5, %v197_v26 }
 0x18f   :  { %v5821_v30 = vpop.eup %5820  ;;  %v190_v31 = vadd.f32 1e-06, %v184_v28 }
 0x190   :  { %v199_v32 = vmul.f32 %v5819_v16, %v198_v29  ;;  %v205_v34 = vmul.f32 %v5821_v30, %v189_v19  ;;  %vm211_vm6 = vweird.f32 %v5821_v30 }
 0x191   :  { %5822 = vrsqrt.f32 %v190_v31  ;;  %vm212_vm8 = vmor %vm210_vm7, %vm211_vm6  ;;  %vm220_vm10 = vweird.f32 %v190_v31  ;;  %vm426_vm6 = vcmask 64512  }
 0x192   :  { %v203_v37 = vsel %vm202_vm5, %v5819_v16, %v199_v32  ;;  %v206_v38 = vmul.f32 %v5821_v30, %v205_v34 }
 0x193   :  { %v254_v40 = vmul.f32 %v203_v37, %v6275_v36 }
 0x194   :  { %v207_v41 = vmul.f32 0.5, %v206_v38  ;;  %v138_v44 = vpop.xlane.xlu2 %137  ;;  %v175_v45 = vpop.xlane.xlu0 %174 }
 0x195   :  { %v261_v46 = vmul.f32 %v6358_v35, %v254_v40  ;;  %v151_v47 = vmul.f32 %v6271_v33, %v138_v44  ;;  %v185_v48 = vmul.f32 %v175_v45, %v6271_v33 }
 0x196   :  { %v208_v50 = vsub.f32 1.5, %v207_v41 }
 0x197   :  { %v5823_v51 = vpop.eup %5822  ;;  %v6370_v52 = vadd.f32 %v6363_v39, %v261_v46  ;;  %v6373_v53 = vsub.f32 %v6299_v55, %v151_v47  ;;  %v191_v54 = vadd.f32 1e-06, %v185_v48 }
 0x198   :  { %v209_v36 = vmul.f32 %v5821_v30, %v208_v50  ;;  %v215_v57 = vmul.f32 %v5823_v51, %v190_v31  ;;  %vm221_vm9 = vweird.f32 %v5823_v51 }
 0x199   :  { %5824 = vrsqrt.f32 %v191_v54  ;;  %5256 = vmatmul.msk.f32.vlgmr.msra.gmra.mxu1 %vm120_vm1, %v6370_v52  ;;  %5267 = vmatmul.msk.f32.vlgmr.msra.gmra.mxu2 %vm120_vm1, %v6370_v52  ;;  %v163_v58 = vmul.f32 %v6373_v53, %v6373_v53  ;;  %vm222_vm11 = vmor %vm220_vm10, %vm221_vm9  ;;  %vm230_vm13 = vweird.f32 %v191_v54 }
 0x19a   :  { %v213_v59 = vsel %vm212_vm8, %v5821_v30, %v209_v36  ;;  %v216_v60 = vmul.f32 %v5823_v51, %v215_v57  ;;  %5278 = vmatmul.msk.f32.vlgmr.msra.gmra.mxu3 %vm120_vm1, %v6370_v52  ;;  %vm477_vm8 = vcmask 195584  }
 0x19b   :  { %v255_v61 = vmul.f32 %v213_v59, %v6284_v43  ;;  %v179_v62 = vsel %vm120_vm1, %v163_v58, 0.0 }
 0x19c   :  { %v217_v63 = vmul.f32 0.5, %v216_v60  ;;  %180 = vadd.xlane.f32.xlu2 %v179_v62  ;;  %v6438_v60 = vld [vmem:[%s8429_s5 + $0x1] ss:$0 sm:$0xff] }
 0x19d   :  { %v262_v0 = vmul.f32 %v6358_v35, %v255_v61 }
 0x19e   :  { %v218_v1 = vsub.f32 1.5, %v217_v63 }
 0x19f   :  { %v5825_v2 = vpop.eup %5824  ;;  %v6387_v3 = vadd.f32 %v6363_v39, %v262_v0 }
 0x1a0   :  { %v219_v4 = vmul.f32 %v5823_v51, %v218_v1  ;;  %v225_v5 = vmul.f32 %v5825_v2, %v191_v54  ;;  %vm231_vm12 = vweird.f32 %v5825_v2 }
 0x1a1   :  { %5257 = vmatmul.msk.f32.gmra.mxu1 %vm120_vm1, %v6387_v3  ;;  %5268 = vmatmul.msk.f32.gmra.mxu2 %vm120_vm1, %v6387_v3  ;;  %vm232_vm14 = vmor %vm230_vm13, %vm231_vm12 }
 0x1a2   :  { %v223_v43 = vsel %vm222_vm11, %v5823_v51, %v219_v4  ;;  %v226_v6 = vmul.f32 %v5825_v2, %v225_v5  ;;  %5279 = vmatmul.msk.f32.gmra.mxu3 %vm120_vm1, %v6387_v3  ;;  %v6458_v4 = vld [vmem:[%s8429_s5] ss:$0 sm:$0xff] }
 0x1a3   :  { %v256_v7 = vmul.f32 %v223_v43, %v6293_v49  ;;  %v5305_v43 = vld [vmem:[%s8428_s4 + $0x78] sm:$0xff] }
 0x1a4   :  { %v227_v8 = vmul.f32 0.5, %v226_v6 }
 0x1a5   :  { %v263_v9 = vmul.f32 %v6358_v35, %v256_v7 }
 0x1a6   :  { %v228_v10 = vsub.f32 1.5, %v227_v8  ;;  %v5304_v8 = vld [vmem:[%s8428_s4 + $0x70] sm:$0xff] }
 0x1a7   :  { %v6398_v11 = vadd.f32 %v6363_v39, %v263_v9  ;;  %v5303_v9 = vld [vmem:[%s8428_s4 + $0x68] sm:$0xff] }
 0x1a8   :  { %v229_v12 = vmul.f32 %v5825_v2, %v228_v10  ;;  %v5302_v10 = vld [vmem:[%s8428_s4 + $0x60] sm:$0xff] }
 0x1a9   :  { %5258 = vmatmul.msk.f32.gmra.mxu1 %vm120_vm1, %v6398_v11  ;;  %5269 = vmatmul.msk.f32.gmra.mxu2 %vm120_vm1, %v6398_v11 }
 0x1aa   :  { %v233_v13 = vsel %vm232_vm14, %v5825_v2, %v229_v12  ;;  %5280 = vmatmul.msk.f32.gmra.mxu3 %vm120_vm1, %v6398_v11 }
 0x1ab   :  { %v257_v49 = vmul.f32 %v233_v13, %v6302_v56 }
 0x1ad   :  { %v264_v15 = vmul.f32 %v6358_v35, %v257_v49 }
 0x1af   :  { %v6409_v16 = vadd.f32 %v6363_v39, %v264_v15 }
 0x1b1   :  { %5259 = vmatmul.msk.f32.gmra.mxu1 %vm120_vm1, %v6409_v16  ;;  %5270 = vmatmul.msk.f32.gmra.mxu2 %vm120_vm1, %v6409_v16 }
 0x1b2   :  { %5281 = vmatmul.msk.f32.gmra.mxu3 %vm120_vm1, %v6409_v16 }
 0x1ff   :  { %v178_v19 = vpop.xlane.xlu1 %177 }
 0x200   :  { %v186_v20 = vmul.f32 %v178_v19, %v6271_v33 }
 0x202   :  { %v192_v21 = vadd.f32 1e-06, %v186_v20 }
 0x204   :  { %5826 = vrsqrt.f32 %v192_v21  ;;  %vm240_vm0 = vweird.f32 %v192_v21 }
 0x20a   :  { %v5827_v56 = vpop.eup %5826 }
 0x20b   :  { %v235_v23 = vmul.f32 %v5827_v56, %v192_v21  ;;  %vm241_vm15 = vweird.f32 %v5827_v56 }
 0x20c   :  { %vm242_vm2 = vmor %vm240_vm0, %vm241_vm15 }
 0x20d   :  { %v236_v24 = vmul.f32 %v5827_v56, %v235_v23  ;;  %v109_v23 = vlaneseq }
 0x20f   :  { %v237_v26 = vmul.f32 0.5, %v236_v24  ;;  %v181_v27 = vpop.xlane.xlu2 %180 }
 0x210   :  { %v187_v28 = vmul.f32 %v181_v27, %v6271_v33 }
 0x211   :  { %v238_v29 = vsub.f32 1.5, %v237_v26 }
 0x212   :  { %v193_v30 = vadd.f32 1e-06, %v187_v28 }
 0x213   :  { %v239_v31 = vmul.f32 %v5827_v56, %v238_v29  ;;  %v110_v29 = vand.u32 127, %v109_v23 }
 0x214   :  { %5828 = vrsqrt.f32 %v193_v30  ;;  %vm250_vm4 = vweird.f32 %v193_v30 }
 0x215   :  { %v243_v32 = vsel %vm242_vm2, %v5827_v56, %v239_v31  ;;  %vm111_vm7 = vcmp.lt.s32.totalorder %v110_v29, 17 }
 0x216   :  { %v258_v34 = vmul.f32 %v243_v32, %v6349_v17  ;;  %v317_v58 = vpop.f32.mrf.mxu1 }
 0x217   :  { %v318_v6 = vadd.f32 %v6458_v4, %v317_v58 }
 0x218   :  { %v265_v37 = vmul.f32 %v6358_v35, %v258_v34 }
 0x21a   :  { %v5829_v38 = vpop.eup %5828  ;;  %v6422_v40 = vadd.f32 %v6363_v39, %v265_v37 }
 0x21b   :  { %v245_v41 = vmul.f32 %v5829_v38, %v193_v30  ;;  %vm251_vm3 = vweird.f32 %v5829_v38 }
 0x21c   :  { %5260 = vmatmul.msk.f32.gmra.mxu1 %vm120_vm1, %v6422_v40  ;;  %v362_v44 = vpop.f32.mrf.mxu2  ;;  %5271 = vmatmul.msk.f32.gmra.mxu2 %vm120_vm1, %v6422_v40  ;;  %vm252_vm5 = vmor %vm250_vm4, %vm251_vm3 }
 0x21d   :  { %v246_v45 = vmul.f32 %v5829_v38, %v245_v41  ;;  %v407_v46 = vpop.f32.mrf.mxu3  ;;  %5282 = vmatmul.msk.f32.gmra.mxu3 %vm120_vm1, %v6422_v40  ;;  %v363_v5 = vadd.f32 %v6438_v60, %v362_v44 }
 0x21e   :  { %v320_v2 = vpop.f32.mrf.mxu1 }
 0x21f   :  { %v247_v17 = vmul.f32 0.5, %v246_v45  ;;  %v321_v7 = vadd.f32 %v6458_v4, %v320_v2 }
 0x221   :  { %v248_v47 = vsub.f32 1.5, %v247_v17 }
 0x223   :  { %v249_v48 = vmul.f32 %v5829_v38, %v248_v47 }
 0x224   :  { %v365_v50 = vpop.f32.mrf.mxu2 }
 0x225   :  { %v253_v51 = vsel %vm252_vm5, %v5829_v38, %v249_v48  ;;  %v410_v54 = vpop.f32.mrf.mxu3  ;;  %v366_v0 = vadd.f32 %v6438_v60, %v365_v50  ;;  %v6143_v38 = vmov -1e+30   ;;  %v5326_v48 = vld [vmem:[%s8428_s4 + $0xb0] sm:$0xff] }
 0x226   :  { %v259_v36 = vmul.f32 %v253_v51, %v6373_v53  ;;  %v323_v12 = vpop.f32.mrf.mxu1  ;;  %v6497_v41 = vsel %vm111_vm7, 0.0, %v6143_v38  ;;  %v5313_v38 = vld [vmem:[%s8428_s4 + $0x80] sm:$0xff] }
 0x227   :  { %v324_v13 = vadd.f32 %v6458_v4, %v323_v12 }
 0x228   :  { %v266_v57 = vmul.f32 %v6358_v35, %v259_v36  ;;  %v5774_v35 = vld [vmem:[%s8429_s5 + $0x2] ss:$0 sm:$0xff] }
 0x229   :  { %v411_v63 = vadd.f32 %v5774_v35, %v410_v54  ;;  %v408_v1 = vadd.f32 %v5774_v35, %v407_v46  ;;  %v5327_v46 = vld [vmem:[%s8428_s4 + $0xb8] sm:$0xff]  ;;  %v5325_v54 = vld [vmem:[%s8428_s4 + $0xa8] sm:$0xff] }
 0x22a   :  { %v6433_v59 = vadd.f32 %v6363_v39, %v266_v57  ;;  %v5324_v57 = vld [vmem:[%s8428_s4 + $0xa0] sm:$0xff] }
 0x22c   :  { %5261 = vmatmul.msk.f32.gmra.mxu1 %vm120_vm1, %v6433_v59  ;;  %v368_v61 = vpop.f32.mrf.mxu2  ;;  %5272 = vmatmul.msk.f32.gmra.mxu2 %vm120_vm1, %v6433_v59 }
 0x22d   :  { %v369_v39 = vadd.f32 %v6438_v60, %v368_v61  ;;  %v413_v53 = vpop.f32.mrf.mxu3  ;;  %5283 = vmatmul.msk.f32.gmra.mxu3 %vm120_vm1, %v6433_v59 }
 0x22e   :  { %v414_v62 = vadd.f32 %v5774_v35, %v413_v53  ;;  %v326_v49 = vpop.f32.mrf.mxu1 }
 0x22f   :  { %5284 = vmatpush.xpose.msk.msrb.mxu1 %vm426_vm6, %v369_v39  ;;  %5762 = vmatpush.xpose.msk.msrb.mxu3 %vm426_vm6, %v369_v39  ;;  %v327_v47 = vadd.f32 %v6458_v4, %v326_v49 }
 0x230   :  { %533 = vmatpush.msrb.mxu2 %v414_v62 }
 0x232   :  { %534 = vmatpush.msrb.mxu2 %v411_v63 }
 0x233   :  { %5285 = vmatpush.xpose.msk.msrb.mxu1 %vm426_vm6, %v366_v0  ;;  %5763 = vmatpush.xpose.msk.msrb.mxu3 %vm426_vm6, %v366_v0 }
 0x234   :  { %535 = vmatpush.msrb.mxu2 %v408_v1  ;;  %v371_v15 = vpop.f32.mrf.mxu2 }
 0x235   :  { %v416_v19 = vpop.f32.mrf.mxu3  ;;  %v372_v44 = vadd.f32 %v6438_v60, %v371_v15 }
 0x236   :  { %v417_v34 = vadd.f32 %v5774_v35, %v416_v19 }
 0x237   :  { %5286 = vmatpush.xpose.msk.msrb.mxu1 %vm426_vm6, %v363_v5  ;;  %5764 = vmatpush.xpose.msk.msrb.mxu3 %vm426_vm6, %v363_v5 }
 0x23a   :  { %5287 = vmatmul.msk.f32.vlgmr.msrb.gmra.mxu1 %vm426_vm6, %v318_v6  ;;  %5288 = vmatmul.msk.f32.vlgmr.msrb.gmra.mxu3 %vm426_vm6, %v321_v7 }
 0x23b   :  { %686 = vmatpush.msra.mxu1 %v5305_v43 }
 0x23d   :  { %687 = vmatpush.msra.mxu1 %v5304_v8 }
 0x23f   :  { %688 = vmatpush.msra.mxu1 %v5303_v9 }
 0x241   :  { %689 = vmatpush.msra.mxu1 %v5302_v10 }
 0x242   :  { %5289 = vmatmul.msk.f32.gmra.mxu3 %vm426_vm6, %v324_v13  ;;  %5307 = vmatmul.msk.f32.vlgmr.msra.gmra.mxu1 %vm120_vm1, %v6370_v52 }
 0x24a   :  { %5308 = vmatmul.msk.f32.gmra.mxu1 %vm120_vm1, %v6387_v3 }
 0x252   :  { %5309 = vmatmul.msk.f32.gmra.mxu1 %vm120_vm1, %v6398_v11 }
 0x25a   :  { %5310 = vmatmul.msk.f32.gmra.mxu1 %vm120_vm1, %v6409_v16 }
 0x262   :  { %5311 = vmatmul.msk.f32.gmra.mxu1 %vm120_vm1, %v6422_v40 }
 0x26a   :  { %5312 = vmatmul.msk.f32.gmra.mxu1 %vm120_vm1, %v6433_v59 }
 0x299   :  { %v329_v20 = vpop.f32.mrf.mxu1 }
 0x29a   :  { %v330_v61 = vadd.f32 %v6458_v4, %v329_v20 }
 0x29f   :  { %v374_v21 = vpop.f32.mrf.mxu2 }
 0x2a0   :  { %v419_v56 = vpop.f32.mrf.mxu3  ;;  %v375_v32 = vadd.f32 %v6438_v60, %v374_v21 }
 0x2a1   :  { %v420_v31 = vadd.f32 %v5774_v35, %v419_v56 }
 0x2a9   :  { %v332_v24 = vpop.f32.mrf.mxu1 }
 0x2aa   :  { %v333_v63 = vadd.f32 %v6458_v4, %v332_v24 }
 0x2af   :  { %v377_v26 = vpop.f32.mrf.mxu2 }
 0x2b0   :  { %v378_v27 = vadd.f32 %v6438_v60, %v377_v26  ;;  %v422_v28 = vpop.f32.mrf.mxu3 }
 0x2b1   :  { %v423_v30 = vadd.f32 %v5774_v35, %v422_v28 }
 0x2b2   :  { %5293 = vmatpush.xpose.msk.msra.mxu3 %vm426_vm6, %v378_v27 }
 0x2b3   :  { %651 = vmatpush.msrb.mxu0 %v423_v30 }
 0x2b5   :  { %652 = vmatpush.msrb.mxu0 %v420_v31 }
 0x2b6   :  { %5294 = vmatpush.xpose.msk.msra.mxu3 %vm426_vm6, %v375_v32  ;;  %v5316_v32 = vld [vmem:[%s8428_s4 + $0x98] sm:$0xff] }
 0x2b7   :  { %653 = vmatpush.msrb.mxu0 %v417_v34  ;;  %v462_v37 = vpop.f32.mrf.mxu1  ;;  %731 = vmatpush.msra.mxu2 %v5316_v32  ;;  %v5315_v34 = vld [vmem:[%s8428_s4 + $0x90] sm:$0xff] }
 0x2b8   :  { %v471_v45 = vmul.f32 0.35355338, %v462_v37  ;;  %v5314_v37 = vld [vmem:[%s8428_s4 + $0x88] sm:$0xff] }
 0x2b9   :  { %732 = vmatpush.msra.mxu2 %v5315_v34 }
 0x2ba   :  { %5295 = vmatpush.xpose.msk.msra.mxu3 %vm426_vm6, %v372_v44  ;;  %v474_v17 = vadd.f32 %v471_v45, %v6497_v41 }
 0x2bb   :  { %733 = vmatpush.msra.mxu2 %v5314_v37 }
 0x2bc   :  { %v478_v50 = vsel %vm477_vm8, %v474_v17, -inf }
 0x2bd   :  { %v465_v51 = vpop.f32.mrf.mxu3  ;;  %479 = vmax.xlane.f32.xlu0 %v478_v50  ;;  %5296 = vmatmul.msk.f32.vlgmr.msra.gmra.mxu3 %vm426_vm6, %v327_v47 }
 0x2be   :  { %776 = vmatpush.msrb.mxu3 %v5327_v46  ;;  %v472_v36 = vmul.f32 0.35355338, %v465_v51  ;;  %734 = vmatpush.msra.mxu2 %v5313_v38  ;;  %v5775_v38 = vld [vmem:[%s8429_s5 + $0x3] ss:$0 sm:$0xff] }
 0x2c0   :  { %777 = vmatpush.msrb.mxu3 %v5326_v48  ;;  %v475_v58 = vadd.f32 %v472_v36, %v6497_v41 }
 0x2c2   :  { %778 = vmatpush.msrb.mxu3 %v5325_v54  ;;  %v481_v60 = vsel %vm477_vm8, %v475_v58, -inf }
 0x2c3   :  { %482 = vmax.xlane.f32.xlu1 %v481_v60 }
 0x2c4   :  { %779 = vmatpush.msrb.mxu3 %v5324_v57 }
 0x2c5   :  { %v468_v35 = vpop.f32.mrf.mxu3  ;;  %5297 = vmatmul.msk.f32.gmra.mxu3 %vm426_vm6, %v330_v61 }
 0x2c6   :  { %v473_v39 = vmul.f32 0.35355338, %v468_v35 }
 0x2c8   :  { %v476_v53 = vadd.f32 %v473_v39, %v6497_v41 }
 0x2ca   :  { %v484_v62 = vsel %vm477_vm8, %v476_v53, -inf }
 0x2cb   :  { %485 = vmax.xlane.f32.xlu2 %v484_v62 }
 0x2cd   :  { %5298 = vmatmul.msk.f32.gmra.mxu3 %vm426_vm6, %v333_v63 }
 0x2d5   :  { %5329 = vmatmul.msk.f32.vlgmr.msrb.gmra.mxu3 %vm120_vm1, %v6370_v52 }
 0x2dd   :  { %5330 = vmatmul.msk.f32.gmra.mxu3 %vm120_vm1, %v6387_v3 }
 0x2e5   :  { %5331 = vmatmul.msk.f32.gmra.mxu3 %vm120_vm1, %v6398_v11 }
 0x2ed   :  { %5332 = vmatmul.msk.f32.gmra.mxu3 %vm120_vm1, %v6409_v16 }
 0x2f5   :  { %5333 = vmatmul.msk.f32.gmra.mxu3 %vm120_vm1, %v6422_v40 }
 0x2fd   :  { %5334 = vmatmul.msk.f32.gmra.mxu3 %vm120_vm1, %v6433_v59 }
 0x330   :  { %v480_v0 = vpop.xlane.xlu0 %479 }
 0x331   :  { %v487_v1 = vsub.f32 %v474_v17, %v480_v0 }
 0x333   :  { %v490_v2 = vmul.f32 1.442695, %v487_v1 }
 0x335   :  { %5830 = vpow2.f32 %v490_v2 }
 0x336   :  { %v483_v4 = vpop.xlane.xlu1 %482 }
 0x337   :  { %v488_v5 = vsub.f32 %v475_v58, %v483_v4 }
 0x339   :  { %v492_v43 = vmul.f32 1.442695, %v488_v5 }
 0x33b   :  { %v5831_v6 = vpop.eup %5830  ;;  %5832 = vpow2.f32 %v492_v43  ;;  %v6579_v43 = vld [vmem:[%s8430_s6] sm:$0xff] }
 0x33c   :  { %v496_v7 = vsel %vm477_vm8, %v5831_v6, 0.0 }
 0x33d   :  { %497 = vadd.xlane.f32.xlu0 %v496_v7 }
 0x33e   :  { %v486_v8 = vpop.xlane.xlu2 %485 }
 0x33f   :  { %v489_v9 = vsub.f32 %v476_v53, %v486_v8 }
 0x340   :  { %v581_v10 = vpop.f32.mrf.mxu3 }
 0x341   :  { %v5833_v12 = vpop.eup %5832  ;;  %v494_v13 = vmul.f32 1.442695, %v489_v9  ;;  %v590_v49 = vmul.f32 0.35355338, %v581_v10 }
 0x342   :  { %v499_v15 = vsel %vm477_vm8, %v5833_v12, 0.0 }
 0x343   :  { %5834 = vpow2.f32 %v494_v13  ;;  %500 = vadd.xlane.f32.xlu1 %v499_v15  ;;  %v593_v19 = vadd.f32 %v590_v49, %v6497_v41 }
 0x345   :  { %v596_v20 = vsel %vm477_vm8, %v593_v19, -inf }
 0x346   :  { %597 = vmax.xlane.f32.xlu0 %v596_v20 }
 0x348   :  { %v584_v21 = vpop.f32.mrf.mxu3 }
 0x349   :  { %v5835_v56 = vpop.eup %5834  ;;  %v591_v23 = vmul.f32 0.35355338, %v584_v21 }
 0x34a   :  { %v502_v24 = vsel %vm477_vm8, %v5835_v56, 0.0 }
 0x34b   :  { %503 = vadd.xlane.f32.xlu2 %v502_v24  ;;  %v594_v26 = vadd.f32 %v591_v23, %v6497_v41 }
 0x34d   :  { %v599_v27 = vsel %vm477_vm8, %v594_v26, -inf }
 0x34e   :  { %600 = vmax.xlane.f32.xlu1 %v599_v27 }
 0x350   :  { %v587_v28 = vpop.f32.mrf.mxu3 }
 0x351   :  { %v592_v29 = vmul.f32 0.35355338, %v587_v28 }
 0x353   :  { %v595_v30 = vadd.f32 %v592_v29, %v6497_v41  ;;  %v691_v29 = vpop.f32.mrf.mxu1 }
 0x355   :  { %v602_v31 = vsel %vm477_vm8, %v595_v30, -inf }
 0x356   :  { %603 = vmax.xlane.f32.xlu2 %v602_v31 }
 0x358   :  { %v781_v9 = vpop.f32.mrf.mxu3 }
 0x360   :  { %v784_v20 = vpop.f32.mrf.mxu3 }
 0x368   :  { %v787_v24 = vpop.f32.mrf.mxu3 }
 0x370   :  { %v790_v28 = vpop.f32.mrf.mxu3 }
 0x378   :  { %v793_v34 = vpop.f32.mrf.mxu3 }
 0x3b0   :  { %v498_v44 = vpop.xlane.xlu0 %497 }
 0x3b1   :  { %5836 = vrcp.f32 %v498_v44  ;;  %v5776_v44 = vld [vmem:[%s8429_s5 + $0x5] ss:$0 sm:$0xff] }
 0x3b6   :  { %v501_v45 = vpop.xlane.xlu1 %500 }
 0x3b7   :  { %v5837_v46 = vpop.eup %5836  ;;  %5838 = vrcp.f32 %v501_v45 }
 0x3b8   :  { %v508_v17 = vmul.f32 %v5837_v46, %v5831_v6  ;;  %v694_v46 = vpop.f32.mrf.mxu1 }
 0x3b9   :  { %v598_v47 = vpop.xlane.xlu0 %597 }
 0x3ba   :  { %v605_v48 = vsub.f32 %v593_v19, %v598_v47  ;;  %5290 = vmatmul.msk.f32.vlgmr.msrb.gmra.mxu2 %vm477_vm8, %v508_v17  ;;  %v788_v47 = vadd.f32 %v5776_v44, %v787_v24 }
 0x3bb   :  { %977 = vmatpush.msrb.mxu2 %v6579_v43 }
 0x3bc   :  { %v608_v50 = vmul.f32 1.442695, %v605_v48  ;;  %v692_v48 = vadd.f32 %v5775_v38, %v691_v29 }
 0x3bd   :  { %v5839_v51 = vpop.eup %5838 }
 0x3be   :  { %5840 = vpow2.f32 %v608_v50  ;;  %v504_v54 = vpop.xlane.xlu2 %503  ;;  %v509_v36 = vmul.f32 %v5839_v51, %v5833_v12  ;;  %v785_v50 = vadd.f32 %v5776_v44, %v784_v20  ;;  %v796_v51 = vpop.f32.mrf.mxu3 }
 0x3bf   :  { %5842 = vrcp.f32 %v504_v54  ;;  %v782_v54 = vadd.f32 %v5776_v44, %v781_v9 }
 0x3c1   :  { %v601_v57 = vpop.xlane.xlu1 %600 }
 0x3c2   :  { %v606_v58 = vsub.f32 %v594_v26, %v601_v57  ;;  %5291 = vmatmul.msk.f32.gmra.mxu2 %vm477_vm8, %v509_v36  ;;  %v797_v36 = vadd.f32 %v5776_v44, %v796_v51 }
 0x3c4   :  { %v5841_v60 = vpop.eup %5840  ;;  %v610_v61 = vmul.f32 1.442695, %v606_v58  ;;  %v794_v58 = vadd.f32 %v5776_v44, %v793_v34 }
 0x3c5   :  { %v5843_v35 = vpop.eup %5842  ;;  %v614_v39 = vsel %vm477_vm8, %v5841_v60, 0.0 }
 0x3c6   :  { %5844 = vpow2.f32 %v610_v61  ;;  %615 = vadd.xlane.f32.xlu0 %v614_v39  ;;  %v510_v53 = vmul.f32 %v5843_v35, %v5835_v56  ;;  %v791_v61 = vadd.f32 %v5776_v44, %v790_v28  ;;  %v695_v35 = vadd.f32 %v5775_v38, %v694_v46 }
 0x3c9   :  { %v604_v62 = vpop.xlane.xlu2 %603 }
 0x3ca   :  { %v607_v63 = vsub.f32 %v595_v30, %v604_v62  ;;  %5292 = vmatmul.msk.f32.gmra.mxu2 %vm477_vm8, %v510_v53  ;;  %v5777_v30 = vld [vmem:[%s8429_s5 + $0x4] ss:$0 sm:$0xff] }
 0x3cc   :  { %v5845_v0 = vpop.eup %5844  ;;  %v612_v1 = vmul.f32 1.442695, %v607_v63 }
 0x3cd   :  { %v617_v2 = vsel %vm477_vm8, %v5845_v0, 0.0 }
 0x3ce   :  { %5846 = vpow2.f32 %v612_v1  ;;  %618 = vadd.xlane.f32.xlu1 %v617_v2  ;;  %v5368_v2 = vld [vmem:[%s8428_s4 + $0xd8] sm:$0xff] }
 0x3d2   :  { %5318 = vmatmul.msk.f32.vlgmr.msra.gmra.mxu2 %vm120_vm1, %v6370_v52 }
 0x3d3   :  { %5765 = vmatpush.msra.mxu2 %v6579_v43 }
 0x3d4   :  { %v5847_v4 = vpop.eup %5846 }
 0x3d5   :  { %v620_v5 = vsel %vm477_vm8, %v5847_v4, 0.0 }
 0x3d6   :  { %621 = vadd.xlane.f32.xlu2 %v620_v5  ;;  %v5367_v5 = vld [vmem:[%s8428_s4 + $0xd0] sm:$0xff] }
 0x3da   :  { %5319 = vmatmul.msk.f32.gmra.mxu2 %vm120_vm1, %v6387_v3 }
 0x3e2   :  { %5320 = vmatmul.msk.f32.gmra.mxu2 %vm120_vm1, %v6398_v11 }
 0x3ea   :  { %5321 = vmatmul.msk.f32.gmra.mxu2 %vm120_vm1, %v6409_v16 }
 0x3f2   :  { %5322 = vmatmul.msk.f32.gmra.mxu2 %vm120_vm1, %v6422_v40 }
 0x3fa   :  { %5323 = vmatmul.msk.f32.gmra.mxu2 %vm120_vm1, %v6433_v59 }
 0x439   :  { %v616_v6 = vpop.xlane.xlu0 %615 }
 0x43a   :  { %5848 = vrcp.f32 %v616_v6  ;;  %v5366_v6 = vld [vmem:[%s8428_s4 + $0xc8] sm:$0xff] }
 0x43d   :  { %v537_v7 = vpop.f32.mrf.mxu2 }
 0x43e   :  { %5347 = vmatmul.msk.f32.vlgmr.msrb.gmra.mxu2 %vm426_vm6, %v537_v7 }
 0x440   :  { %v5849_v8 = vpop.eup %5848 }
 0x441   :  { %v619_v10 = vpop.xlane.xlu1 %618  ;;  %v626_v12 = vmul.f32 %v5849_v8, %v5841_v60  ;;  %v697_v60 = vpop.f32.mrf.mxu1  ;;  %v5365_v8 = vld [vmem:[%s8428_s4 + $0xc0] sm:$0xff] }
 0x442   :  { %5850 = vrcp.f32 %v619_v10  ;;  %v698_v62 = vadd.f32 %v5775_v38, %v697_v60 }
 0x443   :  { %5299 = vmatmul.msk.f32.vlgmr.msrb.gmra.mxu0 %vm477_vm8, %v626_v12 }
 0x445   :  { %v540_v13 = vpop.f32.mrf.mxu2 }
 0x446   :  { %5348 = vmatmul.msk.f32.gmra.mxu2 %vm426_vm6, %v540_v13 }
 0x448   :  { %v5851_v49 = vpop.eup %5850 }
 0x449   :  { %v622_v15 = vpop.xlane.xlu2 %621  ;;  %v627_v19 = vmul.f32 %v5851_v49, %v5845_v0  ;;  %v700_v63 = vpop.f32.mrf.mxu1 }
 0x44a   :  { %5852 = vrcp.f32 %v622_v15 }
 0x44b   :  { %5300 = vmatmul.msk.f32.gmra.mxu0 %vm477_vm8, %v627_v19 }
 0x44d   :  { %v543_v21 = vpop.f32.mrf.mxu2 }
 0x44e   :  { %5349 = vmatmul.msk.f32.gmra.mxu2 %vm426_vm6, %v543_v21 }
 0x450   :  { %v5853_v56 = vpop.eup %5852 }
 0x451   :  { %v628_v23 = vmul.f32 %v5853_v56, %v5847_v4  ;;  %v701_v4 = vadd.f32 %v5775_v38, %v700_v63  ;;  %v703_v7 = vpop.f32.mrf.mxu1 }
 0x452   :  { %v704_v9 = vadd.f32 %v5775_v38, %v703_v7 }
 0x453   :  { %5301 = vmatmul.msk.f32.gmra.mxu0 %vm477_vm8, %v628_v23 }
 0x455   :  { %v736_v26 = vpop.f32.mrf.mxu2 }
 0x456   :  { %v737_v17 = vadd.f32 %v5777_v30, %v736_v26 }
 0x459   :  { %v706_v10 = vpop.f32.mrf.mxu1 }
 0x45a   :  { %v707_v12 = vadd.f32 %v5775_v38, %v706_v10 }
 0x45d   :  { %v739_v27 = vpop.f32.mrf.mxu2 }
 0x45e   :  { %v740_v37 = vadd.f32 %v5777_v30, %v739_v27 }
 0x465   :  { %v742_v31 = vpop.f32.mrf.mxu2 }
 0x466   :  { %v743_v32 = vadd.f32 %v5777_v30, %v742_v31 }
 0x468   :  { %5335 = vmatpush.xpose.msk.msra.mxu0 %vm426_vm6, %v743_v32 }
 0x46c   :  { %5336 = vmatpush.xpose.msk.msra.mxu0 %vm426_vm6, %v740_v37 }
 0x46d   :  { %v745_v45 = vpop.f32.mrf.mxu2 }
 0x46e   :  { %v746_v1 = vadd.f32 %v5777_v30, %v745_v45 }
 0x470   :  { %5337 = vmatpush.xpose.msk.msra.mxu0 %vm426_vm6, %v737_v17 }
 0x473   :  { %5338 = vmatmul.msk.f32.vlgmr.msra.gmra.mxu0 %vm426_vm6, %v692_v48 }
 0x474   :  { %905 = vmatpush.msrb.mxu0 %v788_v47 }
 0x475   :  { %v748_v57 = vpop.f32.mrf.mxu2 }
 0x476   :  { %906 = vmatpush.msrb.mxu0 %v785_v50  ;;  %v749_v0 = vadd.f32 %v5777_v30, %v748_v57 }
 0x478   :  { %907 = vmatpush.msrb.mxu0 %v782_v54 }
 0x47a   :  { %1093 = vmatpush.msra.mxu0 %v797_v36 }
 0x47b   :  { %5339 = vmatmul.msk.f32.gmra.mxu0 %vm426_vm6, %v695_v35 }
 0x47c   :  { %1094 = vmatpush.msra.mxu0 %v794_v58 }
 0x47d   :  { %v751_v39 = vpop.f32.mrf.mxu2 }
 0x47e   :  { %1095 = vmatpush.msra.mxu0 %v791_v61  ;;  %v752_v53 = vadd.f32 %v5777_v30, %v751_v39 }
 0x480   :  { %5350 = vmatpush.xpose.msk.msra.mxu3 %vm426_vm6, %v752_v53 }
 0x483   :  { %5340 = vmatmul.msk.f32.gmra.mxu0 %vm426_vm6, %v698_v62 }
 0x484   :  { %5351 = vmatpush.xpose.msk.msra.mxu3 %vm426_vm6, %v749_v0 }
 0x488   :  { %5352 = vmatpush.xpose.msk.msra.mxu3 %vm426_vm6, %v746_v1 }
 0x48b   :  { %5353 = vmatmul.msk.f32.vlgmr.msra.gmra.mxu3 %vm426_vm6, %v701_v4 }
 0x48c   :  { %1198 = vmatpush.msrb.mxu3 %v5368_v2 }
 0x48e   :  { %1199 = vmatpush.msrb.mxu3 %v5367_v5 }
 0x490   :  { %1200 = vmatpush.msrb.mxu3 %v5366_v6 }
 0x492   :  { %1201 = vmatpush.msrb.mxu3 %v5365_v8 }
 0x493   :  { %5354 = vmatmul.msk.f32.gmra.mxu3 %vm426_vm6, %v704_v9 }
 0x49b   :  { %5355 = vmatmul.msk.f32.gmra.mxu3 %vm426_vm6, %v707_v12 }
 0x4a3   :  { %5370 = vmatmul.msk.f32.vlgmr.msrb.gmra.mxu3 %vm120_vm1, %v6370_v52 }
 0x4ab   :  { %5371 = vmatmul.msk.f32.gmra.mxu3 %vm120_vm1, %v6387_v3 }
 0x4b3   :  { %5372 = vmatmul.msk.f32.gmra.mxu3 %vm120_vm1, %v6398_v11 }
 0x4bb   :  { %5373 = vmatmul.msk.f32.gmra.mxu3 %vm120_vm1, %v6409_v16 }
 0x4c0   :  { %v6630_v13 = vpop.f32.mrf.mxu0 }
 0x4c3   :  { %5374 = vmatmul.msk.f32.gmra.mxu3 %vm120_vm1, %v6422_v40 }
 0x4c8   :  { %v658_v49 = vpop.f32.mrf.mxu0 }
 0x4c9   :  { %5363 = vmatmul.msk.f32.vlgmr.msra.gmra.mxu2 %vm426_vm6, %v658_v49 }
 0x4cb   :  { %5375 = vmatmul.msk.f32.gmra.mxu3 %vm120_vm1, %v6433_v59 }
 0x4d0   :  { %v661_v15 = vpop.f32.mrf.mxu0 }
 0x4d1   :  { %5364 = vmatmul.msk.f32.gmra.mxu2 %vm426_vm6, %v661_v15 }
 0x4f0   :  { %v835_v19 = vpop.f32.mrf.mxu0 }
 0x4f1   :  { %v844_v20 = vmul.f32 0.35355338, %v835_v19 }
 0x4f3   :  { %v847_v21 = vadd.f32 %v844_v20, %v6497_v41 }
 0x4f5   :  { %v850_v56 = vsel %vm477_vm8, %v847_v21, -inf }
 0x4f6   :  { %851 = vmax.xlane.f32.xlu0 %v850_v56 }
 0x4f8   :  { %v838_v23 = vpop.f32.mrf.mxu0 }
 0x4f9   :  { %v845_v24 = vmul.f32 0.35355338, %v838_v23 }
 0x4fb   :  { %v848_v26 = vadd.f32 %v845_v24, %v6497_v41 }
 0x4fd   :  { %v853_v27 = vsel %vm477_vm8, %v848_v26, -inf }
 0x4fe   :  { %854 = vmax.xlane.f32.xlu1 %v853_v27 }
 0x500   :  { %v841_v28 = vpop.f32.mrf.mxu0 }
 0x501   :  { %v846_v29 = vmul.f32 0.35355338, %v841_v28 }
 0x503   :  { %v849_v30 = vadd.f32 %v846_v29, %v6497_v41 }
 0x505   :  { %v856_v31 = vsel %vm477_vm8, %v849_v30, -inf }
 0x506   :  { %857 = vmax.xlane.f32.xlu2 %v856_v31 }
 0x50e   :  { %v1023_v32 = vpop.f32.mrf.mxu3 }
 0x50f   :  { %v1032_v34 = vmul.f32 0.35355338, %v1023_v32 }
 0x511   :  { %v1035_v37 = vadd.f32 %v1032_v34, %v6497_v41 }
 0x513   :  { %v1038_v38 = vsel %vm477_vm8, %v1035_v37, -inf }
 0x514   :  { %1039 = vmax.xlane.f32.xlu0 %v1038_v38 }
 0x516   :  { %v1026_v44 = vpop.f32.mrf.mxu3 }
 0x517   :  { %v1033_v45 = vmul.f32 0.35355338, %v1026_v44  ;;  %v5378_v44 = vld [vmem:[%s8428_s4 + $0xf0] sm:$0xff] }
 0x519   :  { %v1036_v46 = vadd.f32 %v1033_v45, %v6497_v41  ;;  %v5377_v45 = vld [vmem:[%s8428_s4 + $0xe8] sm:$0xff] }
 0x51b   :  { %v1041_v17 = vsel %vm477_vm8, %v1036_v46, -inf }
 0x51c   :  { %1042 = vmax.xlane.f32.xlu1 %v1041_v17 }
 0x51e   :  { %v1029_v47 = vpop.f32.mrf.mxu3 }
 0x51f   :  { %v1034_v48 = vmul.f32 0.35355338, %v1029_v47 }
 0x521   :  { %v1037_v50 = vadd.f32 %v1034_v48, %v6497_v41 }
 0x523   :  { %v1044_v51 = vsel %vm477_vm8, %v1037_v50, -inf }
 0x524   :  { %1045 = vmax.xlane.f32.xlu2 %v1044_v51 }
 0x569   :  { %v852_v54 = vpop.xlane.xlu0 %851 }
 0x56a   :  { %v859_v36 = vsub.f32 %v847_v21, %v852_v54 }
 0x56c   :  { %v862_v57 = vmul.f32 1.442695, %v859_v36 }
 0x56e   :  { %5854 = vpow2.f32 %v862_v57 }
 0x571   :  { %v855_v58 = vpop.xlane.xlu1 %854 }
 0x572   :  { %v860_v60 = vsub.f32 %v848_v26, %v855_v58 }
 0x574   :  { %v5855_v61 = vpop.eup %5854  ;;  %v864_v35 = vmul.f32 1.442695, %v860_v60  ;;  %v799_v60 = vld [vmem:[%s8430_s6 + $0x8] sm:$0xff] }
 0x575   :  { %v868_v39 = vsel %vm477_vm8, %v5855_v61, 0.0  ;;  %942 = vmatpush.msrb.mxu1 %v799_v60 }
 0x576   :  { %869 = vadd.xlane.f32.xlu0 %v868_v39  ;;  %5856 = vpow2.f32 %v864_v35 }
 0x577   :  { %1130 = vmatpush.msra.mxu1 %v799_v60 }
 0x579   :  { %v858_v53 = vpop.xlane.xlu2 %857 }
 0x57a   :  { %v861_v62 = vsub.f32 %v849_v30, %v858_v53  ;;  %v5390_v53 = vld [vmem:[%s8428_s4 + $0x118] sm:$0xff] }
 0x57c   :  { %v5857_v63 = vpop.eup %5856  ;;  %v866_v0 = vmul.f32 1.442695, %v861_v62 }
 0x57d   :  { %v871_v1 = vsel %vm477_vm8, %v5857_v63, 0.0 }
 0x57e   :  { %5858 = vpow2.f32 %v866_v0  ;;  %872 = vadd.xlane.f32.xlu1 %v871_v1  ;;  %v5387_v0 = vld [vmem:[%s8428_s4 + $0x100] sm:$0xff] }
 0x584   :  { %v5859_v2 = vpop.eup %5858 }
 0x585   :  { %v874_v4 = vsel %vm477_vm8, %v5859_v2, 0.0 }
 0x586   :  { %875 = vadd.xlane.f32.xlu2 %v874_v4 }
 0x587   :  { %v1040_v5 = vpop.xlane.xlu0 %1039 }
 0x588   :  { %v1047_v6 = vsub.f32 %v1035_v37, %v1040_v5  ;;  %v5379_v37 = vld [vmem:[%s8428_s4 + $0xf8] sm:$0xff] }
 0x58a   :  { %v1050_v7 = vmul.f32 1.442695, %v1047_v6  ;;  %v1203_v6 = vpop.f32.mrf.mxu3 }
 0x58c   :  { %5860 = vpow2.f32 %v1050_v7  ;;  %v5779_v7 = vld [vmem:[%s8429_s5 + $0x7] ss:$0 sm:$0xff] }
 0x58f   :  { %v1043_v8 = vpop.xlane.xlu1 %1042 }
 0x590   :  { %v1048_v9 = vsub.f32 %v1036_v46, %v1043_v8  ;;  %v5376_v46 = vld [vmem:[%s8428_s4 + $0xe0] sm:$0xff] }
 0x592   :  { %v5861_v10 = vpop.eup %5860  ;;  %v1052_v12 = vmul.f32 1.442695, %v1048_v9 }
 0x593   :  { %v1056_v49 = vsel %vm477_vm8, %v5861_v10, 0.0 }
 0x594   :  { %5862 = vpow2.f32 %v1052_v12  ;;  %1057 = vadd.xlane.f32.xlu0 %v1056_v49  ;;  %v1206_v49 = vpop.f32.mrf.mxu3 }
 0x597   :  { %v1046_v15 = vpop.xlane.xlu2 %1045 }
 0x598   :  { %v1049_v19 = vsub.f32 %v1037_v50, %v1046_v15 }
 0x59a   :  { %v5863_v20 = vpop.eup %5862  ;;  %v1054_v21 = vmul.f32 1.442695, %v1049_v19 }
 0x59b   :  { %v1059_v56 = vsel %vm477_vm8, %v5863_v20, 0.0 }
 0x59c   :  { %5864 = vpow2.f32 %v1054_v21  ;;  %1060 = vadd.xlane.f32.xlu1 %v1059_v56  ;;  %v1209_v21 = vpop.f32.mrf.mxu3 }
 0x5a2   :  { %v5865_v23 = vpop.eup %5864 }
 0x5a3   :  { %v1062_v24 = vsel %vm477_vm8, %v5865_v23, 0.0 }
 0x5a4   :  { %1063 = vadd.xlane.f32.xlu2 %v1062_v24 }
 0x5e9   :  { %v870_v26 = vpop.xlane.xlu0 %869 }
 0x5ea   :  { %5866 = vrcp.f32 %v870_v26 }
 0x5f0   :  { %v5867_v27 = vpop.eup %5866 }
 0x5f1   :  { %v880_v28 = vmul.f32 %v5867_v27, %v5855_v61  ;;  %v873_v29 = vpop.xlane.xlu1 %872  ;;  %v1212_v27 = vpop.f32.mrf.mxu3 }
 0x5f2   :  { %5868 = vrcp.f32 %v873_v29 }
 0x5f3   :  { %5341 = vmatmul.msk.f32.vlgmr.msrb.gmra.mxu0 %vm477_vm8, %v880_v28 }
 0x5f4   :  { %1243 = vmatpush.msrb.mxu0 %v5379_v37 }
 0x5f6   :  { %1244 = vmatpush.msrb.mxu0 %v5378_v44 }
 0x5f8   :  { %v5869_v30 = vpop.eup %5868  ;;  %1245 = vmatpush.msrb.mxu0 %v5377_v45 }
 0x5f9   :  { %v876_v31 = vpop.xlane.xlu2 %875  ;;  %v881_v32 = vmul.f32 %v5869_v30, %v5857_v63  ;;  %v5389_v63 = vld [vmem:[%s8428_s4 + $0x110] sm:$0xff]  ;;  %v5436_v30 = vld [vmem:[%s8428_s4 + $0x158] sm:$0xff]  ;;  %v1215_v37 = vpop.f32.mrf.mxu3 }
 0x5fa   :  { %5870 = vrcp.f32 %v876_v31  ;;  %1246 = vmatpush.msrb.mxu0 %v5376_v46 }
 0x5fb   :  { %5342 = vmatmul.msk.f32.gmra.mxu0 %vm477_vm8, %v881_v32  ;;  %v5435_v32 = vld [vmem:[%s8428_s4 + $0x150] sm:$0xff] }
 0x600   :  { %v5871_v34 = vpop.eup %5870 }
 0x601   :  { %v882_v38 = vmul.f32 %v5871_v34, %v5859_v2  ;;  %v5434_v34 = vld [vmem:[%s8428_s4 + $0x148] sm:$0xff]  ;;  %v1218_v45 = vpop.f32.mrf.mxu3 }
 0x603   :  { %5343 = vmatmul.msk.f32.gmra.mxu0 %vm477_vm8, %v882_v38  ;;  %v5433_v38 = vld [vmem:[%s8428_s4 + $0x140] sm:$0xff] }
 0x607   :  { %v1058_v17 = vpop.xlane.xlu0 %1057 }
 0x608   :  { %5872 = vrcp.f32 %v1058_v17 }
 0x60e   :  { %v5873_v47 = vpop.eup %5872 }
 0x60f   :  { %v1068_v48 = vmul.f32 %v5873_v47, %v5861_v10  ;;  %v1061_v50 = vpop.xlane.xlu1 %1060 }
 0x610   :  { %5874 = vrcp.f32 %v1061_v50 }
 0x611   :  { %5356 = vmatmul.msk.f32.vlgmr.msra.gmra.mxu0 %vm477_vm8, %v1068_v48 }
 0x616   :  { %v5875_v51 = vpop.eup %5874 }
 0x617   :  { %v1064_v54 = vpop.xlane.xlu2 %1063  ;;  %v1069_v36 = vmul.f32 %v5875_v51, %v5863_v20 }
 0x618   :  { %5876 = vrcp.f32 %v1064_v54  ;;  %v6772_v54 = vpop.f32.mrf.mxu2 }
 0x619   :  { %5357 = vmatmul.msk.f32.gmra.mxu0 %vm477_vm8, %v1069_v36 }
 0x61e   :  { %v5877_v57 = vpop.eup %5876 }
 0x61f   :  { %v1070_v58 = vmul.f32 %v5877_v57, %v5865_v23 }
 0x620   :  { %v6778_v57 = vpop.f32.mrf.mxu2 }
 0x621   :  { %5358 = vmatmul.msk.f32.gmra.mxu0 %vm477_vm8, %v1070_v58 }
 0x629   :  { %5381 = vmatmul.msk.f32.vlgmr.msrb.gmra.mxu0 %vm120_vm1, %v6370_v52 }
 0x631   :  { %5382 = vmatmul.msk.f32.gmra.mxu0 %vm120_vm1, %v6387_v3 }
 0x639   :  { %5383 = vmatmul.msk.f32.gmra.mxu0 %vm120_vm1, %v6398_v11 }
 0x641   :  { %5384 = vmatmul.msk.f32.gmra.mxu0 %vm120_vm1, %v6409_v16 }
 0x649   :  { %5385 = vmatmul.msk.f32.gmra.mxu0 %vm120_vm1, %v6422_v40 }
 0x651   :  { %5386 = vmatmul.msk.f32.gmra.mxu0 %vm120_vm1, %v6433_v59 }
 0x670   :  { %v909_v61 = vpop.f32.mrf.mxu0 }
 0x671   :  { %5344 = vmatmul.msk.f32.vlgmr.msrb.gmra.mxu1 %vm426_vm6, %v909_v61  ;;  %v6782_v61 = vpop.f32.mrf.mxu2 }
 0x672   :  { %1165 = vmatpush.msrb.mxu1 %v6579_v43  ;;  %v5388_v43 = vld [vmem:[%s8428_s4 + $0x108] sm:$0xff] }
 0x678   :  { %v912_v35 = vpop.f32.mrf.mxu0 }
 0x679   :  { %5345 = vmatmul.msk.f32.gmra.mxu1 %vm426_vm6, %v912_v35 }
 0x680   :  { %v915_v39 = vpop.f32.mrf.mxu0 }
 0x681   :  { %5346 = vmatmul.msk.f32.gmra.mxu1 %vm426_vm6, %v915_v39  ;;  %v6784_v39 = vpop.f32.mrf.mxu2 }
 0x68e   :  { %v1097_v62 = vpop.f32.mrf.mxu0 }
 0x68f   :  { %5359 = vmatmul.msk.f32.vlgmr.msra.gmra.mxu1 %vm426_vm6, %v1097_v62 }
 0x690   :  { %1288 = vmatpush.msra.mxu1 %v5390_v53  ;;  %v5780_v53 = vld [vmem:[%s8429_s5 + $0x8] ss:$0 sm:$0xff] }
 0x692   :  { %1289 = vmatpush.msra.mxu1 %v5389_v63 }
 0x694   :  { %1290 = vmatpush.msra.mxu1 %v5388_v43  ;;  %v6789_v43 = vpop.f32.mrf.mxu2 }
 0x696   :  { %v1100_v1 = vpop.f32.mrf.mxu0  ;;  %1291 = vmatpush.msra.mxu1 %v5387_v0 }
 0x697   :  { %5360 = vmatmul.msk.f32.gmra.mxu1 %vm426_vm6, %v1100_v1 }
 0x69e   :  { %v1103_v2 = vpop.f32.mrf.mxu0 }
 0x69f   :  { %5361 = vmatmul.msk.f32.gmra.mxu1 %vm426_vm6, %v1103_v2 }
 0x6a6   :  { %v1248_v4 = vpop.f32.mrf.mxu0 }
 0x6a7   :  { %5362 = vmatmul.msk.f32.vlgmr.msrb.gmra.mxu1 %vm426_vm6, %v6630_v13  ;;  %v5778_v13 = vld [vmem:[%s8429_s5 + $0x6] ss:$0 sm:$0xff]  ;;  %v1249_v15 = vadd.f32 %v5779_v7, %v1248_v4 }
 0x6a8   :  { %v1204_v19 = vadd.f32 %v5778_v13, %v1203_v6  ;;  %v1207_v56 = vadd.f32 %v5778_v13, %v1206_v49  ;;  %v1210_v26 = vadd.f32 %v5778_v13, %v1209_v21  ;;  %v1213_v31 = vadd.f32 %v5778_v13, %v1212_v27 }
 0x6a9   :  { %v1216_v44 = vadd.f32 %v5778_v13, %v1215_v37  ;;  %v1219_v46 = vadd.f32 %v5778_v13, %v1218_v45  ;;  %v6802_v37 = vld [vmem:[%s8429_s5 + $0xa] ss:$0 sm:$0xff] }
 0x6ae   :  { %v1251_v5 = vpop.f32.mrf.mxu0 }
 0x6af   :  { %5392 = vmatmul.msk.f32.vlgmr.msra.gmra.mxu1 %vm120_vm1, %v6370_v52  ;;  %v1252_v10 = vadd.f32 %v5779_v7, %v1251_v5 }
 0x6b6   :  { %v1254_v8 = vpop.f32.mrf.mxu0 }
 0x6b7   :  { %v1255_v9 = vadd.f32 %v5779_v7, %v1254_v8  ;;  %5393 = vmatmul.msk.f32.gmra.mxu1 %vm120_vm1, %v6387_v3 }
 0x6b9   :  { %5398 = vmatpush.xpose.msk.msrb.mxu2 %vm426_vm6, %v1255_v9 }
 0x6bd   :  { %5399 = vmatpush.xpose.msk.msrb.mxu2 %vm426_vm6, %v1252_v10 }
 0x6be   :  { %v1257_v12 = vpop.f32.mrf.mxu0 }
 0x6bf   :  { %5394 = vmatmul.msk.f32.gmra.mxu1 %vm120_vm1, %v6398_v11  ;;  %v1258_v29 = vadd.f32 %v5779_v7, %v1257_v12 }
 0x6c1   :  { %5400 = vmatpush.xpose.msk.msrb.mxu2 %vm426_vm6, %v1249_v15 }
 0x6c4   :  { %5401 = vmatmul.msk.f32.vlgmr.msrb.gmra.mxu2 %vm426_vm6, %v1204_v19 }
 0x6c6   :  { %v1260_v20 = vpop.f32.mrf.mxu0 }
 0x6c7   :  { %5395 = vmatmul.msk.f32.gmra.mxu1 %vm120_vm1, %v6409_v16  ;;  %v1261_v28 = vadd.f32 %v5779_v7, %v1260_v20 }
 0x6cc   :  { %5402 = vmatmul.msk.f32.gmra.mxu2 %vm426_vm6, %v1207_v56 }
 0x6ce   :  { %v1263_v23 = vpop.f32.mrf.mxu0 }
 0x6cf   :  { %v1264_v24 = vadd.f32 %v5779_v7, %v1263_v23  ;;  %5396 = vmatmul.msk.f32.gmra.mxu1 %vm120_vm1, %v6422_v40 }
 0x6d1   :  { %5410 = vmatpush.xpose.msk.msra.mxu0 %vm426_vm6, %v1264_v24 }
 0x6d4   :  { %5403 = vmatmul.msk.f32.gmra.mxu2 %vm426_vm6, %v1210_v26 }
 0x6d5   :  { %5411 = vmatpush.xpose.msk.msra.mxu0 %vm426_vm6, %v1261_v28 }
 0x6d7   :  { %5397 = vmatmul.msk.f32.gmra.mxu1 %vm120_vm1, %v6433_v59 }
 0x6d9   :  { %5412 = vmatpush.xpose.msk.msra.mxu0 %vm426_vm6, %v1258_v29 }
 0x6dc   :  { %5413 = vmatmul.msk.f32.vlgmr.msra.gmra.mxu0 %vm426_vm6, %v1213_v31 }
 0x6dd   :  { %1691 = vmatpush.msrb.mxu0 %v5436_v30 }
 0x6df   :  { %1692 = vmatpush.msrb.mxu0 %v5435_v32 }
 0x6e1   :  { %1693 = vmatpush.msrb.mxu0 %v5434_v34 }
 0x6e3   :  { %1694 = vmatpush.msrb.mxu0 %v5433_v38 }
 0x6e4   :  { %5414 = vmatmul.msk.f32.gmra.mxu0 %vm426_vm6, %v1216_v44 }
 0x6ec   :  { %5415 = vmatmul.msk.f32.gmra.mxu0 %vm426_vm6, %v1219_v46 }
 0x6ee   :  { %v6752_v17 = vpop.f32.mrf.mxu1 }
 0x6f4   :  { %5438 = vmatmul.msk.f32.vlgmr.msrb.gmra.mxu0 %vm120_vm1, %v6370_v52 }
 0x6f6   :  { %v6756_v47 = vpop.f32.mrf.mxu1 }
 0x6fc   :  { %5439 = vmatmul.msk.f32.gmra.mxu0 %vm120_vm1, %v6387_v3 }
 0x6fe   :  { %v6760_v48 = vpop.f32.mrf.mxu1 }
 0x704   :  { %5440 = vmatmul.msk.f32.gmra.mxu0 %vm120_vm1, %v6398_v11 }
 0x70c   :  { %v6764_v50 = vpop.f32.mrf.mxu1  ;;  %5441 = vmatmul.msk.f32.gmra.mxu0 %vm120_vm1, %v6409_v16 }
 0x714   :  { %v6768_v51 = vpop.f32.mrf.mxu1  ;;  %5442 = vmatmul.msk.f32.gmra.mxu0 %vm120_vm1, %v6422_v40 }
 0x71c   :  { %v6774_v36 = vpop.f32.mrf.mxu1  ;;  %5443 = vmatmul.msk.f32.gmra.mxu0 %vm120_vm1, %v6433_v59 }
 0x724   :  { %v6780_v58 = vpop.f32.mrf.mxu1 }
 0x72c   :  { %v1293_v60 = vpop.f32.mrf.mxu1 }
 0x72d   :  { %v1294_v1 = vadd.f32 %v5780_v53, %v1293_v60 }
 0x734   :  { %v1296_v35 = vpop.f32.mrf.mxu1 }
 0x735   :  { %v1297_v0 = vadd.f32 %v5780_v53, %v1296_v35 }
 0x73c   :  { %v1299_v62 = vpop.f32.mrf.mxu1 }
 0x73d   :  { %v1300_v63 = vadd.f32 %v5780_v53, %v1299_v62 }
 0x73f   :  { %1417 = vmatpush.msra.mxu2 %v1300_v63 }
 0x741   :  { %1418 = vmatpush.msra.mxu2 %v1297_v0 }
 0x743   :  { %1419 = vmatpush.msra.mxu2 %v1294_v1 }
 0x744   :  { %v1302_v2 = vpop.f32.mrf.mxu1 }
 0x745   :  { %v1303_v56 = vadd.f32 %v5780_v53, %v1302_v2 }
 0x747   :  { %v1347_v4 = vpop.f32.mrf.mxu2 }
 0x748   :  { %v1356_v5 = vmul.f32 0.35355338, %v1347_v4 }
 0x74a   :  { %v1359_v6 = vadd.f32 %v1356_v5, %v6497_v41 }
 0x74c   :  { %v1305_v7 = vpop.f32.mrf.mxu1  ;;  %v1362_v8 = vsel %vm477_vm8, %v1359_v6, -inf }
 0x74d   :  { %1363 = vmax.xlane.f32.xlu0 %v1362_v8  ;;  %v1306_v19 = vadd.f32 %v5780_v53, %v1305_v7 }
 0x74f   :  { %v1350_v9 = vpop.f32.mrf.mxu2 }
 0x750   :  { %v1357_v10 = vmul.f32 0.35355338, %v1350_v9 }
 0x752   :  { %v1360_v13 = vadd.f32 %v1357_v10, %v6497_v41 }
 0x754   :  { %v1308_v12 = vpop.f32.mrf.mxu1  ;;  %v1365_v49 = vsel %vm477_vm8, %v1360_v13, -inf }
 0x755   :  { %v1309_v15 = vadd.f32 %v5780_v53, %v1308_v12  ;;  %1366 = vmax.xlane.f32.xlu1 %v1365_v49 }
 0x757   :  { %v1353_v20 = vpop.f32.mrf.mxu2  ;;  %1573 = vmatpush.msrb.mxu1 %v1309_v15 }
 0x758   :  { %v1358_v21 = vmul.f32 0.35355338, %v1353_v20 }
 0x759   :  { %v1503_v23 = vpop.f32.mrf.mxu0  ;;  %1574 = vmatpush.msrb.mxu1 %v1306_v19 }
 0x75a   :  { %v1361_v24 = vadd.f32 %v1358_v21, %v6497_v41  ;;  %v1512_v2 = vmul.f32 0.35355338, %v1503_v23 }
 0x75b   :  { %1575 = vmatpush.msrb.mxu1 %v1303_v56 }
 0x75c   :  { %v1368_v26 = vsel %vm477_vm8, %v1361_v24, -inf  ;;  %v1515_v7 = vadd.f32 %v1512_v2, %v6497_v41 }
 0x75d   :  { %1369 = vmax.xlane.f32.xlu2 %v1368_v26 }
 0x761   :  { %v1506_v27 = vpop.f32.mrf.mxu0 }
 0x762   :  { %v1513_v12 = vmul.f32 0.35355338, %v1506_v27 }
 0x769   :  { %v1509_v28 = vpop.f32.mrf.mxu0 }
 0x76a   :  { %v1514_v19 = vmul.f32 0.35355338, %v1509_v28 }
 0x76c   :  { %v1517_v56 = vadd.f32 %v1514_v19, %v6497_v41  ;;  %v5446_v19 = vld [vmem:[%s8428_s4 + $0x170] sm:$0xff] }
 0x76e   :  { %v1524_v23 = vsel %vm477_vm8, %v1517_v56, -inf }
 0x771   :  { %v6797_v29 = vpop.f32.mrf.mxu0 }
 0x779   :  { %v1699_v30 = vpop.f32.mrf.mxu0 }
 0x781   :  { %v1702_v31 = vpop.f32.mrf.mxu0 }
 0x789   :  { %v1705_v32 = vpop.f32.mrf.mxu0 }
 0x78a   :  { %v1706_v46 = vadd.f32 %v6802_v37, %v1705_v32 }
 0x791   :  { %v1708_v34 = vpop.f32.mrf.mxu0 }
 0x792   :  { %v1709_v45 = vadd.f32 %v6802_v37, %v1708_v34 }
 0x799   :  { %v1711_v38 = vpop.f32.mrf.mxu0 }
 0x79a   :  { %v1712_v44 = vadd.f32 %v6802_v37, %v1711_v38  ;;  %v1703_v38 = vadd.f32 %v6802_v37, %v1702_v31 }
 0x79c   :  { %5467 = vmatpush.xpose.msk.msra.mxu0 %vm426_vm6, %v1712_v44 }
 0x7a0   :  { %5468 = vmatpush.xpose.msk.msra.mxu0 %vm426_vm6, %v1709_v45 }
 0x7a4   :  { %5469 = vmatpush.xpose.msk.msra.mxu0 %vm426_vm6, %v1706_v46  ;;  %v1700_v46 = vadd.f32 %v6802_v37, %v1699_v30 }
 0x7c0   :  { %v1364_v60 = vpop.xlane.xlu0 %1363 }
 0x7c1   :  { %v1371_v35 = vsub.f32 %v1359_v6, %v1364_v60  ;;  %v1518_v6 = vsel %vm477_vm8, %v1515_v7, -inf }
 0x7c3   :  { %v1374_v53 = vmul.f32 1.442695, %v1371_v35 }
 0x7c5   :  { %5878 = vpow2.f32 %v1374_v53 }
 0x7c8   :  { %v1367_v62 = vpop.xlane.xlu1 %1366 }
 0x7c9   :  { %v1372_v63 = vsub.f32 %v1360_v13, %v1367_v62  ;;  %v1516_v13 = vadd.f32 %v1513_v12, %v6497_v41  ;;  %v5425_v12 = vld [vmem:[%s8428_s4 + $0x138] sm:$0xff] }
 0x7cb   :  { %v5879_v0 = vpop.eup %5878  ;;  %v1376_v1 = vmul.f32 1.442695, %v1372_v63  ;;  %v1521_v20 = vsel %vm477_vm8, %v1516_v13, -inf  ;;  %v1697_v63 = vadd.f32 %v6802_v37, %v6797_v29 }
 0x7cc   :  { %v1380_v4 = vsel %vm477_vm8, %v5879_v0, 0.0 }
 0x7cd   :  { %5880 = vpow2.f32 %v1376_v1  ;;  %1381 = vadd.xlane.f32.xlu0 %v1380_v4 }
 0x7d0   :  { %v1370_v5 = vpop.xlane.xlu2 %1369 }
 0x7d1   :  { %v1373_v8 = vsub.f32 %v1361_v24, %v1370_v5  ;;  %v1311_v24 = vld [vmem:[%s8430_s6 + $0x10] sm:$0xff] }
 0x7d2   :  { %1610 = vmatpush.msrb.mxu2 %v1311_v24  ;;  %1454 = vmatpush.msra.mxu3 %v1311_v24 }
 0x7d3   :  { %v5881_v9 = vpop.eup %5880  ;;  %v1378_v10 = vmul.f32 1.442695, %v1373_v8 }
 0x7d4   :  { %v1383_v49 = vsel %vm477_vm8, %v5881_v9, 0.0  ;;  %1646 = vmatpush.msrb.mxu3 %v5425_v12 }
 0x7d5   :  { %5882 = vpow2.f32 %v1378_v10  ;;  %1519 = vmax.xlane.f32.xlu0 %v1518_v6  ;;  %1384 = vadd.xlane.f32.xlu1 %v1383_v49  ;;  %v5424_v6 = vld [vmem:[%s8428_s4 + $0x130] sm:$0xff]  ;;  %v5423_v49 = vld [vmem:[%s8428_s4 + $0x128] sm:$0xff] }
 0x7d6   :  { %1647 = vmatpush.msrb.mxu3 %v5424_v6 }
 0x7d8   :  { %1648 = vmatpush.msrb.mxu3 %v5423_v49 }
 0x7db   :  { %v5883_v15 = vpop.eup %5882 }
 0x7dc   :  { %v1386_v21 = vsel %vm477_vm8, %v5883_v15, 0.0 }
 0x7dd   :  { %1522 = vmax.xlane.f32.xlu1 %v1521_v20  ;;  %1387 = vadd.xlane.f32.xlu2 %v1386_v21  ;;  %v5445_v20 = vld [vmem:[%s8428_s4 + $0x168] sm:$0xff]  ;;  %v5444_v21 = vld [vmem:[%s8428_s4 + $0x160] sm:$0xff] }
 0x7e5   :  { %1525 = vmax.xlane.f32.xlu2 %v1524_v23 }
 0x840   :  { %v1382_v26 = vpop.xlane.xlu0 %1381 }
 0x841   :  { %5884 = vrcp.f32 %v1382_v26 }
 0x847   :  { %v5885_v27 = vpop.eup %5884 }
 0x848   :  { %v1392_v28 = vmul.f32 %v5885_v27, %v5879_v0  ;;  %v1520_v32 = vpop.xlane.xlu0 %1519  ;;  %v1385_v34 = vpop.xlane.xlu1 %1384 }
 0x849   :  { %v1527_v44 = vsub.f32 %v1515_v7, %v1520_v32  ;;  %5886 = vrcp.f32 %v1385_v34 }
 0x84a   :  { %5404 = vmatmul.msk.f32.vlgmr.msra.gmra.mxu2 %vm477_vm8, %v1392_v28 }
 0x84b   :  { %v1530_v45 = vmul.f32 1.442695, %v1527_v44  ;;  %5455 = vmatpush.xpose.msk.msra.mxu2 %vm426_vm6, %v1703_v38 }
 0x84d   :  { %5888 = vpow2.f32 %v1530_v45 }
 0x84f   :  { %v5887_v60 = vpop.eup %5886  ;;  %5456 = vmatpush.xpose.msk.msra.mxu2 %vm426_vm6, %v1700_v46 }
 0x850   :  { %v1523_v35 = vpop.xlane.xlu1 %1522  ;;  %v1388_v53 = vpop.xlane.xlu2 %1387  ;;  %v1393_v62 = vmul.f32 %v5887_v60, %v5881_v9 }
 0x851   :  { %v1528_v31 = vsub.f32 %v1516_v13, %v1523_v35  ;;  %5890 = vrcp.f32 %v1388_v53  ;;  %v5447_v13 = vld [vmem:[%s8428_s4 + $0x178] sm:$0xff]  ;;  %v5783_v35 = vld [vmem:[%s8429_s5 + $0x9] ss:$0 sm:$0xff] }
 0x852   :  { %5405 = vmatmul.msk.f32.gmra.mxu2 %vm477_vm8, %v1393_v62  ;;  %1736 = vmatpush.msra.mxu1 %v5447_v13 }
 0x853   :  { %v5889_v0 = vpop.eup %5888  ;;  %v1532_v1 = vmul.f32 1.442695, %v1528_v31  ;;  %5457 = vmatpush.xpose.msk.msra.mxu2 %vm426_vm6, %v1697_v63 }
 0x854   :  { %v1536_v30 = vsel %vm477_vm8, %v5889_v0, 0.0  ;;  %1737 = vmatpush.msra.mxu1 %v5446_v19 }
 0x855   :  { %5892 = vpow2.f32 %v1532_v1  ;;  %1537 = vadd.xlane.f32.xlu0 %v1536_v30  ;;  %v5782_v1 = vld [vmem:[%s8429_s5 + $0xb] ss:$0 sm:$0xff] }
 0x856   :  { %1738 = vmatpush.msra.mxu1 %v5445_v20 }
 0x857   :  { %v5891_v2 = vpop.eup %5890 }
 0x858   :  { %v1526_v4 = vpop.xlane.xlu2 %1525  ;;  %v1394_v5 = vmul.f32 %v5891_v2, %v5883_v15  ;;  %v5422_v15 = vld [vmem:[%s8428_s4 + $0x120] sm:$0xff]  ;;  %1739 = vmatpush.msra.mxu1 %v5444_v21 }
 0x859   :  { %v1529_v7 = vsub.f32 %v1517_v56, %v1526_v4  ;;  %1649 = vmatpush.msrb.mxu3 %v5422_v15 }
 0x85a   :  { %5406 = vmatmul.msk.f32.gmra.mxu2 %vm477_vm8, %v1394_v5 }
 0x85b   :  { %v5893_v8 = vpop.eup %5892  ;;  %v1534_v29 = vmul.f32 1.442695, %v1529_v7 }
 0x85c   :  { %v1539_v37 = vsel %vm477_vm8, %v5893_v8, 0.0 }
 0x85d   :  { %5894 = vpow2.f32 %v1534_v29  ;;  %1540 = vadd.xlane.f32.xlu1 %v1539_v37 }
 0x863   :  { %v5895_v9 = vpop.eup %5894 }
 0x864   :  { %v1542_v10 = vsel %vm477_vm8, %v5895_v9, 0.0 }
 0x865   :  { %1543 = vadd.xlane.f32.xlu2 %v1542_v10 }
 0x8c8   :  { %v1538_v56 = vpop.xlane.xlu0 %1537 }
 0x8c9   :  { %5896 = vrcp.f32 %v1538_v56 }
 0x8cd   :  { %v1421_v23 = vpop.f32.mrf.mxu2 }
 0x8ce   :  { %5407 = vmatmul.msk.f32.vlgmr.msra.gmra.mxu3 %vm426_vm6, %v1421_v23 }
 0x8cf   :  { %v5897_v24 = vpop.eup %5896 }
 0x8d0   :  { %v1548_v26 = vmul.f32 %v5897_v24, %v5889_v0  ;;  %v1541_v27 = vpop.xlane.xlu1 %1540 }
 0x8d1   :  { %5898 = vrcp.f32 %v1541_v27 }
 0x8d2   :  { %5416 = vmatmul.msk.f32.vlgmr.msrb.gmra.mxu1 %vm477_vm8, %v1548_v26 }
 0x8d5   :  { %v1424_v28 = vpop.f32.mrf.mxu2 }
 0x8d6   :  { %5408 = vmatmul.msk.f32.gmra.mxu3 %vm426_vm6, %v1424_v28 }
 0x8d7   :  { %v5899_v32 = vpop.eup %5898 }
 0x8d8   :  { %v1544_v34 = vpop.xlane.xlu2 %1543  ;;  %v1549_v38 = vmul.f32 %v5899_v32, %v5893_v8 }
 0x8d9   :  { %5900 = vrcp.f32 %v1544_v34 }
 0x8da   :  { %5417 = vmatmul.msk.f32.gmra.mxu1 %vm477_vm8, %v1549_v38 }
 0x8dd   :  { %v1427_v44 = vpop.f32.mrf.mxu2 }
 0x8de   :  { %5409 = vmatmul.msk.f32.gmra.mxu3 %vm426_vm6, %v1427_v44 }
 0x8df   :  { %v5901_v45 = vpop.eup %5900 }
 0x8e0   :  { %v1550_v46 = vmul.f32 %v5901_v45, %v5895_v9 }
 0x8e2   :  { %5418 = vmatmul.msk.f32.gmra.mxu1 %vm477_vm8, %v1550_v46 }
 0x8e6   :  { %5427 = vmatmul.msk.f32.vlgmr.msrb.gmra.mxu3 %vm120_vm1, %v6370_v52 }
 0x8ea   :  { %5449 = vmatmul.msk.f32.vlgmr.msra.gmra.mxu1 %vm120_vm1, %v6370_v52 }
 0x8ee   :  { %5428 = vmatmul.msk.f32.gmra.mxu3 %vm120_vm1, %v6387_v3 }
 0x8f2   :  { %5450 = vmatmul.msk.f32.gmra.mxu1 %vm120_vm1, %v6387_v3 }
 0x8f6   :  { %5429 = vmatmul.msk.f32.gmra.mxu3 %vm120_vm1, %v6398_v11 }
 0x8fa   :  { %5451 = vmatmul.msk.f32.gmra.mxu1 %vm120_vm1, %v6398_v11 }
 0x8fe   :  { %5430 = vmatmul.msk.f32.gmra.mxu3 %vm120_vm1, %v6409_v16 }
 0x902   :  { %5452 = vmatmul.msk.f32.gmra.mxu1 %vm120_vm1, %v6409_v16 }
 0x906   :  { %5431 = vmatmul.msk.f32.gmra.mxu3 %vm120_vm1, %v6422_v40 }
 0x90a   :  { %5453 = vmatmul.msk.f32.gmra.mxu1 %vm120_vm1, %v6422_v40 }
 0x90e   :  { %5432 = vmatmul.msk.f32.gmra.mxu3 %vm120_vm1, %v6433_v59 }
 0x912   :  { %5454 = vmatmul.msk.f32.gmra.mxu1 %vm120_vm1, %v6433_v59 }
 0x94f   :  { %v1577_v52 = vpop.f32.mrf.mxu1 }
 0x950   :  { %5419 = vmatmul.msk.f32.vlgmr.msrb.gmra.mxu2 %vm426_vm6, %v1577_v52 }
 0x951   :  { %v6890_v3 = vpop.f32.mrf.mxu3 }
 0x957   :  { %v1580_v11 = vpop.f32.mrf.mxu1 }
 0x958   :  { %5420 = vmatmul.msk.f32.gmra.mxu2 %vm426_vm6, %v1580_v11 }
 0x959   :  { %v6893_v16 = vpop.f32.mrf.mxu3 }
 0x95f   :  { %v1583_v60 = vpop.f32.mrf.mxu1 }
 0x960   :  { %5421 = vmatmul.msk.f32.gmra.mxu2 %vm426_vm6, %v1583_v60 }
 0x961   :  { %v6896_v40 = vpop.f32.mrf.mxu3 }
 0x967   :  { %v1741_v59 = vpop.f32.mrf.mxu1 }
 0x968   :  { %v1742_v8 = vadd.f32 %v5782_v1, %v1741_v59 }
 0x969   :  { %v1651_v53 = vpop.f32.mrf.mxu3 }
 0x96a   :  { %v1652_v62 = vadd.f32 %v5783_v35, %v1651_v53 }
 0x96c   :  { %5458 = vmatmul.msk.f32.vlgmr.msra.gmra.mxu2 %vm426_vm6, %v1652_v62 }
 0x96f   :  { %v1744_v63 = vpop.f32.mrf.mxu1 }
 0x970   :  { %v1745_v7 = vadd.f32 %v5782_v1, %v1744_v63 }
 0x971   :  { %v1654_v31 = vpop.f32.mrf.mxu3 }
 0x972   :  { %v1655_v0 = vadd.f32 %v5783_v35, %v1654_v31 }
 0x974   :  { %5459 = vmatmul.msk.f32.gmra.mxu2 %vm426_vm6, %v1655_v0 }
 0x977   :  { %v1747_v30 = vpop.f32.mrf.mxu1 }
 0x978   :  { %v1748_v2 = vadd.f32 %v5782_v1, %v1747_v30 }
 0x979   :  { %v1657_v4 = vpop.f32.mrf.mxu3 }
 0x97a   :  { %v1658_v5 = vadd.f32 %v5783_v35, %v1657_v4  ;;  %1865 = vmatpush.msrb.mxu2 %v1748_v2 }
 0x97c   :  { %5460 = vmatmul.msk.f32.gmra.mxu2 %vm426_vm6, %v1658_v5 }
 0x97d   :  { %1866 = vmatpush.msrb.mxu2 %v1745_v7 }
 0x97f   :  { %1867 = vmatpush.msrb.mxu2 %v1742_v8  ;;  %v1750_v29 = vpop.f32.mrf.mxu1 }
 0x980   :  { %v1751_v21 = vadd.f32 %v5782_v1, %v1750_v29 }
 0x981   :  { %v1660_v37 = vpop.f32.mrf.mxu3 }
 0x982   :  { %v1661_v9 = vadd.f32 %v5783_v35, %v1660_v37 }
 0x984   :  { %5470 = vmatmul.msk.f32.vlgmr.msra.gmra.mxu0 %vm426_vm6, %v1661_v9 }
 0x987   :  { %v1753_v10 = vpop.f32.mrf.mxu1 }
 0x988   :  { %v1754_v19 = vadd.f32 %v5782_v1, %v1753_v10 }
 0x989   :  { %v1663_v12 = vpop.f32.mrf.mxu3 }
 0x98a   :  { %v1664_v6 = vadd.f32 %v5783_v35, %v1663_v12 }
 0x98c   :  { %5471 = vmatmul.msk.f32.gmra.mxu0 %vm426_vm6, %v1664_v6 }
 0x98f   :  { %v1756_v49 = vpop.f32.mrf.mxu1 }
 0x990   :  { %v1757_v13 = vadd.f32 %v5782_v1, %v1756_v49 }
 0x991   :  { %v1666_v15 = vpop.f32.mrf.mxu3 }
 0x992   :  { %v1667_v20 = vadd.f32 %v5783_v35, %v1666_v15  ;;  %2021 = vmatpush.msrb.mxu1 %v1757_v13 }
 0x994   :  { %5472 = vmatmul.msk.f32.gmra.mxu0 %vm426_vm6, %v1667_v20  ;;  %2022 = vmatpush.msrb.mxu1 %v1754_v19 }
 0x996   :  { %2023 = vmatpush.msrb.mxu1 %v1751_v21 }
 0x9d3   :  { %v6910_v56 = vpop.f32.mrf.mxu2 }
 0x9db   :  { %v6912_v23 = vpop.f32.mrf.mxu2 }
 0x9e3   :  { %v6914_v24 = vpop.f32.mrf.mxu2 }
 0x9ef   :  { %v1795_v26 = vpop.f32.mrf.mxu2 }
 0x9f0   :  { %v1804_v27 = vmul.f32 0.35355338, %v1795_v26 }
 0x9f2   :  { %v1807_v28 = vadd.f32 %v1804_v27, %v6497_v41 }
 0x9f4   :  { %v1810_v32 = vsel %vm477_vm8, %v1807_v28, -inf }
 0x9f5   :  { %1811 = vmax.xlane.f32.xlu0 %v1810_v32 }
 0x9f7   :  { %v1798_v34 = vpop.f32.mrf.mxu2 }
 0x9f8   :  { %v1805_v38 = vmul.f32 0.35355338, %v1798_v34 }
 0x9fa   :  { %v1808_v44 = vadd.f32 %v1805_v38, %v6497_v41 }
 0x9fc   :  { %v1813_v45 = vsel %vm477_vm8, %v1808_v44, -inf }
 0x9fd   :  { %1814 = vmax.xlane.f32.xlu1 %v1813_v45 }
 0x9ff   :  { %v1801_v46 = vpop.f32.mrf.mxu2 }
 0xa00   :  { %v1806_v52 = vmul.f32 0.35355338, %v1801_v46 }
 0xa01   :  { %v1951_v62 = vpop.f32.mrf.mxu0 }
 0xa02   :  { %v1809_v11 = vadd.f32 %v1806_v52, %v6497_v41  ;;  %v1960_v30 = vmul.f32 0.35355338, %v1951_v62 }
 0xa04   :  { %v1816_v60 = vsel %vm477_vm8, %v1809_v11, -inf  ;;  %v1963_v7 = vadd.f32 %v1960_v30, %v6497_v41 }
 0xa05   :  { %1817 = vmax.xlane.f32.xlu2 %v1816_v60 }
 0xa06   :  { %v1966_v10 = vsel %vm477_vm8, %v1963_v7, -inf }
 0xa09   :  { %v1954_v4 = vpop.f32.mrf.mxu0 }
 0xa0a   :  { %v1961_v9 = vmul.f32 0.35355338, %v1954_v4 }
 0xa0c   :  { %v1964_v6 = vadd.f32 %v1961_v9, %v6497_v41 }
 0xa0e   :  { %v1969_v19 = vsel %vm477_vm8, %v1964_v6, -inf }
 0xa11   :  { %v1957_v49 = vpop.f32.mrf.mxu0 }
 0xa12   :  { %v1962_v15 = vmul.f32 0.35355338, %v1957_v49 }
 0xa14   :  { %v1965_v21 = vadd.f32 %v1962_v15, %v6497_v41 }
 0xa16   :  { %v1972_v26 = vsel %vm477_vm8, %v1965_v21, -inf }
 0xa68   :  { %v1812_v35 = vpop.xlane.xlu0 %1811 }
 0xa69   :  { %v1819_v59 = vsub.f32 %v1807_v28, %v1812_v35  ;;  %v1759_v28 = vld [vmem:[%s8430_s6 + $0x18] sm:$0xff] }
 0xa6a   :  { %1902 = vmatpush.msra.mxu3 %v1759_v28  ;;  %2058 = vmatpush.msra.mxu2 %v1759_v28 }
 0xa6b   :  { %v1822_v53 = vmul.f32 1.442695, %v1819_v59 }
 0xa6d   :  { %5902 = vpow2.f32 %v1822_v53 }
 0xa70   :  { %v1815_v63 = vpop.xlane.xlu1 %1814 }
 0xa71   :  { %v1820_v31 = vsub.f32 %v1808_v44, %v1815_v63 }
 0xa73   :  { %v5903_v0 = vpop.eup %5902  ;;  %v1824_v1 = vmul.f32 1.442695, %v1820_v31 }
 0xa74   :  { %v1828_v2 = vsel %vm477_vm8, %v5903_v0, 0.0 }
 0xa75   :  { %5904 = vpow2.f32 %v1824_v1  ;;  %1829 = vadd.xlane.f32.xlu0 %v1828_v2 }
 0xa78   :  { %v1818_v5 = vpop.xlane.xlu2 %1817 }
 0xa79   :  { %v1821_v8 = vsub.f32 %v1809_v11, %v1818_v5 }
 0xa7b   :  { %v5905_v29 = vpop.eup %5904  ;;  %v1826_v37 = vmul.f32 1.442695, %v1821_v8 }
 0xa7c   :  { %v1831_v12 = vsel %vm477_vm8, %v5905_v29, 0.0 }
 0xa7d   :  { %5906 = vpow2.f32 %v1826_v37  ;;  %1967 = vmax.xlane.f32.xlu0 %v1966_v10  ;;  %1832 = vadd.xlane.f32.xlu1 %v1831_v12 }
 0xa83   :  { %v5907_v13 = vpop.eup %5906 }
 0xa84   :  { %v1834_v20 = vsel %vm477_vm8, %v5907_v13, 0.0 }
 0xa85   :  { %1970 = vmax.xlane.f32.xlu1 %v1969_v19  ;;  %1835 = vadd.xlane.f32.xlu2 %v1834_v20 }
 0xa8d   :  { %1973 = vmax.xlane.f32.xlu2 %v1972_v26  ;;  %v980_v26 = vadd.f32 %v6772_v54, %v6752_v17 }
 0xa8f   :  { %v1465_v28 = vadd.f32 %v6890_v3, %v980_v26 }
 0xae8   :  { %v1830_v27 = vpop.xlane.xlu0 %1829 }
 0xae9   :  { %5908 = vrcp.f32 %v1830_v27 }
 0xaef   :  { %v5909_v32 = vpop.eup %5908 }
 0xaf0   :  { %v1840_v34 = vmul.f32 %v5909_v32, %v5903_v0  ;;  %v1968_v38 = vpop.xlane.xlu0 %1967  ;;  %v1833_v44 = vpop.xlane.xlu1 %1832  ;;  %v6953_v32 = vld [vmem:[%s8427_s9 + $0x4] ss:$0 sm:$0xff] }
 0xaf1   :  { %v1975_v45 = vsub.f32 %v1963_v7, %v1968_v38  ;;  %5910 = vrcp.f32 %v1833_v44 }
 0xaf2   :  { %5461 = vmatmul.msk.f32.vlgmr.msrb.gmra.mxu2 %vm477_vm8, %v1840_v34 }
 0xaf3   :  { %v1978_v46 = vmul.f32 1.442695, %v1975_v45  ;;  %v983_v45 = vadd.f32 %v6778_v57, %v6756_v47 }
 0xaf5   :  { %5912 = vpow2.f32 %v1978_v46  ;;  %v1466_v54 = vadd.f32 %v6893_v16, %v983_v45 }
 0xaf7   :  { %v5911_v52 = vpop.eup %5910 }
 0xaf8   :  { %v1971_v11 = vpop.xlane.xlu1 %1970  ;;  %v1836_v60 = vpop.xlane.xlu2 %1835  ;;  %v1841_v35 = vmul.f32 %v5911_v52, %v5905_v29 }
 0xaf9   :  { %v1976_v59 = vsub.f32 %v1964_v6, %v1971_v11  ;;  %5914 = vrcp.f32 %v1836_v60 }
 0xafa   :  { %5462 = vmatmul.msk.f32.gmra.mxu2 %vm477_vm8, %v1841_v35  ;;  %v986_v35 = vadd.f32 %v6782_v61, %v6760_v48 }
 0xafb   :  { %v5913_v53 = vpop.eup %5912  ;;  %v1980_v62 = vmul.f32 1.442695, %v1976_v59 }
 0xafc   :  { %v1984_v63 = vsel %vm477_vm8, %v5913_v53, 0.0  ;;  %v1467_v57 = vadd.f32 %v6896_v40, %v986_v35 }
 0xafd   :  { %5916 = vpow2.f32 %v1980_v62  ;;  %1985 = vadd.xlane.f32.xlu0 %v1984_v63 }
 0xaff   :  { %v5915_v31 = vpop.eup %5914 }
 0xb00   :  { %v1974_v0 = vpop.xlane.xlu2 %1973  ;;  %v1842_v1 = vmul.f32 %v5915_v31, %v5907_v13  ;;  %v1168_v31 = vadd.f32 %v6780_v58, %v6764_v50  ;;  %v1171_v50 = vadd.f32 %v6784_v39, %v6768_v51 }
 0xb01   :  { %v1977_v30 = vsub.f32 %v1965_v21, %v1974_v0 }
 0xb02   :  { %5463 = vmatmul.msk.f32.gmra.mxu2 %vm477_vm8, %v1842_v1  ;;  %v1621_v1 = vadd.f32 %v6910_v56, %v1168_v31 }
 0xb03   :  { %v5917_v2 = vpop.eup %5916  ;;  %v1982_v4 = vmul.f32 1.442695, %v1977_v30 }
 0xb04   :  { %v1987_v5 = vsel %vm477_vm8, %v5917_v2, 0.0 }
 0xb05   :  { %5918 = vpow2.f32 %v1982_v4  ;;  %1988 = vadd.xlane.f32.xlu1 %v1987_v5 }
 0xb0b   :  { %v5919_v7 = vpop.eup %5918 }
 0xb0c   :  { %v1990_v8 = vsel %vm477_vm8, %v5919_v7, 0.0 }
 0xb0d   :  { %1991 = vadd.xlane.f32.xlu2 %v1990_v8 }
 0xb70   :  { %v1986_v29 = vpop.xlane.xlu0 %1985 }
 0xb71   :  { %5920 = vrcp.f32 %v1986_v29  ;;  %v1622_v29 = vadd.f32 %v6912_v23, %v1171_v50  ;;  %v1174_v23 = vadd.f32 %v6789_v43, %v6774_v36  ;;  %v2234_v43 = vld [vmem:[%s8431_s7 + $0x18] sm:$0xff] }
 0xb72   :  { %2266 = vmatpush.msrb.mxu3 %v2234_v43 }
 0xb75   :  { %v1869_v37 = vpop.f32.mrf.mxu2 }
 0xb76   :  { %5464 = vmatmul.msk.f32.vlgmr.msra.gmra.mxu3 %vm426_vm6, %v1869_v37 }
 0xb77   :  { %v5921_v9 = vpop.eup %5920 }
 0xb78   :  { %v1996_v10 = vmul.f32 %v5921_v9, %v5913_v53  ;;  %v1989_v12 = vpop.xlane.xlu1 %1988 }
 0xb79   :  { %5922 = vrcp.f32 %v1989_v12 }
 0xb7a   :  { %5473 = vmatmul.msk.f32.vlgmr.msrb.gmra.mxu1 %vm477_vm8, %v1996_v10 }
 0xb7d   :  { %v1872_v6 = vpop.f32.mrf.mxu2 }
 0xb7e   :  { %5465 = vmatmul.msk.f32.gmra.mxu3 %vm426_vm6, %v1872_v6 }
 0xb7f   :  { %v5923_v49 = vpop.eup %5922 }
 0xb80   :  { %v1992_v13 = vpop.xlane.xlu2 %1991  ;;  %v1997_v15 = vmul.f32 %v5923_v49, %v5917_v2 }
 0xb81   :  { %5924 = vrcp.f32 %v1992_v13 }
 0xb82   :  { %5474 = vmatmul.msk.f32.gmra.mxu1 %vm477_vm8, %v1997_v15  ;;  %v1623_v15 = vadd.f32 %v6914_v24, %v1174_v23  ;;  %v2233_v24 = vld [vmem:[%s8431_s7 + $0x10] sm:$0xff] }
 0xb83   :  { %2267 = vmatpush.msrb.mxu3 %v2233_v24 }
 0xb85   :  { %v1875_v19 = vpop.f32.mrf.mxu2 }
 0xb86   :  { %5466 = vmatmul.msk.f32.gmra.mxu3 %vm426_vm6, %v1875_v19 }
 0xb87   :  { %v5925_v20 = vpop.eup %5924 }
 0xb88   :  { %v1998_v21 = vmul.f32 %v5925_v20, %v5919_v7 }
 0xb8a   :  { %5475 = vmatmul.msk.f32.gmra.mxu1 %vm477_vm8, %v1998_v21 }
 0xbf7   :  { %v2025_v27 = vpop.f32.mrf.mxu1 }
 0xbf8   :  { %5476 = vmatmul.msk.f32.vlgmr.msra.gmra.mxu2 %vm426_vm6, %v2025_v27 }
 0xbf9   :  { %v1904_v34 = vpop.f32.mrf.mxu3 }
 0xbfa   :  { %v1913_v38 = vadd.f32 %v1904_v34, %v1465_v28  ;;  %v2232_v28 = vld [vmem:[%s8431_s7 + $0x8] sm:$0xff] }
 0xbfb   :  { %2268 = vmatpush.msrb.mxu3 %v2232_v28 }
 0xbfc   :  { %v2073_v44 = vadd.f32 %v6953_v32, %v1913_v38 }
 0xbfe   :  { %v6959_v46 = vadd.f32 %v2073_v44, %v6249_v14 }
 0xbff   :  { %v2028_v17 = vpop.f32.mrf.mxu1 }
 0xc00   :  { %5477 = vmatmul.msk.f32.gmra.mxu2 %vm426_vm6, %v2028_v17  ;;  %v2085_v3 = vsel %vm120_vm1, %v6959_v46, 0.0 }
 0xc01   :  { %2086 = vadd.xlane.f32.xlu0 %v2085_v3  ;;  %v1907_v52 = vpop.f32.mrf.mxu3 }
 0xc02   :  { %v1914_v11 = vadd.f32 %v1907_v52, %v1466_v54 }
 0xc04   :  { %v2074_v60 = vadd.f32 %v6953_v32, %v1914_v11 }
 0xc06   :  { %v6969_v47 = vadd.f32 %v2074_v60, %v6256_v18 }
 0xc07   :  { %v2031_v14 = vpop.f32.mrf.mxu1 }
 0xc08   :  { %5478 = vmatmul.msk.f32.gmra.mxu2 %vm426_vm6, %v2031_v14  ;;  %v2088_v16 = vsel %vm120_vm1, %v6969_v47, 0.0 }
 0xc09   :  { %2089 = vadd.xlane.f32.xlu1 %v2088_v16  ;;  %v1910_v59 = vpop.f32.mrf.mxu3 }
 0xc0a   :  { %v1915_v53 = vadd.f32 %v1910_v59, %v1467_v57 }
 0xc0c   :  { %v2075_v62 = vadd.f32 %v6953_v32, %v1915_v53 }
 0xc0e   :  { %v6977_v63 = vadd.f32 %v2075_v62, %v6263_v22 }
 0xc10   :  { %v2091_v18 = vsel %vm120_vm1, %v6977_v63, 0.0 }
 0xc11   :  { %2092 = vadd.xlane.f32.xlu2 %v2091_v18 }
 0xc74   :  { %v2087_v48 = vpop.xlane.xlu0 %2086 }
 0xc75   :  { %v2103_v61 = vmul.f32 %v2087_v48, %v6271_v33 }
 0xc77   :  { %v6983_v40 = vsub.f32 %v6959_v46, %v2103_v61 }
 0xc79   :  { %v2115_v0 = vmul.f32 %v6983_v40, %v6983_v40 }
 0xc7b   :  { %v2060_v22 = vpop.f32.mrf.mxu2  ;;  %v2121_v30 = vsel %vm120_vm1, %v2115_v0, 0.0 }
 0xc7c   :  { %v2069_v2 = vadd.f32 %v2060_v22, %v1621_v1  ;;  %2122 = vadd.xlane.f32.xlu0 %v2121_v30  ;;  %v2090_v4 = vpop.xlane.xlu1 %2089  ;;  %v7058_v30 = vld [vmem:[%s8427_s9 + $0x2] ss:$0 sm:$0xff] }
 0xc7d   :  { %v2104_v5 = vmul.f32 %v2090_v4, %v6271_v33 }
 0xc7e   :  { %v2076_v7 = vadd.f32 %v6953_v32, %v2069_v2 }
 0xc7f   :  { %v6994_v8 = vsub.f32 %v6969_v47, %v2104_v5 }
 0xc80   :  { %v6999_v58 = vadd.f32 %v2076_v7, %v6267_v25  ;;  %v7065_v7 = vld [vmem:[%s8427_s9 + $0x3] ss:$0 sm:$0xff] }
 0xc81   :  { %v2116_v56 = vmul.f32 %v6994_v8, %v6994_v8 }
 0xc82   :  { %v2094_v37 = vsel %vm120_vm1, %v6999_v58, 0.0 }
 0xc83   :  { %v2063_v9 = vpop.f32.mrf.mxu2  ;;  %v2124_v10 = vsel %vm120_vm1, %v2116_v56, 0.0 }
 0xc84   :  { %v2070_v12 = vadd.f32 %v2063_v9, %v1622_v29  ;;  %2125 = vadd.xlane.f32.xlu1 %v2124_v10  ;;  %v2093_v6 = vpop.xlane.xlu2 %2092  ;;  %2095 = vadd.xlane.f32.xlu0 %v2094_v37 }
 0xc85   :  { %v2105_v51 = vmul.f32 %v2093_v6, %v6271_v33 }
 0xc86   :  { %v2077_v25 = vadd.f32 %v6953_v32, %v2070_v12 }
 0xc87   :  { %v7010_v39 = vsub.f32 %v6977_v63, %v2105_v51 }
 0xc88   :  { %v7015_v49 = vadd.f32 %v2077_v25, %v6281_v42 }
 0xc89   :  { %v2117_v13 = vmul.f32 %v7010_v39, %v7010_v39 }
 0xc8a   :  { %v2097_v19 = vsel %vm120_vm1, %v7015_v49, 0.0 }
 0xc8b   :  { %v2066_v20 = vpop.f32.mrf.mxu2  ;;  %v2127_v21 = vsel %vm120_vm1, %v2117_v13, 0.0 }
 0xc8c   :  { %v2071_v26 = vadd.f32 %v2066_v20, %v1623_v15  ;;  %2098 = vadd.xlane.f32.xlu1 %v2097_v19  ;;  %2128 = vadd.xlane.f32.xlu2 %v2127_v21 }
 0xc8e   :  { %v2078_v27 = vadd.f32 %v6953_v32, %v2071_v26 }
 0xc90   :  { %v7025_v36 = vadd.f32 %v2078_v27, %v6299_v55  ;;  %v2231_v55 = vld [vmem:[%s8431_s7] sm:$0xff] }
 0xc91   :  { %2269 = vmatpush.msrb.mxu3 %v2231_v55 }
 0xc92   :  { %v2100_v42 = vsel %vm120_vm1, %v7025_v36, 0.0 }
 0xc94   :  { %2101 = vadd.xlane.f32.xlu2 %v2100_v42 }
 0xcef   :  { %v2123_v32 = vpop.xlane.xlu0 %2122 }
 0xcf0   :  { %v2139_v34 = vmul.f32 %v2123_v32, %v6271_v33 }
 0xcf2   :  { %v2145_v38 = vadd.f32 1e-06, %v2139_v34  ;;  %v2358_v34 = vld [vmem:[%s8432_s8 + $0x78] sm:$0xff] }
 0xcf3   :  { %2360 = vmatpush.msrb.mxu0 %v2358_v34 }
 0xcf4   :  { %5926 = vrsqrt.f32 %v2145_v38  ;;  %vm2157_vm10 = vweird.f32 %v2145_v38 }
 0xcf7   :  { %v2126_v44 = vpop.xlane.xlu1 %2125  ;;  %v2096_v45 = vpop.xlane.xlu0 %2095 }
 0xcf8   :  { %v2140_v17 = vmul.f32 %v2126_v44, %v6271_v33  ;;  %v2106_v54 = vmul.f32 %v2096_v45, %v6271_v33  ;;  %v2355_v44 = vld [vmem:[%s8432_s8 + $0x60] sm:$0xff]  ;;  %v2354_v45 = vld [vmem:[%s8432_s8 + $0x58] sm:$0xff] }
 0xcfa   :  { %v5927_v3 = vpop.eup %5926  ;;  %v2146_v52 = vadd.f32 1e-06, %v2140_v17  ;;  %v7045_v11 = vsub.f32 %v6999_v58, %v2106_v54  ;;  %v2353_v54 = vld [vmem:[%s8432_s8 + $0x50] sm:$0xff] }
 0xcfb   :  { %v2152_v60 = vmul.f32 %v5927_v3, %v2145_v38  ;;  %vm2158_vm9 = vweird.f32 %v5927_v3  ;;  %v2357_v38 = vld [vmem:[%s8432_s8 + $0x70] sm:$0xff] }
 0xcfc   :  { %5928 = vrsqrt.f32 %v2146_v52  ;;  %v2118_v35 = vmul.f32 %v7045_v11, %v7045_v11  ;;  %vm2159_vm11 = vmor %vm2157_vm10, %vm2158_vm9  ;;  %vm2167_vm13 = vweird.f32 %v2146_v52  ;;  %2361 = vmatpush.msrb.mxu0 %v2357_v38 }
 0xcfd   :  { %v2153_v14 = vmul.f32 %v5927_v3, %v2152_v60 }
 0xcfe   :  { %v2130_v57 = vsel %vm120_vm1, %v2118_v35, 0.0  ;;  %v2351_v35 = vld [vmem:[%s8432_s8 + $0x40] sm:$0xff] }
 0xcff   :  { %v2154_v16 = vmul.f32 0.5, %v2153_v14  ;;  %v2099_v59 = vpop.xlane.xlu1 %2098  ;;  %v2129_v53 = vpop.xlane.xlu2 %2128  ;;  %2131 = vadd.xlane.f32.xlu0 %v2130_v57  ;;  %v2350_v14 = vld [vmem:[%s8432_s8 + $0x38] sm:$0xff] }
 0xd00   :  { %v2107_v62 = vmul.f32 %v2099_v59, %v6271_v33  ;;  %v2141_v18 = vmul.f32 %v2129_v53, %v6271_v33  ;;  %v2348_v53 = vld [vmem:[%s8432_s8 + $0x28] sm:$0xff] }
 0xd01   :  { %v2155_v48 = vsub.f32 1.5, %v2154_v16  ;;  %v2349_v16 = vld [vmem:[%s8432_s8 + $0x30] sm:$0xff] }
 0xd02   :  { %v5929_v61 = vpop.eup %5928  ;;  %v7053_v31 = vsub.f32 %v7015_v49, %v2107_v62  ;;  %v2147_v0 = vadd.f32 1e-06, %v2141_v18  ;;  %v2347_v62 = vld [vmem:[%s8432_s8 + $0x20] sm:$0xff] }
 0xd03   :  { %v2156_v1 = vmul.f32 %v5927_v3, %v2155_v48  ;;  %v2162_v22 = vmul.f32 %v5929_v61, %v2146_v52  ;;  %vm2168_vm12 = vweird.f32 %v5929_v61  ;;  %v2352_v52 = vld [vmem:[%s8432_s8 + $0x48] sm:$0xff] }
 0xd04   :  { %5930 = vrsqrt.f32 %v2147_v0  ;;  %v2119_v2 = vmul.f32 %v7053_v31, %v7053_v31  ;;  %vm2169_vm14 = vmor %vm2167_vm13, %vm2168_vm12  ;;  %vm2177_vm0 = vweird.f32 %v2147_v0 }
 0xd05   :  { %v2160_v4 = vsel %vm2159_vm11, %v5927_v3, %v2156_v1  ;;  %v2163_v5 = vmul.f32 %v5929_v61, %v2162_v22  ;;  %v2346_v1 = vld [vmem:[%s8432_s8 + $0x18] sm:$0xff] }
 0xd06   :  { %v2211_v50 = vmul.f32 %v2160_v4, %v6983_v40  ;;  %v2133_v56 = vsel %vm120_vm1, %v2119_v2, 0.0  ;;  %v2345_v4 = vld [vmem:[%s8432_s8 + $0x10] sm:$0xff] }
 0xd07   :  { %v2164_v29 = vmul.f32 0.5, %v2163_v5  ;;  %2134 = vadd.xlane.f32.xlu1 %v2133_v56  ;;  %v2102_v37 = vpop.xlane.xlu2 %2101  ;;  %v2344_v5 = vld [vmem:[%s8432_s8 + $0x8] sm:$0xff] }
 0xd08   :  { %v2218_v9 = vmul.f32 %v7058_v30, %v2211_v50  ;;  %v2108_v10 = vmul.f32 %v2102_v37, %v6271_v33 }
 0xd09   :  { %v2165_v12 = vsub.f32 1.5, %v2164_v29  ;;  %v2343_v29 = vld [vmem:[%s8432_s8] sm:$0xff] }
 0xd0a   :  { %v5931_v6 = vpop.eup %5930  ;;  %v2225_v51 = vadd.f32 %v7065_v7, %v2218_v9  ;;  %v7073_v25 = vsub.f32 %v7025_v36, %v2108_v10 }
 0xd0b   :  { %v2166_v23 = vmul.f32 %v5929_v61, %v2165_v12  ;;  %v2172_v40 = vmul.f32 %v5931_v6, %v2147_v0  ;;  %vm2178_vm15 = vweird.f32 %v5931_v6 }
 0xd0c   :  { %5479 = vmatmul.msk.f32.vlgmr.msrb.gmra.mxu3 %vm120_vm1, %v2225_v51  ;;  %v2120_v13 = vmul.f32 %v7073_v25, %v7073_v25  ;;  %vm2179_vm2 = vmor %vm2177_vm0, %vm2178_vm15 }
 0xd0d   :  { %v2170_v15 = vsel %vm2169_vm14, %v5929_v61, %v2166_v23  ;;  %v2173_v19 = vmul.f32 %v5931_v6, %v2172_v40 }
 0xd0e   :  { %v2212_v20 = vmul.f32 %v2170_v15, %v6994_v8  ;;  %v2136_v21 = vsel %vm120_vm1, %v2120_v13, 0.0 }
 0xd0f   :  { %v2174_v26 = vmul.f32 0.5, %v2173_v19  ;;  %2137 = vadd.xlane.f32.xlu2 %v2136_v21  ;;  %v7143_v19 = vld [vmem:[%s8427_s9 + $0x5] ss:$0 sm:$0xff] }
 0xd10   :  { %v2219_v27 = vmul.f32 %v7058_v30, %v2212_v20 }
 0xd11   :  { %v2175_v42 = vsub.f32 1.5, %v2174_v26 }
 0xd12   :  { %v2226_v43 = vadd.f32 %v7065_v7, %v2219_v27 }
 0xd13   :  { %v2176_v24 = vmul.f32 %v5931_v6, %v2175_v42 }
 0xd14   :  { %5480 = vmatmul.msk.f32.gmra.mxu3 %vm120_vm1, %v2226_v43 }
 0xd15   :  { %v2180_v28 = vsel %vm2179_vm2, %v5931_v6, %v2176_v24 }
 0xd16   :  { %v2213_v55 = vmul.f32 %v2180_v28, %v7010_v39  ;;  %v2356_v39 = vld [vmem:[%s8432_s8 + $0x68] sm:$0xff] }
 0xd17   :  { %2362 = vmatpush.msrb.mxu0 %v2356_v39 }
 0xd18   :  { %v2220_v8 = vmul.f32 %v7058_v30, %v2213_v55 }
 0xd19   :  { %2363 = vmatpush.msrb.mxu0 %v2355_v44 }
 0xd1a   :  { %v2227_v32 = vadd.f32 %v7065_v7, %v2220_v8 }
 0xd1b   :  { %2364 = vmatpush.msrb.mxu0 %v2354_v45 }
 0xd1c   :  { %5481 = vmatmul.msk.f32.gmra.mxu3 %vm120_vm1, %v2227_v32 }
 0xd1d   :  { %2365 = vmatpush.msrb.mxu0 %v2353_v54 }
 0xd1f   :  { %2366 = vmatpush.msrb.mxu0 %v2352_v52 }
 0xd21   :  { %2367 = vmatpush.msrb.mxu0 %v2351_v35 }
 0xd23   :  { %2368 = vmatpush.msrb.mxu0 %v2350_v14 }
 0xd25   :  { %2369 = vmatpush.msrb.mxu0 %v2349_v16 }
 0xd27   :  { %2370 = vmatpush.msrb.mxu0 %v2348_v53 }
 0xd29   :  { %2371 = vmatpush.msrb.mxu0 %v2347_v62 }
 0xd2b   :  { %2372 = vmatpush.msrb.mxu0 %v2346_v1 }
 0xd2d   :  { %2373 = vmatpush.msrb.mxu0 %v2345_v4 }
 0xd2f   :  { %2374 = vmatpush.msrb.mxu0 %v2344_v5 }
 0xd31   :  { %2375 = vmatpush.msrb.mxu0 %v2343_v29 }
 0xd72   :  { %v2132_v17 = vpop.xlane.xlu0 %2131 }
 0xd73   :  { %v2142_v3 = vmul.f32 %v2132_v17, %v6271_v33 }
 0xd75   :  { %v2148_v60 = vadd.f32 1e-06, %v2142_v3 }
 0xd77   :  { %5932 = vrsqrt.f32 %v2148_v60  ;;  %vm2187_vm4 = vweird.f32 %v2148_v60 }
 0xd7a   :  { %v2135_v57 = vpop.xlane.xlu1 %2134 }
 0xd7b   :  { %v2143_v59 = vmul.f32 %v2135_v57, %v6271_v33 }
 0xd7d   :  { %v5933_v18 = vpop.eup %5932  ;;  %v2149_v48 = vadd.f32 1e-06, %v2143_v59 }
 0xd7e   :  { %v2182_v61 = vmul.f32 %v5933_v18, %v2148_v60  ;;  %vm2188_vm3 = vweird.f32 %v5933_v18 }
 0xd7f   :  { %5934 = vrsqrt.f32 %v2149_v48  ;;  %vm2189_vm5 = vmor %vm2187_vm4, %vm2188_vm3  ;;  %vm2197_vm9 = vweird.f32 %v2149_v48 }
 0xd80   :  { %v2183_v0 = vmul.f32 %v5933_v18, %v2182_v61 }
 0xd82   :  { %v2184_v22 = vmul.f32 0.5, %v2183_v0  ;;  %v2138_v2 = vpop.xlane.xlu2 %2137 }
 0xd83   :  { %v2144_v50 = vmul.f32 %v2138_v2, %v6271_v33 }
 0xd84   :  { %v2185_v56 = vsub.f32 1.5, %v2184_v22 }
 0xd85   :  { %v5935_v37 = vpop.eup %5934  ;;  %v2150_v9 = vadd.f32 1e-06, %v2144_v50 }
 0xd86   :  { %v2186_v10 = vmul.f32 %v5933_v18, %v2185_v56  ;;  %v2192_v12 = vmul.f32 %v5935_v37, %v2149_v48  ;;  %vm2198_vm7 = vweird.f32 %v5935_v37 }
 0xd87   :  { %5936 = vrsqrt.f32 %v2150_v9  ;;  %vm2199_vm10 = vmor %vm2197_vm9, %vm2198_vm7  ;;  %vm2207_vm12 = vweird.f32 %v2150_v9 }
 0xd88   :  { %v2190_v6 = vsel %vm2189_vm5, %v5933_v18, %v2186_v10  ;;  %v2193_v51 = vmul.f32 %v5935_v37, %v2192_v12 }
 0xd89   :  { %v2214_v23 = vmul.f32 %v2190_v6, %v7045_v11 }
 0xd8a   :  { %v2194_v40 = vmul.f32 0.5, %v2193_v51 }
 0xd8b   :  { %v2221_v13 = vmul.f32 %v7058_v30, %v2214_v23 }
 0xd8c   :  { %v2195_v15 = vsub.f32 1.5, %v2194_v40 }
 0xd8d   :  { %v5937_v20 = vpop.eup %5936  ;;  %v2228_v21 = vadd.f32 %v7065_v7, %v2221_v13 }
 0xd8e   :  { %v2196_v26 = vmul.f32 %v5935_v37, %v2195_v15  ;;  %v2202_v27 = vmul.f32 %v5937_v20, %v2150_v9  ;;  %vm2208_vm11 = vweird.f32 %v5937_v20 }
 0xd8f   :  { %v2271_v42 = vpop.f32.mrf.mxu3  ;;  %5482 = vmatmul.msk.f32.gmra.mxu3 %vm120_vm1, %v2228_v21  ;;  %vm2209_vm13 = vmor %vm2207_vm12, %vm2208_vm11 }
 0xd90   :  { %v2200_v11 = vsel %vm2199_vm10, %v5935_v37, %v2196_v26  ;;  %v2203_v43 = vmul.f32 %v5937_v20, %v2202_v27  ;;  %v2272_v24 = vadd.f32 %v7143_v19, %v2271_v42 }
 0xd91   :  { %v2215_v28 = vmul.f32 %v2200_v11, %v7053_v31  ;;  %v7163_v11 = vld [vmem:[%s8427_s9 + $0x6] ss:$0 sm:$0xff] }
 0xd92   :  { %v2204_v55 = vmul.f32 0.5, %v2203_v43  ;;  %v2295_v8 = vmul.f32 0.044715, %v2272_v24  ;;  %v2289_v1 = vmul.f32 0.5, %v2272_v24 }
 0xd93   :  { %v2222_v32 = vmul.f32 %v7058_v30, %v2215_v28 }
 0xd94   :  { %v2205_v34 = vsub.f32 1.5, %v2204_v55  ;;  %v2301_v38 = vmul.f32 %v2295_v8, %v2272_v24 }
 0xd95   :  { %v2229_v39 = vadd.f32 %v7065_v7, %v2222_v32 }
 0xd96   :  { %v2206_v44 = vmul.f32 %v5937_v20, %v2205_v34  ;;  %v2307_v45 = vmul.f32 %v2301_v38, %v2272_v24 }
 0xd97   :  { %v2274_v17 = vpop.f32.mrf.mxu3  ;;  %5483 = vmatmul.msk.f32.gmra.mxu3 %vm120_vm1, %v2229_v39 }
 0xd98   :  { %v2210_v54 = vsel %vm2209_vm13, %v5937_v20, %v2206_v44  ;;  %v2313_v3 = vadd.f32 %v2307_v45, %v2272_v24  ;;  %v2275_v31 = vadd.f32 %v7143_v19, %v2274_v17 }
 0xd99   :  { %v2216_v52 = vmul.f32 %v2210_v54, %v7073_v25 }
 0xd9a   :  { %v2319_v60 = vmul.f32 0.7978846, %v2313_v3  ;;  %v2296_v35 = vmul.f32 0.044715, %v2275_v31  ;;  %v2290_v50 = vmul.f32 0.5, %v2275_v31 }
 0xd9b   :  { %v2223_v14 = vmul.f32 %v7058_v30, %v2216_v52 }
 0xd9c   :  { %5938 = vtanh.f32 %v2319_v60  ;;  %v2302_v57 = vmul.f32 %v2296_v35, %v2275_v31 }
 0xd9d   :  { %v2230_v16 = vadd.f32 %v7065_v7, %v2223_v14 }
 0xd9e   :  { %v2308_v59 = vmul.f32 %v2302_v57, %v2275_v31 }
 0xd9f   :  { %v2277_v53 = vpop.f32.mrf.mxu3  ;;  %5484 = vmatmul.msk.f32.gmra.mxu3 %vm120_vm1, %v2230_v16 }
 0xda0   :  { %v2278_v62 = vadd.f32 %v7143_v19, %v2277_v53  ;;  %v2314_v18 = vadd.f32 %v2308_v59, %v2275_v31 }
 0xda2   :  { %v5939_v48 = vpop.eup %5938  ;;  %v2297_v61 = vmul.f32 0.044715, %v2278_v62  ;;  %v2320_v0 = vmul.f32 0.7978846, %v2314_v18  ;;  %v2291_v9 = vmul.f32 0.5, %v2278_v62 }
 0xda3   :  { %v2331_v25 = vadd.f32 1.0, %v5939_v48 }
 0xda4   :  { %5940 = vtanh.f32 %v2320_v0  ;;  %v2303_v22 = vmul.f32 %v2297_v61, %v2278_v62 }
 0xda5   :  { %v2337_v2 = vmul.f32 %v2331_v25, %v2289_v1 }
 0xda6   :  { %v2309_v30 = vmul.f32 %v2303_v22, %v2278_v62 }
 0xda7   :  { %2376 = vmatmul.f32.vlgmr.msrb.gmra.mxu0 %v2337_v2 }
 0xda8   :  { %v2315_v4 = vadd.f32 %v2309_v30, %v2278_v62 }
 0xdaa   :  { %v5941_v5 = vpop.eup %5940  ;;  %v2321_v7 = vmul.f32 0.7978846, %v2315_v4 }
 0xdab   :  { %v2332_v56 = vadd.f32 1.0, %v5941_v5 }
 0xdac   :  { %5942 = vtanh.f32 %v2321_v7 }
 0xdad   :  { %v2338_v29 = vmul.f32 %v2332_v56, %v2290_v50 }
 0xdaf   :  { %2379 = vmatmul.f32.gmra.mxu0 %v2338_v29 }
 0xdb2   :  { %v5943_v37 = vpop.eup %5942 }
 0xdb3   :  { %v2333_v10 = vadd.f32 1.0, %v5943_v37 }
 0xdb5   :  { %v2339_v12 = vmul.f32 %v2333_v10, %v2291_v9 }
 0xdb7   :  { %2382 = vmatmul.f32.gmra.mxu0 %v2339_v12 }
 0xe12   :  { %v2280_v6 = vpop.f32.mrf.mxu3 }
 0xe13   :  { %v2281_v51 = vadd.f32 %v7143_v19, %v2280_v6 }
 0xe15   :  { %v2298_v23 = vmul.f32 0.044715, %v2281_v51  ;;  %v2292_v44 = vmul.f32 0.5, %v2281_v51 }
 0xe17   :  { %v2304_v40 = vmul.f32 %v2298_v23, %v2281_v51 }
 0xe19   :  { %v2310_v13 = vmul.f32 %v2304_v40, %v2281_v51 }
 0xe1a   :  { %v2283_v15 = vpop.f32.mrf.mxu3 }
 0xe1b   :  { %v2284_v20 = vadd.f32 %v7143_v19, %v2283_v15  ;;  %v2316_v21 = vadd.f32 %v2310_v13, %v2281_v51 }
 0xe1d   :  { %v2299_v26 = vmul.f32 0.044715, %v2284_v20  ;;  %v2322_v27 = vmul.f32 0.7978846, %v2316_v21  ;;  %v2293_v16 = vmul.f32 0.5, %v2284_v20 }
 0xe1f   :  { %5944 = vtanh.f32 %v2322_v27  ;;  %v2305_v42 = vmul.f32 %v2299_v26, %v2284_v20 }
 0xe21   :  { %v2311_v43 = vmul.f32 %v2305_v42, %v2284_v20 }
 0xe22   :  { %v2286_v24 = vpop.f32.mrf.mxu3 }
 0xe23   :  { %v2287_v28 = vadd.f32 %v7143_v19, %v2286_v24  ;;  %v2317_v55 = vadd.f32 %v2311_v43, %v2284_v20  ;;  %v5495_v24 = vld [vmem:[%s8428_s4 + $0x198] sm:$0xff] }
 0xe24   :  { %v2377_v8 = vpop.f32.mrf.mxu0  ;;  %2595 = vmatpush.msra.mxu1 %v5495_v24 }
 0xe25   :  { %v5945_v32 = vpop.eup %5944  ;;  %v2300_v34 = vmul.f32 0.044715, %v2287_v28  ;;  %v2378_v38 = vadd.f32 %v7163_v11, %v2377_v8  ;;  %v2323_v39 = vmul.f32 0.7978846, %v2317_v55  ;;  %v2294_v0 = vmul.f32 0.5, %v2287_v28  ;;  %v5517_v55 = vld [vmem:[%s8428_s4 + $0x1d8] sm:$0xff] }
 0xe26   :  { %v2334_v45 = vadd.f32 1.0, %v5945_v32  ;;  %2685 = vmatpush.msra.mxu3 %v5517_v55  ;;  %v5516_v8 = vld [vmem:[%s8428_s4 + $0x1d0] sm:$0xff]  ;;  %v5493_v32 = vld [vmem:[%s8428_s4 + $0x188] sm:$0xff] }
 0xe27   :  { %v7168_v17 = vadd.f32 %v2378_v38, %v6959_v46  ;;  %5946 = vtanh.f32 %v2323_v39  ;;  %v2306_v54 = vmul.f32 %v2300_v34, %v2287_v28  ;;  %v5504_v34 = vld [vmem:[%s8428_s4 + $0x1a8] sm:$0xff]  ;;  %v5492_v39 = vld [vmem:[%s8428_s4 + $0x180] sm:$0xff] }
 0xe28   :  { %v2340_v3 = vmul.f32 %v2334_v45, %v2292_v44  ;;  %2686 = vmatpush.msra.mxu3 %v5516_v8  ;;  %v5515_v38 = vld [vmem:[%s8428_s4 + $0x1c8] sm:$0xff]  ;;  %v5503_v44 = vld [vmem:[%s8428_s4 + $0x1a0] sm:$0xff] }
 0xe29   :  { %v2409_v31 = vsel %vm120_vm1, %v7168_v17, 0.0  ;;  %v2312_v52 = vmul.f32 %v2306_v54, %v2287_v28  ;;  %v5514_v45 = vld [vmem:[%s8428_s4 + $0x1c0] sm:$0xff] }
 0xe2a   :  { %2410 = vadd.xlane.f32.xlu0 %v2409_v31  ;;  %2385 = vmatmul.f32.gmra.mxu0 %v2340_v3 }
 0xe2b   :  { %v2318_v19 = vadd.f32 %v2312_v52, %v2287_v28  ;;  %v5506_v28 = vld [vmem:[%s8428_s4 + $0x1b8] sm:$0xff]  ;;  %2687 = vmatpush.msra.mxu3 %v5515_v38 }
 0xe2c   :  { %v2380_v60 = vpop.f32.mrf.mxu0  ;;  %2640 = vmatpush.msrb.mxu2 %v5506_v28 }
 0xe2d   :  { %v5947_v35 = vpop.eup %5946  ;;  %v2381_v14 = vadd.f32 %v7163_v11, %v2380_v60  ;;  %v2324_v57 = vmul.f32 0.7978846, %v2318_v19  ;;  %2688 = vmatpush.msra.mxu3 %v5514_v45 }
 0xe2e   :  { %v2335_v59 = vadd.f32 1.0, %v5947_v35 }
 0xe2f   :  { %v7174_v46 = vadd.f32 %v2381_v14, %v6969_v47  ;;  %5948 = vtanh.f32 %v2324_v57 }
 0xe30   :  { %v2341_v53 = vmul.f32 %v2335_v59, %v2293_v16 }
 0xe31   :  { %v2412_v62 = vsel %vm120_vm1, %v7174_v46, 0.0 }
 0xe32   :  { %2413 = vadd.xlane.f32.xlu1 %v2412_v62  ;;  %2388 = vmatmul.f32.gmra.mxu0 %v2341_v53 }
 0xe34   :  { %v2383_v18 = vpop.f32.mrf.mxu0 }
 0xe35   :  { %v5949_v48 = vpop.eup %5948  ;;  %v2384_v61 = vadd.f32 %v7163_v11, %v2383_v18 }
 0xe36   :  { %v2336_v1 = vadd.f32 1.0, %v5949_v48 }
 0xe37   :  { %v7180_v25 = vadd.f32 %v2384_v61, %v6977_v63 }
 0xe38   :  { %v2342_v22 = vmul.f32 %v2336_v1, %v2294_v0 }
 0xe39   :  { %v2415_v47 = vsel %vm120_vm1, %v7180_v25, 0.0 }
 0xe3a   :  { %2416 = vadd.xlane.f32.xlu2 %v2415_v47  ;;  %2391 = vmatmul.f32.gmra.mxu0 %v2342_v22 }
 0xe9d   :  { %v2411_v2 = vpop.xlane.xlu0 %2410 }
 0xe9e   :  { %v2427_v30 = vmul.f32 %v2411_v2, %v6271_v33 }
 0xea0   :  { %v7186_v4 = vsub.f32 %v7168_v17, %v2427_v30 }
 0xea2   :  { %v2439_v5 = vmul.f32 %v7186_v4, %v7186_v4 }
 0xea4   :  { %v2445_v7 = vsel %vm120_vm1, %v2439_v5, 0.0 }
 0xea5   :  { %v2414_v50 = vpop.xlane.xlu1 %2413  ;;  %2446 = vadd.xlane.f32.xlu0 %v2445_v7 }
 0xea6   :  { %v2428_v63 = vmul.f32 %v2414_v50, %v6271_v33 }
 0xea7   :  { %v2386_v56 = vpop.f32.mrf.mxu0 }
 0xea8   :  { %v7193_v29 = vsub.f32 %v7174_v46, %v2428_v63  ;;  %v2387_v37 = vadd.f32 %v7163_v11, %v2386_v56  ;;  %v7276_v63 = vld [vmem:[%s8427_s9 + $0x8] ss:$0 sm:$0xff] }
 0xeaa   :  { %v7197_v9 = vadd.f32 %v2387_v37, %v6999_v58  ;;  %v2440_v10 = vmul.f32 %v7193_v29, %v7193_v29 }
 0xeac   :  { %v2448_v12 = vsel %vm120_vm1, %v2440_v10, 0.0  ;;  %v2418_v6 = vsel %vm120_vm1, %v7197_v9, 0.0 }
 0xead   :  { %2449 = vadd.xlane.f32.xlu1 %v2448_v12  ;;  %v2417_v51 = vpop.xlane.xlu2 %2416  ;;  %2419 = vadd.xlane.f32.xlu0 %v2418_v6  ;;  %v7283_v12 = vld [vmem:[%s8427_s9 + $0x9] ss:$0 sm:$0xff] }
 0xeae   :  { %v2429_v23 = vmul.f32 %v2417_v51, %v6271_v33 }
 0xeaf   :  { %v2389_v40 = vpop.f32.mrf.mxu0 }
 0xeb0   :  { %v7206_v13 = vsub.f32 %v7180_v25, %v2429_v23  ;;  %v2390_v58 = vadd.f32 %v7163_v11, %v2389_v40 }
 0xeb2   :  { %v7210_v15 = vadd.f32 %v2390_v58, %v7015_v49  ;;  %v2441_v20 = vmul.f32 %v7206_v13, %v7206_v13 }
 0xeb4   :  { %v2451_v21 = vsel %vm120_vm1, %v2441_v20, 0.0  ;;  %v2421_v26 = vsel %vm120_vm1, %v7210_v15, 0.0 }
 0xeb5   :  { %2452 = vadd.xlane.f32.xlu2 %v2451_v21  ;;  %2422 = vadd.xlane.f32.xlu1 %v2421_v26 }
 0xeb7   :  { %v2392_v27 = vpop.f32.mrf.mxu0 }
 0xeb8   :  { %v2393_v42 = vadd.f32 %v7163_v11, %v2392_v27  ;;  %v5505_v11 = vld [vmem:[%s8428_s4 + $0x1b0] sm:$0xff] }
 0xeb9   :  { %2641 = vmatpush.msrb.mxu2 %v5505_v11 }
 0xeba   :  { %v7219_v43 = vadd.f32 %v2393_v42, %v7025_v36  ;;  %v5494_v36 = vld [vmem:[%s8428_s4 + $0x190] sm:$0xff] }
 0xebb   :  { %2596 = vmatpush.msra.mxu1 %v5494_v36  ;;  %2642 = vmatpush.msrb.mxu2 %v5504_v34 }
 0xebc   :  { %v2424_v49 = vsel %vm120_vm1, %v7219_v43, 0.0 }
 0xebd   :  { %2425 = vadd.xlane.f32.xlu2 %v2424_v49  ;;  %2597 = vmatpush.msra.mxu1 %v5493_v32 }
 0xebe   :  { %2643 = vmatpush.msrb.mxu2 %v5503_v44 }
 0xebf   :  { %2598 = vmatpush.msra.mxu1 %v5492_v39 }
 0xf18   :  { %v2447_v54 = vpop.xlane.xlu0 %2446 }
 0xf19   :  { %v2463_v3 = vmul.f32 %v2447_v54, %v6271_v33 }
 0xf1b   :  { %v2469_v31 = vadd.f32 1e-06, %v2463_v3 }
 0xf1d   :  { %5950 = vrsqrt.f32 %v2469_v31  ;;  %vm2481_vm15 = vweird.f32 %v2469_v31 }
 0xf20   :  { %v2450_v52 = vpop.xlane.xlu1 %2449  ;;  %v2420_v19 = vpop.xlane.xlu0 %2419 }
 0xf21   :  { %v2464_v60 = vmul.f32 %v2450_v52, %v6271_v33  ;;  %v2430_v35 = vmul.f32 %v2420_v19, %v6271_v33 }
 0xf23   :  { %v5951_v14 = vpop.eup %5950  ;;  %v2470_v57 = vadd.f32 1e-06, %v2464_v60  ;;  %v7263_v16 = vsub.f32 %v7197_v9, %v2430_v35 }
 0xf24   :  { %v2476_v59 = vmul.f32 %v5951_v14, %v2469_v31  ;;  %vm2482_vm14 = vweird.f32 %v5951_v14 }
 0xf25   :  { %5952 = vrsqrt.f32 %v2470_v57  ;;  %v2442_v53 = vmul.f32 %v7263_v16, %v7263_v16  ;;  %vm2483_vm0 = vmor %vm2481_vm15, %vm2482_vm14  ;;  %vm2491_vm3 = vweird.f32 %v2470_v57 }
 0xf26   :  { %v2477_v62 = vmul.f32 %v5951_v14, %v2476_v59  ;;  %v5569_v59 = vld [vmem:[%s8428_s4 + $0x238] sm:$0xff] }
 0xf27   :  { %v2454_v18 = vsel %vm120_vm1, %v2442_v53, 0.0  ;;  %3058 = vmatpush.msrb.mxu3 %v5569_v59 }
 0xf28   :  { %v2478_v48 = vmul.f32 0.5, %v2477_v62  ;;  %v2453_v61 = vpop.xlane.xlu2 %2452  ;;  %v2423_v0 = vpop.xlane.xlu1 %2422  ;;  %2455 = vadd.xlane.f32.xlu0 %v2454_v18  ;;  %v5568_v18 = vld [vmem:[%s8428_s4 + $0x230] sm:$0xff] }
 0xf29   :  { %v2465_v1 = vmul.f32 %v2453_v61, %v6271_v33  ;;  %v2431_v22 = vmul.f32 %v2423_v0, %v6271_v33  ;;  %3059 = vmatpush.msrb.mxu3 %v5568_v18  ;;  %v5567_v0 = vld [vmem:[%s8428_s4 + $0x228] sm:$0xff] }
 0xf2a   :  { %v2479_v47 = vsub.f32 1.5, %v2478_v48 }
 0xf2b   :  { %v5953_v2 = vpop.eup %5952  ;;  %v2471_v30 = vadd.f32 1e-06, %v2465_v1  ;;  %v7271_v5 = vsub.f32 %v7210_v15, %v2431_v22  ;;  %3060 = vmatpush.msrb.mxu3 %v5567_v0 }
 0xf2c   :  { %v2480_v7 = vmul.f32 %v5951_v14, %v2479_v47  ;;  %v2486_v50 = vmul.f32 %v5953_v2, %v2470_v57  ;;  %vm2492_vm2 = vweird.f32 %v5953_v2 }
 0xf2d   :  { %5954 = vrsqrt.f32 %v2471_v30  ;;  %v2443_v56 = vmul.f32 %v7271_v5, %v7271_v5  ;;  %vm2493_vm4 = vmor %vm2491_vm3, %vm2492_vm2  ;;  %vm2501_vm7 = vweird.f32 %v2471_v30 }
 0xf2e   :  { %v2484_v37 = vsel %vm2483_vm0, %v5951_v14, %v2480_v7  ;;  %v2487_v10 = vmul.f32 %v5953_v2, %v2486_v50 }
 0xf2f   :  { %v2535_v6 = vmul.f32 %v2484_v37, %v7186_v4  ;;  %v2457_v51 = vsel %vm120_vm1, %v2443_v56, 0.0 }
 0xf30   :  { %v2488_v23 = vmul.f32 0.5, %v2487_v10  ;;  %v2426_v40 = vpop.xlane.xlu2 %2425  ;;  %2458 = vadd.xlane.f32.xlu1 %v2457_v51 }
 0xf31   :  { %v2542_v58 = vmul.f32 %v7276_v63, %v2535_v6  ;;  %v2432_v20 = vmul.f32 %v2426_v40, %v6271_v33 }
 0xf32   :  { %v2489_v21 = vsub.f32 1.5, %v2488_v23 }
 0xf33   :  { %v5955_v26 = vpop.eup %5954  ;;  %v7290_v27 = vadd.f32 %v7283_v12, %v2542_v58  ;;  %v7293_v42 = vsub.f32 %v7219_v43, %v2432_v20 }
 0xf34   :  { %v2490_v49 = vmul.f32 %v5953_v2, %v2489_v21  ;;  %v2496_v4 = vmul.f32 %v5955_v26, %v2471_v30  ;;  %vm2502_vm5 = vweird.f32 %v5955_v26  ;;  %v5566_v30 = vld [vmem:[%s8428_s4 + $0x220] sm:$0xff] }
 0xf35   :  { %5497 = vmatmul.msk.f32.vlgmr.msra.gmra.mxu1 %vm120_vm1, %v7290_v27  ;;  %5508 = vmatmul.msk.f32.vlgmr.msrb.gmra.mxu2 %vm120_vm1, %v7290_v27  ;;  %v2444_v24 = vmul.f32 %v7293_v42, %v7293_v42  ;;  %vm2503_vm9 = vmor %vm2501_vm7, %vm2502_vm5 }
 0xf36   :  { %v2494_v28 = vsel %vm2493_vm4, %v5953_v2, %v2490_v49  ;;  %v2497_v55 = vmul.f32 %v5955_v26, %v2496_v4  ;;  %5519 = vmatmul.msk.f32.vlgmr.msra.gmra.mxu3 %vm120_vm1, %v7290_v27 }
 0xf37   :  { %v2536_v36 = vmul.f32 %v2494_v28, %v7193_v29  ;;  %v2460_v11 = vsel %vm120_vm1, %v2444_v24, 0.0  ;;  %3061 = vmatpush.msrb.mxu3 %v5566_v30 }
 0xf38   :  { %v2498_v8 = vmul.f32 0.5, %v2497_v55  ;;  %2461 = vadd.xlane.f32.xlu2 %v2460_v11 }
 0xf39   :  { %v2543_v32 = vmul.f32 %v7276_v63, %v2536_v36 }
 0xf3a   :  { %v2499_v34 = vsub.f32 1.5, %v2498_v8 }
 0xf3b   :  { %v7307_v38 = vadd.f32 %v7283_v12, %v2543_v32 }
 0xf3c   :  { %v2500_v39 = vmul.f32 %v5955_v26, %v2499_v34 }
 0xf3d   :  { %5498 = vmatmul.msk.f32.gmra.mxu1 %vm120_vm1, %v7307_v38  ;;  %5509 = vmatmul.msk.f32.gmra.mxu2 %vm120_vm1, %v7307_v38 }
 0xf3e   :  { %v2504_v29 = vsel %vm2503_vm9, %v5955_v26, %v2500_v39  ;;  %5520 = vmatmul.msk.f32.gmra.mxu3 %vm120_vm1, %v7307_v38 }
 0xf3f   :  { %v2537_v44 = vmul.f32 %v2504_v29, %v7206_v13  ;;  %v5792_v29 = vld [vmem:[%s8429_s5 + $0xd] ss:$0 sm:$0xff] }
 0xf41   :  { %v2544_v45 = vmul.f32 %v7276_v63, %v2537_v44  ;;  %v5793_v44 = vld [vmem:[%s8429_s5 + $0xe] ss:$0 sm:$0xff] }
 0xf43   :  { %v7318_v54 = vadd.f32 %v7283_v12, %v2544_v45 }
 0xf45   :  { %5499 = vmatmul.msk.f32.gmra.mxu1 %vm120_vm1, %v7318_v54  ;;  %5510 = vmatmul.msk.f32.gmra.mxu2 %vm120_vm1, %v7318_v54 }
 0xf46   :  { %5521 = vmatmul.msk.f32.gmra.mxu3 %vm120_vm1, %v7318_v54 }
 0xf9b   :  { %v2456_v3 = vpop.xlane.xlu0 %2455 }
 0xf9c   :  { %v2466_v31 = vmul.f32 %v2456_v3, %v6271_v33 }
 0xf9e   :  { %v2472_v52 = vadd.f32 1e-06, %v2466_v31 }
 0xfa0   :  { %5956 = vrsqrt.f32 %v2472_v52  ;;  %vm2511_vm11 = vweird.f32 %v2472_v52 }
 0xfa3   :  { %v2459_v13 = vpop.xlane.xlu1 %2458 }
 0xfa4   :  { %v2467_v19 = vmul.f32 %v2459_v13, %v6271_v33 }
 0xfa6   :  { %v5957_v60 = vpop.eup %5956  ;;  %v2473_v35 = vadd.f32 1e-06, %v2467_v19  ;;  %v7385_v19 = vld [vmem:[%s8429_s5 + $0xc] ss:$0 sm:$0xff] }
 0xfa7   :  { %v2506_v14 = vmul.f32 %v5957_v60, %v2472_v52  ;;  %vm2512_vm10 = vweird.f32 %v5957_v60 }
 0xfa8   :  { %5958 = vrsqrt.f32 %v2473_v35  ;;  %vm2513_vm12 = vmor %vm2511_vm11, %vm2512_vm10  ;;  %vm2521_vm14 = vweird.f32 %v2473_v35 }
 0xfa9   :  { %v2507_v57 = vmul.f32 %v5957_v60, %v2506_v14 }
 0xfab   :  { %v2508_v53 = vmul.f32 0.5, %v2507_v57  ;;  %v2462_v62 = vpop.xlane.xlu2 %2461 }
 0xfac   :  { %v2468_v48 = vmul.f32 %v2462_v62, %v6271_v33 }
 0xfad   :  { %v2509_v61 = vsub.f32 1.5, %v2508_v53 }
 0xfae   :  { %v5959_v1 = vpop.eup %5958  ;;  %v2474_v22 = vadd.f32 1e-06, %v2468_v48 }
 0xfaf   :  { %v2510_v47 = vmul.f32 %v5957_v60, %v2509_v61  ;;  %v2516_v2 = vmul.f32 %v5959_v1, %v2473_v35  ;;  %vm2522_vm13 = vweird.f32 %v5959_v1 }
 0xfb0   :  { %5960 = vrsqrt.f32 %v2474_v22  ;;  %vm2523_vm15 = vmor %vm2521_vm14, %vm2522_vm13  ;;  %vm2531_vm2 = vweird.f32 %v2474_v22 }
 0xfb1   :  { %v2514_v7 = vsel %vm2513_vm12, %v5957_v60, %v2510_v47  ;;  %v2517_v50 = vmul.f32 %v5959_v1, %v2516_v2 }
 0xfb2   :  { %v2538_v56 = vmul.f32 %v2514_v7, %v7263_v16  ;;  %v2600_v31 = vpop.f32.mrf.mxu1 }
 0xfb3   :  { %v2518_v37 = vmul.f32 0.5, %v2517_v50  ;;  %v2601_v35 = vadd.f32 %v7385_v19, %v2600_v31 }
 0xfb4   :  { %v2545_v10 = vmul.f32 %v7276_v63, %v2538_v56 }
 0xfb5   :  { %v2519_v6 = vsub.f32 1.5, %v2518_v37 }
 0xfb6   :  { %v5961_v51 = vpop.eup %5960  ;;  %v7344_v23 = vadd.f32 %v7283_v12, %v2545_v10 }
 0xfb7   :  { %v2520_v40 = vmul.f32 %v5959_v1, %v2519_v6  ;;  %v2526_v58 = vmul.f32 %v5961_v51, %v2474_v22  ;;  %vm2532_vm0 = vweird.f32 %v5961_v51  ;;  %v5558_v6 = vld [vmem:[%s8428_s4 + $0x218] sm:$0xff] }
 0xfb8   :  { %5500 = vmatmul.msk.f32.gmra.mxu1 %vm120_vm1, %v7344_v23  ;;  %v2645_v20 = vpop.f32.mrf.mxu2  ;;  %5511 = vmatmul.msk.f32.gmra.mxu2 %vm120_vm1, %v7344_v23  ;;  %vm2533_vm3 = vmor %vm2531_vm2, %vm2532_vm0 }
 0xfb9   :  { %v2524_v16 = vsel %vm2523_vm15, %v5959_v1, %v2520_v40  ;;  %v2527_v21 = vmul.f32 %v5961_v51, %v2526_v58  ;;  %v2690_v26 = vpop.f32.mrf.mxu3  ;;  %5522 = vmatmul.msk.f32.gmra.mxu3 %vm120_vm1, %v7344_v23  ;;  %v2646_v60 = vadd.f32 %v5792_v29, %v2645_v20  ;;  %v5557_v58 = vld [vmem:[%s8428_s4 + $0x210] sm:$0xff] }
 0xfba   :  { %v2539_v49 = vmul.f32 %v2524_v16, %v7271_v5  ;;  %v2691_v13 = vadd.f32 %v5793_v44, %v2690_v26  ;;  %v2603_v14 = vpop.f32.mrf.mxu1  ;;  %v5556_v16 = vld [vmem:[%s8428_s4 + $0x208] sm:$0xff] }
 0xfbb   :  { %v2528_v4 = vmul.f32 0.5, %v2527_v21  ;;  %v2604_v57 = vadd.f32 %v7385_v19, %v2603_v14 }
 0xfbc   :  { %v2546_v24 = vmul.f32 %v7276_v63, %v2539_v49  ;;  %v5555_v49 = vld [vmem:[%s8428_s4 + $0x200] sm:$0xff] }
 0xfbd   :  { %v2529_v28 = vsub.f32 1.5, %v2528_v4 }
 0xfbe   :  { %v7355_v55 = vadd.f32 %v7283_v12, %v2546_v24 }
 0xfbf   :  { %v2530_v36 = vmul.f32 %v5961_v51, %v2529_v28 }
 0xfc0   :  { %5501 = vmatmul.msk.f32.gmra.mxu1 %vm120_vm1, %v7355_v55  ;;  %v2648_v11 = vpop.f32.mrf.mxu2  ;;  %5512 = vmatmul.msk.f32.gmra.mxu2 %vm120_vm1, %v7355_v55 }
 0xfc1   :  { %v2534_v8 = vsel %vm2533_vm3, %v5961_v51, %v2530_v36  ;;  %v2693_v5 = vpop.f32.mrf.mxu3  ;;  %5523 = vmatmul.msk.f32.gmra.mxu3 %vm120_vm1, %v7355_v55  ;;  %v2649_v52 = vadd.f32 %v5792_v29, %v2648_v11 }
 0xfc2   :  { %v2540_v32 = vmul.f32 %v2534_v8, %v7293_v42  ;;  %v2694_v3 = vadd.f32 %v5793_v44, %v2693_v5  ;;  %v2606_v59 = vpop.f32.mrf.mxu1 }
 0xfc3   :  { %v2607_v53 = vadd.f32 %v7385_v19, %v2606_v59 }
 0xfc4   :  { %v2547_v34 = vmul.f32 %v7276_v63, %v2540_v32 }
 0xfc6   :  { %v7366_v39 = vadd.f32 %v7283_v12, %v2547_v34 }
 0xfc8   :  { %5502 = vmatmul.msk.f32.gmra.mxu1 %vm120_vm1, %v7366_v39  ;;  %v2651_v45 = vpop.f32.mrf.mxu2  ;;  %5513 = vmatmul.msk.f32.gmra.mxu2 %vm120_vm1, %v7366_v39 }
 0xfc9   :  { %v2652_v42 = vadd.f32 %v5792_v29, %v2651_v45  ;;  %v2696_v63 = vpop.f32.mrf.mxu3  ;;  %5524 = vmatmul.msk.f32.gmra.mxu3 %vm120_vm1, %v7366_v39 }
 0xfca   :  { %v2697_v12 = vadd.f32 %v5793_v44, %v2696_v63 }
 0xfcb   :  { %5526 = vmatpush.xpose.msk.msra.mxu0 %vm426_vm6, %v2652_v42 }
 0xfcc   :  { %2815 = vmatpush.msrb.mxu1 %v2697_v12 }
 0xfce   :  { %2816 = vmatpush.msrb.mxu1 %v2694_v3 }
 0xfcf   :  { %5527 = vmatpush.xpose.msk.msra.mxu0 %vm426_vm6, %v2649_v52 }
 0xfd0   :  { %2817 = vmatpush.msrb.mxu1 %v2691_v13 }
 0xfd1   :  { %5571 = vmatmul.msk.f32.vlgmr.msrb.gmra.mxu3 %vm120_vm1, %v7290_v27 }
 0xfd3   :  { %5528 = vmatpush.xpose.msk.msra.mxu0 %vm426_vm6, %v2646_v60 }
 0xfd6   :  { %5529 = vmatmul.msk.f32.vlgmr.msra.gmra.mxu0 %vm426_vm6, %v2601_v35 }
 0xfd9   :  { %5572 = vmatmul.msk.f32.gmra.mxu3 %vm120_vm1, %v7307_v38 }
 0xfde   :  { %5530 = vmatmul.msk.f32.gmra.mxu0 %vm426_vm6, %v2604_v57 }
 0xfe1   :  { %5573 = vmatmul.msk.f32.gmra.mxu3 %vm120_vm1, %v7318_v54 }
 0xfe6   :  { %5531 = vmatmul.msk.f32.gmra.mxu0 %vm426_vm6, %v2607_v53 }
 0xfe9   :  { %5574 = vmatmul.msk.f32.gmra.mxu3 %vm120_vm1, %v7344_v23 }
 0xff1   :  { %5575 = vmatmul.msk.f32.gmra.mxu3 %vm120_vm1, %v7355_v55 }
 0xff9   :  { %5576 = vmatmul.msk.f32.gmra.mxu3 %vm120_vm1, %v7366_v39 }
0x1035   :  { %v2609_v30 = vpop.f32.mrf.mxu1 }
0x1036   :  { %v2610_v40 = vadd.f32 %v7385_v19, %v2609_v30 }
0x103b   :  { %v2654_v62 = vpop.f32.mrf.mxu2 }
0x103c   :  { %v2699_v18 = vpop.f32.mrf.mxu3  ;;  %v2655_v37 = vadd.f32 %v5792_v29, %v2654_v62 }
0x103d   :  { %v2700_v50 = vadd.f32 %v5793_v44, %v2699_v18  ;;  %v2612_v21 = vpop.f32.mrf.mxu1 }
0x103e   :  { %v2613_v28 = vadd.f32 %v7385_v19, %v2612_v21 }
0x1043   :  { %v2657_v48 = vpop.f32.mrf.mxu2 }
0x1044   :  { %v2702_v61 = vpop.f32.mrf.mxu3  ;;  %v2658_v7 = vadd.f32 %v5792_v29, %v2657_v48 }
0x1045   :  { %v2703_v2 = vadd.f32 %v5793_v44, %v2702_v61  ;;  %v2615_v8 = vpop.f32.mrf.mxu1 }
0x1046   :  { %v2616_v34 = vadd.f32 %v7385_v19, %v2615_v8 }
0x104b   :  { %v2660_v0 = vpop.f32.mrf.mxu2 }
0x104c   :  { %v2661_v1 = vadd.f32 %v5792_v29, %v2660_v0  ;;  %v2705_v22 = vpop.f32.mrf.mxu3 }
0x104d   :  { %v2706_v47 = vadd.f32 %v5793_v44, %v2705_v22 }
0x104e   :  { %5535 = vmatpush.xpose.msk.msra.mxu2 %vm426_vm6, %v2661_v1 }
0x104f   :  { %2933 = vmatpush.msrb.mxu0 %v2706_v47 }
0x1051   :  { %2934 = vmatpush.msrb.mxu0 %v2703_v2 }
0x1052   :  { %5536 = vmatpush.xpose.msk.msra.mxu2 %vm426_vm6, %v2658_v7 }
0x1053   :  { %2935 = vmatpush.msrb.mxu0 %v2700_v50  ;;  %v2745_v56 = vpop.f32.mrf.mxu0 }
0x1054   :  { %v2754_v10 = vmul.f32 0.35355338, %v2745_v56 }
0x1056   :  { %5537 = vmatpush.xpose.msk.msra.mxu2 %vm426_vm6, %v2655_v37  ;;  %v2757_v51 = vadd.f32 %v2754_v10, %v6497_v41  ;;  %v5795_v37 = vld [vmem:[%s8429_s5 + $0x10] ss:$0 sm:$0xff] }
0x1058   :  { %v2760_v20 = vsel %vm477_vm8, %v2757_v51, -inf }
0x1059   :  { %2761 = vmax.xlane.f32.xlu0 %v2760_v20  ;;  %5538 = vmatmul.msk.f32.vlgmr.msra.gmra.mxu2 %vm426_vm6, %v2610_v40 }
0x105a   :  { %3013 = vmatpush.msrb.mxu2 %v5558_v6 }
0x105b   :  { %v2748_v26 = vpop.f32.mrf.mxu0 }
0x105c   :  { %3014 = vmatpush.msrb.mxu2 %v5557_v58  ;;  %v2755_v4 = vmul.f32 0.35355338, %v2748_v26 }
0x105e   :  { %3015 = vmatpush.msrb.mxu2 %v5556_v16  ;;  %v2758_v24 = vadd.f32 %v2755_v4, %v6497_v41  ;;  %v5547_v4 = vld [vmem:[%s8428_s4 + $0x1f8] sm:$0xff] }
0x105f   :  { %2968 = vmatpush.msra.mxu1 %v5547_v4 }
0x1060   :  { %3016 = vmatpush.msrb.mxu2 %v5555_v49  ;;  %v2763_v36 = vsel %vm477_vm8, %v2758_v24, -inf }
0x1061   :  { %2764 = vmax.xlane.f32.xlu1 %v2763_v36  ;;  %5539 = vmatmul.msk.f32.gmra.mxu2 %vm426_vm6, %v2613_v28  ;;  %v5545_v28 = vld [vmem:[%s8428_s4 + $0x1e8] sm:$0xff]  ;;  %v5544_v36 = vld [vmem:[%s8428_s4 + $0x1e0] sm:$0xff] }
0x1063   :  { %v2751_v11 = vpop.f32.mrf.mxu0 }
0x1064   :  { %v2756_v5 = vmul.f32 0.35355338, %v2751_v11 }
0x1066   :  { %v2759_v32 = vadd.f32 %v2756_v5, %v6497_v41 }
0x1068   :  { %v2766_v29 = vsel %vm477_vm8, %v2759_v32, -inf }
0x1069   :  { %2767 = vmax.xlane.f32.xlu2 %v2766_v29  ;;  %5540 = vmatmul.msk.f32.gmra.mxu2 %vm426_vm6, %v2616_v34 }
0x1071   :  { %5560 = vmatmul.msk.f32.vlgmr.msrb.gmra.mxu2 %vm120_vm1, %v7290_v27 }
0x1079   :  { %5561 = vmatmul.msk.f32.gmra.mxu2 %vm120_vm1, %v7307_v38 }
0x1081   :  { %5562 = vmatmul.msk.f32.gmra.mxu2 %vm120_vm1, %v7318_v54 }
0x1089   :  { %5563 = vmatmul.msk.f32.gmra.mxu2 %vm120_vm1, %v7344_v23 }
0x1091   :  { %5564 = vmatmul.msk.f32.gmra.mxu2 %vm120_vm1, %v7355_v55 }
0x1099   :  { %5565 = vmatmul.msk.f32.gmra.mxu2 %vm120_vm1, %v7366_v39 }
0x10cc   :  { %v2762_v44 = vpop.xlane.xlu0 %2761 }
0x10cd   :  { %v2769_v45 = vsub.f32 %v2757_v51, %v2762_v44 }
0x10cf   :  { %v2772_v42 = vmul.f32 1.442695, %v2769_v45 }
0x10d1   :  { %5962 = vpow2.f32 %v2772_v42 }
0x10d4   :  { %v2765_v63 = vpop.xlane.xlu1 %2764 }
0x10d5   :  { %v2770_v12 = vsub.f32 %v2758_v24, %v2765_v63  ;;  %v5546_v24 = vld [vmem:[%s8428_s4 + $0x1f0] sm:$0xff] }
0x10d6   :  { %2969 = vmatpush.msra.mxu1 %v5546_v24  ;;  %v5796_v24 = vld [vmem:[%s8429_s5 + $0xf] ss:$0 sm:$0xff] }
0x10d7   :  { %v5963_v3 = vpop.eup %5962  ;;  %v2774_v31 = vmul.f32 1.442695, %v2770_v12 }
0x10d8   :  { %v2778_v52 = vsel %vm477_vm8, %v5963_v3, 0.0  ;;  %2970 = vmatpush.msra.mxu1 %v5545_v28 }
0x10d9   :  { %5964 = vpow2.f32 %v2774_v31  ;;  %2779 = vadd.xlane.f32.xlu0 %v2778_v52 }
0x10da   :  { %2971 = vmatpush.msra.mxu1 %v5544_v36 }
0x10dc   :  { %v2768_v13 = vpop.xlane.xlu2 %2767  ;;  %v2863_v19 = vpop.f32.mrf.mxu2 }
0x10dd   :  { %v2771_v60 = vsub.f32 %v2759_v32, %v2768_v13  ;;  %v2872_v35 = vmul.f32 0.35355338, %v2863_v19 }
0x10df   :  { %v5965_v14 = vpop.eup %5964  ;;  %v2776_v57 = vmul.f32 1.442695, %v2771_v60  ;;  %v2875_v59 = vadd.f32 %v2872_v35, %v6497_v41 }
0x10e0   :  { %v2781_v53 = vsel %vm477_vm8, %v5965_v14, 0.0 }
0x10e1   :  { %5966 = vpow2.f32 %v2776_v57  ;;  %2782 = vadd.xlane.f32.xlu1 %v2781_v53  ;;  %v2878_v62 = vsel %vm477_vm8, %v2875_v59, -inf }
0x10e2   :  { %2879 = vmax.xlane.f32.xlu0 %v2878_v62 }
0x10e4   :  { %v2866_v18 = vpop.f32.mrf.mxu2 }
0x10e5   :  { %v2873_v48 = vmul.f32 0.35355338, %v2866_v18 }
0x10e7   :  { %v5967_v61 = vpop.eup %5966  ;;  %v2876_v0 = vadd.f32 %v2873_v48, %v6497_v41  ;;  %v5525_v48 = vld [vmem:[%s8430_s6 + $0x20] sm:$0xff] }
0x10e8   :  { %v2784_v1 = vsel %vm477_vm8, %v5967_v61, 0.0  ;;  %3259 = vmatpush.msra.mxu2 %v5525_v48 }
0x10e9   :  { %2785 = vadd.xlane.f32.xlu2 %v2784_v1  ;;  %v2881_v22 = vsel %vm477_vm8, %v2876_v0, -inf }
0x10ea   :  { %2882 = vmax.xlane.f32.xlu1 %v2881_v22  ;;  %3447 = vmatpush.msrb.mxu2 %v5525_v48 }
0x10ec   :  { %v2869_v47 = vpop.f32.mrf.mxu2 }
0x10ed   :  { %v2874_v2 = vmul.f32 0.35355338, %v2869_v47 }
0x10ef   :  { %v2877_v30 = vadd.f32 %v2874_v2, %v6497_v41 }
0x10f1   :  { %v2884_v7 = vsel %vm477_vm8, %v2877_v30, -inf }
0x10f2   :  { %2885 = vmax.xlane.f32.xlu2 %v2884_v7  ;;  %v5794_v7 = vld [vmem:[%s8429_s5 + $0x11] ss:$0 sm:$0xff] }
0x10f4   :  { %v3018_v50 = vpop.f32.mrf.mxu2 }
0x10f5   :  { %v3019_v58 = vadd.f32 %v5795_v37, %v3018_v50 }
0x10fc   :  { %v3021_v56 = vpop.f32.mrf.mxu2 }
0x10fd   :  { %v3022_v51 = vadd.f32 %v5795_v37, %v3021_v56 }
0x1104   :  { %v3024_v10 = vpop.f32.mrf.mxu2 }
0x1105   :  { %v3025_v6 = vadd.f32 %v5795_v37, %v3024_v10 }
0x1107   :  { %5578 = vmatpush.xpose.msk.msra.mxu0 %vm426_vm6, %v3025_v6 }
0x110b   :  { %5579 = vmatpush.xpose.msk.msra.mxu0 %vm426_vm6, %v3022_v51 }
0x110c   :  { %v3027_v40 = vpop.f32.mrf.mxu2 }
0x110d   :  { %v3028_v49 = vadd.f32 %v5795_v37, %v3027_v40 }
0x110f   :  { %5580 = vmatpush.xpose.msk.msra.mxu0 %vm426_vm6, %v3019_v58 }
0x1114   :  { %v3030_v20 = vpop.f32.mrf.mxu2 }
0x1115   :  { %v3031_v26 = vadd.f32 %v5795_v37, %v3030_v20 }
0x111c   :  { %v3033_v16 = vpop.f32.mrf.mxu2 }
0x111d   :  { %v3034_v21 = vadd.f32 %v5795_v37, %v3033_v16 }
0x111f   :  { %5593 = vmatpush.xpose.msk.msra.mxu3 %vm426_vm6, %v3034_v21 }
0x1123   :  { %5594 = vmatpush.xpose.msk.msra.mxu3 %vm426_vm6, %v3031_v26 }
0x1127   :  { %5595 = vmatpush.xpose.msk.msra.mxu3 %vm426_vm6, %v3028_v49 }
0x114c   :  { %v2780_v11 = vpop.xlane.xlu0 %2779 }
0x114d   :  { %5968 = vrcp.f32 %v2780_v11 }
0x1153   :  { %v5969_v8 = vpop.eup %5968 }
0x1154   :  { %v2790_v5 = vmul.f32 %v5969_v8, %v5963_v3  ;;  %v2783_v32 = vpop.xlane.xlu1 %2782 }
0x1155   :  { %5970 = vrcp.f32 %v2783_v32  ;;  %v2880_v34 = vpop.xlane.xlu0 %2879  ;;  %v5610_v32 = vld [vmem:[%s8428_s4 + $0x250] sm:$0xff] }
0x1156   :  { %v2887_v29 = vsub.f32 %v2875_v59, %v2880_v34  ;;  %5532 = vmatmul.msk.f32.vlgmr.msrb.gmra.mxu1 %vm477_vm8, %v2790_v5  ;;  %v5611_v5 = vld [vmem:[%s8428_s4 + $0x258] sm:$0xff] }
0x1157   :  { %3480 = vmatpush.msrb.mxu3 %v5611_v5 }
0x1158   :  { %v2890_v44 = vmul.f32 1.442695, %v2887_v29  ;;  %v5609_v29 = vld [vmem:[%s8428_s4 + $0x248] sm:$0xff] }
0x1159   :  { %3481 = vmatpush.msrb.mxu3 %v5610_v32 }
0x115a   :  { %5972 = vpow2.f32 %v2890_v44 }
0x115b   :  { %v5971_v45 = vpop.eup %5970  ;;  %3482 = vmatpush.msrb.mxu3 %v5609_v29 }
0x115c   :  { %v2786_v42 = vpop.xlane.xlu2 %2785  ;;  %v2791_v63 = vmul.f32 %v5971_v45, %v5965_v14  ;;  %v5608_v45 = vld [vmem:[%s8428_s4 + $0x240] sm:$0xff] }
0x115d   :  { %5974 = vrcp.f32 %v2786_v42  ;;  %v2883_v12 = vpop.xlane.xlu1 %2882  ;;  %3483 = vmatpush.msrb.mxu3 %v5608_v45 }
0x115e   :  { %v2888_v31 = vsub.f32 %v2876_v0, %v2883_v12  ;;  %5533 = vmatmul.msk.f32.gmra.mxu1 %vm477_vm8, %v2791_v63 }
0x1160   :  { %v5973_v52 = vpop.eup %5972  ;;  %v2892_v13 = vmul.f32 1.442695, %v2888_v31 }
0x1161   :  { %v2896_v3 = vsel %vm477_vm8, %v5973_v52, 0.0 }
0x1162   :  { %5976 = vpow2.f32 %v2892_v13  ;;  %2897 = vadd.xlane.f32.xlu0 %v2896_v3 }
0x1163   :  { %v5975_v19 = vpop.eup %5974 }
0x1164   :  { %v2792_v60 = vmul.f32 %v5975_v19, %v5967_v61  ;;  %v3063_v61 = vpop.f32.mrf.mxu3 }
0x1165   :  { %v2886_v35 = vpop.xlane.xlu2 %2885  ;;  %v3064_v51 = vadd.f32 %v5794_v7, %v3063_v61 }
0x1166   :  { %v2889_v57 = vsub.f32 %v2877_v30, %v2886_v35  ;;  %5534 = vmatmul.msk.f32.gmra.mxu1 %vm477_vm8, %v2792_v60 }
0x1168   :  { %v5977_v59 = vpop.eup %5976  ;;  %v2894_v53 = vmul.f32 1.442695, %v2889_v57 }
0x1169   :  { %v2899_v14 = vsel %vm477_vm8, %v5977_v59, 0.0 }
0x116a   :  { %5978 = vpow2.f32 %v2894_v53  ;;  %2900 = vadd.xlane.f32.xlu1 %v2899_v14 }
0x116c   :  { %v3066_v0 = vpop.f32.mrf.mxu3 }
0x116d   :  { %v3067_v6 = vadd.f32 %v5794_v7, %v3066_v0 }
0x116e   :  { %5549 = vmatmul.msk.f32.vlgmr.msra.gmra.mxu1 %vm120_vm1, %v7290_v27 }
0x1170   :  { %v5979_v62 = vpop.eup %5978 }
0x1171   :  { %v2902_v18 = vsel %vm477_vm8, %v5979_v62, 0.0 }
0x1172   :  { %2903 = vadd.xlane.f32.xlu2 %v2902_v18 }
0x1174   :  { %v3069_v22 = vpop.f32.mrf.mxu3 }
0x1175   :  { %v3070_v37 = vadd.f32 %v5794_v7, %v3069_v22 }
0x1176   :  { %5550 = vmatmul.msk.f32.gmra.mxu1 %vm120_vm1, %v7307_v38 }
0x117c   :  { %v3072_v10 = vpop.f32.mrf.mxu3 }
0x117d   :  { %v3073_v44 = vadd.f32 %v5794_v7, %v3072_v10 }
0x117e   :  { %5551 = vmatmul.msk.f32.gmra.mxu1 %vm120_vm1, %v7318_v54 }
0x1184   :  { %v3075_v21 = vpop.f32.mrf.mxu3 }
0x1185   :  { %v3076_v34 = vadd.f32 %v5794_v7, %v3075_v21 }
0x1186   :  { %5552 = vmatmul.msk.f32.gmra.mxu1 %vm120_vm1, %v7344_v23 }
0x118c   :  { %v3078_v28 = vpop.f32.mrf.mxu3 }
0x118d   :  { %v3079_v8 = vadd.f32 %v5794_v7, %v3078_v28 }
0x118e   :  { %5553 = vmatmul.msk.f32.gmra.mxu1 %vm120_vm1, %v7355_v55 }
0x1196   :  { %5554 = vmatmul.msk.f32.gmra.mxu1 %vm120_vm1, %v7366_v39 }
0x11d3   :  { %v2819_v1 = vpop.f32.mrf.mxu1 }
0x11d4   :  { %5590 = vmatmul.msk.f32.vlgmr.msra.gmra.mxu2 %vm426_vm6, %v2819_v1 }
0x11d5   :  { %v2898_v47 = vpop.xlane.xlu0 %2897 }
0x11d6   :  { %5980 = vrcp.f32 %v2898_v47 }
0x11db   :  { %v2822_v2 = vpop.f32.mrf.mxu1 }
0x11dc   :  { %v5981_v30 = vpop.eup %5980  ;;  %5591 = vmatmul.msk.f32.gmra.mxu2 %vm426_vm6, %v2822_v2 }
0x11dd   :  { %v2908_v50 = vmul.f32 %v5981_v30, %v5973_v52  ;;  %v2901_v56 = vpop.xlane.xlu1 %2900 }
0x11de   :  { %5982 = vrcp.f32 %v2901_v56 }
0x11df   :  { %5541 = vmatmul.msk.f32.vlgmr.msrb.gmra.mxu0 %vm477_vm8, %v2908_v50 }
0x11e0   :  { %3187 = vmatpush.msrb.mxu0 %v3070_v37 }
0x11e2   :  { %3188 = vmatpush.msrb.mxu0 %v3067_v6 }
0x11e3   :  { %v2825_v40 = vpop.f32.mrf.mxu1 }
0x11e4   :  { %v5983_v58 = vpop.eup %5982  ;;  %3189 = vmatpush.msrb.mxu0 %v3064_v51  ;;  %5592 = vmatmul.msk.f32.gmra.mxu2 %vm426_vm6, %v2825_v40 }
0x11e5   :  { %v2904_v20 = vpop.xlane.xlu2 %2903  ;;  %v2909_v16 = vmul.f32 %v5983_v58, %v5977_v59 }
0x11e6   :  { %5984 = vrcp.f32 %v2904_v20 }
0x11e7   :  { %5542 = vmatmul.msk.f32.gmra.mxu0 %vm477_vm8, %v2909_v16 }
0x11eb   :  { %v2973_v26 = vpop.f32.mrf.mxu1 }
0x11ec   :  { %v5985_v49 = vpop.eup %5984  ;;  %v2974_v11 = vadd.f32 %v5796_v24, %v2973_v26 }
0x11ed   :  { %v2910_v4 = vmul.f32 %v5985_v49, %v5979_v62 }
0x11ef   :  { %5543 = vmatmul.msk.f32.gmra.mxu0 %vm477_vm8, %v2910_v4 }
0x11f3   :  { %v2976_v36 = vpop.f32.mrf.mxu1 }
0x11f4   :  { %v2977_v63 = vadd.f32 %v5796_v24, %v2976_v36 }
0x11f7   :  { %5581 = vmatmul.msk.f32.vlgmr.msra.gmra.mxu0 %vm426_vm6, %v2974_v11 }
0x11f8   :  { %3375 = vmatpush.msra.mxu0 %v3079_v8 }
0x11fa   :  { %3376 = vmatpush.msra.mxu0 %v3076_v34 }
0x11fb   :  { %v2979_v42 = vpop.f32.mrf.mxu1 }
0x11fc   :  { %3377 = vmatpush.msra.mxu0 %v3073_v44  ;;  %v2980_v52 = vadd.f32 %v5796_v24, %v2979_v42 }
0x11ff   :  { %5582 = vmatmul.msk.f32.gmra.mxu0 %vm426_vm6, %v2977_v63 }
0x1203   :  { %v2982_v12 = vpop.f32.mrf.mxu1 }
0x1204   :  { %v2983_v31 = vadd.f32 %v5796_v24, %v2982_v12 }
0x1206   :  { %5596 = vmatmul.msk.f32.vlgmr.msra.gmra.mxu3 %vm426_vm6, %v2983_v31 }
0x1207   :  { %5583 = vmatmul.msk.f32.gmra.mxu0 %vm426_vm6, %v2980_v52 }
0x120b   :  { %v2985_v13 = vpop.f32.mrf.mxu1 }
0x120c   :  { %v2986_v3 = vadd.f32 %v5796_v24, %v2985_v13 }
0x120e   :  { %5597 = vmatmul.msk.f32.gmra.mxu3 %vm426_vm6, %v2986_v3 }
0x1213   :  { %v2988_v19 = vpop.f32.mrf.mxu1 }
0x1214   :  { %v2989_v60 = vadd.f32 %v5796_v24, %v2988_v19 }
0x1216   :  { %5598 = vmatmul.msk.f32.gmra.mxu3 %vm426_vm6, %v2989_v60 }
0x121e   :  { %5613 = vmatmul.msk.f32.vlgmr.msrb.gmra.mxu3 %vm120_vm1, %v7290_v27 }
0x1226   :  { %5614 = vmatmul.msk.f32.gmra.mxu3 %vm120_vm1, %v7307_v38 }
0x122e   :  { %5615 = vmatmul.msk.f32.gmra.mxu3 %vm120_vm1, %v7318_v54 }
0x1236   :  { %5616 = vmatmul.msk.f32.gmra.mxu3 %vm120_vm1, %v7344_v23 }
0x123e   :  { %5617 = vmatmul.msk.f32.gmra.mxu3 %vm120_vm1, %v7355_v55 }
0x1246   :  { %5618 = vmatmul.msk.f32.gmra.mxu3 %vm120_vm1, %v7366_v39 }
0x125c   :  { %v2937_v35 = vpop.f32.mrf.mxu0 }
0x125d   :  { %5605 = vmatmul.msk.f32.vlgmr.msrb.gmra.mxu2 %vm426_vm6, %v2937_v35 }
0x1264   :  { %v2940_v57 = vpop.f32.mrf.mxu0 }
0x1265   :  { %5606 = vmatmul.msk.f32.gmra.mxu2 %vm426_vm6, %v2940_v57 }
0x126c   :  { %v2943_v59 = vpop.f32.mrf.mxu0 }
0x126d   :  { %5607 = vmatmul.msk.f32.gmra.mxu2 %vm426_vm6, %v2943_v59 }
0x1274   :  { %v3117_v53 = vpop.f32.mrf.mxu0 }
0x1275   :  { %v3126_v14 = vmul.f32 0.35355338, %v3117_v53 }
0x1277   :  { %v3129_v62 = vadd.f32 %v3126_v14, %v6497_v41 }
0x1279   :  { %v3132_v18 = vsel %vm477_vm8, %v3129_v62, -inf }
0x127a   :  { %3133 = vmax.xlane.f32.xlu0 %v3132_v18 }
0x127c   :  { %v3120_v48 = vpop.f32.mrf.mxu0 }
0x127d   :  { %v3127_v61 = vmul.f32 0.35355338, %v3120_v48 }
0x127f   :  { %v3130_v0 = vadd.f32 %v3127_v61, %v6497_v41 }
0x1281   :  { %v3135_v1 = vsel %vm477_vm8, %v3130_v0, -inf }
0x1282   :  { %3136 = vmax.xlane.f32.xlu1 %v3135_v1 }
0x1284   :  { %v3123_v22 = vpop.f32.mrf.mxu0 }
0x1285   :  { %v3128_v47 = vmul.f32 0.35355338, %v3123_v22 }
0x1287   :  { %v3131_v2 = vadd.f32 %v3128_v47, %v6497_v41 }
0x1289   :  { %v3305_v30 = vpop.f32.mrf.mxu3  ;;  %v3138_v7 = vsel %vm477_vm8, %v3131_v2, -inf }
0x128a   :  { %v3314_v50 = vmul.f32 0.35355338, %v3305_v30  ;;  %3139 = vmax.xlane.f32.xlu2 %v3138_v7  ;;  %v5622_v30 = vld [vmem:[%s8428_s4 + $0x278] sm:$0xff]  ;;  %v5621_v7 = vld [vmem:[%s8428_s4 + $0x270] sm:$0xff] }
0x128c   :  { %v3317_v56 = vadd.f32 %v3314_v50, %v6497_v41  ;;  %v5620_v50 = vld [vmem:[%s8428_s4 + $0x268] sm:$0xff] }
0x128e   :  { %v3320_v37 = vsel %vm477_vm8, %v3317_v56, -inf }
0x128f   :  { %3321 = vmax.xlane.f32.xlu0 %v3320_v37  ;;  %v5619_v37 = vld [vmem:[%s8428_s4 + $0x260] sm:$0xff] }
0x1291   :  { %v3308_v10 = vpop.f32.mrf.mxu3 }
0x1292   :  { %v3315_v6 = vmul.f32 0.35355338, %v3308_v10 }
0x1294   :  { %v3318_v51 = vadd.f32 %v3315_v6, %v6497_v41 }
0x1296   :  { %v3323_v40 = vsel %vm477_vm8, %v3318_v51, -inf }
0x1297   :  { %3324 = vmax.xlane.f32.xlu1 %v3323_v40 }
0x1299   :  { %v3311_v58 = vpop.f32.mrf.mxu3 }
0x129a   :  { %v3316_v20 = vmul.f32 0.35355338, %v3311_v58 }
0x129c   :  { %v3319_v16 = vadd.f32 %v3316_v20, %v6497_v41 }
0x129e   :  { %v3326_v21 = vsel %vm477_vm8, %v3319_v16, -inf }
0x129f   :  { %3327 = vmax.xlane.f32.xlu2 %v3326_v21 }
0x12ed   :  { %v3134_v26 = vpop.xlane.xlu0 %3133 }
0x12ee   :  { %v3141_v49 = vsub.f32 %v3129_v62, %v3134_v26 }
0x12f0   :  { %v3144_v4 = vmul.f32 1.442695, %v3141_v49 }
0x12f2   :  { %5986 = vpow2.f32 %v3144_v4  ;;  %v5577_v4 = vld [vmem:[%s8430_s6 + $0x28] sm:$0xff] }
0x12f3   :  { %3224 = vmatpush.msrb.mxu1 %v5577_v4 }
0x12f5   :  { %v3137_v24 = vpop.xlane.xlu1 %3136  ;;  %3412 = vmatpush.msra.mxu1 %v5577_v4 }
0x12f6   :  { %v3142_v28 = vsub.f32 %v3130_v0, %v3137_v24 }
0x12f8   :  { %v5987_v36 = vpop.eup %5986  ;;  %v3146_v11 = vmul.f32 1.442695, %v3142_v28 }
0x12f9   :  { %v3150_v8 = vsel %vm477_vm8, %v5987_v36, 0.0 }
0x12fa   :  { %5988 = vpow2.f32 %v3146_v11  ;;  %3151 = vadd.xlane.f32.xlu0 %v3150_v8  ;;  %v5632_v11 = vld [vmem:[%s8428_s4 + $0x290] sm:$0xff]  ;;  %v5631_v8 = vld [vmem:[%s8428_s4 + $0x288] sm:$0xff] }
0x12fd   :  { %v3140_v5 = vpop.xlane.xlu2 %3139 }
0x12fe   :  { %v3143_v32 = vsub.f32 %v3131_v2, %v3140_v5 }
0x1300   :  { %v5989_v34 = vpop.eup %5988  ;;  %v3148_v29 = vmul.f32 1.442695, %v3143_v32  ;;  %v5630_v32 = vld [vmem:[%s8428_s4 + $0x280] sm:$0xff] }
0x1301   :  { %v3153_v44 = vsel %vm477_vm8, %v5989_v34, 0.0 }
0x1302   :  { %5990 = vpow2.f32 %v3148_v29  ;;  %v3322_v45 = vpop.xlane.xlu0 %3321  ;;  %3154 = vadd.xlane.f32.xlu1 %v3153_v44 }
0x1303   :  { %v3329_v42 = vsub.f32 %v3317_v56, %v3322_v45 }
0x1305   :  { %v3332_v63 = vmul.f32 1.442695, %v3329_v42 }
0x1307   :  { %5992 = vpow2.f32 %v3332_v63  ;;  %v3485_v63 = vpop.f32.mrf.mxu3 }
0x1308   :  { %v5991_v12 = vpop.eup %5990 }
0x1309   :  { %v3156_v31 = vsel %vm477_vm8, %v5991_v12, 0.0 }
0x130a   :  { %v3325_v52 = vpop.xlane.xlu1 %3324  ;;  %3157 = vadd.xlane.f32.xlu2 %v3156_v31 }
0x130b   :  { %v3330_v13 = vsub.f32 %v3318_v51, %v3325_v52 }
0x130d   :  { %v5993_v3 = vpop.eup %5992  ;;  %v3334_v19 = vmul.f32 1.442695, %v3330_v13 }
0x130e   :  { %v3338_v60 = vsel %vm477_vm8, %v5993_v3, 0.0 }
0x130f   :  { %5994 = vpow2.f32 %v3334_v19  ;;  %3339 = vadd.xlane.f32.xlu0 %v3338_v60  ;;  %v3488_v60 = vpop.f32.mrf.mxu3 }
0x1312   :  { %v3328_v35 = vpop.xlane.xlu2 %3327 }
0x1313   :  { %v3331_v57 = vsub.f32 %v3319_v16, %v3328_v35 }
0x1315   :  { %v5995_v59 = vpop.eup %5994  ;;  %v3336_v53 = vmul.f32 1.442695, %v3331_v57 }
0x1316   :  { %v3341_v14 = vsel %vm477_vm8, %v5995_v59, 0.0 }
0x1317   :  { %5996 = vpow2.f32 %v3336_v53  ;;  %3342 = vadd.xlane.f32.xlu1 %v3341_v14  ;;  %v3491_v53 = vpop.f32.mrf.mxu3 }
0x131d   :  { %v5997_v62 = vpop.eup %5996 }
0x131e   :  { %v3344_v18 = vsel %vm477_vm8, %v5997_v62, 0.0 }
0x131f   :  { %3345 = vadd.xlane.f32.xlu2 %v3344_v18 }
0x136d   :  { %v3152_v48 = vpop.xlane.xlu0 %3151 }
0x136e   :  { %5998 = vrcp.f32 %v3152_v48 }
0x1374   :  { %v5999_v61 = vpop.eup %5998 }
0x1375   :  { %v3162_v0 = vmul.f32 %v5999_v61, %v5987_v36  ;;  %v3155_v1 = vpop.xlane.xlu1 %3154  ;;  %v5633_v36 = vld [vmem:[%s8428_s4 + $0x298] sm:$0xff]  ;;  %v3494_v61 = vpop.f32.mrf.mxu3 }
0x1376   :  { %6000 = vrcp.f32 %v3155_v1 }
0x1377   :  { %5584 = vmatmul.msk.f32.vlgmr.msrb.gmra.mxu0 %vm477_vm8, %v3162_v0 }
0x1378   :  { %3525 = vmatpush.msrb.mxu0 %v5622_v30  ;;  %v5678_v30 = vld [vmem:[%s8428_s4 + $0x2c8] sm:$0xff] }
0x137a   :  { %3526 = vmatpush.msrb.mxu0 %v5621_v7 }
0x137c   :  { %v6001_v22 = vpop.eup %6000  ;;  %3527 = vmatpush.msrb.mxu0 %v5620_v50  ;;  %v5677_v50 = vld [vmem:[%s8428_s4 + $0x2c0] sm:$0xff] }
0x137d   :  { %v3158_v47 = vpop.xlane.xlu2 %3157  ;;  %v3163_v2 = vmul.f32 %v6001_v22, %v5989_v34  ;;  %v5680_v22 = vld [vmem:[%s8428_s4 + $0x2d8] sm:$0xff]  ;;  %v3497_v7 = vpop.f32.mrf.mxu3 }
0x137e   :  { %6002 = vrcp.f32 %v3158_v47  ;;  %3528 = vmatpush.msrb.mxu0 %v5619_v37 }
0x137f   :  { %5585 = vmatmul.msk.f32.gmra.mxu0 %vm477_vm8, %v3163_v2  ;;  %v5679_v2 = vld [vmem:[%s8428_s4 + $0x2d0] sm:$0xff] }
0x1382   :  { %v3340_v56 = vpop.xlane.xlu0 %3339 }
0x1383   :  { %6004 = vrcp.f32 %v3340_v56 }
0x1384   :  { %v6003_v10 = vpop.eup %6002 }
0x1385   :  { %v3164_v6 = vmul.f32 %v6003_v10, %v5991_v12  ;;  %v5798_v12 = vld [vmem:[%s8429_s5 + $0x13] ss:$0 sm:$0xff]  ;;  %v3500_v37 = vpop.f32.mrf.mxu3 }
0x1387   :  { %5586 = vmatmul.msk.f32.gmra.mxu0 %vm477_vm8, %v3164_v6 }
0x1389   :  { %v6005_v51 = vpop.eup %6004 }
0x138a   :  { %v3343_v40 = vpop.xlane.xlu1 %3342  ;;  %v3350_v58 = vmul.f32 %v6005_v51, %v5993_v3  ;;  %v5797_v3 = vld [vmem:[%s8429_s5 + $0x12] ss:$0 sm:$0xff] }
0x138b   :  { %6006 = vrcp.f32 %v3343_v40  ;;  %v3486_v57 = vadd.f32 %v5797_v3, %v3485_v63  ;;  %v3489_v14 = vadd.f32 %v5797_v3, %v3488_v60  ;;  %v3492_v48 = vadd.f32 %v5797_v3, %v3491_v53 }
0x138c   :  { %v3495_v47 = vadd.f32 %v5797_v3, %v3494_v61  ;;  %v3498_v56 = vadd.f32 %v5797_v3, %v3497_v7  ;;  %v3501_v10 = vadd.f32 %v5797_v3, %v3500_v37 }
0x138f   :  { %5599 = vmatmul.msk.f32.vlgmr.msra.gmra.mxu0 %vm477_vm8, %v3350_v58 }
0x1391   :  { %v6007_v20 = vpop.eup %6006 }
0x1392   :  { %v3346_v16 = vpop.xlane.xlu2 %3345  ;;  %v3351_v21 = vmul.f32 %v6007_v20, %v5995_v59  ;;  %v7668_v20 = vpop.f32.mrf.mxu2 }
0x1393   :  { %6008 = vrcp.f32 %v3346_v16 }
0x1397   :  { %5600 = vmatmul.msk.f32.gmra.mxu0 %vm477_vm8, %v3351_v21 }
0x1399   :  { %v6009_v26 = vpop.eup %6008 }
0x139a   :  { %v3352_v49 = vmul.f32 %v6009_v26, %v5997_v62  ;;  %v7674_v21 = vpop.f32.mrf.mxu2 }
0x139f   :  { %5601 = vmatmul.msk.f32.gmra.mxu0 %vm477_vm8, %v3352_v49 }
0x13a2   :  { %v7680_v49 = vpop.f32.mrf.mxu2 }
0x13a7   :  { %5624 = vmatmul.msk.f32.vlgmr.msrb.gmra.mxu0 %vm120_vm1, %v7290_v27 }
0x13af   :  { %5625 = vmatmul.msk.f32.gmra.mxu0 %vm120_vm1, %v7307_v38 }
0x13b7   :  { %5626 = vmatmul.msk.f32.gmra.mxu0 %vm120_vm1, %v7318_v54 }
0x13bf   :  { %5627 = vmatmul.msk.f32.gmra.mxu0 %vm120_vm1, %v7344_v23 }
0x13c7   :  { %5628 = vmatmul.msk.f32.gmra.mxu0 %vm120_vm1, %v7355_v55 }
0x13cf   :  { %5629 = vmatmul.msk.f32.gmra.mxu0 %vm120_vm1, %v7366_v39 }
0x13f4   :  { %v3191_v24 = vpop.f32.mrf.mxu0 }
0x13f5   :  { %5587 = vmatmul.msk.f32.vlgmr.msrb.gmra.mxu1 %vm426_vm6, %v3191_v24  ;;  %v7682_v24 = vpop.f32.mrf.mxu2 }
0x13f6   :  { %3570 = vmatpush.msrb.mxu1 %v5633_v36  ;;  %v5799_v36 = vld [vmem:[%s8429_s5 + $0x14] ss:$0 sm:$0xff] }
0x13f8   :  { %3571 = vmatpush.msrb.mxu1 %v5632_v11 }
0x13fa   :  { %3572 = vmatpush.msrb.mxu1 %v5631_v8 }
0x13fc   :  { %v3194_v28 = vpop.f32.mrf.mxu0  ;;  %3573 = vmatpush.msrb.mxu1 %v5630_v32 }
0x13fd   :  { %5588 = vmatmul.msk.f32.gmra.mxu1 %vm426_vm6, %v3194_v28  ;;  %v7687_v8 = vpop.f32.mrf.mxu2 }
0x1404   :  { %v3197_v5 = vpop.f32.mrf.mxu0 }
0x1405   :  { %5589 = vmatmul.msk.f32.gmra.mxu1 %vm426_vm6, %v3197_v5 }
0x140c   :  { %v3379_v34 = vpop.f32.mrf.mxu0 }
0x140d   :  { %5602 = vmatmul.msk.f32.vlgmr.msra.gmra.mxu1 %vm426_vm6, %v3379_v34 }
0x1414   :  { %v3382_v29 = vpop.f32.mrf.mxu0 }
0x1415   :  { %5603 = vmatmul.msk.f32.gmra.mxu1 %vm426_vm6, %v3382_v29 }
0x141c   :  { %v3385_v44 = vpop.f32.mrf.mxu0 }
0x141d   :  { %5604 = vmatmul.msk.f32.gmra.mxu1 %vm426_vm6, %v3385_v44  ;;  %v7689_v44 = vpop.f32.mrf.mxu2 }
0x1424   :  { %v3530_v45 = vpop.f32.mrf.mxu0 }
0x1425   :  { %5635 = vmatmul.msk.f32.vlgmr.msrb.gmra.mxu1 %vm120_vm1, %v7290_v27  ;;  %v3531_v35 = vadd.f32 %v5798_v12, %v3530_v45 }
0x142c   :  { %v3533_v42 = vpop.f32.mrf.mxu0 }
0x142d   :  { %5636 = vmatmul.msk.f32.gmra.mxu1 %vm120_vm1, %v7307_v38  ;;  %v3534_v13 = vadd.f32 %v5798_v12, %v3533_v42 }
0x1434   :  { %v3536_v31 = vpop.f32.mrf.mxu0 }
0x1435   :  { %v3537_v52 = vadd.f32 %v5798_v12, %v3536_v31  ;;  %5637 = vmatmul.msk.f32.gmra.mxu1 %vm120_vm1, %v7318_v54 }
0x1437   :  { %5642 = vmatpush.xpose.msk.msra.mxu2 %vm426_vm6, %v3537_v52 }
0x143b   :  { %5643 = vmatpush.xpose.msk.msra.mxu2 %vm426_vm6, %v3534_v13 }
0x143c   :  { %v3539_v19 = vpop.f32.mrf.mxu0 }
0x143d   :  { %5638 = vmatmul.msk.f32.gmra.mxu1 %vm120_vm1, %v7344_v23  ;;  %v3540_v1 = vadd.f32 %v5798_v12, %v3539_v19 }
0x143f   :  { %5644 = vmatpush.xpose.msk.msra.mxu2 %vm426_vm6, %v3531_v35 }
0x1442   :  { %5645 = vmatmul.msk.f32.vlgmr.msra.gmra.mxu2 %vm426_vm6, %v3486_v57 }
0x1444   :  { %v3542_v59 = vpop.f32.mrf.mxu0 }
0x1445   :  { %5639 = vmatmul.msk.f32.gmra.mxu1 %vm120_vm1, %v7355_v55  ;;  %v3543_v0 = vadd.f32 %v5798_v12, %v3542_v59 }
0x144a   :  { %5646 = vmatmul.msk.f32.gmra.mxu2 %vm426_vm6, %v3489_v14 }
0x144c   :  { %v3545_v62 = vpop.f32.mrf.mxu0 }
0x144d   :  { %v3546_v18 = vadd.f32 %v5798_v12, %v3545_v62  ;;  %5640 = vmatmul.msk.f32.gmra.mxu1 %vm120_vm1, %v7366_v39 }
0x144f   :  { %5654 = vmatpush.xpose.msk.msra.mxu0 %vm426_vm6, %v3546_v18 }
0x1452   :  { %5647 = vmatmul.msk.f32.gmra.mxu2 %vm426_vm6, %v3492_v48 }
0x1453   :  { %5655 = vmatpush.xpose.msk.msra.mxu0 %vm426_vm6, %v3543_v0 }
0x1457   :  { %5656 = vmatpush.xpose.msk.msra.mxu0 %vm426_vm6, %v3540_v1  ;;  %v5800_v1 = vld [vmem:[%s8429_s5 + $0x16] ss:$0 sm:$0xff] }
0x145a   :  { %5657 = vmatmul.msk.f32.vlgmr.msra.gmra.mxu0 %vm426_vm6, %v3495_v47 }
0x145b   :  { %3973 = vmatpush.msrb.mxu0 %v5680_v22 }
0x145d   :  { %3974 = vmatpush.msrb.mxu0 %v5679_v2 }
0x145f   :  { %3975 = vmatpush.msrb.mxu0 %v5678_v30 }
0x1461   :  { %3976 = vmatpush.msrb.mxu0 %v5677_v50 }
0x1462   :  { %5658 = vmatmul.msk.f32.gmra.mxu0 %vm426_vm6, %v3498_v56 }
0x146a   :  { %5659 = vmatmul.msk.f32.gmra.mxu0 %vm426_vm6, %v3501_v10 }
0x1472   :  { %v7652_v6 = vpop.f32.mrf.mxu1  ;;  %5682 = vmatmul.msk.f32.vlgmr.msrb.gmra.mxu0 %vm120_vm1, %v7290_v27 }
0x147a   :  { %v7656_v51 = vpop.f32.mrf.mxu1  ;;  %5683 = vmatmul.msk.f32.gmra.mxu0 %vm120_vm1, %v7307_v38 }
0x1482   :  { %v7660_v40 = vpop.f32.mrf.mxu1  ;;  %5684 = vmatmul.msk.f32.gmra.mxu0 %vm120_vm1, %v7318_v54 }
0x148a   :  { %v7664_v58 = vpop.f32.mrf.mxu1  ;;  %5685 = vmatmul.msk.f32.gmra.mxu0 %vm120_vm1, %v7344_v23 }
0x1492   :  { %v7670_v16 = vpop.f32.mrf.mxu1  ;;  %5686 = vmatmul.msk.f32.gmra.mxu0 %vm120_vm1, %v7355_v55 }
0x149a   :  { %v7676_v26 = vpop.f32.mrf.mxu1  ;;  %5687 = vmatmul.msk.f32.gmra.mxu0 %vm120_vm1, %v7366_v39 }
0x14a2   :  { %v3575_v4 = vpop.f32.mrf.mxu1 }
0x14a3   :  { %v3576_v34 = vadd.f32 %v5799_v36, %v3575_v4 }
0x14aa   :  { %v3578_v28 = vpop.f32.mrf.mxu1 }
0x14ab   :  { %v3579_v32 = vadd.f32 %v5799_v36, %v3578_v28 }
0x14b2   :  { %v3581_v11 = vpop.f32.mrf.mxu1 }
0x14b3   :  { %v3582_v5 = vadd.f32 %v5799_v36, %v3581_v11 }
0x14b5   :  { %3699 = vmatpush.msrb.mxu2 %v3582_v5 }
0x14b7   :  { %3700 = vmatpush.msrb.mxu2 %v3579_v32 }
0x14b9   :  { %3701 = vmatpush.msrb.mxu2 %v3576_v34 }
0x14ba   :  { %v3584_v29 = vpop.f32.mrf.mxu1 }
0x14bb   :  { %v3585_v35 = vadd.f32 %v5799_v36, %v3584_v29 }
0x14c2   :  { %v3587_v45 = vpop.f32.mrf.mxu1 }
0x14c3   :  { %v3588_v3 = vadd.f32 %v5799_v36, %v3587_v45 }
0x14c5   :  { %v3629_v42 = vpop.f32.mrf.mxu2 }
0x14c6   :  { %v3638_v63 = vmul.f32 0.35355338, %v3629_v42 }
0x14c8   :  { %v3641_v12 = vadd.f32 %v3638_v63, %v6497_v41 }
0x14ca   :  { %v3590_v31 = vpop.f32.mrf.mxu1  ;;  %v3644_v52 = vsel %vm477_vm8, %v3641_v12, -inf }
0x14cb   :  { %v3591_v13 = vadd.f32 %v5799_v36, %v3590_v31  ;;  %3645 = vmax.xlane.f32.xlu0 %v3644_v52 }
0x14cd   :  { %v3632_v19 = vpop.f32.mrf.mxu2  ;;  %3855 = vmatpush.msra.mxu1 %v3591_v13 }
0x14ce   :  { %v3639_v60 = vmul.f32 0.35355338, %v3632_v19 }
0x14cf   :  { %3856 = vmatpush.msra.mxu1 %v3588_v3 }
0x14d0   :  { %v3642_v57 = vadd.f32 %v3639_v60, %v6497_v41 }
0x14d1   :  { %3857 = vmatpush.msra.mxu1 %v3585_v35 }
0x14d2   :  { %v3647_v59 = vsel %vm477_vm8, %v3642_v57, -inf }
0x14d3   :  { %3648 = vmax.xlane.f32.xlu1 %v3647_v59 }
0x14d5   :  { %v3635_v53 = vpop.f32.mrf.mxu2 }
0x14d6   :  { %v3640_v14 = vmul.f32 0.35355338, %v3635_v53 }
0x14d7   :  { %v3785_v62 = vpop.f32.mrf.mxu0 }
0x14d8   :  { %v3643_v18 = vadd.f32 %v3640_v14, %v6497_v41  ;;  %v3794_v63 = vmul.f32 0.35355338, %v3785_v62 }
0x14da   :  { %v3650_v48 = vsel %vm477_vm8, %v3643_v18, -inf  ;;  %v3797_v13 = vadd.f32 %v3794_v63, %v6497_v41 }
0x14db   :  { %3651 = vmax.xlane.f32.xlu2 %v3650_v48 }
0x14df   :  { %v3788_v61 = vpop.f32.mrf.mxu0 }
0x14e0   :  { %v3795_v35 = vmul.f32 0.35355338, %v3788_v61 }
0x14e7   :  { %v3791_v0 = vpop.f32.mrf.mxu0 }
0x14e8   :  { %v3796_v14 = vmul.f32 0.35355338, %v3791_v0 }
0x14ef   :  { %v3978_v22 = vpop.f32.mrf.mxu0 }
0x14f0   :  { %v7700_v47 = vadd.f32 %v5800_v1, %v3978_v22 }
0x14f7   :  { %v3981_v2 = vpop.f32.mrf.mxu0 }
0x14f8   :  { %v3982_v30 = vadd.f32 %v5800_v1, %v3981_v2 }
0x14ff   :  { %v3984_v7 = vpop.f32.mrf.mxu0 }
0x1500   :  { %v3985_v50 = vadd.f32 %v5800_v1, %v3984_v7 }
0x1507   :  { %v3987_v56 = vpop.f32.mrf.mxu0 }
0x1508   :  { %v3988_v36 = vadd.f32 %v5800_v1, %v3987_v56 }
0x150f   :  { %v3990_v37 = vpop.f32.mrf.mxu0 }
0x1510   :  { %v3991_v28 = vadd.f32 %v5800_v1, %v3990_v37 }
0x1517   :  { %v3993_v10 = vpop.f32.mrf.mxu0 }
0x1518   :  { %v3994_v4 = vadd.f32 %v5800_v1, %v3993_v10  ;;  %v5641_v1 = vld [vmem:[%s8430_s6 + $0x30] sm:$0xff] }
0x1519   :  { %3892 = vmatpush.msra.mxu2 %v5641_v1  ;;  %3736 = vmatpush.msra.mxu3 %v5641_v1 }
0x151a   :  { %5712 = vmatpush.xpose.msk.msra.mxu0 %vm426_vm6, %v3994_v4 }
0x151e   :  { %5713 = vmatpush.xpose.msk.msra.mxu0 %vm426_vm6, %v3991_v28 }
0x1522   :  { %5714 = vmatpush.xpose.msk.msra.mxu0 %vm426_vm6, %v3988_v36 }
0x153e   :  { %v3646_v11 = vpop.xlane.xlu0 %3645 }
0x153f   :  { %v3653_v5 = vsub.f32 %v3641_v12, %v3646_v11  ;;  %v3800_v12 = vsel %vm477_vm8, %v3797_v13, -inf }
0x1541   :  { %v3656_v32 = vmul.f32 1.442695, %v3653_v5 }
0x1543   :  { %6010 = vpow2.f32 %v3656_v32 }
0x1546   :  { %v3649_v34 = vpop.xlane.xlu1 %3648 }
0x1547   :  { %v3654_v29 = vsub.f32 %v3642_v57, %v3649_v34  ;;  %v3798_v57 = vadd.f32 %v3795_v35, %v6497_v41  ;;  %v5691_v35 = vld [vmem:[%s8428_s4 + $0x2f8] sm:$0xff] }
0x1548   :  { %4018 = vmatpush.msrb.mxu1 %v5691_v35 }
0x1549   :  { %v6011_v45 = vpop.eup %6010  ;;  %v3658_v42 = vmul.f32 1.442695, %v3654_v29  ;;  %v3803_v62 = vsel %vm477_vm8, %v3798_v57, -inf }
0x154a   :  { %v3662_v31 = vsel %vm477_vm8, %v6011_v45, 0.0 }
0x154b   :  { %6012 = vpow2.f32 %v3658_v42  ;;  %3663 = vadd.xlane.f32.xlu0 %v3662_v31 }
0x154e   :  { %v3652_v52 = vpop.xlane.xlu2 %3651 }
0x154f   :  { %v3655_v3 = vsub.f32 %v3643_v18, %v3652_v52  ;;  %v3799_v18 = vadd.f32 %v3796_v14, %v6497_v41 }
0x1551   :  { %v6013_v19 = vpop.eup %6012  ;;  %v3660_v60 = vmul.f32 1.442695, %v3655_v3  ;;  %v3806_v61 = vsel %vm477_vm8, %v3799_v18, -inf }
0x1552   :  { %v3665_v59 = vsel %vm477_vm8, %v6013_v19, 0.0 }
0x1553   :  { %6014 = vpow2.f32 %v3660_v60  ;;  %3801 = vmax.xlane.f32.xlu0 %v3800_v12  ;;  %3666 = vadd.xlane.f32.xlu1 %v3665_v59  ;;  %v5667_v60 = vld [vmem:[%s8428_s4 + $0x2a8] sm:$0xff]  ;;  %v5666_v12 = vld [vmem:[%s8428_s4 + $0x2a0] sm:$0xff]  ;;  %v5690_v59 = vld [vmem:[%s8428_s4 + $0x2f0] sm:$0xff] }
0x1554   :  { %4019 = vmatpush.msrb.mxu1 %v5690_v59 }
0x1559   :  { %v6015_v53 = vpop.eup %6014 }
0x155a   :  { %v3668_v48 = vsel %vm477_vm8, %v6015_v53, 0.0 }
0x155b   :  { %3804 = vmax.xlane.f32.xlu1 %v3803_v62  ;;  %3669 = vadd.xlane.f32.xlu2 %v3668_v48 }
0x1563   :  { %3807 = vmax.xlane.f32.xlu2 %v3806_v61 }
0x15be   :  { %v3664_v22 = vpop.xlane.xlu0 %3663 }
0x15bf   :  { %6016 = vrcp.f32 %v3664_v22 }
0x15c5   :  { %v6017_v0 = vpop.eup %6016 }
0x15c6   :  { %v3674_v2 = vmul.f32 %v6017_v0, %v6011_v45  ;;  %v3802_v7 = vpop.xlane.xlu0 %3801  ;;  %v3667_v56 = vpop.xlane.xlu1 %3666 }
0x15c7   :  { %v3809_v37 = vsub.f32 %v3797_v13, %v3802_v7  ;;  %6018 = vrcp.f32 %v3667_v56 }
0x15c8   :  { %5648 = vmatmul.msk.f32.vlgmr.msrb.gmra.mxu2 %vm477_vm8, %v3674_v2 }
0x15c9   :  { %v3812_v10 = vmul.f32 1.442695, %v3809_v37  ;;  %5700 = vmatpush.xpose.msk.msrb.mxu2 %vm426_vm6, %v3985_v50 }
0x15cb   :  { %6020 = vpow2.f32 %v3812_v10 }
0x15cd   :  { %v6019_v4 = vpop.eup %6018  ;;  %5701 = vmatpush.xpose.msk.msrb.mxu2 %vm426_vm6, %v3982_v30 }
0x15ce   :  { %v3805_v28 = vpop.xlane.xlu1 %3804  ;;  %v3670_v36 = vpop.xlane.xlu2 %3669  ;;  %v3675_v11 = vmul.f32 %v6019_v4, %v6013_v19  ;;  %v5668_v19 = vld [vmem:[%s8428_s4 + $0x2b0] sm:$0xff] }
0x15cf   :  { %v3810_v5 = vsub.f32 %v3798_v57, %v3805_v28  ;;  %6022 = vrcp.f32 %v3670_v36  ;;  %v5689_v57 = vld [vmem:[%s8428_s4 + $0x2e8] sm:$0xff]  ;;  %v5802_v4 = vld [vmem:[%s8429_s5 + $0x15] ss:$0 sm:$0xff] }
0x15d0   :  { %5649 = vmatmul.msk.f32.gmra.mxu2 %vm477_vm8, %v3675_v11  ;;  %4020 = vmatpush.msrb.mxu1 %v5689_v57 }
0x15d1   :  { %v6021_v32 = vpop.eup %6020  ;;  %v3814_v34 = vmul.f32 1.442695, %v3810_v5  ;;  %5702 = vmatpush.xpose.msk.msrb.mxu2 %vm426_vm6, %v7700_v47  ;;  %v5669_v47 = vld [vmem:[%s8428_s4 + $0x2b8] sm:$0xff] }
0x15d2   :  { %v3818_v29 = vsel %vm477_vm8, %v6021_v32, 0.0  ;;  %3928 = vmatpush.msrb.mxu3 %v5669_v47 }
0x15d3   :  { %6024 = vpow2.f32 %v3814_v34  ;;  %3819 = vadd.xlane.f32.xlu0 %v3818_v29  ;;  %v5801_v34 = vld [vmem:[%s8429_s5 + $0x17] ss:$0 sm:$0xff] }
0x15d4   :  { %3929 = vmatpush.msrb.mxu3 %v5668_v19 }
0x15d5   :  { %v6023_v50 = vpop.eup %6022 }
0x15d6   :  { %v3808_v45 = vpop.xlane.xlu2 %3807  ;;  %v3676_v42 = vmul.f32 %v6023_v50, %v6015_v53  ;;  %3930 = vmatpush.msrb.mxu3 %v5667_v60  ;;  %v5688_v53 = vld [vmem:[%s8428_s4 + $0x2e0] sm:$0xff] }
0x15d7   :  { %v3811_v30 = vsub.f32 %v3799_v18, %v3808_v45  ;;  %4021 = vmatpush.msrb.mxu1 %v5688_v53 }
0x15d8   :  { %5650 = vmatmul.msk.f32.gmra.mxu2 %vm477_vm8, %v3676_v42  ;;  %3931 = vmatpush.msrb.mxu3 %v5666_v12 }
0x15d9   :  { %v6025_v63 = vpop.eup %6024  ;;  %v3816_v31 = vmul.f32 1.442695, %v3811_v30 }
0x15da   :  { %v3821_v52 = vsel %vm477_vm8, %v6025_v63, 0.0 }
0x15db   :  { %6026 = vpow2.f32 %v3816_v31  ;;  %3822 = vadd.xlane.f32.xlu1 %v3821_v52 }
0x15e1   :  { %v6027_v13 = vpop.eup %6026 }
0x15e2   :  { %v3824_v3 = vsel %vm477_vm8, %v6027_v13, 0.0 }
0x15e3   :  { %3825 = vadd.xlane.f32.xlu2 %v3824_v3 }
0x1646   :  { %v3820_v14 = vpop.xlane.xlu0 %3819 }
0x1647   :  { %6028 = vrcp.f32 %v3820_v14 }
0x164b   :  { %v3703_v62 = vpop.f32.mrf.mxu2 }
0x164c   :  { %5651 = vmatmul.msk.f32.vlgmr.msra.gmra.mxu3 %vm426_vm6, %v3703_v62 }
0x164d   :  { %v6029_v48 = vpop.eup %6028 }
0x164e   :  { %v3830_v18 = vmul.f32 %v6029_v48, %v6021_v32  ;;  %v3823_v61 = vpop.xlane.xlu1 %3822 }
0x164f   :  { %6030 = vrcp.f32 %v3823_v61 }
0x1650   :  { %5660 = vmatmul.msk.f32.vlgmr.msra.gmra.mxu1 %vm477_vm8, %v3830_v18 }
0x1653   :  { %v3706_v1 = vpop.f32.mrf.mxu2 }
0x1654   :  { %5652 = vmatmul.msk.f32.gmra.mxu3 %vm426_vm6, %v3706_v1 }
0x1655   :  { %v6031_v22 = vpop.eup %6030 }
0x1656   :  { %v3826_v0 = vpop.xlane.xlu2 %3825  ;;  %v3831_v2 = vmul.f32 %v6031_v22, %v6025_v63 }
0x1657   :  { %6032 = vrcp.f32 %v3826_v0 }
0x1658   :  { %5661 = vmatmul.msk.f32.gmra.mxu1 %vm477_vm8, %v3831_v2 }
0x165b   :  { %v3709_v7 = vpop.f32.mrf.mxu2 }
0x165c   :  { %5653 = vmatmul.msk.f32.gmra.mxu3 %vm426_vm6, %v3709_v7 }
0x165d   :  { %v6033_v56 = vpop.eup %6032 }
0x165e   :  { %v3832_v37 = vmul.f32 %v6033_v56, %v6027_v13 }
0x1660   :  { %5662 = vmatmul.msk.f32.gmra.mxu1 %vm477_vm8, %v3832_v37 }
0x1664   :  { %5671 = vmatmul.msk.f32.vlgmr.msrb.gmra.mxu3 %vm120_vm1, %v7290_v27 }
0x1668   :  { %5693 = vmatmul.msk.f32.vlgmr.msrb.gmra.mxu1 %vm120_vm1, %v7290_v27 }
0x166c   :  { %5672 = vmatmul.msk.f32.gmra.mxu3 %vm120_vm1, %v7307_v38 }
0x1670   :  { %5694 = vmatmul.msk.f32.gmra.mxu1 %vm120_vm1, %v7307_v38 }
0x1674   :  { %5673 = vmatmul.msk.f32.gmra.mxu3 %vm120_vm1, %v7318_v54 }
0x1678   :  { %5695 = vmatmul.msk.f32.gmra.mxu1 %vm120_vm1, %v7318_v54 }
0x167c   :  { %5674 = vmatmul.msk.f32.gmra.mxu3 %vm120_vm1, %v7344_v23 }
0x1680   :  { %5696 = vmatmul.msk.f32.gmra.mxu1 %vm120_vm1, %v7344_v23 }
0x1684   :  { %5675 = vmatmul.msk.f32.gmra.mxu3 %vm120_vm1, %v7355_v55 }
0x1688   :  { %5697 = vmatmul.msk.f32.gmra.mxu1 %vm120_vm1, %v7355_v55 }
0x168c   :  { %5676 = vmatmul.msk.f32.gmra.mxu3 %vm120_vm1, %v7366_v39 }
0x1690   :  { %5698 = vmatmul.msk.f32.gmra.mxu1 %vm120_vm1, %v7366_v39 }
0x16cd   :  { %v3859_v27 = vpop.f32.mrf.mxu1 }
0x16ce   :  { %5663 = vmatmul.msk.f32.vlgmr.msra.gmra.mxu2 %vm426_vm6, %v3859_v27 }
0x16cf   :  { %v7782_v38 = vpop.f32.mrf.mxu3 }
0x16d5   :  { %v3862_v54 = vpop.f32.mrf.mxu1 }
0x16d6   :  { %5664 = vmatmul.msk.f32.gmra.mxu2 %vm426_vm6, %v3862_v54 }
0x16d7   :  { %v7785_v23 = vpop.f32.mrf.mxu3 }
0x16dd   :  { %v3865_v10 = vpop.f32.mrf.mxu1 }
0x16de   :  { %5665 = vmatmul.msk.f32.gmra.mxu2 %vm426_vm6, %v3865_v10 }
0x16df   :  { %v7788_v55 = vpop.f32.mrf.mxu3 }
0x16e5   :  { %v4023_v39 = vpop.f32.mrf.mxu1 }
0x16e6   :  { %v4024_v63 = vadd.f32 %v5801_v34, %v4023_v39 }
0x16e7   :  { %v3933_v28 = vpop.f32.mrf.mxu3 }
0x16e8   :  { %v3934_v36 = vadd.f32 %v5802_v4, %v3933_v28 }
0x16ea   :  { %5703 = vmatmul.msk.f32.vlgmr.msrb.gmra.mxu2 %vm426_vm6, %v3934_v36 }
0x16ed   :  { %v4026_v11 = vpop.f32.mrf.mxu1 }
0x16ee   :  { %v4027_v30 = vadd.f32 %v5801_v34, %v4026_v11 }
0x16ef   :  { %v3936_v5 = vpop.f32.mrf.mxu3 }
0x16f0   :  { %v3937_v32 = vadd.f32 %v5802_v4, %v3936_v5 }
0x16f2   :  { %5704 = vmatmul.msk.f32.gmra.mxu2 %vm426_vm6, %v3937_v32 }
0x16f5   :  { %v4029_v29 = vpop.f32.mrf.mxu1 }
0x16f6   :  { %v4030_v50 = vadd.f32 %v5801_v34, %v4029_v29 }
0x16f7   :  { %v3939_v45 = vpop.f32.mrf.mxu3 }
0x16f8   :  { %v3940_v42 = vadd.f32 %v5802_v4, %v3939_v45  ;;  %4147 = vmatpush.msra.mxu2 %v4030_v50 }
0x16fa   :  { %5705 = vmatmul.msk.f32.gmra.mxu2 %vm426_vm6, %v3940_v42 }
0x16fb   :  { %4148 = vmatpush.msra.mxu2 %v4027_v30 }
0x16fd   :  { %4149 = vmatpush.msra.mxu2 %v4024_v63  ;;  %v4032_v31 = vpop.f32.mrf.mxu1 }
0x16fe   :  { %v4033_v53 = vadd.f32 %v5801_v34, %v4032_v31 }
0x16ff   :  { %v3942_v52 = vpop.f32.mrf.mxu3 }
0x1700   :  { %v3943_v13 = vadd.f32 %v5802_v4, %v3942_v52 }
0x1702   :  { %5715 = vmatmul.msk.f32.vlgmr.msra.gmra.mxu0 %vm426_vm6, %v3943_v13 }
0x1705   :  { %v4035_v3 = vpop.f32.mrf.mxu1 }
0x1706   :  { %v4036_v59 = vadd.f32 %v5801_v34, %v4035_v3 }
0x1707   :  { %v3945_v47 = vpop.f32.mrf.mxu3 }
0x1708   :  { %v3946_v19 = vadd.f32 %v5802_v4, %v3945_v47 }
0x170a   :  { %5716 = vmatmul.msk.f32.gmra.mxu0 %vm426_vm6, %v3946_v19 }
0x170d   :  { %v4038_v60 = vpop.f32.mrf.mxu1 }
0x170e   :  { %v4039_v35 = vadd.f32 %v5801_v34, %v4038_v60 }
0x170f   :  { %v3948_v12 = vpop.f32.mrf.mxu3 }
0x1710   :  { %v3949_v57 = vadd.f32 %v5802_v4, %v3948_v12  ;;  %4303 = vmatpush.msra.mxu1 %v4039_v35 }
0x1712   :  { %5717 = vmatmul.msk.f32.gmra.mxu0 %vm426_vm6, %v3949_v57  ;;  %4304 = vmatpush.msra.mxu1 %v4036_v59 }
0x1714   :  { %4305 = vmatpush.msra.mxu1 %v4033_v53 }
0x1751   :  { %v7802_v14 = vpop.f32.mrf.mxu2 }
0x1759   :  { %v7804_v62 = vpop.f32.mrf.mxu2 }
0x1761   :  { %v7806_v48 = vpop.f32.mrf.mxu2 }
0x176d   :  { %v4077_v18 = vpop.f32.mrf.mxu2 }
0x176e   :  { %v4086_v61 = vmul.f32 0.35355338, %v4077_v18 }
0x1770   :  { %v4089_v1 = vadd.f32 %v4086_v61, %v6497_v41 }
0x1772   :  { %v4092_v22 = vsel %vm477_vm8, %v4089_v1, -inf }
0x1773   :  { %4093 = vmax.xlane.f32.xlu0 %v4092_v22 }
0x1775   :  { %v4080_v0 = vpop.f32.mrf.mxu2 }
0x1776   :  { %v4087_v2 = vmul.f32 0.35355338, %v4080_v0 }
0x1778   :  { %v4090_v7 = vadd.f32 %v4087_v2, %v6497_v41 }
0x177a   :  { %v4095_v56 = vsel %vm477_vm8, %v4090_v7, -inf }
0x177b   :  { %4096 = vmax.xlane.f32.xlu1 %v4095_v56 }
0x177d   :  { %v4083_v37 = vpop.f32.mrf.mxu2 }
0x177e   :  { %v4088_v27 = vmul.f32 0.35355338, %v4083_v37 }
0x177f   :  { %v4233_v54 = vpop.f32.mrf.mxu0 }
0x1780   :  { %v4242_v10 = vmul.f32 0.35355338, %v4233_v54  ;;  %v4091_v4 = vadd.f32 %v4088_v27, %v6497_v41 }
0x1782   :  { %v4098_v39 = vsel %vm477_vm8, %v4091_v4, -inf  ;;  %v4245_v28 = vadd.f32 %v4242_v10, %v6497_v41 }
0x1783   :  { %4099 = vmax.xlane.f32.xlu2 %v4098_v39 }
0x1784   :  { %v4248_v36 = vsel %vm477_vm8, %v4245_v28, -inf }
0x1785   :  { %4249 = vmax.xlane.f32.xlu0 %v4248_v36 }
0x1787   :  { %v4236_v11 = vpop.f32.mrf.mxu0 }
0x1788   :  { %v4243_v5 = vmul.f32 0.35355338, %v4236_v11 }
0x178a   :  { %v4246_v32 = vadd.f32 %v4243_v5, %v6497_v41 }
0x178c   :  { %v4251_v34 = vsel %vm477_vm8, %v4246_v32, -inf }
0x178d   :  { %4252 = vmax.xlane.f32.xlu1 %v4251_v34  ;;  %v5699_v34 = vld [vmem:[%s8430_s6 + $0x38] sm:$0xff] }
0x178e   :  { %4184 = vmatpush.msra.mxu3 %v5699_v34  ;;  %4340 = vmatpush.msrb.mxu2 %v5699_v34 }
0x178f   :  { %v4239_v29 = vpop.f32.mrf.mxu0 }
0x1790   :  { %v4244_v50 = vmul.f32 0.35355338, %v4239_v29 }
0x1792   :  { %v4247_v45 = vadd.f32 %v4244_v50, %v6497_v41 }
0x1794   :  { %v4254_v42 = vsel %vm477_vm8, %v4247_v45, -inf }
0x1795   :  { %4255 = vmax.xlane.f32.xlu2 %v4254_v42 }
0x17e6   :  { %v4094_v30 = vpop.xlane.xlu0 %4093 }
0x17e7   :  { %v4101_v63 = vsub.f32 %v4089_v1, %v4094_v30 }
0x17e9   :  { %v4104_v31 = vmul.f32 1.442695, %v4101_v63 }
0x17eb   :  { %6034 = vpow2.f32 %v4104_v31 }
0x17ee   :  { %v4097_v52 = vpop.xlane.xlu1 %4096 }
0x17ef   :  { %v4102_v13 = vsub.f32 %v4090_v7, %v4097_v52 }
0x17f1   :  { %v6035_v3 = vpop.eup %6034  ;;  %v4106_v47 = vmul.f32 1.442695, %v4102_v13 }
0x17f2   :  { %v4110_v19 = vsel %vm477_vm8, %v6035_v3, 0.0 }
0x17f3   :  { %6036 = vpow2.f32 %v4106_v47  ;;  %4111 = vadd.xlane.f32.xlu0 %v4110_v19 }
0x17f6   :  { %v4100_v60 = vpop.xlane.xlu2 %4099 }
0x17f7   :  { %v4103_v35 = vsub.f32 %v4091_v4, %v4100_v60 }
0x17f8   :  { %v4250_v12 = vpop.xlane.xlu0 %4249 }
0x17f9   :  { %v6037_v59 = vpop.eup %6036  ;;  %v4108_v41 = vmul.f32 1.442695, %v4103_v35  ;;  %v4257_v57 = vsub.f32 %v4245_v28, %v4250_v12 }
0x17fa   :  { %v4113_v53 = vsel %vm477_vm8, %v6037_v59, 0.0 }
0x17fb   :  { %6038 = vpow2.f32 %v4108_v41  ;;  %v4260_v18 = vmul.f32 1.442695, %v4257_v57  ;;  %4114 = vadd.xlane.f32.xlu1 %v4113_v53 }
0x17fd   :  { %6040 = vpow2.f32 %v4260_v18 }
0x1800   :  { %v4253_v61 = vpop.xlane.xlu1 %4252 }
0x1801   :  { %v6039_v1 = vpop.eup %6038  ;;  %v4258_v22 = vsub.f32 %v4246_v32, %v4253_v61  ;;  %v3262_v61 = vadd.f32 %v7668_v20, %v7652_v6 }
0x1802   :  { %v4116_v0 = vsel %vm477_vm8, %v6039_v1, 0.0 }
0x1803   :  { %v6041_v2 = vpop.eup %6040  ;;  %v4262_v7 = vmul.f32 1.442695, %v4258_v22  ;;  %4117 = vadd.xlane.f32.xlu2 %v4116_v0  ;;  %v5803_v22 = vld [vmem:[%s8427_s9 + $0xc] ss:$0 sm:$0xff] }
0x1804   :  { %v4266_v56 = vsel %vm477_vm8, %v6041_v2, 0.0 }
0x1805   :  { %6042 = vpow2.f32 %v4262_v7  ;;  %4267 = vadd.xlane.f32.xlu0 %v4266_v56  ;;  %v3265_v56 = vadd.f32 %v7674_v21, %v7656_v51  ;;  %v3268_v51 = vadd.f32 %v7680_v49, %v7660_v40 }
0x1808   :  { %v4256_v37 = vpop.xlane.xlu2 %4255 }
0x1809   :  { %v4259_v27 = vsub.f32 %v4247_v45, %v4256_v37 }
0x180b   :  { %v6043_v54 = vpop.eup %6042  ;;  %v4264_v10 = vmul.f32 1.442695, %v4259_v27  ;;  %v3748_v27 = vadd.f32 %v7785_v23, %v3265_v56  ;;  %v3749_v23 = vadd.f32 %v7788_v55, %v3268_v51 }
0x180c   :  { %v4269_v4 = vsel %vm477_vm8, %v6043_v54, 0.0 }
0x180d   :  { %6044 = vpow2.f32 %v4264_v10  ;;  %4270 = vadd.xlane.f32.xlu1 %v4269_v4 }
0x1813   :  { %v6045_v39 = vpop.eup %6044 }
0x1814   :  { %v4272_v28 = vsel %vm477_vm8, %v6045_v39, 0.0 }
0x1815   :  { %4273 = vadd.xlane.f32.xlu2 %v4272_v28 }
0x1866   :  { %v4112_v36 = vpop.xlane.xlu0 %4111 }
0x1867   :  { %6046 = vrcp.f32 %v4112_v36 }
0x186d   :  { %v6047_v11 = vpop.eup %6046 }
0x186e   :  { %v4122_v5 = vmul.f32 %v6047_v11, %v6035_v3  ;;  %v4115_v32 = vpop.xlane.xlu1 %4114 }
0x186f   :  { %6048 = vrcp.f32 %v4115_v32 }
0x1870   :  { %5706 = vmatmul.msk.f32.vlgmr.msra.gmra.mxu2 %vm477_vm8, %v4122_v5 }
0x1875   :  { %v6049_v29 = vpop.eup %6048 }
0x1876   :  { %v4118_v50 = vpop.xlane.xlu2 %4117  ;;  %v4123_v45 = vmul.f32 %v6049_v29, %v6037_v59 }
0x1877   :  { %6050 = vrcp.f32 %v4118_v50 }
0x1878   :  { %v4268_v42 = vpop.xlane.xlu0 %4267  ;;  %5707 = vmatmul.msk.f32.gmra.mxu2 %vm477_vm8, %v4123_v45 }
0x1879   :  { %6052 = vrcp.f32 %v4268_v42 }
0x187d   :  { %v6051_v30 = vpop.eup %6050 }
0x187e   :  { %v4124_v63 = vmul.f32 %v6051_v30, %v6039_v1  ;;  %v3747_v1 = vadd.f32 %v7782_v38, %v3262_v61  ;;  %v3450_v38 = vadd.f32 %v7682_v24, %v7664_v58  ;;  %v3453_v24 = vadd.f32 %v7687_v8, %v7670_v16 }
0x187f   :  { %v6053_v31 = vpop.eup %6052 }
0x1880   :  { %v4278_v52 = vmul.f32 %v6053_v31, %v6041_v2  ;;  %v4271_v13 = vpop.xlane.xlu1 %4270  ;;  %5708 = vmatmul.msk.f32.gmra.mxu2 %vm477_vm8, %v4124_v63  ;;  %v3903_v10 = vadd.f32 %v7802_v14, %v3450_v38  ;;  %v3904_v40 = vadd.f32 %v7804_v62, %v3453_v24  ;;  %v5727_v38 = vld [vmem:[%s8431_s7 + $0x38] sm:$0xff] }
0x1881   :  { %6054 = vrcp.f32 %v4271_v13  ;;  %4549 = vmatpush.msrb.mxu3 %v5727_v38 }
0x1882   :  { %5718 = vmatmul.msk.f32.vlgmr.msra.gmra.mxu1 %vm477_vm8, %v4278_v52 }
0x1887   :  { %v6055_v3 = vpop.eup %6054 }
0x1888   :  { %v4274_v47 = vpop.xlane.xlu2 %4273  ;;  %v4279_v19 = vmul.f32 %v6055_v3, %v6043_v54 }
0x1889   :  { %6056 = vrcp.f32 %v4274_v47 }
0x188a   :  { %5719 = vmatmul.msk.f32.gmra.mxu1 %vm477_vm8, %v4279_v19 }
0x188f   :  { %v6057_v60 = vpop.eup %6056 }
0x1890   :  { %v4280_v35 = vmul.f32 %v6057_v60, %v6045_v39 }
0x1892   :  { %5720 = vmatmul.msk.f32.gmra.mxu1 %vm477_vm8, %v4280_v35 }
0x18f3   :  { %v4151_v12 = vpop.f32.mrf.mxu2 }
0x18f4   :  { %5709 = vmatmul.msk.f32.vlgmr.msra.gmra.mxu3 %vm426_vm6, %v4151_v12 }
0x18fb   :  { %v4154_v59 = vpop.f32.mrf.mxu2 }
0x18fc   :  { %5710 = vmatmul.msk.f32.gmra.mxu3 %vm426_vm6, %v4154_v59 }
0x18ff   :  { %v4307_v41 = vpop.f32.mrf.mxu1 }
0x1900   :  { %5721 = vmatmul.msk.f32.vlgmr.msrb.gmra.mxu2 %vm426_vm6, %v4307_v41 }
0x1903   :  { %v4157_v57 = vpop.f32.mrf.mxu2 }
0x1904   :  { %5711 = vmatmul.msk.f32.gmra.mxu3 %vm426_vm6, %v4157_v57 }
0x1907   :  { %v4310_v53 = vpop.f32.mrf.mxu1 }
0x1908   :  { %5722 = vmatmul.msk.f32.gmra.mxu2 %vm426_vm6, %v4310_v53 }
0x190f   :  { %v4313_v18 = vpop.f32.mrf.mxu1 }
0x1910   :  { %5723 = vmatmul.msk.f32.gmra.mxu2 %vm426_vm6, %v4313_v18 }
0x1977   :  { %v4186_v0 = vpop.f32.mrf.mxu3 }
0x1978   :  { %v4195_v2 = vadd.f32 %v4186_v0, %v3747_v1 }
0x197a   :  { %v4355_v7 = vadd.f32 %v5803_v22, %v4195_v2 }
0x197c   :  { %v7850_v37 = vadd.f32 %v4355_v7, %v7168_v17 }
0x197e   :  { %v4367_v6 = vsel %vm120_vm1, %v7850_v37, 0.0 }
0x197f   :  { %4368 = vadd.xlane.f32.xlu0 %v4367_v6  ;;  %v4189_v20 = vpop.f32.mrf.mxu3 }
0x1980   :  { %v4196_v54 = vadd.f32 %v4189_v20, %v3748_v27 }
0x1982   :  { %v4356_v4 = vadd.f32 %v5803_v22, %v4196_v54  ;;  %v5726_v54 = vld [vmem:[%s8431_s7 + $0x30] sm:$0xff] }
0x1983   :  { %v4342_v39 = vpop.f32.mrf.mxu2  ;;  %4550 = vmatpush.msrb.mxu3 %v5726_v54 }
0x1984   :  { %v7861_v17 = vadd.f32 %v4356_v4, %v7174_v46  ;;  %v4351_v21 = vadd.f32 %v4342_v39, %v3903_v10  ;;  %v5725_v10 = vld [vmem:[%s8431_s7 + $0x28] sm:$0xff]  ;;  %v5724_v4 = vld [vmem:[%s8431_s7 + $0x20] sm:$0xff] }
0x1985   :  { %4551 = vmatpush.msrb.mxu3 %v5725_v10 }
0x1986   :  { %v4358_v28 = vadd.f32 %v5803_v22, %v4351_v21  ;;  %v4370_v36 = vsel %vm120_vm1, %v7861_v17, 0.0 }
0x1987   :  { %4371 = vadd.xlane.f32.xlu1 %v4370_v36  ;;  %v4192_v58 = vpop.f32.mrf.mxu3  ;;  %4552 = vmatpush.msrb.mxu3 %v5724_v4 }
0x1988   :  { %v7869_v14 = vadd.f32 %v4358_v28, %v7197_v9  ;;  %v4197_v11 = vadd.f32 %v4192_v58, %v3749_v23  ;;  %v3456_v9 = vadd.f32 %v7689_v44, %v7676_v26 }
0x198a   :  { %v4357_v46 = vadd.f32 %v5803_v22, %v4197_v11  ;;  %v4376_v49 = vsel %vm120_vm1, %v7869_v14, 0.0  ;;  %v3905_v62 = vadd.f32 %v7806_v48, %v3456_v9 }
0x198b   :  { %4377 = vadd.xlane.f32.xlu0 %v4376_v49  ;;  %v4345_v55 = vpop.f32.mrf.mxu2 }
0x198c   :  { %v7875_v5 = vadd.f32 %v4357_v46, %v7180_v25  ;;  %v4352_v32 = vadd.f32 %v4345_v55, %v3904_v40 }
0x198e   :  { %v4359_v34 = vadd.f32 %v5803_v22, %v4352_v32  ;;  %v4373_v16 = vsel %vm120_vm1, %v7875_v5, 0.0 }
0x198f   :  { %4374 = vadd.xlane.f32.xlu2 %v4373_v16 }
0x1990   :  { %v7882_v8 = vadd.f32 %v4359_v34, %v7210_v15 }
0x1992   :  { %v4379_v29 = vsel %vm120_vm1, %v7882_v8, 0.0 }
0x1993   :  { %4380 = vadd.xlane.f32.xlu1 %v4379_v29  ;;  %v4348_v25 = vpop.f32.mrf.mxu2 }
0x1994   :  { %v4353_v50 = vadd.f32 %v4348_v25, %v3905_v62 }
0x1996   :  { %v4360_v45 = vadd.f32 %v5803_v22, %v4353_v50 }
0x1998   :  { %v7888_v42 = vadd.f32 %v4360_v45, %v7219_v43  ;;  %v7956_v45 = vld [vmem:[%s8427_s9 + $0xa] ss:$0 sm:$0xff] }
0x199a   :  { %v4382_v30 = vsel %vm120_vm1, %v7888_v42, 0.0 }
0x199b   :  { %4383 = vadd.xlane.f32.xlu2 %v4382_v30 }
0x19f2   :  { %v4369_v26 = vpop.xlane.xlu0 %4368 }
0x19f3   :  { %v4385_v15 = vmul.f32 %v4369_v26, %v6271_v33 }
0x19f5   :  { %v7894_v44 = vsub.f32 %v7850_v37, %v4385_v15 }
0x19f7   :  { %v4397_v48 = vmul.f32 %v7894_v44, %v7894_v44 }
0x19f9   :  { %v4403_v63 = vsel %vm120_vm1, %v4397_v48, 0.0 }
0x19fa   :  { %v4372_v31 = vpop.xlane.xlu1 %4371  ;;  %4404 = vadd.xlane.f32.xlu0 %v4403_v63  ;;  %v7962_v63 = vld [vmem:[%s8427_s9 + $0xb] ss:$0 sm:$0xff] }
0x19fb   :  { %v4386_v43 = vmul.f32 %v4372_v31, %v6271_v33 }
0x19fd   :  { %v7901_v52 = vsub.f32 %v7861_v17, %v4386_v43 }
0x19fe   :  { %v4378_v13 = vpop.xlane.xlu0 %4377 }
0x19ff   :  { %v4388_v3 = vmul.f32 %v4378_v13, %v6271_v33  ;;  %v4398_v47 = vmul.f32 %v7901_v52, %v7901_v52 }
0x1a01   :  { %v7907_v19 = vsub.f32 %v7869_v14, %v4388_v3  ;;  %v4406_v60 = vsel %vm120_vm1, %v4398_v47, 0.0 }
0x1a02   :  { %4407 = vadd.xlane.f32.xlu1 %v4406_v60  ;;  %v4375_v35 = vpop.xlane.xlu2 %4374 }
0x1a03   :  { %v4387_v12 = vmul.f32 %v4375_v35, %v6271_v33  ;;  %v4400_v59 = vmul.f32 %v7907_v19, %v7907_v19 }
0x1a05   :  { %v7914_v41 = vsub.f32 %v7875_v5, %v4387_v12  ;;  %v4412_v57 = vsel %vm120_vm1, %v4400_v59, 0.0 }
0x1a06   :  { %4413 = vadd.xlane.f32.xlu0 %v4412_v57  ;;  %v4381_v53 = vpop.xlane.xlu1 %4380 }
0x1a07   :  { %v4389_v18 = vmul.f32 %v4381_v53, %v6271_v33  ;;  %v4399_v61 = vmul.f32 %v7914_v41, %v7914_v41 }
0x1a09   :  { %v7921_v1 = vsub.f32 %v7882_v8, %v4389_v18  ;;  %v4409_v22 = vsel %vm120_vm1, %v4399_v61, 0.0 }
0x1a0a   :  { %4410 = vadd.xlane.f32.xlu2 %v4409_v22 }
0x1a0b   :  { %v4401_v0 = vmul.f32 %v7921_v1, %v7921_v1 }
0x1a0d   :  { %v4415_v2 = vsel %vm120_vm1, %v4401_v0, 0.0 }
0x1a0e   :  { %4416 = vadd.xlane.f32.xlu1 %v4415_v2  ;;  %v4384_v7 = vpop.xlane.xlu2 %4383 }
0x1a0f   :  { %v4390_v56 = vmul.f32 %v4384_v7, %v6271_v33 }
0x1a11   :  { %v7929_v27 = vsub.f32 %v7888_v42, %v4390_v56 }
0x1a13   :  { %v4402_v6 = vmul.f32 %v7929_v27, %v7929_v27 }
0x1a15   :  { %v4418_v20 = vsel %vm120_vm1, %v4402_v6, 0.0 }
0x1a16   :  { %4419 = vadd.xlane.f32.xlu2 %v4418_v20 }
0x1a6d   :  { %v4405_v39 = vpop.xlane.xlu0 %4404 }
0x1a6e   :  { %v4421_v51 = vmul.f32 %v4405_v39, %v6271_v33 }
0x1a70   :  { %v4427_v21 = vadd.f32 1e-06, %v4421_v51 }
0x1a72   :  { %6058 = vrsqrt.f32 %v4427_v21  ;;  %vm4439_vm8 = vweird.f32 %v4427_v21 }
0x1a75   :  { %v4408_v23 = vpop.xlane.xlu1 %4407 }
0x1a76   :  { %v4422_v28 = vmul.f32 %v4408_v23, %v6271_v33 }
0x1a78   :  { %v6059_v36 = vpop.eup %6058  ;;  %v4428_v58 = vadd.f32 1e-06, %v4422_v28  ;;  %v5748_v28 = vld [vmem:[%s8432_s8 + $0xf0] sm:$0xff] }
0x1a79   :  { %v4434_v24 = vmul.f32 %v6059_v36, %v4427_v21  ;;  %v4414_v11 = vpop.xlane.xlu0 %4413  ;;  %vm4440_vm6 = vweird.f32 %v6059_v36 }
0x1a7a   :  { %6060 = vrsqrt.f32 %v4428_v58  ;;  %v4424_v40 = vmul.f32 %v4414_v11, %v6271_v33  ;;  %vm4441_vm4 = vmor %vm4439_vm8, %vm4440_vm6  ;;  %vm4449_vm7 = vweird.f32 %v4428_v58  ;;  %v5747_v11 = vld [vmem:[%s8432_s8 + $0xe8] sm:$0xff] }
0x1a7b   :  { %v4435_v46 = vmul.f32 %v6059_v36, %v4434_v24 }
0x1a7c   :  { %v7949_v49 = vadd.f32 1e-06, %v4424_v40 }
0x1a7d   :  { %v4436_v55 = vmul.f32 0.5, %v4435_v46  ;;  %v4411_v32 = vpop.xlane.xlu2 %4410 }
0x1a7e   :  { %6062 = vrsqrt.f32 %v7949_v49  ;;  %v4423_v34 = vmul.f32 %v4411_v32, %v6271_v33  ;;  %vm4469_vm14 = vweird.f32 %v7949_v49 }
0x1a7f   :  { %v4437_v16 = vsub.f32 1.5, %v4436_v55 }
0x1a80   :  { %v6061_v9 = vpop.eup %6060  ;;  %v4429_v62 = vadd.f32 1e-06, %v4423_v34 }
0x1a81   :  { %v4438_v29 = vmul.f32 %v6059_v36, %v4437_v16  ;;  %v4444_v25 = vmul.f32 %v6061_v9, %v4428_v58  ;;  %v4417_v50 = vpop.xlane.xlu1 %4416  ;;  %vm4450_vm5 = vweird.f32 %v6061_v9 }
0x1a82   :  { %6064 = vrsqrt.f32 %v4429_v62  ;;  %v4425_v30 = vmul.f32 %v4417_v50, %v6271_v33  ;;  %vm4451_vm9 = vmor %vm4449_vm7, %vm4450_vm5  ;;  %vm4459_vm11 = vweird.f32 %v4429_v62 }
0x1a83   :  { %v4442_v26 = vsel %vm4441_vm4, %v6059_v36, %v4438_v29  ;;  %v4445_v15 = vmul.f32 %v6061_v9, %v4444_v25 }
0x1a84   :  { %v6063_v48 = vpop.eup %6062  ;;  %v4493_v31 = vmul.f32 %v4442_v26, %v7894_v44  ;;  %v7965_v43 = vadd.f32 1e-06, %v4425_v30 }
0x1a85   :  { %v4446_v13 = vmul.f32 0.5, %v4445_v15  ;;  %v4464_v3 = vmul.f32 %v6063_v48, %v7949_v49  ;;  %vm4470_vm12 = vweird.f32 %v6063_v48  ;;  %v5746_v49 = vld [vmem:[%s8432_s8 + $0xe0] sm:$0xff] }
0x1a86   :  { %v4500_v47 = vmul.f32 %v7956_v45, %v4493_v31  ;;  %6066 = vrsqrt.f32 %v7965_v43  ;;  %vm4471_vm15 = vmor %vm4469_vm14, %vm4470_vm12  ;;  %vm4479_vm2 = vweird.f32 %v7965_v43 }
0x1a87   :  { %v4447_v60 = vsub.f32 1.5, %v4446_v13  ;;  %v4465_v35 = vmul.f32 %v6063_v48, %v4464_v3  ;;  %v5745_v3 = vld [vmem:[%s8432_s8 + $0xd8] sm:$0xff] }
0x1a88   :  { %v6065_v12 = vpop.eup %6064  ;;  %v4507_v59 = vadd.f32 %v7962_v63, %v4500_v47  ;;  %v5744_v47 = vld [vmem:[%s8432_s8 + $0xd0] sm:$0xff] }
0x1a89   :  { %v4448_v57 = vmul.f32 %v6061_v9, %v4447_v60  ;;  %v4466_v53 = vmul.f32 0.5, %v4465_v35  ;;  %v4454_v18 = vmul.f32 %v6065_v12, %v4429_v62  ;;  %v4420_v44 = vpop.xlane.xlu2 %4419  ;;  %vm4460_vm10 = vweird.f32 %v6065_v12  ;;  %v5740_v60 = vld [vmem:[%s8432_s8 + $0xb0] sm:$0xff]  ;;  %v5739_v35 = vld [vmem:[%s8432_s8 + $0xa8] sm:$0xff] }
0x1a8a   :  { %v4426_v61 = vmul.f32 %v4420_v44, %v6271_v33  ;;  %5728 = vmatmul.msk.f32.vlgmr.msrb.gmra.mxu3 %vm120_vm1, %v4507_v59  ;;  %vm4461_vm13 = vmor %vm4459_vm11, %vm4460_vm10  ;;  %v5737_v59 = vld [vmem:[%s8432_s8 + $0x98] sm:$0xff]  ;;  %v5806_v44 = vld [vmem:[%s8427_s9 + $0xd] ss:$0 sm:$0xff] }
0x1a8b   :  { %v4452_v22 = vsel %vm4451_vm9, %v6061_v9, %v4448_v57  ;;  %v4455_v0 = vmul.f32 %v6065_v12, %v4454_v18  ;;  %v4467_v6 = vsub.f32 1.5, %v4466_v53  ;;  %v5736_v57 = vld [vmem:[%s8432_s8 + $0x90] sm:$0xff]  ;;  %v5735_v53 = vld [vmem:[%s8432_s8 + $0x88] sm:$0xff]  ;;  %v5734_v18 = vld [vmem:[%s8432_s8 + $0x80] sm:$0xff] }
0x1a8c   :  { %v6067_v2 = vpop.eup %6066  ;;  %v4494_v7 = vmul.f32 %v4452_v22, %v7901_v52  ;;  %v4432_v56 = vadd.f32 1e-06, %v4426_v61  ;;  %v5749_v52 = vld [vmem:[%s8432_s8 + $0xf8] sm:$0xff] }
0x1a8d   :  { %v4456_v20 = vmul.f32 0.5, %v4455_v0  ;;  %v4474_v38 = vmul.f32 %v6067_v2, %v7965_v43  ;;  %v4468_v51 = vmul.f32 %v6063_v48, %v4467_v6  ;;  %4644 = vmatpush.msrb.mxu0 %v5749_v52  ;;  %vm4480_vm0 = vweird.f32 %v6067_v2 }
0x1a8e   :  { %6068 = vrsqrt.f32 %v4432_v56  ;;  %v4501_v54 = vmul.f32 %v7956_v45, %v4494_v7  ;;  %vm4481_vm3 = vmor %vm4479_vm2, %vm4480_vm0  ;;  %vm4489_vm8 = vweird.f32 %v4432_v56 }
0x1a8f   :  { %v4457_v10 = vsub.f32 1.5, %v4456_v20  ;;  %v4475_v4 = vmul.f32 %v6067_v2, %v4474_v38  ;;  %v4472_v40 = vsel %vm4471_vm15, %v6063_v48, %v4468_v51  ;;  %4645 = vmatpush.msrb.mxu0 %v5748_v28 }
0x1a90   :  { %v4508_v39 = vadd.f32 %v7962_v63, %v4501_v54  ;;  %v4496_v16 = vmul.f32 %v4472_v40, %v7907_v19 }
0x1a91   :  { %v4458_v21 = vmul.f32 %v6065_v12, %v4457_v10  ;;  %v4476_v23 = vmul.f32 0.5, %v4475_v4  ;;  %4646 = vmatpush.msrb.mxu0 %v5747_v11 }
0x1a92   :  { %5729 = vmatmul.msk.f32.gmra.mxu3 %vm120_vm1, %v4508_v39  ;;  %v4503_v29 = vmul.f32 %v7956_v45, %v4496_v16 }
0x1a93   :  { %v4462_v36 = vsel %vm4461_vm13, %v6065_v12, %v4458_v21  ;;  %v4477_v46 = vsub.f32 1.5, %v4476_v23  ;;  %4647 = vmatpush.msrb.mxu0 %v5746_v49  ;;  %v5738_v12 = vld [vmem:[%s8432_s8 + $0xa0] sm:$0xff] }
0x1a94   :  { %v6069_v58 = vpop.eup %6068  ;;  %v4495_v24 = vmul.f32 %v4462_v36, %v7914_v41  ;;  %v4510_v26 = vadd.f32 %v7962_v63, %v4503_v29 }
0x1a95   :  { %v4484_v55 = vmul.f32 %v6069_v58, %v4432_v56  ;;  %v4478_v9 = vmul.f32 %v6067_v2, %v4477_v46  ;;  %vm4490_vm6 = vweird.f32 %v6069_v58  ;;  %4648 = vmatpush.msrb.mxu0 %v5745_v3 }
0x1a96   :  { %v4502_v32 = vmul.f32 %v7956_v45, %v4495_v24  ;;  %vm4491_vm4 = vmor %vm4489_vm8, %vm4490_vm6 }
0x1a97   :  { %v4485_v34 = vmul.f32 %v6069_v58, %v4484_v55  ;;  %v4482_v25 = vsel %vm4481_vm3, %v6067_v2, %v4478_v9  ;;  %4649 = vmatpush.msrb.mxu0 %v5744_v47 }
0x1a98   :  { %v4509_v41 = vadd.f32 %v7962_v63, %v4502_v32  ;;  %v4497_v30 = vmul.f32 %v4482_v25, %v7921_v1 }
0x1a99   :  { %v4486_v62 = vmul.f32 0.5, %v4485_v34 }
0x1a9a   :  { %5730 = vmatmul.msk.f32.gmra.mxu3 %vm120_vm1, %v4509_v41  ;;  %v4504_v15 = vmul.f32 %v7956_v45, %v4497_v30 }
0x1a9b   :  { %v4487_v50 = vsub.f32 1.5, %v4486_v62 }
0x1a9c   :  { %v4511_v43 = vadd.f32 %v7962_v63, %v4504_v15 }
0x1a9d   :  { %v4488_v19 = vmul.f32 %v6069_v58, %v4487_v50 }
0x1a9f   :  { %v4492_v48 = vsel %vm4491_vm4, %v6069_v58, %v4488_v19 }
0x1aa0   :  { %v4498_v31 = vmul.f32 %v4492_v48, %v7929_v27  ;;  %v5743_v27 = vld [vmem:[%s8432_s8 + $0xc8] sm:$0xff] }
0x1aa1   :  { %4650 = vmatpush.msrb.mxu0 %v5743_v27 }
0x1aa2   :  { %5731 = vmatmul.msk.f32.gmra.mxu3 %vm120_vm1, %v4510_v26  ;;  %v4505_v13 = vmul.f32 %v7956_v45, %v4498_v31  ;;  %v5742_v45 = vld [vmem:[%s8432_s8 + $0xc0] sm:$0xff] }
0x1aa3   :  { %4651 = vmatpush.msrb.mxu0 %v5742_v45 }
0x1aa4   :  { %v4512_v1 = vadd.f32 %v7962_v63, %v4505_v13  ;;  %v5741_v63 = vld [vmem:[%s8432_s8 + $0xb8] sm:$0xff] }
0x1aa5   :  { %4652 = vmatpush.msrb.mxu0 %v5741_v63 }
0x1aa7   :  { %4653 = vmatpush.msrb.mxu0 %v5740_v60 }
0x1aa9   :  { %4654 = vmatpush.msrb.mxu0 %v5739_v35 }
0x1aaa   :  { %5732 = vmatmul.msk.f32.gmra.mxu3 %vm120_vm1, %v4511_v43 }
0x1aab   :  { %4655 = vmatpush.msrb.mxu0 %v5738_v12 }
0x1aad   :  { %4656 = vmatpush.msrb.mxu0 %v5737_v59 }
0x1aaf   :  { %4657 = vmatpush.msrb.mxu0 %v5736_v57 }
0x1ab1   :  { %4658 = vmatpush.msrb.mxu0 %v5735_v53 }
0x1ab2   :  { %5733 = vmatmul.msk.f32.gmra.mxu3 %vm120_vm1, %v4512_v1 }
0x1ab3   :  { %4659 = vmatpush.msrb.mxu0 %v5734_v18 }
0x1b0d   :  { %v4554_v61 = vpop.f32.mrf.mxu3 }
0x1b0e   :  { %v4555_v22 = vadd.f32 %v5806_v44, %v4554_v61 }
0x1b10   :  { %v4578_v0 = vmul.f32 0.044715, %v4555_v22  ;;  %v4572_v36 = vmul.f32 0.5, %v4555_v22 }
0x1b12   :  { %v4584_v2 = vmul.f32 %v4578_v0, %v4555_v22 }
0x1b14   :  { %v4590_v7 = vmul.f32 %v4584_v2, %v4555_v22 }
0x1b15   :  { %v4557_v56 = vpop.f32.mrf.mxu3 }
0x1b16   :  { %v4596_v6 = vadd.f32 %v4590_v7, %v4555_v22  ;;  %v4558_v20 = vadd.f32 %v5806_v44, %v4557_v56 }
0x1b18   :  { %v4602_v38 = vmul.f32 0.7978846, %v4596_v6  ;;  %v4579_v54 = vmul.f32 0.044715, %v4558_v20  ;;  %v4573_v41 = vmul.f32 0.5, %v4558_v20 }
0x1b1a   :  { %6070 = vtanh.f32 %v4602_v38  ;;  %v4585_v10 = vmul.f32 %v4579_v54, %v4558_v20  ;;  %v5807_v54 = vld [vmem:[%s8427_s9 + $0xe] ss:$0 sm:$0xff] }
0x1b1c   :  { %v4591_v4 = vmul.f32 %v4585_v10, %v4558_v20 }
0x1b1d   :  { %v4560_v39 = vpop.f32.mrf.mxu3 }
0x1b1e   :  { %v4561_v51 = vadd.f32 %v5806_v44, %v4560_v39  ;;  %v4597_v21 = vadd.f32 %v4591_v4, %v4558_v20 }
0x1b20   :  { %v6071_v23 = vpop.eup %6070  ;;  %v4580_v52 = vmul.f32 0.044715, %v4561_v51  ;;  %v4603_v28 = vmul.f32 0.7978846, %v4597_v21  ;;  %v4574_v31 = vmul.f32 0.5, %v4561_v51 }
0x1b21   :  { %v4614_v58 = vadd.f32 1.0, %v6071_v23 }
0x1b22   :  { %6072 = vtanh.f32 %v4603_v28  ;;  %v4586_v24 = vmul.f32 %v4580_v52, %v4561_v51 }
0x1b23   :  { %v4620_v11 = vmul.f32 %v4614_v58, %v4572_v36 }
0x1b24   :  { %v4592_v40 = vmul.f32 %v4586_v24, %v4561_v51 }
0x1b25   :  { %v4563_v46 = vpop.f32.mrf.mxu3  ;;  %4660 = vmatmul.f32.vlgmr.msrb.gmra.mxu0 %v4620_v11 }
0x1b26   :  { %v4564_v55 = vadd.f32 %v5806_v44, %v4563_v46  ;;  %v4598_v32 = vadd.f32 %v4592_v40, %v4561_v51 }
0x1b28   :  { %v6073_v49 = vpop.eup %6072  ;;  %v4581_v34 = vmul.f32 0.044715, %v4564_v55  ;;  %v4604_v16 = vmul.f32 0.7978846, %v4598_v32  ;;  %v4575_v12 = vmul.f32 0.5, %v4564_v55 }
0x1b29   :  { %v4615_v9 = vadd.f32 1.0, %v6073_v49 }
0x1b2a   :  { %6074 = vtanh.f32 %v4604_v16  ;;  %v4587_v62 = vmul.f32 %v4581_v34, %v4564_v55 }
0x1b2b   :  { %v4621_v29 = vmul.f32 %v4615_v9, %v4573_v41 }
0x1b2c   :  { %v4593_v25 = vmul.f32 %v4587_v62, %v4564_v55 }
0x1b2d   :  { %v4566_v50 = vpop.f32.mrf.mxu3  ;;  %4663 = vmatmul.f32.gmra.mxu0 %v4621_v29 }
0x1b2e   :  { %v4567_v30 = vadd.f32 %v5806_v44, %v4566_v50  ;;  %v4599_v26 = vadd.f32 %v4593_v25, %v4564_v55 }
0x1b30   :  { %v6075_v19 = vpop.eup %6074  ;;  %v4582_v15 = vmul.f32 0.044715, %v4567_v30  ;;  %v4605_v48 = vmul.f32 0.7978846, %v4599_v26  ;;  %v4576_v2 = vmul.f32 0.5, %v4567_v30 }
0x1b31   :  { %v4616_v43 = vadd.f32 1.0, %v6075_v19 }
0x1b32   :  { %6076 = vtanh.f32 %v4605_v48  ;;  %v4588_v13 = vmul.f32 %v4582_v15, %v4567_v30 }
0x1b33   :  { %v4622_v1 = vmul.f32 %v4616_v43, %v4574_v31 }
0x1b34   :  { %v4594_v3 = vmul.f32 %v4588_v13, %v4567_v30 }
0x1b35   :  { %v4569_v47 = vpop.f32.mrf.mxu3  ;;  %4666 = vmatmul.f32.gmra.mxu0 %v4622_v1 }
0x1b36   :  { %v4570_v27 = vadd.f32 %v5806_v44, %v4569_v47  ;;  %v4600_v45 = vadd.f32 %v4594_v3, %v4567_v30 }
0x1b38   :  { %v6077_v63 = vpop.eup %6076  ;;  %v4583_v60 = vmul.f32 0.044715, %v4570_v27  ;;  %v4606_v35 = vmul.f32 0.7978846, %v4600_v45  ;;  %v4577_v6 = vmul.f32 0.5, %v4570_v27 }
0x1b39   :  { %v4617_v59 = vadd.f32 1.0, %v6077_v63 }
0x1b3a   :  { %6078 = vtanh.f32 %v4606_v35  ;;  %v4589_v57 = vmul.f32 %v4583_v60, %v4570_v27 }
0x1b3b   :  { %v4623_v53 = vmul.f32 %v4617_v59, %v4575_v12 }
0x1b3c   :  { %v4595_v18 = vmul.f32 %v4589_v57, %v4570_v27 }
0x1b3d   :  { %4669 = vmatmul.f32.gmra.mxu0 %v4623_v53 }
0x1b3e   :  { %v4601_v61 = vadd.f32 %v4595_v18, %v4570_v27 }
0x1b40   :  { %v6079_v22 = vpop.eup %6078  ;;  %v4607_v0 = vmul.f32 0.7978846, %v4601_v61 }
0x1b41   :  { %v4618_v7 = vadd.f32 1.0, %v6079_v22 }
0x1b42   :  { %6080 = vtanh.f32 %v4607_v0  ;;  %v4690_v0 = vld [vmem:[%s8433_s10 + $0x58] sm:$0xff] }
0x1b43   :  { %v4624_v56 = vmul.f32 %v4618_v7, %v4576_v2  ;;  %4878 = vmatpush.msrb.mxu1 %v4690_v0  ;;  %v4689_v2 = vld [vmem:[%s8433_s10 + $0x50] sm:$0xff]  ;;  %v4688_v7 = vld [vmem:[%s8433_s10 + $0x48] sm:$0xff]  ;;  %v4696_v0 = vld [vmem:[%s8433_s10 + $0x20] sm:$0xff] }
0x1b45   :  { %4672 = vmatmul.f32.gmra.mxu0 %v4624_v56  ;;  %4879 = vmatpush.msrb.mxu1 %v4689_v2  ;;  %v4687_v56 = vld [vmem:[%s8433_s10 + $0x40] sm:$0xff] }
0x1b47   :  { %4880 = vmatpush.msrb.mxu1 %v4688_v7 }
0x1b48   :  { %v6081_v44 = vpop.eup %6080 }
0x1b49   :  { %v4619_v20 = vadd.f32 1.0, %v6081_v44  ;;  %4881 = vmatpush.msrb.mxu1 %v4687_v56 }
0x1b4b   :  { %v4625_v38 = vmul.f32 %v4619_v20, %v4577_v6 }
0x1b4d   :  { %4675 = vmatmul.f32.gmra.mxu0 %v4625_v38 }
0x1ba2   :  { %v4661_v10 = vpop.f32.mrf.mxu0 }
0x1ba3   :  { %v4662_v4 = vadd.f32 %v5807_v54, %v4661_v10 }
0x1ba5   :  { %v4679_v39 = vadd.f32 %v4662_v4, %v7850_v37 }
0x1ba7   :  { %v4701_v51 = vsel %vm120_vm1, %v4679_v39, 0.0 }
0x1ba8   :  { %4702 = vadd.xlane.f32.xlu0 %v4701_v51 }
0x1baa   :  { %v4664_v21 = vpop.f32.mrf.mxu0 }
0x1bab   :  { %v4665_v23 = vadd.f32 %v5807_v54, %v4664_v21 }
0x1bad   :  { %v4680_v52 = vadd.f32 %v4665_v23, %v7861_v17 }
0x1baf   :  { %v4704_v28 = vsel %vm120_vm1, %v4680_v52, 0.0 }
0x1bb0   :  { %4705 = vadd.xlane.f32.xlu1 %v4704_v28 }
0x1bb2   :  { %v4667_v36 = vpop.f32.mrf.mxu0 }
0x1bb3   :  { %v4668_v58 = vadd.f32 %v5807_v54, %v4667_v36 }
0x1bb5   :  { %v4681_v24 = vadd.f32 %v4668_v58, %v7875_v5 }
0x1bb7   :  { %v4707_v11 = vsel %vm120_vm1, %v4681_v24, 0.0 }
0x1bb8   :  { %4708 = vadd.xlane.f32.xlu2 %v4707_v11 }
0x1bba   :  { %v4670_v40 = vpop.f32.mrf.mxu0 }
0x1bbb   :  { %v4671_v46 = vadd.f32 %v5807_v54, %v4670_v40  ;;  %v8116_v40 = vld [vmem:[%s8433_s10 + $0x60] ss:$0 sm:$0xff] }
0x1bbd   :  { %v4682_v37 = vadd.f32 %v4671_v46, %v7869_v14 }
0x1bbf   :  { %v4710_v55 = vsel %vm120_vm1, %v4682_v37, 0.0 }
0x1bc0   :  { %4711 = vadd.xlane.f32.xlu0 %v4710_v55  ;;  %v8121_v55 = vld [vmem:[%s8433_s10 + $0x61] ss:$0 sm:$0xff] }
0x1bc2   :  { %v4673_v32 = vpop.f32.mrf.mxu0 }
0x1bc3   :  { %v4674_v49 = vadd.f32 %v5807_v54, %v4673_v32 }
0x1bc5   :  { %v4683_v17 = vadd.f32 %v4674_v49, %v7882_v8 }
0x1bc7   :  { %v4713_v34 = vsel %vm120_vm1, %v4683_v17, 0.0 }
0x1bc8   :  { %4714 = vadd.xlane.f32.xlu1 %v4713_v34 }
0x1bca   :  { %v4676_v16 = vpop.f32.mrf.mxu0 }
0x1bcb   :  { %v4677_v41 = vadd.f32 %v5807_v54, %v4676_v16 }
0x1bcd   :  { %v4684_v5 = vadd.f32 %v4677_v41, %v7888_v42 }
0x1bcf   :  { %v4716_v9 = vsel %vm120_vm1, %v4684_v5, 0.0 }
0x1bd0   :  { %4717 = vadd.xlane.f32.xlu2 %v4716_v9 }
0x1c1b   :  { %v4703_v62 = vpop.xlane.xlu0 %4702 }
0x1c1c   :  { %v4719_v14 = vmul.f32 %v4703_v62, %v6271_v33 }
0x1c1e   :  { %v8063_v29 = vsub.f32 %v4679_v39, %v4719_v14 }
0x1c20   :  { %v4731_v25 = vmul.f32 %v8063_v29, %v8063_v29 }
0x1c22   :  { %v4737_v8 = vsel %vm120_vm1, %v4731_v25, 0.0 }
0x1c23   :  { %v4706_v50 = vpop.xlane.xlu1 %4705  ;;  %4738 = vadd.xlane.f32.xlu0 %v4737_v8 }
0x1c24   :  { %v4720_v30 = vmul.f32 %v4706_v50, %v6271_v33 }
0x1c26   :  { %v8069_v26 = vsub.f32 %v4680_v52, %v4720_v30 }
0x1c28   :  { %v4732_v42 = vmul.f32 %v8069_v26, %v8069_v26 }
0x1c2a   :  { %v4740_v19 = vsel %vm120_vm1, %v4732_v42, 0.0 }
0x1c2b   :  { %4741 = vadd.xlane.f32.xlu1 %v4740_v19  ;;  %v4709_v15 = vpop.xlane.xlu2 %4708 }
0x1c2c   :  { %v4721_v48 = vmul.f32 %v4709_v15, %v6271_v33 }
0x1c2e   :  { %v8075_v31 = vsub.f32 %v4681_v24, %v4721_v48 }
0x1c30   :  { %v4733_v43 = vmul.f32 %v8075_v31, %v8075_v31 }
0x1c32   :  { %v4743_v13 = vsel %vm120_vm1, %v4733_v43, 0.0 }
0x1c33   :  { %v4712_v1 = vpop.xlane.xlu0 %4711  ;;  %4744 = vadd.xlane.f32.xlu2 %v4743_v13 }
0x1c34   :  { %v4722_v3 = vmul.f32 %v4712_v1, %v6271_v33 }
0x1c36   :  { %v8081_v47 = vsub.f32 %v4682_v37, %v4722_v3 }
0x1c38   :  { %v4734_v27 = vmul.f32 %v8081_v47, %v8081_v47 }
0x1c3a   :  { %v4746_v45 = vsel %vm120_vm1, %v4734_v27, 0.0 }
0x1c3b   :  { %v4715_v63 = vpop.xlane.xlu1 %4714  ;;  %4747 = vadd.xlane.f32.xlu0 %v4746_v45  ;;  %v4698_v45 = vld [vmem:[%s8433_s10 + $0x30] sm:$0xff] }
0x1c3c   :  { %v4723_v60 = vmul.f32 %v4715_v63, %v6271_v33 }
0x1c3e   :  { %v8087_v35 = vsub.f32 %v4683_v17, %v4723_v60 }
0x1c40   :  { %v4735_v12 = vmul.f32 %v8087_v35, %v8087_v35 }
0x1c42   :  { %v4749_v59 = vsel %vm120_vm1, %v4735_v12, 0.0 }
0x1c43   :  { %4750 = vadd.xlane.f32.xlu1 %v4749_v59  ;;  %v4718_v57 = vpop.xlane.xlu2 %4717  ;;  %v4697_v59 = vld [vmem:[%s8433_s10 + $0x28] sm:$0xff] }
0x1c44   :  { %v4724_v53 = vmul.f32 %v4718_v57, %v6271_v33 }
0x1c46   :  { %v8093_v18 = vsub.f32 %v4684_v5, %v4724_v53 }
0x1c48   :  { %v4736_v61 = vmul.f32 %v8093_v18, %v8093_v18 }
0x1c4a   :  { %v4752_v22 = vsel %vm120_vm1, %v4736_v61, 0.0 }
0x1c4b   :  { %4753 = vadd.xlane.f32.xlu2 %v4752_v22 }
0x1c96   :  { %v4739_v44 = vpop.xlane.xlu0 %4738 }
0x1c97   :  { %v4755_v6 = vmul.f32 %v4739_v44, %v6271_v33  ;;  %v4695_v44 = vld [vmem:[%s8433_s10 + $0x18] sm:$0xff] }
0x1c99   :  { %v4761_v20 = vadd.f32 1e-06, %v4755_v6 }
0x1c9b   :  { %6082 = vrsqrt.f32 %v4761_v20  ;;  %vm4773_vm7 = vweird.f32 %v4761_v20 }
0x1c9e   :  { %v4742_v38 = vpop.xlane.xlu1 %4741 }
0x1c9f   :  { %v4756_v54 = vmul.f32 %v4742_v38, %v6271_v33 }
0x1ca1   :  { %v6083_v10 = vpop.eup %6082  ;;  %v4762_v4 = vadd.f32 1e-06, %v4756_v54 }
0x1ca2   :  { %v4768_v39 = vmul.f32 %v6083_v10, %v4761_v20  ;;  %vm4774_vm5 = vweird.f32 %v6083_v10 }
0x1ca3   :  { %6084 = vrsqrt.f32 %v4762_v4  ;;  %vm4775_vm9 = vmor %vm4773_vm7, %vm4774_vm5  ;;  %vm4783_vm11 = vweird.f32 %v4762_v4 }
0x1ca4   :  { %v4769_v51 = vmul.f32 %v6083_v10, %v4768_v39 }
0x1ca6   :  { %v4770_v21 = vmul.f32 0.5, %v4769_v51  ;;  %v4745_v23 = vpop.xlane.xlu2 %4744 }
0x1ca7   :  { %v4757_v52 = vmul.f32 %v4745_v23, %v6271_v33 }
0x1ca8   :  { %v4771_v28 = vsub.f32 1.5, %v4770_v21 }
0x1ca9   :  { %v6085_v36 = vpop.eup %6084  ;;  %v4763_v58 = vadd.f32 1e-06, %v4757_v52 }
0x1caa   :  { %v4772_v24 = vmul.f32 %v6083_v10, %v4771_v28  ;;  %v4778_v11 = vmul.f32 %v6085_v36, %v4762_v4  ;;  %vm4784_vm10 = vweird.f32 %v6085_v36 }
0x1cab   :  { %6086 = vrsqrt.f32 %v4763_v58  ;;  %vm4785_vm12 = vmor %vm4783_vm11, %vm4784_vm10  ;;  %vm4793_vm14 = vweird.f32 %v4763_v58  ;;  %vm5234_vm10 = vcmask 1040384  }
0x1cac   :  { %v4776_v46 = vsel %vm4775_vm9, %v6083_v10, %v4772_v24  ;;  %v4779_v37 = vmul.f32 %v6085_v36, %v4778_v11 }
0x1cad   :  { %v4827_v32 = vmul.f32 %v4776_v46, %v8063_v29 }
0x1cae   :  { %v4780_v49 = vmul.f32 0.5, %v4779_v37  ;;  %v4748_v17 = vpop.xlane.xlu0 %4747 }
0x1caf   :  { %v4834_v34 = vmul.f32 %v8116_v40, %v4827_v32  ;;  %v4758_v16 = vmul.f32 %v4748_v17, %v6271_v33 }
0x1cb0   :  { %v4781_v41 = vsub.f32 1.5, %v4780_v49 }
0x1cb1   :  { %v6087_v5 = vpop.eup %6086  ;;  %v4841_v9 = vadd.f32 %v8121_v55, %v4834_v34  ;;  %v4764_v62 = vadd.f32 1e-06, %v4758_v16  ;;  %v4693_v16 = vld [vmem:[%s8433_s10 + $0x8] sm:$0xff] }
0x1cb2   :  { %v4782_v14 = vmul.f32 %v6085_v36, %v4781_v41  ;;  %v4788_v25 = vmul.f32 %v6087_v5, %v4763_v58  ;;  %vm4794_vm13 = vweird.f32 %v6087_v5 }
0x1cb3   :  { %6088 = vrsqrt.f32 %v4764_v62  ;;  %5750 = vmatmul.msk.f32.vlgmr.msrb.gmra.mxu1 %vm120_vm1, %v4841_v9  ;;  %vm4795_vm15 = vmor %vm4793_vm14, %vm4794_vm13  ;;  %vm4803_vm2 = vweird.f32 %v4764_v62 }
0x1cb4   :  { %v4786_v29 = vsel %vm4785_vm12, %v6085_v36, %v4782_v14  ;;  %v4789_v8 = vmul.f32 %v6087_v5, %v4788_v25  ;;  %v4972_v25 = vld [vmem:[%s8434_s1] sm:$0xff] }
0x1cb5   :  { %v4828_v50 = vmul.f32 %v4786_v29, %v8069_v26  ;;  %v4699_v26 = vld [vmem:[%s8433_s10 + $0x38] sm:$0xff]  ;;  %v8185_v29 = vld [vmem:[%s8433_s10 + $0x66] ss:$0 sm:$0xff] }
0x1cb6   :  { %v4790_v30 = vmul.f32 0.5, %v4789_v8  ;;  %v4751_v42 = vpop.xlane.xlu1 %4750  ;;  %4935 = vmatpush.msra.mxu2 %v4699_v26  ;;  %v4973_v8 = vld [vmem:[%s8434_s1 + $0x8] sm:$0xff] }
0x1cb7   :  { %v4759_v19 = vmul.f32 %v4751_v42, %v6271_v33  ;;  %v4835_v15 = vmul.f32 %v8116_v40, %v4828_v50  ;;  %v8193_v50 = vld [vmem:[%s8433_s10 + $0x67] ss:$0 sm:$0xff]  ;;  %v5047_v42 = vmul.f32 %v8185_v29, %v4973_v8 }
0x1cb8   :  { %v4791_v48 = vsub.f32 1.5, %v4790_v30  ;;  %4936 = vmatpush.msra.mxu2 %v4698_v45  ;;  %v5046_v30 = vmul.f32 %v8185_v29, %v4972_v25  ;;  %v4974_v45 = vld [vmem:[%s8434_s1 + $0x10] sm:$0xff] }
0x1cb9   :  { %v6089_v43 = vpop.eup %6088  ;;  %v4765_v13 = vadd.f32 1e-06, %v4759_v19  ;;  %v4842_v1 = vadd.f32 %v8121_v55, %v4835_v15  ;;  %v5174_v15 = vmul.f32 %v8193_v50, %v4972_v25  ;;  %5072 = vadd.xlane.f32.xlu1 %v5047_v42 }
0x1cba   :  { %v4792_v3 = vmul.f32 %v6087_v5, %v4791_v48  ;;  %v4798_v27 = vmul.f32 %v6089_v43, %v4764_v62  ;;  %vm4804_vm0 = vweird.f32 %v6089_v43  ;;  %4937 = vmatpush.msra.mxu2 %v4697_v59  ;;  %5070 = vadd.xlane.f32.xlu0 %v5046_v30 }
0x1cbb   :  { %6090 = vrsqrt.f32 %v4765_v13  ;;  %5751 = vmatmul.msk.f32.gmra.mxu1 %vm120_vm1, %v4842_v1  ;;  %vm4805_vm3 = vmor %vm4803_vm2, %vm4804_vm0  ;;  %vm4813_vm8 = vweird.f32 %v4765_v13  ;;  %5198 = vadd.xlane.f32.xlu2 %v5174_v15  ;;  %v5175_v1 = vmul.f32 %v8193_v50, %v4973_v8 }
0x1cbc   :  { %v4796_v63 = vsel %vm4795_vm15, %v6087_v5, %v4792_v3  ;;  %v4799_v60 = vmul.f32 %v6089_v43, %v4798_v27  ;;  %4938 = vmatpush.msra.mxu2 %v4696_v0 }
0x1cbd   :  { %v4829_v12 = vmul.f32 %v4796_v63, %v8075_v31 }
0x1cbe   :  { %v4800_v57 = vmul.f32 0.5, %v4799_v60  ;;  %v4754_v53 = vpop.xlane.xlu2 %4753  ;;  %4939 = vmatpush.msra.mxu2 %v4695_v44  ;;  %v5048_v60 = vmul.f32 %v8185_v29, %v4974_v45 }
0x1cbf   :  { %v4760_v61 = vmul.f32 %v4754_v53, %v6271_v33  ;;  %v4836_v22 = vmul.f32 %v8116_v40, %v4829_v12  ;;  %v5176_v53 = vmul.f32 %v8193_v50, %v4974_v45 }
0x1cc0   :  { %v4801_v2 = vsub.f32 1.5, %v4800_v57 }
0x1cc1   :  { %v6091_v7 = vpop.eup %6090  ;;  %v4766_v31 = vadd.f32 1e-06, %v4760_v61  ;;  %v4843_v56 = vadd.f32 %v8121_v55, %v4836_v22 }
0x1cc2   :  { %v4802_v6 = vmul.f32 %v6089_v43, %v4801_v2  ;;  %v4808_v33 = vmul.f32 %v6091_v7, %v4765_v13  ;;  %vm4814_vm6 = vweird.f32 %v6091_v7  ;;  %v8201_v13 = vld [vmem:[%s8434_s1 + $0x18] sm:$0xff]  ;;  %5200 = vadd.xlane.f32.xlu0 %v5175_v1  ;;  %v5813_v2 = vld [vmem:[%s8433_s10 + $0x63] ss:$0 sm:$0xff] }
0x1cc3   :  { %6092 = vrsqrt.f32 %v4766_v31  ;;  %5752 = vmatmul.msk.f32.gmra.mxu1 %vm120_vm1, %v4843_v56  ;;  %vm4815_vm4 = vmor %vm4813_vm8, %vm4814_vm6  ;;  %vm4823_vm7 = vweird.f32 %v4766_v31  ;;  %v8207_v3 = vmul.f32 %v8185_v29, %v8201_v13  ;;  %v5177_v25 = vmul.f32 %v8193_v50, %v8201_v13 }
0x1cc4   :  { %v4806_v20 = vsel %vm4805_vm3, %v6089_v43, %v4802_v6  ;;  %v4809_v38 = vmul.f32 %v6091_v7, %v4808_v33 }
0x1cc5   :  { %v4830_v54 = vmul.f32 %v4806_v20, %v8081_v47  ;;  %5076 = vadd.xlane.f32.xlu2 %v8207_v3 }
0x1cc6   :  { %v4810_v10 = vmul.f32 0.5, %v4809_v38 }
0x1cc7   :  { %v4837_v4 = vmul.f32 %v8116_v40, %v4830_v54 }
0x1cc8   :  { %v4811_v39 = vsub.f32 1.5, %v4810_v10 }
0x1cc9   :  { %v6093_v51 = vpop.eup %6092  ;;  %v4844_v21 = vadd.f32 %v8121_v55, %v4837_v4 }
0x1cca   :  { %v4812_v23 = vmul.f32 %v6091_v7, %v4811_v39  ;;  %v4818_v52 = vmul.f32 %v6093_v51, %v4766_v31  ;;  %vm4824_vm5 = vweird.f32 %v6093_v51  ;;  %5074 = vadd.xlane.f32.xlu0 %v5048_v60  ;;  %v5815_v31 = vld [vmem:[%s8433_s10 + $0x65] ss:$0 sm:$0xff] }
0x1ccb   :  { %5753 = vmatmul.msk.f32.gmra.mxu1 %vm120_vm1, %v4844_v21  ;;  %vm4825_vm9 = vmor %vm4823_vm7, %vm4824_vm5 }
0x1ccc   :  { %v4816_v28 = vsel %vm4815_vm4, %v6091_v7, %v4812_v23  ;;  %v4819_v36 = vmul.f32 %v6093_v51, %v4818_v52  ;;  %v5814_v7 = vld [vmem:[%s8433_s10 + $0x64] ss:$0 sm:$0xff] }
0x1ccd   :  { %v4831_v58 = vmul.f32 %v4816_v28, %v8087_v35  ;;  %v4694_v35 = vld [vmem:[%s8433_s10 + $0x10] sm:$0xff] }
0x1cce   :  { %v4820_v24 = vmul.f32 0.5, %v4819_v36  ;;  %4940 = vmatpush.msra.mxu2 %v4694_v35 }
0x1ccf   :  { %v4838_v47 = vmul.f32 %v8116_v40, %v4831_v58 }
0x1cd0   :  { %v4821_v11 = vsub.f32 1.5, %v4820_v24  ;;  %4941 = vmatpush.msra.mxu2 %v4693_v16 }
0x1cd1   :  { %v4845_v46 = vadd.f32 %v8121_v55, %v4838_v47 }
0x1cd2   :  { %v4822_v37 = vmul.f32 %v6093_v51, %v4821_v11  ;;  %5202 = vadd.xlane.f32.xlu0 %v5176_v53  ;;  %v4976_v11 = vld [vmem:[%s8434_s1 + $0x20] sm:$0xff] }
0x1cd3   :  { %5754 = vmatmul.msk.f32.gmra.mxu1 %vm120_vm1, %v4845_v46  ;;  %v5050_v46 = vmul.f32 %v8185_v29, %v4976_v11 }
0x1cd4   :  { %v4826_v32 = vsel %vm4825_vm9, %v6093_v51, %v4822_v37  ;;  %v5178_v37 = vmul.f32 %v8193_v50, %v4976_v11 }
0x1cd5   :  { %v4832_v49 = vmul.f32 %v4826_v32, %v8093_v18  ;;  %v4692_v18 = vld [vmem:[%s8433_s10] sm:$0xff] }
0x1cd6   :  { %4942 = vmatpush.msra.mxu2 %v4692_v18 }
0x1cd7   :  { %v4839_v17 = vmul.f32 %v8116_v40, %v4832_v49  ;;  %v5810_v40 = vld [vmem:[%s8433_s10 + $0x62] ss:$0 sm:$0xff] }
0x1cd9   :  { %v4846_v34 = vadd.f32 %v8121_v55, %v4839_v17 }
0x1cdb   :  { %5755 = vmatmul.msk.f32.gmra.mxu1 %vm120_vm1, %v4846_v34  ;;  %vm4908_vm1 = vcmask 523264  }
0x1d30   :  { %v4883_v55 = vpop.f32.mrf.mxu1 }
0x1d31   :  { %v4884_v41 = vadd.f32 %v5810_v40, %v4883_v55 }
0x1d33   :  { %v4901_v5 = vmax.f32 %v4884_v41, 0.0 }
0x1d35   :  { %5756 = vmatmul.msk.f32.vlgmr.msra.gmra.mxu2 %vm4908_vm1, %v4901_v5 }
0x1d38   :  { %v4886_v9 = vpop.f32.mrf.mxu1 }
0x1d39   :  { %v4887_v62 = vadd.f32 %v5810_v40, %v4886_v9 }
0x1d3b   :  { %v4902_v14 = vmax.f32 %v4887_v62, 0.0 }
0x1d3d   :  { %5757 = vmatmul.msk.f32.gmra.mxu2 %vm4908_vm1, %v4902_v14 }
0x1d40   :  { %v4889_v19 = vpop.f32.mrf.mxu1 }
0x1d41   :  { %v4890_v48 = vadd.f32 %v5810_v40, %v4889_v19 }
0x1d43   :  { %v4903_v43 = vmax.f32 %v4890_v48, 0.0  ;;  %v8306_v48 = vpop.xlane.xlu1 %5072 }
0x1d45   :  { %5758 = vmatmul.msk.f32.gmra.mxu2 %vm4908_vm1, %v4903_v43 }
0x1d48   :  { %v4892_v27 = vpop.f32.mrf.mxu1 }
0x1d49   :  { %v4893_v26 = vadd.f32 %v5810_v40, %v4892_v27 }
0x1d4b   :  { %v4904_v63 = vmax.f32 %v4893_v26, 0.0 }
0x1d4d   :  { %5759 = vmatmul.msk.f32.gmra.mxu2 %vm4908_vm1, %v4904_v63 }
0x1d50   :  { %v4895_v12 = vpop.f32.mrf.mxu1 }
0x1d51   :  { %v4896_v59 = vadd.f32 %v5810_v40, %v4895_v12 }
0x1d53   :  { %v4905_v57 = vmax.f32 %v4896_v59, 0.0 }
0x1d55   :  { %5760 = vmatmul.msk.f32.gmra.mxu2 %vm4908_vm1, %v4905_v57 }
0x1d58   :  { %v4898_v61 = vpop.f32.mrf.mxu1 }
0x1d59   :  { %v4899_v22 = vadd.f32 %v5810_v40, %v4898_v61 }
0x1d5b   :  { %v4906_v0 = vmax.f32 %v4899_v22, 0.0 }
0x1d5d   :  { %5761 = vmatmul.msk.f32.gmra.mxu2 %vm4908_vm1, %v4906_v0 }
0x1db8   :  { %v4944_v56 = vpop.f32.mrf.mxu2 }
0x1db9   :  { %v4945_v44 = vadd.f32 %v5813_v2, %v4944_v56 }
0x1dbb   :  { %4962 = vst [vmem:[%s8435_s11] sm:$0xff] %v4945_v44  ;;  %v5052_v6 = vmul.f32 %v5046_v30, %v4945_v44  ;;  %v8230_v33 = vadd.f32 %v5814_v7, %v4945_v44  ;;  %v8232_v20 = vadd.f32 %v5815_v31, %v4945_v44  ;;  %v5180_v10 = vmul.f32 %v5174_v15, %v4945_v44  ;;  %v8298_v30 = vpop.xlane.xlu0 %5070  ;;  %v8304_v15 = vpop.xlane.xlu2 %5198 }
0x1dbd   :  { %5058 = vadd.xlane.f32.xlu1 %v5052_v6  ;;  %4985 = vmax.xlane.f32.xlu0 %v8230_v33 }
0x1dbe   :  { %5113 = vmax.xlane.f32.xlu2 %v8232_v20 }
0x1dc0   :  { %v4947_v38 = vpop.f32.mrf.mxu2 }
0x1dc1   :  { %v4948_v54 = vadd.f32 %v5813_v2, %v4947_v38 }
0x1dc3   :  { %4963 = vst [vmem:[%s8435_s11 + $0x8] sm:$0xff] %v4948_v54  ;;  %v8239_v4 = vadd.f32 %v5815_v31, %v4948_v54  ;;  %v5053_v39 = vmul.f32 %v5047_v42, %v4948_v54  ;;  %v8245_v23 = vadd.f32 %v5814_v7, %v4948_v54  ;;  %v5181_v52 = vmul.f32 %v5175_v1, %v4948_v54  ;;  %v8300_v42 = vpop.xlane.xlu0 %5200  ;;  %v8310_v1 = vpop.xlane.xlu2 %5076 }
0x1dc5   :  { %5186 = vadd.xlane.f32.xlu1 %v5180_v10  ;;  %5115 = vmax.xlane.f32.xlu0 %v8239_v4 }
0x1dc6   :  { %5060 = vadd.xlane.f32.xlu2 %v5053_v39 }
0x1dc8   :  { %v4950_v51 = vpop.f32.mrf.mxu2 }
0x1dc9   :  { %v4951_v21 = vadd.f32 %v5813_v2, %v4950_v51 }
0x1dcb   :  { %4964 = vst [vmem:[%s8435_s11 + $0x10] sm:$0xff] %v4951_v21  ;;  %v8253_v24 = vadd.f32 %v5814_v7, %v4951_v21  ;;  %v8255_v47 = vadd.f32 %v5815_v31, %v4951_v21  ;;  %v5054_v17 = vmul.f32 %v5048_v60, %v4951_v21  ;;  %v5182_v41 = vmul.f32 %v5176_v53, %v4951_v21  ;;  %v8302_v19 = vpop.xlane.xlu0 %5074 }
0x1dcd   :  { %4987 = vmax.xlane.f32.xlu1 %v8245_v23 }
0x1dce   :  { %5188 = vadd.xlane.f32.xlu2 %v5181_v52 }
0x1dd0   :  { %v4953_v28 = vpop.f32.mrf.mxu2 }
0x1dd1   :  { %v4954_v36 = vadd.f32 %v5813_v2, %v4953_v28 }
0x1dd3   :  { %4965 = vst [vmem:[%s8435_s11 + $0x18] sm:$0xff] %v4954_v36  ;;  %v8251_v58 = vadd.f32 %v5814_v7, %v4954_v36  ;;  %v8284_v5 = vadd.f32 %v5815_v31, %v4954_v36  ;;  %v5055_v14 = vmul.f32 %v8207_v3, %v4954_v36  ;;  %v5183_v8 = vmul.f32 %v5177_v25, %v4954_v36  ;;  %v8308_v43 = vpop.xlane.xlu0 %5202 }
0x1dd5   :  { %4991 = vmax.xlane.f32.xlu0 %v8251_v58  ;;  %4989 = vmax.xlane.f32.xlu1 %v8253_v24 }
0x1dd6   :  { %5117 = vmax.xlane.f32.xlu2 %v8255_v47 }
0x1dd8   :  { %v4956_v32 = vpop.f32.mrf.mxu2 }
0x1dd9   :  { %v4957_v49 = vadd.f32 %v5813_v2, %v4956_v32 }
0x1ddb   :  { %4966 = vst [vmem:[%s8435_s11 + $0x20] sm:$0xff] %v4957_v49  ;;  %v8268_v34 = vadd.f32 %v5815_v31, %v4957_v49  ;;  %v8270_v35 = vadd.f32 %v5814_v7, %v4957_v49  ;;  %v8272_v16 = vmul.f32 %v5050_v46, %v4957_v49  ;;  %v8274_v18 = vmul.f32 %v5178_v37, %v4957_v49 }
0x1ddd   :  { %5121 = vmax.xlane.f32.xlu0 %v8268_v34  ;;  %5062 = vadd.xlane.f32.xlu1 %v5054_v17 }
0x1dde   :  { %4993 = vmax.xlane.f32.xlu2 %v8270_v35 }
0x1de0   :  { %v4959_v40 = vpop.f32.mrf.mxu2 }
0x1de1   :  { %v8278_v55 = vadd.f32 %v5813_v2, %v4959_v40 }
0x1de3   :  { %4967 = vst [vmem:[%s8435_s11 + $0x28] sm:$0xff] %v8278_v55  ;;  %v8287_v9 = vadd.f32 %v5815_v31, %v8278_v55  ;;  %v8292_v62 = vadd.f32 %v5814_v7, %v8278_v55 }
0x1de5   :  { %5190 = vadd.xlane.f32.xlu0 %v5182_v41  ;;  %5119 = vmax.xlane.f32.xlu1 %v8284_v5 }
0x1de6   :  { %5123 = vmax.xlane.f32.xlu2 %v8287_v9 }
0x1ded   :  { %4995 = vmax.xlane.f32.xlu1 %v8292_v62  ;;  %5078 = vadd.xlane.f32.xlu0 %v5050_v46 }
0x1dee   :  { %5064 = vadd.xlane.f32.xlu2 %v5055_v14 }
0x1df5   :  { %5204 = vadd.xlane.f32.xlu1 %v5177_v25 }
0x1df6   :  { %5206 = vadd.xlane.f32.xlu2 %v5178_v37 }
0x1dfd   :  { %5192 = vadd.xlane.f32.xlu1 %v5183_v8 }
0x1e30   :  { %v8312_v3 = vpop.xlane.xlu1 %5058  ;;  %v8314_v13 = vpop.xlane.xlu0 %4985 }
0x1e31   :  { %v4997_v27 = vsub.f32 %v8230_v33, %v8314_v13  ;;  %v8318_v26 = vpop.xlane.xlu2 %5113 }
0x1e32   :  { %v5125_v45 = vsub.f32 %v8232_v20, %v8318_v26 }
0x1e33   :  { %v5003_v63 = vmul.f32 1.442695, %v4997_v27 }
0x1e34   :  { %v5131_v60 = vmul.f32 1.442695, %v5125_v45 }
0x1e35   :  { %6094 = vpow2.f32 %v5003_v63 }
0x1e36   :  { %6096 = vpow2.f32 %v5131_v60 }
0x1e38   :  { %v8322_v12 = vpop.xlane.xlu1 %5186  ;;  %v8324_v59 = vpop.xlane.xlu0 %5115 }
0x1e39   :  { %v5126_v57 = vsub.f32 %v8239_v4, %v8324_v59  ;;  %v8328_v53 = vpop.xlane.xlu2 %5060 }
0x1e3b   :  { %v6095_v61 = vpop.eup %6094  ;;  %v5133_v22 = vmul.f32 1.442695, %v5126_v57 }
0x1e3c   :  { %v6097_v0 = vpop.eup %6096  ;;  %5015 = vadd.xlane.f32.xlu0 %v6095_v61 }
0x1e3d   :  { %6098 = vpow2.f32 %v5133_v22  ;;  %5143 = vadd.xlane.f32.xlu2 %v6097_v0 }
0x1e40   :  { %v8330_v2 = vpop.xlane.xlu1 %4987 }
0x1e41   :  { %v4998_v7 = vsub.f32 %v8245_v23, %v8330_v2  ;;  %v8334_v31 = vpop.xlane.xlu2 %5188 }
0x1e43   :  { %v6099_v56 = vpop.eup %6098  ;;  %v5005_v44 = vmul.f32 1.442695, %v4998_v7 }
0x1e44   :  { %5145 = vadd.xlane.f32.xlu0 %v6099_v56 }
0x1e45   :  { %6100 = vpow2.f32 %v5005_v44 }
0x1e48   :  { %v8336_v6 = vpop.xlane.xlu0 %4991  ;;  %v8338_v33 = vpop.xlane.xlu1 %4989 }
0x1e49   :  { %v5000_v20 = vsub.f32 %v8251_v58, %v8336_v6  ;;  %v4999_v38 = vsub.f32 %v8253_v24, %v8338_v33  ;;  %v8344_v54 = vpop.xlane.xlu2 %5117 }
0x1e4a   :  { %v5127_v10 = vsub.f32 %v8255_v47, %v8344_v54 }
0x1e4b   :  { %v6101_v4 = vpop.eup %6100  ;;  %v5009_v39 = vmul.f32 1.442695, %v5000_v20  ;;  %v5007_v51 = vmul.f32 1.442695, %v4999_v38 }
0x1e4c   :  { %v5135_v21 = vmul.f32 1.442695, %v5127_v10  ;;  %5017 = vadd.xlane.f32.xlu1 %v6101_v4 }
0x1e4d   :  { %6102 = vpow2.f32 %v5009_v39 }
0x1e4e   :  { %6104 = vpow2.f32 %v5007_v51 }
0x1e4f   :  { %6106 = vpow2.f32 %v5135_v21 }
0x1e50   :  { %v8348_v23 = vpop.xlane.xlu0 %5121  ;;  %v8350_v52 = vpop.xlane.xlu1 %5062 }
0x1e51   :  { %v5129_v28 = vsub.f32 %v8268_v34, %v8348_v23  ;;  %v8354_v36 = vpop.xlane.xlu2 %4993 }
0x1e52   :  { %v5001_v58 = vsub.f32 %v8270_v35, %v8354_v36 }
0x1e53   :  { %v6103_v24 = vpop.eup %6102  ;;  %v5139_v47 = vmul.f32 1.442695, %v5129_v28 }
0x1e54   :  { %v6105_v11 = vpop.eup %6104  ;;  %v5011_v46 = vmul.f32 1.442695, %v5001_v58  ;;  %5021 = vadd.xlane.f32.xlu0 %v6103_v24 }
0x1e55   :  { %v6107_v37 = vpop.eup %6106  ;;  %6108 = vpow2.f32 %v5139_v47  ;;  %5019 = vadd.xlane.f32.xlu1 %v6105_v11 }
0x1e56   :  { %6110 = vpow2.f32 %v5011_v46  ;;  %5147 = vadd.xlane.f32.xlu2 %v6107_v37 }
0x1e58   :  { %v8358_v32 = vpop.xlane.xlu1 %5119  ;;  %v8379_v61 = vpop.xlane.xlu0 %5190 }
0x1e59   :  { %v5128_v49 = vsub.f32 %v8284_v5, %v8358_v32  ;;  %v8362_v17 = vpop.xlane.xlu2 %5123 }
0x1e5a   :  { %v5130_v34 = vsub.f32 %v8287_v9, %v8362_v17  ;;  %v4977_v9 = vld [vmem:[%s8434_s1 + $0x28] sm:$0xff] }
0x1e5b   :  { %v6109_v35 = vpop.eup %6108  ;;  %v5137_v40 = vmul.f32 1.442695, %v5128_v49  ;;  %v5179_v63 = vmul.f32 %v8193_v50, %v4977_v9 }
0x1e5c   :  { %v6111_v41 = vpop.eup %6110  ;;  %v5141_v14 = vmul.f32 1.442695, %v5130_v34  ;;  %5151 = vadd.xlane.f32.xlu0 %v6109_v35 }
0x1e5d   :  { %6112 = vpow2.f32 %v5137_v40  ;;  %v5185_v57 = vmul.f32 %v5179_v63, %v8278_v55 }
0x1e5e   :  { %6114 = vpow2.f32 %v5141_v14  ;;  %5023 = vadd.xlane.f32.xlu2 %v6111_v41 }
0x1e60   :  { %v8366_v25 = vpop.xlane.xlu1 %4995  ;;  %v8381_v22 = vpop.xlane.xlu0 %5078 }
0x1e61   :  { %v5002_v8 = vsub.f32 %v8292_v62, %v8366_v25  ;;  %v5051_v62 = vmul.f32 %v8185_v29, %v4977_v9  ;;  %v8383_v0 = vpop.xlane.xlu2 %5064 }
0x1e63   :  { %v6113_v27 = vpop.eup %6112  ;;  %v5013_v5 = vmul.f32 1.442695, %v5002_v8 }
0x1e64   :  { %v6115_v45 = vpop.eup %6114  ;;  %5066 = vadd.xlane.f32.xlu0 %v8272_v16  ;;  %5149 = vadd.xlane.f32.xlu1 %v6113_v27  ;;  %v5057_v16 = vmul.f32 %v5051_v62, %v8278_v55 }
0x1e65   :  { %6116 = vpow2.f32 %v5013_v5 }
0x1e66   :  { %5153 = vadd.xlane.f32.xlu2 %v6115_v45 }
0x1e68   :  { %v8385_v50 = vpop.xlane.xlu1 %5204 }
0x1e69   :  { %v8387_v56 = vpop.xlane.xlu2 %5206 }
0x1e6b   :  { %v6117_v60 = vpop.eup %6116 }
0x1e6c   :  { %5025 = vadd.xlane.f32.xlu1 %v6117_v60  ;;  %5208 = vadd.xlane.f32.xlu0 %v5179_v63 }
0x1e6e   :  { %5194 = vadd.xlane.f32.xlu2 %v8274_v18 }
0x1e70   :  { %v8389_v18 = vpop.xlane.xlu1 %5192 }
0x1e74   :  { %5080 = vadd.xlane.f32.xlu1 %v5051_v62 }
0x1e76   :  { %5196 = vadd.xlane.f32.xlu2 %v5185_v57 }
0x1e7c   :  { %5068 = vadd.xlane.f32.xlu1 %v5057_v16  ;;  %v6144_v16 = vmov 0  }
0x1e7d   :  { %5769 = vset.pattern.permute.xlu0 %v6144_v16 }
0x1eaf   :  { %v5016_v7 = vpop.xlane.xlu0 %5015 }
0x1eb0   :  { %v5144_v44 = vpop.xlane.xlu2 %5143 }
0x1eb1   :  { %6118 = vlog2.f32 %v5144_v44 }
0x1eb7   :  { %v5146_v29 = vpop.xlane.xlu0 %5145  ;;  %v6119_v4 = vpop.eup %6118 }
0x1eb8   :  { %6120 = vlog2.f32 %v5146_v29  ;;  %v5156_v58 = vmul.f32 0.6931472, %v6119_v4 }
0x1eba   :  { %v5167_v49 = vadd.f32 %v5156_v58, %v8318_v26 }
0x1ebc   :  { %v5210_v45 = vmul.f32 %v8304_v15, %v5167_v49 }
0x1ebe   :  { %v6121_v39 = vpop.eup %6120  ;;  %v5216_v44 = vsub.f32 %v5210_v45, %v8322_v12 }
0x1ebf   :  { %v5018_v20 = vpop.xlane.xlu1 %5017  ;;  %v5158_v24 = vmul.f32 0.6931472, %v6121_v39 }
0x1ec1   :  { %v5168_v34 = vadd.f32 %v5158_v24, %v8324_v59 }
0x1ec3   :  { %v5211_v9 = vmul.f32 %v8300_v42, %v5168_v34 }
0x1ec5   :  { %v5217_v15 = vsub.f32 %v5211_v9, %v8334_v31 }
0x1ec7   :  { %v5022_v38 = vpop.xlane.xlu0 %5021 }
0x1ec8   :  { %v5020_v10 = vpop.xlane.xlu1 %5019 }
0x1ec9   :  { %v5148_v55 = vpop.xlane.xlu2 %5147 }
0x1eca   :  { %6122 = vlog2.f32 %v5148_v55 }
0x1ecb   :  { %6124 = vlog2.f32 %v5018_v20 }
0x1ecc   :  { %6126 = vlog2.f32 %v5016_v7 }
0x1ecd   :  { %6128 = vlog2.f32 %v5020_v10 }
0x1ecf   :  { %v5152_v51 = vpop.xlane.xlu0 %5151 }
0x1ed0   :  { %v6123_v28 = vpop.eup %6122  ;;  %6130 = vlog2.f32 %v5152_v51 }
0x1ed1   :  { %v5024_v21 = vpop.xlane.xlu2 %5023  ;;  %v6125_v47 = vpop.eup %6124  ;;  %v5160_v11 = vmul.f32 0.6931472, %v6123_v28  ;;  %6132 = vlog2.f32 %v5022_v38 }
0x1ed2   :  { %v6127_v46 = vpop.eup %6126  ;;  %6134 = vlog2.f32 %v5024_v21  ;;  %v5030_v40 = vmul.f32 0.6931472, %v6125_v47  ;;  %v5222_v21 = vadd.f32 %v5217_v15, %v5216_v44 }
0x1ed3   :  { %v6129_v37 = vpop.eup %6128  ;;  %v5169_v41 = vadd.f32 %v5160_v11, %v8344_v54  ;;  %v5028_v27 = vmul.f32 0.6931472, %v6127_v46 }
0x1ed4   :  { %v5032_v5 = vmul.f32 0.6931472, %v6129_v37  ;;  %v5040_v26 = vadd.f32 %v5030_v40, %v8330_v2 }
0x1ed5   :  { %v5212_v59 = vmul.f32 %v8308_v43, %v5169_v41  ;;  %v5039_v7 = vadd.f32 %v5028_v27, %v8314_v13 }
0x1ed6   :  { %v6131_v8 = vpop.eup %6130  ;;  %v5041_v29 = vadd.f32 %v5032_v5, %v8338_v33  ;;  %v5083_v2 = vmul.f32 %v8306_v48, %v5040_v26 }
0x1ed7   :  { %v5150_v35 = vpop.xlane.xlu1 %5149  ;;  %v6133_v63 = vpop.eup %6132  ;;  %v5164_v62 = vmul.f32 0.6931472, %v6131_v8  ;;  %v5218_v10 = vsub.f32 %v5212_v59, %v8379_v61  ;;  %v5082_v12 = vmul.f32 %v8298_v30, %v5039_v7 }
0x1ed8   :  { %6136 = vlog2.f32 %v5150_v35  ;;  %v6135_v60 = vpop.eup %6134  ;;  %v5067_v57 = vpop.xlane.xlu0 %5066  ;;  %v5034_v55 = vmul.f32 0.6931472, %v6133_v63  ;;  %v5084_v31 = vmul.f32 %v8302_v19, %v5041_v29  ;;  %v5089_v48 = vsub.f32 %v5083_v2, %v8328_v53 }
0x1ed9   :  { %v5154_v14 = vpop.xlane.xlu2 %5153  ;;  %v5036_v43 = vmul.f32 0.6931472, %v6135_v60  ;;  %v5171_v4 = vadd.f32 %v5164_v62, %v8348_v23  ;;  %v5223_v24 = vadd.f32 %v5222_v21, %v5218_v10  ;;  %v5088_v19 = vsub.f32 %v5082_v12, %v8312_v3 }
0x1eda   :  { %6138 = vlog2.f32 %v5154_v14  ;;  %v5042_v28 = vadd.f32 %v5034_v55, %v8336_v6 }
0x1edb   :  { %v5043_v58 = vadd.f32 %v5036_v43, %v8354_v36  ;;  %v5214_v23 = vmul.f32 %v8387_v56, %v5171_v4 }
0x1edc   :  { %v5085_v6 = vmul.f32 %v8310_v1, %v5042_v28 }
0x1edd   :  { %v5086_v36 = vmul.f32 %v8381_v22, %v5043_v58 }
0x1ede   :  { %v6137_v54 = vpop.eup %6136  ;;  %v5091_v3 = vsub.f32 %v5085_v6, %v8383_v0 }
0x1edf   :  { %v5162_v42 = vmul.f32 0.6931472, %v6137_v54  ;;  %v5026_v20 = vpop.xlane.xlu1 %5025  ;;  %v5092_v41 = vsub.f32 %v5086_v36, %v5067_v57 }
0x1ee0   :  { %v6139_v38 = vpop.eup %6138  ;;  %6140 = vlog2.f32 %v5026_v20  ;;  %v5209_v47 = vpop.xlane.xlu0 %5208 }
0x1ee1   :  { %v5170_v13 = vadd.f32 %v5162_v42, %v8358_v32  ;;  %v5166_v39 = vmul.f32 0.6931472, %v6139_v38  ;;  %v5195_v33 = vpop.xlane.xlu2 %5194 }
0x1ee2   :  { %v5220_v53 = vsub.f32 %v5214_v23, %v5195_v33 }
0x1ee3   :  { %v5213_v51 = vmul.f32 %v8385_v50, %v5170_v13  ;;  %v5172_v61 = vadd.f32 %v5166_v39, %v8362_v17  ;;  %v5090_v50 = vsub.f32 %v5084_v31, %v8350_v52  ;;  %v5094_v17 = vadd.f32 %v5089_v48, %v5088_v19 }
0x1ee5   :  { %v5219_v32 = vsub.f32 %v5213_v51, %v8389_v18  ;;  %v5215_v49 = vmul.f32 %v5209_v47, %v5172_v61  ;;  %v5095_v18 = vadd.f32 %v5094_v17, %v5090_v50 }
0x1ee6   :  { %v6141_v30 = vpop.eup %6140 }
0x1ee7   :  { %v5038_v11 = vmul.f32 0.6931472, %v6141_v30  ;;  %v5224_v46 = vadd.f32 %v5223_v24, %v5219_v32  ;;  %v5081_v37 = vpop.xlane.xlu1 %5080  ;;  %v5096_v14 = vadd.f32 %v5095_v18, %v5091_v3 }
0x1ee9   :  { %v5225_v56 = vadd.f32 %v5224_v46, %v5220_v53  ;;  %v5197_v34 = vpop.xlane.xlu2 %5196  ;;  %v5044_v35 = vadd.f32 %v5038_v11, %v8366_v25  ;;  %v5097_v45 = vadd.f32 %v5096_v14, %v5092_v41 }
0x1eea   :  { %v5221_v40 = vsub.f32 %v5215_v49, %v5197_v34 }
0x1eeb   :  { %v5087_v8 = vmul.f32 %v5081_v37, %v5044_v35 }
0x1eec   :  { %v5226_v52 = vadd.f32 %v5225_v56, %v5221_v40 }
0x1eee   :  { %v5227_v27 = vrot.slane %v5226_v52, 4 }
0x1eef   :  { %v5069_v5 = vpop.xlane.xlu1 %5068 }
0x1ef0   :  { %v5228_v1 = vadd.f32 %v5227_v27, %v5226_v52  ;;  %v5093_v9 = vsub.f32 %v5087_v8, %v5069_v5 }
0x1ef2   :  { %v5229_v22 = vrot.slane %v5228_v1, 2  ;;  %v5098_v63 = vadd.f32 %v5097_v45, %v5093_v9 }
0x1ef4   :  { %v5230_v26 = vadd.f32 %v5229_v22, %v5228_v1  ;;  %v5099_v60 = vrot.slane %v5098_v63, 4 }
0x1ef6   :  { %v5100_v59 = vadd.f32 %v5099_v60, %v5098_v63  ;;  %v5231_v62 = vrot.slane %v5230_v26, 1 }
0x1ef8   :  { %v5101_v16 = vrot.slane %v5100_v59, 2  ;;  %v5232_v7 = vadd.f32 %v5231_v62, %v5230_v26 }
0x1efa   :  { %v5102_v25 = vadd.f32 %v5101_v16, %v5100_v59  ;;  %v5233_v29 = vmul.f32 0.5, %v5232_v7 }
0x1efc   :  { %v5103_v54 = vrot.slane %v5102_v25, 1 }
0x1efe   :  { %v5104_v0 = vadd.f32 %v5103_v54, %v5102_v25 }
0x1f00   :  { %v5105_v57 = vmul.f32 0.5, %v5104_v0 }
0x1f02   :  { %v5235_v44 = vsel %vm5234_vm10, %v5105_v57, %v5233_v29 }
0x1f03   :  { %5238 = vperm.xlu0 %5769, %v5235_v44  }
0x1f75   :  { %v5239_v15 = vpop.permute.xlu0 %5238 }
0x1f76   :  { %5241 = vst [vmem:[%s8436_s12] sm:$0x3] %v5239_v15 }

</bundles_post_ra>
